<compile_context>
chip_gen: v6e
topology: v6e:2x2x1
jax: 0.10.0
libtpu: 0.0.40
codegen_flags: <defaults>
</compile_context>

<pallas_src>
import functools

import jax
import jax.numpy as jnp
from jax import lax
from jax.experimental import pallas as pl
from jax.experimental.pallas import tpu as pltpu


_TARGET_BLOCK_BYTES = int(1.5 * (1 << 20))   # ~1.5 MiB per activation block


def _spatial_tile(hw, c, itemsize):
    """Byte-sized spatial tile: multiple of 128 that divides hw."""
    target = (_TARGET_BLOCK_BYTES // (c * itemsize)) // 128 * 128
    target = max(512, min(4096, target))
    if hw <= target:
        return hw
    m = hw // 128
    d = min(target // 128, m)
    while m % d:                 # largest divisor of (hw/128) not above target
        d -= 1
    return 128 * d


def _pallas_ok(use_pallas, x):
    hw = x.shape[2] * x.shape[3]
    return use_pallas and hw >= 128 and hw % 128 == 0


# ----------------------------------------------------------------------------
# Pallas kernel bodies (x, r blocks: (C, TS) bf16; per-channel params (C,1) f32)
# ----------------------------------------------------------------------------
def _affine_res_kernel(x_ref, r_ref, scale_ref, shift_ref, o_ref, *, relu):
    # out = relu(x*scale + shift + residual)   -- BasicBlock tail
    y = (x_ref[...].astype(jnp.float32) * scale_ref[...] + shift_ref[...]
         + r_ref[...].astype(jnp.float32))
    if relu:
        y = jnp.maximum(y, 0.0)
    o_ref[...] = y.astype(o_ref.dtype)


def _affine_dual_kernel(x_ref, r_ref, s1_ref, s2_ref, shift_ref, o_ref, *, relu):
    # out = relu(x*s1 + r*s2 + shift)   -- downsample BasicBlock tail
    y = (x_ref[...].astype(jnp.float32) * s1_ref[...]
         + r_ref[...].astype(jnp.float32) * s2_ref[...] + shift_ref[...])
    if relu:
        y = jnp.maximum(y, 0.0)
    o_ref[...] = y.astype(o_ref.dtype)


def _convrelu_final_kernel(x_ref, shift_ref, w_ref, b_ref, o_ref, *, use_mxu):
    # y = relu(conv_out + bias); out = W @ y + b_final   (f32 accumulate)
    y = jnp.maximum(x_ref[...].astype(jnp.float32) + shift_ref[...], 0.0)
    if use_mxu:
        # w_ref: (K, C) bf16 -> one MXU matmul regardless of K.
        out = jnp.dot(w_ref[...], y.astype(w_ref.dtype),
                      preferred_element_type=jnp.float32)
    else:
        # K == 1: VPU multiply + cross-sublane f32 reduce (skinny MXU matvec
        # would be 1/128 utilized).  w_ref: (C, 1) f32.
        out = jnp.sum(y * w_ref[...], axis=0, keepdims=True)
    o_ref[...] = (out + b_ref[...]).astype(o_ref.dtype)


# ----------------------------------------------------------------------------
# Pallas wrappers
# ----------------------------------------------------------------------------
def _elementwise_call(kernel, acts, params_c1, out_dtype, flops_per_elem):
    """Shared pallas_call builder for the elementwise fusions (NCHW as (N,C,HW))."""
    n, c, hw = acts[0].shape
    itemsize = jnp.dtype(acts[0].dtype).itemsize
    ts = _spatial_tile(hw, c, itemsize)
    grid = (n, hw // ts)

    act_spec = pl.BlockSpec((None, c, ts), lambda i, s: (i, 0, s))
    par_spec = pl.BlockSpec((c, 1), lambda i, s: (0, 0))

    return pl.pallas_call(
        kernel,
        out_shape=jax.ShapeDtypeStruct((n, c, hw), out_dtype),
        grid_spec=pltpu.PrefetchScalarGridSpec(
            num_scalar_prefetch=0,
            grid=grid,
            in_specs=[act_spec] * len(acts) + [par_spec] * len(params_c1),
            out_specs=pl.BlockSpec((None, c, ts), lambda i, s: (i, 0, s)),
        ),
        compiler_params=pltpu.CompilerParams(
            dimension_semantics=("parallel", "parallel")),
        cost_estimate=pl.CostEstimate(
            flops=flops_per_elem * n * c * hw,
            transcendentals=0,
            bytes_accessed=(len(acts) + 1) * n * c * hw * itemsize
            + len(params_c1) * c * 4),
    )(*acts, *params_c1)


def fused_residual_affine(x, residual, scale, shift, relu=True):
    n, c, h, w = x.shape
    hw = h * w
    acts = (x.reshape(n, c, hw), residual.reshape(n, c, hw))
    params = (scale.reshape(c, 1).astype(jnp.float32),
              shift.reshape(c, 1).astype(jnp.float32))
    out = _elementwise_call(functools.partial(_affine_res_kernel, relu=relu),
                            acts, params, x.dtype, 4)
    return out.reshape(n, c, h, w)


def fused_dual_affine(x, residual, s1, s2, shift, relu=True):
    n, c, h, w = x.shape
    hw = h * w
    acts = (x.reshape(n, c, hw), residual.reshape(n, c, hw))
    params = (s1.reshape(c, 1).astype(jnp.float32),
              s2.reshape(c, 1).astype(jnp.float32),
              shift.reshape(c, 1).astype(jnp.float32))
    out = _elementwise_call(functools.partial(_affine_dual_kernel, relu=relu),
                            acts, params, x.dtype, 6)
    return out.reshape(n, c, h, w)


def conv_relu_final(d, conv_bias, final_w, final_b):
    """Fused dec1_2 epilogue (bias + ReLU) + final 1x1 conv, f32 output."""
    n, c, h, w = d.shape
    k_out = final_w.shape[0]
    hw = h * w
    itemsize = jnp.dtype(d.dtype).itemsize
    ts = _spatial_tile(hw, c, itemsize)
    grid = (n, hw // ts)

    use_mxu = k_out > 1
    if use_mxu:
        wmat = final_w.reshape(k_out, c).astype(jnp.bfloat16)          # (K, C)
        w_spec = pl.BlockSpec((k_out, c), lambda i, s: (0, 0))
    else:
        wmat = final_w.reshape(k_out, c).T.astype(jnp.float32)         # (C, 1)
        w_spec = pl.BlockSpec((c, k_out), lambda i, s: (0, 0))
    shift = conv_bias.reshape(c, 1).astype(jnp.float32)
    bias = final_b.reshape(k_out, 1).astype(jnp.float32)

    out = pl.pallas_call(
        functools.partial(_convrelu_final_kernel, use_mxu=use_mxu),
        out_shape=jax.ShapeDtypeStruct((n, k_out, hw), jnp.float32),
        grid_spec=pltpu.PrefetchScalarGridSpec(
            num_scalar_prefetch=0,
            grid=grid,
            in_specs=[
                pl.BlockSpec((None, c, ts), lambda i, s: (i, 0, s)),
                pl.BlockSpec((c, 1), lambda i, s: (0, 0)),
                w_spec,
                pl.BlockSpec((k_out, 1), lambda i, s: (0, 0)),
            ],
            out_specs=pl.BlockSpec((None, k_out, ts), lambda i, s: (i, 0, s)),
        ),
        compiler_params=pltpu.CompilerParams(
            dimension_semantics=("parallel", "parallel")),
        cost_estimate=pl.CostEstimate(
            flops=2 * n * c * hw * (1 + k_out),
            transcendentals=0,
            bytes_accessed=n * c * hw * itemsize + n * k_out * hw * 4
            + (c + c * k_out + k_out) * 4),
    )(d.reshape(n, c, hw), shift, wmat, bias)
    return out.reshape(n, k_out, h, w)


# ----------------------------------------------------------------------------
# XLA building blocks + pure-JAX fallbacks (math identical to the kernels).
# ----------------------------------------------------------------------------
def conv2d_nchw(x, w, stride=1, padding=1):
    # TODO(synk): 7x7/3x3 (strided) spatial convolutions stay on XLA's MXU conv.
    return lax.conv_general_dilated(
        x, w.astype(x.dtype), window_strides=(stride, stride),
        padding=((padding, padding), (padding, padding)),
        dimension_numbers=("NCHW", "OIHW", "NCHW"))


def upsample2x_bilinear(x):
    n, c, h, w = x.shape
    # TODO(synk): nn.Upsample(scale_factor=2, mode='bilinear') via jax.image.resize.
    return jax.image.resize(x, (n, c, 2 * h, 2 * w), method="bilinear").astype(x.dtype)


def _affine_ref(x, scale, shift, relu=True):
    # Single-operand BN/bias + ReLU epilogue: left to XLA's conv fusion.
    y = (x.astype(jnp.float32) * scale[None, :, None, None]
         + shift[None, :, None, None])
    if relu:
        y = jnp.maximum(y, 0.0)
    return y.astype(x.dtype)


def _bias_relu_ref(x, bias):
    y = jnp.maximum(x.astype(jnp.float32) + bias[None, :, None, None], 0.0)
    return y.astype(x.dtype)


def _residual_ref(x, residual, scale, shift, relu=True):
    y = (x.astype(jnp.float32) * scale[None, :, None, None]
         + shift[None, :, None, None] + residual.astype(jnp.float32))
    if relu:
        y = jnp.maximum(y, 0.0)
    return y.astype(x.dtype)


def _dual_ref(x, residual, s1, s2, shift, relu=True):
    y = (x.astype(jnp.float32) * s1[None, :, None, None]
         + residual.astype(jnp.float32) * s2[None, :, None, None]
         + shift[None, :, None, None])
    if relu:
        y = jnp.maximum(y, 0.0)
    return y.astype(x.dtype)


def _final_ref(d, conv_bias, final_w, final_b):
    y = jnp.maximum(d.astype(jnp.float32) + conv_bias[None, :, None, None], 0.0)
    w = final_w.reshape(final_w.shape[0], -1).astype(jnp.float32)
    return (jnp.einsum("nchw,kc->nkhw", y, w)
            + final_b.astype(jnp.float32)[None, :, None, None])


# ----------------------------------------------------------------------------
# Network wiring (torchvision resnet34 encoder pieces, inference BN folded).
# ----------------------------------------------------------------------------
def basic_block(x, bp, stride, use_pallas):
    out = conv2d_nchw(x, bp["w1"], stride=stride, padding=1)
    out = _affine_ref(out, *bp["bn1"], relu=True)              # XLA fuses into conv
    out = conv2d_nchw(out, bp["w2"], stride=1, padding=1)
    s_bn, t_bn = bp["bn2"]
    if "wd" in bp:                                             # downsample branch
        id_raw = conv2d_nchw(x, bp["wd"], stride=stride, padding=0)
        s_d, t_d = bp["bnd"]
        if _pallas_ok(use_pallas, out):
            return fused_dual_affine(out, id_raw, s_bn, s_d, t_bn + t_d, relu=True)
        return _dual_ref(out, id_raw, s_bn, s_d, t_bn + t_d, relu=True)
    if _pallas_ok(use_pallas, out):
        return fused_residual_affine(out, x, s_bn, t_bn, relu=True)
    return _residual_ref(out, x, s_bn, t_bn, relu=True)


def conv_relu(x, cp):
    return _bias_relu_ref(conv2d_nchw(x, cp["w"], stride=1, padding=1), cp["b"])


def decoder_block(x, cp1, cp2):
    # DecoderBlockV2 with is_deconv=False: Upsample(2x bilinear) + 2x ConvRelu
    x = upsample2x_bilinear(x)
    x = conv_relu(x, cp1)
    return conv_relu(x, cp2)


def salt_unet_forward(params, x, use_pallas=True, act_dtype=jnp.bfloat16):
    # Activations in bf16 (HBM-bound); per-channel params & accumulators f32.
    x = x.astype(act_dtype)

    # input_adjust = encoder.conv1 (7x7 s2) + bn1 + relu
    y = conv2d_nchw(x, params["ia_w"], stride=2, padding=3)
    input_adjust = _affine_ref(y, *params["ia_bn"], relu=True)

    conv1 = basic_block(input_adjust, params["b1"], 1, use_pallas)   # layer1[1]
    conv2 = basic_block(conv1, params["b2"], 1, use_pallas)          # layer1[2]
    conv3 = basic_block(conv2, params["b3"], 2, use_pallas)          # layer2[0]
    center = basic_block(conv3, params["b4"], 1, use_pallas)         # layer2[1]

    dec3 = decoder_block(jnp.concatenate([center, conv3], axis=1),
                         params["dec3_1"], params["dec3_2"])

    # dec2 = ConvBnRelu(320, 256): conv bias folded into the BN shift
    d2 = conv2d_nchw(jnp.concatenate([dec3, conv2], axis=1),
                     params["dec2_w"], stride=1, padding=1)
    s2d, t2d = params["dec2_bn"]
    dec2 = _affine_ref(d2, s2d, t2d + s2d * params["dec2_b"], relu=True)

    # dec1 = DecoderBlockV2(320, 640, 256): last ConvRelu's epilogue is fused
    # with the final 1x1 conv in a single Pallas kernel.
    x1 = upsample2x_bilinear(jnp.concatenate([dec2, conv1], axis=1))
    x1 = conv_relu(x1, params["dec1_1"])
    d1 = conv2d_nchw(x1, params["dec1_2"]["w"], stride=1, padding=1)

    # TODO(synk): F.dropout2d(p=0.2) is stochastic; treated as identity (eval mode).

    if _pallas_ok(use_pallas, d1):
        return conv_relu_final(d1, params["dec1_2"]["b"],
                               params["final_w"], params["final_b"])
    return _final_ref(d1, params["dec1_2"]["b"],
                      params["final_w"], params["final_b"])


# ----------------------------------------------------------------------------
# Deterministic parameter initialization (pretrained=False semantics).
# ----------------------------------------------------------------------------
def _conv_w(key, out_c, in_c, k):
    fan_in = in_c * k * k
    return jax.random.normal(key, (out_c, in_c, k, k), jnp.float32) * jnp.sqrt(
        2.0 / fan_in)


def _bn_params(key, c, eps=1e-5):
    k1, k2, k3, k4 = jax.random.split(key, 4)
    gamma = 1.0 + 0.1 * jax.random.normal(k1, (c,), jnp.float32)
    beta = 0.1 * jax.random.normal(k2, (c,), jnp.float32)
    mean = 0.1 * jax.random.normal(k3, (c,), jnp.float32)
    var = 1.0 + 0.5 * jax.random.uniform(k4, (c,), jnp.float32)
    scale = gamma * lax.rsqrt(var + eps)      # folded inference BatchNorm
    shift = beta - mean * scale
    return scale, shift


def _basic_block_params(keys, in_c, out_c, downsample):
    p = {"w1": _conv_w(next(keys), out_c, in_c, 3),
         "bn1": _bn_params(next(keys), out_c),
         "w2": _conv_w(next(keys), out_c, out_c, 3),
         "bn2": _bn_params(next(keys), out_c)}
    if downsample:
        p["wd"] = _conv_w(next(keys), out_c, in_c, 1)
        p["bnd"] = _bn_params(next(keys), out_c)
    return p


def _conv_relu_params(keys, in_c, out_c):
    return {"w": _conv_w(next(keys), out_c, in_c, 3),
            "b": 0.1 * jax.random.normal(next(keys), (out_c,), jnp.float32)}


def init_params(key, num_classes=1):
    keys = iter(jax.random.split(key, 64))
    return {
        "ia_w": _conv_w(next(keys), 64, 3, 7),              # resnet34 conv1
        "ia_bn": _bn_params(next(keys), 64),
        "b1": _basic_block_params(keys, 64, 64, False),     # layer1[1]
        "b2": _basic_block_params(keys, 64, 64, False),     # layer1[2]
        "b3": _basic_block_params(keys, 64, 128, True),     # layer2[0], stride 2
        "b4": _basic_block_params(keys, 128, 128, False),   # layer2[1]
        "dec3_1": _conv_relu_params(keys, 256, 512),        # dec3 ConvRelu
        "dec3_2": _conv_relu_params(keys, 512, 256),
        "dec2_w": _conv_w(next(keys), 256, 320, 3),         # dec2 ConvBnRelu
        "dec2_b": 0.1 * jax.random.normal(next(keys), (256,), jnp.float32),
        "dec2_bn": _bn_params(next(keys), 256),
        "dec1_1": _conv_relu_params(keys, 320, 640),        # dec1 ConvRelu
        "dec1_2": _conv_relu_params(keys, 640, 256),
        "final_w": _conv_w(next(keys), num_classes, 256, 1),
        "final_b": 0.1 * jax.random.normal(next(keys), (num_classes,), jnp.float32),
    }


if __name__ == "__main__":
    root = jax.random.PRNGKey(0)
    k_params, k_x = jax.random.split(root)

    num_classes = 1
    params = init_params(k_params, num_classes=num_classes)
    # 64x64 is the smallest input at which every Pallas kernel takes the
    # Pallas path (two stride-2 stages still leave H*W >= 128, multiple of 128).
    x = jax.random.normal(k_x, (2, 3, 64, 64), dtype=jnp.float32)

    fwd_pallas = jax.jit(functools.partial(salt_unet_forward, use_pallas=True))
    fwd_ref = jax.jit(functools.partial(salt_unet_forward, use_pallas=False))

    out = jax.block_until_ready(fwd_pallas(params, x))
    ref = jax.block_until_ready(fwd_ref(params, x))

    assert out.shape == (2, num_classes, 64, 64), out.shape
    max_err = float(jnp.max(jnp.abs(out.astype(jnp.float32) - ref.astype(jnp.float32))))
    ref_max = float(jnp.max(jnp.abs(ref)))
    tol = 2e-2 * max(1.0, ref_max)   # both paths share the bf16 conv pipeline
    assert max_err <= tol, f"max abs error {max_err} vs tolerance {tol}"
    print("KERNEL_OK")
</pallas_src>

<mosaic_0001>
module attributes {stable_mosaic.version = 11 : i64} {
  func.func @_affine_res_kernel(%arg0: i32, %arg1: i32, %arg2: memref<1x64x1024xbf16, #tpu.memory_space<vmem>>, %arg3: memref<1x64x1024xbf16, #tpu.memory_space<vmem>>, %arg4: memref<64x1xf32, #tpu.memory_space<vmem>>, %arg5: memref<64x1xf32, #tpu.memory_space<vmem>>, %arg6: memref<1x64x1024xbf16, #tpu.memory_space<vmem>>) attributes {dimension_semantics = [#tpu.dimension_semantics<parallel>, #tpu.dimension_semantics<parallel>], iteration_bounds = array<i64: 2, 1>, scalar_prefetch = 0 : i64, scratch_operands = 0 : i64, tpu.core_type = #tpu.core_type<tc>, window_params = [{transform_indices = @transform_0, window_bounds = array<i64: 1, 64, 1024>}, {transform_indices = @transform_1, window_bounds = array<i64: 1, 64, 1024>}, {pipeline_mode = #tpu.pipeline_mode<synchronous>, transform_indices = @transform_2, window_bounds = array<i64: 64, 1>}, {pipeline_mode = #tpu.pipeline_mode<synchronous>, transform_indices = @transform_3, window_bounds = array<i64: 64, 1>}, {transform_indices = @transform_4, window_bounds = array<i64: 1, 64, 1024>}]} {
    %c0 = arith.constant 0 : index
    %c0_0 = arith.constant 0 : index
    %c0_1 = arith.constant 0 : index
    %0 = vector.load %arg2[%c0, %c0_0, %c0_1] : memref<1x64x1024xbf16, #tpu.memory_space<vmem>>, vector<1x64x1024xbf16>
    %1 = vector.shape_cast %0 : vector<1x64x1024xbf16> to vector<64x1024xbf16>
    %2 = arith.extf %1 : vector<64x1024xbf16> to vector<64x1024xf32>
    %c0_2 = arith.constant 0 : index
    %c0_3 = arith.constant 0 : index
    %3 = vector.load %arg4[%c0_2, %c0_3] : memref<64x1xf32, #tpu.memory_space<vmem>>, vector<64x1xf32>
    %4 = vector.broadcast %3 : vector<64x1xf32> to vector<64x1024xf32>
    %5 = arith.mulf %2, %4 : vector<64x1024xf32>
    %c0_4 = arith.constant 0 : index
    %c0_5 = arith.constant 0 : index
    %6 = vector.load %arg5[%c0_4, %c0_5] : memref<64x1xf32, #tpu.memory_space<vmem>>, vector<64x1xf32>
    %7 = vector.broadcast %6 : vector<64x1xf32> to vector<64x1024xf32>
    %8 = arith.addf %5, %7 : vector<64x1024xf32>
    %c0_6 = arith.constant 0 : index
    %c0_7 = arith.constant 0 : index
    %c0_8 = arith.constant 0 : index
    %9 = vector.load %arg3[%c0_6, %c0_7, %c0_8] : memref<1x64x1024xbf16, #tpu.memory_space<vmem>>, vector<1x64x1024xbf16>
    %10 = vector.shape_cast %9 : vector<1x64x1024xbf16> to vector<64x1024xbf16>
    %11 = arith.extf %10 : vector<64x1024xbf16> to vector<64x1024xf32>
    %12 = arith.addf %8, %11 : vector<64x1024xf32>
    %cst = arith.constant 0.000000e+00 : f32
    %13 = vector.broadcast %cst : f32 to vector<64x1024xf32>
    %14 = arith.maximumf %12, %13 : vector<64x1024xf32>
    %15 = arith.truncf %14 : vector<64x1024xf32> to vector<64x1024xbf16>
    %c0_9 = arith.constant 0 : index
    %c0_10 = arith.constant 0 : index
    %c0_11 = arith.constant 0 : index
    %16 = vector.load %arg6[%c0_9, %c0_10, %c0_11] : memref<1x64x1024xbf16, #tpu.memory_space<vmem>>, vector<1x64x1024xbf16>
    %17 = vector.shape_cast %16 : vector<1x64x1024xbf16> to vector<64x1024xbf16>
    %18 = vector.shape_cast %15 : vector<64x1024xbf16> to vector<1x64x1024xbf16>
    tpu.vector_store %arg6[%c0_9, %c0_10, %c0_11], %18 {strides = array<i32>} : memref<1x64x1024xbf16, #tpu.memory_space<vmem>>, vector<1x64x1024xbf16>,
    return
  }
  func.func @transform_0(%arg0: i32, %arg1: i32) -> (i32, i32, i32) {
    %c0_i32 = arith.constant 0 : i32
    %c0_i32_0 = arith.constant 0 : i32
    return %arg0, %c0_i32, %arg1 : i32, i32, i32
  }
  func.func @transform_1(%arg0: i32, %arg1: i32) -> (i32, i32, i32) {
    %c0_i32 = arith.constant 0 : i32
    %c0_i32_0 = arith.constant 0 : i32
    return %arg0, %c0_i32, %arg1 : i32, i32, i32
  }
  func.func @transform_2(%arg0: i32, %arg1: i32) -> (i32, i32) {
    %c0_i32 = arith.constant 0 : i32
    %c0_i32_0 = arith.constant 0 : i32
    %c0_i32_1 = arith.constant 0 : i32
    return %c0_i32, %c0_i32_0 : i32, i32
  }
  func.func @transform_3(%arg0: i32, %arg1: i32) -> (i32, i32) {
    %c0_i32 = arith.constant 0 : i32
    %c0_i32_0 = arith.constant 0 : i32
    %c0_i32_1 = arith.constant 0 : i32
    return %c0_i32, %c0_i32_0 : i32, i32
  }
  func.func @transform_4(%arg0: i32, %arg1: i32) -> (i32, i32, i32) {
    %c0_i32 = arith.constant 0 : i32
    %c0_i32_0 = arith.constant 0 : i32
    return %arg0, %c0_i32, %arg1 : i32, i32, i32
  }
}

module attributes {stable_mosaic.version = 11 : i64} {
  func.func @_affine_dual_kernel(%arg0: i32, %arg1: i32, %arg2: memref<1x128x256xbf16, #tpu.memory_space<vmem>>, %arg3: memref<1x128x256xbf16, #tpu.memory_space<vmem>>, %arg4: memref<128x1xf32, #tpu.memory_space<vmem>>, %arg5: memref<128x1xf32, #tpu.memory_space<vmem>>, %arg6: memref<128x1xf32, #tpu.memory_space<vmem>>, %arg7: memref<1x128x256xbf16, #tpu.memory_space<vmem>>) attributes {dimension_semantics = [#tpu.dimension_semantics<parallel>, #tpu.dimension_semantics<parallel>], iteration_bounds = array<i64: 2, 1>, scalar_prefetch = 0 : i64, scratch_operands = 0 : i64, tpu.core_type = #tpu.core_type<tc>, window_params = [{transform_indices = @transform_0, window_bounds = array<i64: 1, 128, 256>}, {transform_indices = @transform_1, window_bounds = array<i64: 1, 128, 256>}, {pipeline_mode = #tpu.pipeline_mode<synchronous>, transform_indices = @transform_2, window_bounds = array<i64: 128, 1>}, {pipeline_mode = #tpu.pipeline_mode<synchronous>, transform_indices = @transform_3, window_bounds = array<i64: 128, 1>}, {pipeline_mode = #tpu.pipeline_mode<synchronous>, transform_indices = @transform_4, window_bounds = array<i64: 128, 1>}, {transform_indices = @transform_5, window_bounds = array<i64: 1, 128, 256>}]} {
    %c0 = arith.constant 0 : index
    %c0_0 = arith.constant 0 : index
    %c0_1 = arith.constant 0 : index
    %0 = vector.load %arg2[%c0, %c0_0, %c0_1] : memref<1x128x256xbf16, #tpu.memory_space<vmem>>, vector<1x128x256xbf16>
    %1 = vector.shape_cast %0 : vector<1x128x256xbf16> to vector<128x256xbf16>
    %2 = arith.extf %1 : vector<128x256xbf16> to vector<128x256xf32>
    %c0_2 = arith.constant 0 : index
    %c0_3 = arith.constant 0 : index
    %3 = vector.load %arg4[%c0_2, %c0_3] : memref<128x1xf32, #tpu.memory_space<vmem>>, vector<128x1xf32>
    %4 = vector.broadcast %3 : vector<128x1xf32> to vector<128x256xf32>
    %5 = arith.mulf %2, %4 : vector<128x256xf32>
    %c0_4 = arith.constant 0 : index
    %c0_5 = arith.constant 0 : index
    %c0_6 = arith.constant 0 : index
    %6 = vector.load %arg3[%c0_4, %c0_5, %c0_6] : memref<1x128x256xbf16, #tpu.memory_space<vmem>>, vector<1x128x256xbf16>
    %7 = vector.shape_cast %6 : vector<1x128x256xbf16> to vector<128x256xbf16>
    %8 = arith.extf %7 : vector<128x256xbf16> to vector<128x256xf32>
    %c0_7 = arith.constant 0 : index
    %c0_8 = arith.constant 0 : index
    %9 = vector.load %arg5[%c0_7, %c0_8] : memref<128x1xf32, #tpu.memory_space<vmem>>, vector<128x1xf32>
    %10 = vector.broadcast %9 : vector<128x1xf32> to vector<128x256xf32>
    %11 = arith.mulf %8, %10 : vector<128x256xf32>
    %12 = arith.addf %5, %11 : vector<128x256xf32>
    %c0_9 = arith.constant 0 : index
    %c0_10 = arith.constant 0 : index
    %13 = vector.load %arg6[%c0_9, %c0_10] : memref<128x1xf32, #tpu.memory_space<vmem>>, vector<128x1xf32>
    %14 = vector.broadcast %13 : vector<128x1xf32> to vector<128x256xf32>
    %15 = arith.addf %12, %14 : vector<128x256xf32>
    %cst = arith.constant 0.000000e+00 : f32
    %16 = vector.broadcast %cst : f32 to vector<128x256xf32>
    %17 = arith.maximumf %15, %16 : vector<128x256xf32>
    %18 = arith.truncf %17 : vector<128x256xf32> to vector<128x256xbf16>
    %c0_11 = arith.constant 0 : index
    %c0_12 = arith.constant 0 : index
    %c0_13 = arith.constant 0 : index
    %19 = vector.load %arg7[%c0_11, %c0_12, %c0_13] : memref<1x128x256xbf16, #tpu.memory_space<vmem>>, vector<1x128x256xbf16>
    %20 = vector.shape_cast %19 : vector<1x128x256xbf16> to vector<128x256xbf16>
    %21 = vector.shape_cast %18 : vector<128x256xbf16> to vector<1x128x256xbf16>
    tpu.vector_store %arg7[%c0_11, %c0_12, %c0_13], %21 {strides = array<i32>} : memref<1x128x256xbf16, #tpu.memory_space<vmem>>, vector<1x128x256xbf16>,
    return
  }
  func.func @transform_0(%arg0: i32, %arg1: i32) -> (i32, i32, i32) {
    %c0_i32 = arith.constant 0 : i32
    %c0_i32_0 = arith.constant 0 : i32
    return %arg0, %c0_i32, %arg1 : i32, i32, i32
  }
  func.func @transform_1(%arg0: i32, %arg1: i32) -> (i32, i32, i32) {
    %c0_i32 = arith.constant 0 : i32
    %c0_i32_0 = arith.constant 0 : i32
    return %arg0, %c0_i32, %arg1 : i32, i32, i32
  }
  func.func @transform_2(%arg0: i32, %arg1: i32) -> (i32, i32) {
    %c0_i32 = arith.constant 0 : i32
    %c0_i32_0 = arith.constant 0 : i32
    %c0_i32_1 = arith.constant 0 : i32
    return %c0_i32, %c0_i32_0 : i32, i32
  }
  func.func @transform_3(%arg0: i32, %arg1: i32) -> (i32, i32) {
    %c0_i32 = arith.constant 0 : i32
    %c0_i32_0 = arith.constant 0 : i32
    %c0_i32_1 = arith.constant 0 : i32
    return %c0_i32, %c0_i32_0 : i32, i32
  }
  func.func @transform_4(%arg0: i32, %arg1: i32) -> (i32, i32) {
    %c0_i32 = arith.constant 0 : i32
    %c0_i32_0 = arith.constant 0 : i32
    %c0_i32_1 = arith.constant 0 : i32
    return %c0_i32, %c0_i32_0 : i32, i32
  }
  func.func @transform_5(%arg0: i32, %arg1: i32) -> (i32, i32, i32) {
    %c0_i32 = arith.constant 0 : i32
    %c0_i32_0 = arith.constant 0 : i32
    return %arg0, %c0_i32, %arg1 : i32, i32, i32
  }
}

module attributes {stable_mosaic.version = 11 : i64} {
  func.func @_affine_res_kernel(%arg0: i32, %arg1: i32, %arg2: memref<1x128x256xbf16, #tpu.memory_space<vmem>>, %arg3: memref<1x128x256xbf16, #tpu.memory_space<vmem>>, %arg4: memref<128x1xf32, #tpu.memory_space<vmem>>, %arg5: memref<128x1xf32, #tpu.memory_space<vmem>>, %arg6: memref<1x128x256xbf16, #tpu.memory_space<vmem>>) attributes {dimension_semantics = [#tpu.dimension_semantics<parallel>, #tpu.dimension_semantics<parallel>], iteration_bounds = array<i64: 2, 1>, scalar_prefetch = 0 : i64, scratch_operands = 0 : i64, tpu.core_type = #tpu.core_type<tc>, window_params = [{transform_indices = @transform_0, window_bounds = array<i64: 1, 128, 256>}, {transform_indices = @transform_1, window_bounds = array<i64: 1, 128, 256>}, {pipeline_mode = #tpu.pipeline_mode<synchronous>, transform_indices = @transform_2, window_bounds = array<i64: 128, 1>}, {pipeline_mode = #tpu.pipeline_mode<synchronous>, transform_indices = @transform_3, window_bounds = array<i64: 128, 1>}, {transform_indices = @transform_4, window_bounds = array<i64: 1, 128, 256>}]} {
    %c0 = arith.constant 0 : index
    %c0_0 = arith.constant 0 : index
    %c0_1 = arith.constant 0 : index
    %0 = vector.load %arg2[%c0, %c0_0, %c0_1] : memref<1x128x256xbf16, #tpu.memory_space<vmem>>, vector<1x128x256xbf16>
    %1 = vector.shape_cast %0 : vector<1x128x256xbf16> to vector<128x256xbf16>
    %2 = arith.extf %1 : vector<128x256xbf16> to vector<128x256xf32>
    %c0_2 = arith.constant 0 : index
    %c0_3 = arith.constant 0 : index
    %3 = vector.load %arg4[%c0_2, %c0_3] : memref<128x1xf32, #tpu.memory_space<vmem>>, vector<128x1xf32>
    %4 = vector.broadcast %3 : vector<128x1xf32> to vector<128x256xf32>
    %5 = arith.mulf %2, %4 : vector<128x256xf32>
    %c0_4 = arith.constant 0 : index
    %c0_5 = arith.constant 0 : index
    %6 = vector.load %arg5[%c0_4, %c0_5] : memref<128x1xf32, #tpu.memory_space<vmem>>, vector<128x1xf32>
    %7 = vector.broadcast %6 : vector<128x1xf32> to vector<128x256xf32>
    %8 = arith.addf %5, %7 : vector<128x256xf32>
    %c0_6 = arith.constant 0 : index
    %c0_7 = arith.constant 0 : index
    %c0_8 = arith.constant 0 : index
    %9 = vector.load %arg3[%c0_6, %c0_7, %c0_8] : memref<1x128x256xbf16, #tpu.memory_space<vmem>>, vector<1x128x256xbf16>
    %10 = vector.shape_cast %9 : vector<1x128x256xbf16> to vector<128x256xbf16>
    %11 = arith.extf %10 : vector<128x256xbf16> to vector<128x256xf32>
    %12 = arith.addf %8, %11 : vector<128x256xf32>
    %cst = arith.constant 0.000000e+00 : f32
    %13 = vector.broadcast %cst : f32 to vector<128x256xf32>
    %14 = arith.maximumf %12, %13 : vector<128x256xf32>
    %15 = arith.truncf %14 : vector<128x256xf32> to vector<128x256xbf16>
    %c0_9 = arith.constant 0 : index
    %c0_10 = arith.constant 0 : index
    %c0_11 = arith.constant 0 : index
    %16 = vector.load %arg6[%c0_9, %c0_10, %c0_11] : memref<1x128x256xbf16, #tpu.memory_space<vmem>>, vector<1x128x256xbf16>
    %17 = vector.shape_cast %16 : vector<1x128x256xbf16> to vector<128x256xbf16>
    %18 = vector.shape_cast %15 : vector<128x256xbf16> to vector<1x128x256xbf16>
    tpu.vector_store %arg6[%c0_9, %c0_10, %c0_11], %18 {strides = array<i32>} : memref<1x128x256xbf16, #tpu.memory_space<vmem>>, vector<1x128x256xbf16>,
    return
  }
  func.func @transform_0(%arg0: i32, %arg1: i32) -> (i32, i32, i32) {
    %c0_i32 = arith.constant 0 : i32
    %c0_i32_0 = arith.constant 0 : i32
    return %arg0, %c0_i32, %arg1 : i32, i32, i32
  }
  func.func @transform_1(%arg0: i32, %arg1: i32) -> (i32, i32, i32) {
    %c0_i32 = arith.constant 0 : i32
    %c0_i32_0 = arith.constant 0 : i32
    return %arg0, %c0_i32, %arg1 : i32, i32, i32
  }
  func.func @transform_2(%arg0: i32, %arg1: i32) -> (i32, i32) {
    %c0_i32 = arith.constant 0 : i32
    %c0_i32_0 = arith.constant 0 : i32
    %c0_i32_1 = arith.constant 0 : i32
    return %c0_i32, %c0_i32_0 : i32, i32
  }
  func.func @transform_3(%arg0: i32, %arg1: i32) -> (i32, i32) {
    %c0_i32 = arith.constant 0 : i32
    %c0_i32_0 = arith.constant 0 : i32
    %c0_i32_1 = arith.constant 0 : i32
    return %c0_i32, %c0_i32_0 : i32, i32
  }
  func.func @transform_4(%arg0: i32, %arg1: i32) -> (i32, i32, i32) {
    %c0_i32 = arith.constant 0 : i32
    %c0_i32_0 = arith.constant 0 : i32
    return %arg0, %c0_i32, %arg1 : i32, i32, i32
  }
}

module attributes {stable_mosaic.version = 11 : i64} {
  func.func @_convrelu_final_kernel(%arg0: i32, %arg1: i32, %arg2: memref<1x256x2048xbf16, #tpu.memory_space<vmem>>, %arg3: memref<256x1xf32, #tpu.memory_space<vmem>>, %arg4: memref<256x1xf32, #tpu.memory_space<vmem>>, %arg5: memref<1x1xf32, #tpu.memory_space<vmem>>, %arg6: memref<1x1x2048xf32, #tpu.memory_space<vmem>>) attributes {dimension_semantics = [#tpu.dimension_semantics<parallel>, #tpu.dimension_semantics<parallel>], iteration_bounds = array<i64: 2, 2>, scalar_prefetch = 0 : i64, scratch_operands = 0 : i64, tpu.core_type = #tpu.core_type<tc>, window_params = [{transform_indices = @transform_0, window_bounds = array<i64: 1, 256, 2048>}, {pipeline_mode = #tpu.pipeline_mode<synchronous>, transform_indices = @transform_1, window_bounds = array<i64: 256, 1>}, {pipeline_mode = #tpu.pipeline_mode<synchronous>, transform_indices = @transform_2, window_bounds = array<i64: 256, 1>}, {pipeline_mode = #tpu.pipeline_mode<synchronous>, transform_indices = @transform_3, window_bounds = array<i64: 1, 1>}, {transform_indices = @transform_4, window_bounds = array<i64: 1, 1, 2048>}]} {
    %c0 = arith.constant 0 : index
    %c0_0 = arith.constant 0 : index
    %c0_1 = arith.constant 0 : index
    %0 = vector.load %arg2[%c0, %c0_0, %c0_1] : memref<1x256x2048xbf16, #tpu.memory_space<vmem>>, vector<1x256x2048xbf16>
    %1 = vector.shape_cast %0 : vector<1x256x2048xbf16> to vector<256x2048xbf16>
    %2 = arith.extf %1 : vector<256x2048xbf16> to vector<256x2048xf32>
    %c0_2 = arith.constant 0 : index
    %c0_3 = arith.constant 0 : index
    %3 = vector.load %arg3[%c0_2, %c0_3] : memref<256x1xf32, #tpu.memory_space<vmem>>, vector<256x1xf32>
    %4 = vector.broadcast %3 : vector<256x1xf32> to vector<256x2048xf32>
    %5 = arith.addf %2, %4 : vector<256x2048xf32>
    %cst = arith.constant 0.000000e+00 : f32
    %6 = vector.broadcast %cst : f32 to vector<256x2048xf32>
    %7 = arith.maximumf %5, %6 : vector<256x2048xf32>
    %c0_4 = arith.constant 0 : index
    %c0_5 = arith.constant 0 : index
    %8 = vector.load %arg4[%c0_4, %c0_5] : memref<256x1xf32, #tpu.memory_space<vmem>>, vector<256x1xf32>
    %9 = vector.broadcast %8 : vector<256x1xf32> to vector<256x2048xf32>
    %10 = arith.mulf %7, %9 : vector<256x2048xf32>
    %cst_6 = arith.constant dense<0.000000e+00> : vector<2048xf32>
    %11 = vector.multi_reduction <add>, %10, %cst_6 [0] : vector<256x2048xf32> to vector<2048xf32>
    %12 = vector.shape_cast %11 : vector<2048xf32> to vector<1x2048xf32>
    %c0_7 = arith.constant 0 : index
    %c0_8 = arith.constant 0 : index
    %13 = vector.load %arg5[%c0_7, %c0_8] : memref<1x1xf32, #tpu.memory_space<vmem>>, vector<1x1xf32>
    %14 = vector.broadcast %13 : vector<1x1xf32> to vector<1x2048xf32>
    %15 = arith.addf %12, %14 : vector<1x2048xf32>
    %c0_9 = arith.constant 0 : index
    %c0_10 = arith.constant 0 : index
    %c0_11 = arith.constant 0 : index
    %16 = vector.load %arg6[%c0_9, %c0_10, %c0_11] : memref<1x1x2048xf32, #tpu.memory_space<vmem>>, vector<1x1x2048xf32>
    %17 = vector.shape_cast %16 : vector<1x1x2048xf32> to vector<1x2048xf32>
    %18 = vector.shape_cast %15 : vector<1x2048xf32> to vector<1x1x2048xf32>
    tpu.vector_store %arg6[%c0_9, %c0_10, %c0_11], %18 {strides = array<i32>} : memref<1x1x2048xf32, #tpu.memory_space<vmem>>, vector<1x1x2048xf32>,
    return
  }
  func.func @transform_0(%arg0: i32, %arg1: i32) -> (i32, i32, i32) {
    %c0_i32 = arith.constant 0 : i32
    %c0_i32_0 = arith.constant 0 : i32
    return %arg0, %c0_i32, %arg1 : i32, i32, i32
  }
  func.func @transform_1(%arg0: i32, %arg1: i32) -> (i32, i32) {
    %c0_i32 = arith.constant 0 : i32
    %c0_i32_0 = arith.constant 0 : i32
    %c0_i32_1 = arith.constant 0 : i32
    return %c0_i32, %c0_i32_0 : i32, i32
  }
  func.func @transform_2(%arg0: i32, %arg1: i32) -> (i32, i32) {
    %c0_i32 = arith.constant 0 : i32
    %c0_i32_0 = arith.constant 0 : i32
    %c0_i32_1 = arith.constant 0 : i32
    return %c0_i32, %c0_i32_0 : i32, i32
  }
  func.func @transform_3(%arg0: i32, %arg1: i32) -> (i32, i32) {
    %c0_i32 = arith.constant 0 : i32
    %c0_i32_0 = arith.constant 0 : i32
    %c0_i32_1 = arith.constant 0 : i32
    return %c0_i32, %c0_i32_0 : i32, i32
  }
  func.func @transform_4(%arg0: i32, %arg1: i32) -> (i32, i32, i32) {
    %c0_i32 = arith.constant 0 : i32
    %c0_i32_0 = arith.constant 0 : i32
    return %arg0, %c0_i32, %arg1 : i32, i32, i32
  }
}

</mosaic_0001>

<bundles_post_ra>
// kernel: salt_unet_forward.5
= control target key start
LH: loop header
LB: loop body
LE: loop exit
PB: predicated region body
PF: predicated region fallthrough
CT: control target
= control target key end

     0   :  { %s1303_s15 = smov 0   ;;  %s1305_s16 = smov 0   ;;  %s2178_s0 = inlined_call_operand.vmem [shape: bf16[2,64,1024], index: 0, kind: input, shape index: {}]   ;;  %s2179_s1 = inlined_call_operand.vmem [shape: bf16[2,64,1024], index: 1, kind: input, shape index: {}]   ;;  %s2180_s2 = inlined_call_operand.vmem [shape: f32[64,1], index: 2, kind: input, shape index: {}]   ;;  %s2181_s3 = inlined_call_operand.vmem [shape: f32[64,1], index: 3, kind: input, shape index: {}]   ;;  %s2182_s4 = inlined_call_operand.vmem [shape: bf16[2,64,1024], index: 4, kind: output, shape index: {}]  }
   0x1   :  { %s1307_s17 = smov 0  }
   0x2 LB: > { %s26_s18 = sadd.s32 1, %s1271_s16  ;;  %p1150_p0 = scmp.ge.s32.totalorder %s1275_s17, 1  ;;  %s1275_s17 = sphi %s1307_s17, %s14_s17   ;;  %s1271_s16 = sphi %s1305_s16, %s2452_s16   ;;  %s1267_s15 = sphi %s1303_s15, %s2451_s15  }
   0x3   : > { %p28_p1 = scmp.ge.s32.totalorder %s26_s18, 2  ;;  %p200_p2 = scmp.lt.s32.totalorder %s1275_s17, 3 }
   0x5   : > { %s2454_s18 = smov (%p28_p1, %s26_s18), 0  ;;  %p201_p3 = pnand %p1150_p0, %p200_p2 }
   0x7   : > { %204 = sbr.rel (%p201_p3) target bundleno = 242 (0xf2), region = 36 }
   0xc   : > { %v371_v0 = vld [vmem:[%s2180_s2 + $0x10] sm:$0xff]  ;;  %v369_v1 = vld [vmem:[%s2180_s2] sm:$0xff]  ;;  %v1277_v2 = vmov 0   ;;  %v372_v3 = vld [vmem:[%s2180_s2 + $0x18] sm:$0xff]  ;;  %p244_p4 = scmp.lt.s32.totalorder %s1267_s15, 1 }
   0xd   : > { %1252 = vset.pattern.permute.xlu1 %v1277_v2  ;;  %1251 = vset.pattern.permute.xlu0 %v1277_v2  ;;  %v370_v4 = vld [vmem:[%s2180_s2 + $0x8] sm:$0xff]  ;;  %v373_v6 = vld [vmem:[%s2180_s2 + $0x20] sm:$0xff]  ;;  %v376_v7 = vld [vmem:[%s2180_s2 + $0x38] sm:$0xff] }
   0xe   : > { %389 = vperm.xlu1 %1252, %v371_v0   ;;  %379 = vperm.xlu0 %1251, %v369_v1   ;;  %v374_v5 = vld [vmem:[%s2180_s2 + $0x28] sm:$0xff]  ;;  %v375_v8 = vld [vmem:[%s2180_s2 + $0x30] sm:$0xff]  ;;  %v481_v10 = vld [vmem:[%s2181_s3] sm:$0xff]  ;;  %s2456_s15 = smov (!%p244_p4, %s1267_s15), 1 }
   0xf   : > { %v482_v9 = vld [vmem:[%s2181_s3 + $0x8] sm:$0xff]  ;;  %v484_v11 = vld [vmem:[%s2181_s3 + $0x18] sm:$0xff]  ;;  %v483_v12 = vld [vmem:[%s2181_s3 + $0x10] sm:$0xff]  ;;  %s1373_s29 = sshll.u32 %s2456_s15, 8 }
  0x10   : > { %v486_v13 = vld [vmem:[%s2181_s3 + $0x28] sm:$0xff]  ;;  %v485_v14 = vld [vmem:[%s2181_s3 + $0x20] sm:$0xff]  ;;  %v488_v15 = vld [vmem:[%s2181_s3 + $0x38] sm:$0xff]  ;;  %s1379_s6 = scalar_lea.vmem %s2178_s0, %s1373_s29  ;;  %s1473_s8 = scalar_lea.vmem %s2179_s1, %s1373_s29 }
  0x11   : > { %v487_v16 = vld [vmem:[%s2181_s3 + $0x30] sm:$0xff]  ;;  %v1382_v17 = vld [vmem:[%s1379_s6 + $0x40] sm:$0xff]  ;;  %v1385_v18 = vld [vmem:[%s1379_s6 + $0x48] sm:$0xff]  ;;  %s1967_s11 = scalar_lea.vmem %s2182_s4, %s1373_s29 }
  0x12   : > { %394 = vperm.xlu1 %1252, %v372_v3   ;;  %384 = vperm.xlu0 %1251, %v370_v4   ;;  %v1388_v19 = vld [vmem:[%s1379_s6 + $0x50] sm:$0xff]  ;;  %v1391_v20 = vld [vmem:[%s1379_s6 + $0x58] sm:$0xff]  ;;  %v1394_v21 = vld [vmem:[%s1379_s6] sm:$0xff] }
  0x13   : > { %v1397_v22 = vld [vmem:[%s1379_s6 + $0x8] sm:$0xff]  ;;  %v1404_v27 = vld [vmem:[%s1379_s6 + $0x10] sm:$0xff]  ;;  %v1407_v28 = vld [vmem:[%s1379_s6 + $0x18] sm:$0xff]  ;;  %v2254_v25 = vunpack.c.l.bf16 %v1388_v19  ;;  %v2256_v31 = vunpack.c.h.bf16 %v1388_v19 }
  0x14   : > { %v1414_v33 = vld [vmem:[%s1379_s6 + $0x60] sm:$0xff]  ;;  %v1417_v34 = vld [vmem:[%s1379_s6 + $0x68] sm:$0xff]  ;;  %v1424_v39 = vld [vmem:[%s1379_s6 + $0x70] sm:$0xff]  ;;  %v2264_v19 = vunpack.c.l.bf16 %v1397_v22 }
  0x15   : > { %v1427_v40 = vld [vmem:[%s1379_s6 + $0x78] sm:$0xff]  ;;  %v1434_v45 = vld [vmem:[%s1379_s6 + $0x20] sm:$0xff]  ;;  %v1437_v46 = vld [vmem:[%s1379_s6 + $0x28] sm:$0xff] }
  0x16   : > { %404 = vperm.xlu1 %1252, %v374_v5   ;;  %399 = vperm.xlu0 %1251, %v373_v6   ;;  %v1444_v51 = vld [vmem:[%s1379_s6 + $0x30] sm:$0xff]  ;;  %v1447_v52 = vld [vmem:[%s1379_s6 + $0x38] sm:$0xff]  ;;  %v1454_v57 = vld [vmem:[%s1379_s6 + $0xa0] sm:$0xff] }
  0x17   : > { %v1457_v58 = vld [vmem:[%s1379_s6 + $0xa8] sm:$0xff]  ;;  %v1464_v63 = vld [vmem:[%s1379_s6 + $0xb0] sm:$0xff]  ;;  %v1467_v0 = vld [vmem:[%s1379_s6 + $0xb8] sm:$0xff] }
  0x18   : > { %v1480_v5 = vld [vmem:[%s1379_s6 + $0x80] sm:$0xff]  ;;  %v1483_v6 = vld [vmem:[%s1379_s6 + $0x88] sm:$0xff]  ;;  %v1513_v3 = vld [vmem:[%s1473_s8 + $0x38] sm:$0xff] }
  0x19   : > { %v1523_v1 = vld [vmem:[%s1473_s8 + $0x8] sm:$0xff]  ;;  %v1533_v61 = vld [vmem:[%s1473_s8 + $0x18] sm:$0xff]  ;;  %v1570_v4 = vld [vmem:[%s1473_s8 + $0x50] sm:$0xff] }
  0x1a   : > { %414 = vperm.xlu1 %1252, %v376_v7   ;;  %409 = vperm.xlu0 %1251, %v375_v8   ;;  %v1500_v8 = vld [vmem:[%s1473_s8 + $0x20] sm:$0xff]  ;;  %v1503_v7 = vld [vmem:[%s1473_s8 + $0x28] sm:$0xff]  ;;  %v1553_v55 = vld [vmem:[%s1473_s8 + $0x78] sm:$0xff]  ;;  %2228 = vst [vmem:[#allocation5_spill] sm:$0xff] %v1570_v4 }
  0x1b   : > { %v1543_v59 = vld [vmem:[%s1473_s8 + $0x68] sm:$0xff]  ;;  %2225 = vst [vmem:[#allocation2_spill] sm:$0xff] %v1553_v55  ;;  %v1573_v49 = vld [vmem:[%s1473_s8 + $0x58] sm:$0xff]  ;;  %v1580_v2 = vld [vmem:[%s1379_s6 + $0xe0] sm:$0xff]  ;;  %v2286_v55 = vunpack.c.l.bf16 %v1454_v57 }
  0x1c   : > { %v1563_v53 = vld [vmem:[%s1473_s8 + $0x48] sm:$0xff]  ;;  %2229 = vst [vmem:[#allocation6_spill] sm:$0xff] %v1573_v49  ;;  %v1590_v44 = vld [vmem:[%s1379_s6 + $0xf0] sm:$0xff]  ;;  %v1593_v56 = vld [vmem:[%s1379_s6 + $0xf8] sm:$0xff] }
  0x1d   : > { %2227 = vst [vmem:[#allocation4_spill] sm:$0xff] %v1563_v53  ;;  %v1583_v47 = vld [vmem:[%s1379_s6 + $0xe8] sm:$0xff]  ;;  %v1600_v42 = vld [vmem:[%s1379_s6 + $0xc0] sm:$0xff]  ;;  %v1610_v43 = vld [vmem:[%s1379_s6 + $0xd0] sm:$0xff] }
  0x1e   : > { %496 = vperm.xlu1 %1252, %v482_v9   ;;  %491 = vperm.xlu0 %1251, %v481_v10   ;;  %v1520_v9 = vld [vmem:[%s1473_s8] sm:$0xff]  ;;  %v1550_v10 = vld [vmem:[%s1473_s8 + $0x70] sm:$0xff]  ;;  %v1603_v54 = vld [vmem:[%s1379_s6 + $0xc8] sm:$0xff] }
  0x1f   : > { %v1613_v50 = vld [vmem:[%s1379_s6 + $0xd8] sm:$0xff]  ;;  %v1616_v60 = vld [vmem:[%s1473_s8 + $0xa0] sm:$0xff]  ;;  %v1619_v37 = vld [vmem:[%s1473_s8 + $0xa8] sm:$0xff] }
  0x20   : > { %2230 = vst [vmem:[#allocation7_spill] sm:$0xff] %v1616_v60  ;;  %2231 = vst [vmem:[#allocation8_spill] sm:$0xff] %v1619_v37  ;;  %v1626_v35 = vld [vmem:[%s1473_s8 + $0xb0] sm:$0xff]  ;;  %v1629_v48 = vld [vmem:[%s1473_s8 + $0xb8] sm:$0xff]  ;;  %v2248_v37 = vunpack.c.h.bf16 %v1382_v17 }
  0x21   : > { %2232 = vst [vmem:[#allocation9_spill] sm:$0xff] %v1626_v35  ;;  %2233 = vst [vmem:[#allocation10_spill] sm:$0xff] %v1629_v48  ;;  %v1636_v29 = vld [vmem:[%s1473_s8 + $0x80] sm:$0xff]  ;;  %v1639_v41 = vld [vmem:[%s1473_s8 + $0x88] sm:$0xff] }
  0x22   : > { %506 = vperm.xlu1 %1252, %v484_v11   ;;  %501 = vperm.xlu0 %1251, %v483_v12   ;;  %v1490_v11 = vld [vmem:[%s1379_s6 + $0x90] sm:$0xff]  ;;  %v1493_v12 = vld [vmem:[%s1379_s6 + $0x98] sm:$0xff]  ;;  %2234 = vst [vmem:[#allocation11_spill] sm:$0xff] %v1636_v29  ;;  %2235 = vst [vmem:[#allocation12_spill] sm:$0xff] %v1639_v41  ;;  %v2250_v29 = vunpack.c.l.bf16 %v1385_v18 }
  0x23   : > { %v1650_v24 = vld [vmem:[%s1473_s8 + $0x90] sm:$0xff]  ;;  %v1653_v23 = vld [vmem:[%s1473_s8 + $0x98] sm:$0xff]  ;;  %v1660_v30 = vld [vmem:[%s1473_s8 + $0xe0] sm:$0xff] }
  0x24   : > { %2236 = vst [vmem:[#allocation13_spill] sm:$0xff] %v1650_v24  ;;  %2237 = vst [vmem:[#allocation14_spill] sm:$0xff] %v1653_v23  ;;  %v1663_v38 = vld [vmem:[%s1473_s8 + $0xe8] sm:$0xff]  ;;  %v1670_v26 = vld [vmem:[%s1473_s8 + $0xf0] sm:$0xff]  ;;  %v2246_v23 = vunpack.c.l.bf16 %v1382_v17  ;;  %v2252_v24 = vunpack.c.h.bf16 %v1385_v18  ;;  %v2258_v17 = vunpack.c.l.bf16 %v1391_v20  ;;  %v2262_v18 = vunpack.c.l.bf16 %v1394_v21 }
  0x25   : > { %2238 = vst [vmem:[#allocation15_spill] sm:$0xff] %v1660_v30  ;;  %2239 = vst [vmem:[#allocation16_spill] sm:$0xff] %v1663_v38  ;;  %v1673_v35 = vld [vmem:[%s1473_s8 + $0xf8] sm:$0xff]  ;;  %v1680_v60 = vld [vmem:[%s1473_s8 + $0xc0] sm:$0xff] }
  0x26   : > { %516 = vperm.xlu1 %1252, %v486_v13   ;;  %511 = vperm.xlu0 %1251, %v485_v14   ;;  %v1510_v14 = vld [vmem:[%s1473_s8 + $0x30] sm:$0xff]  ;;  %v1540_v13 = vld [vmem:[%s1473_s8 + $0x60] sm:$0xff]  ;;  %2240 = vst [vmem:[#allocation17_spill] sm:$0xff] %v1670_v26  ;;  %2241 = vst [vmem:[#allocation18_spill] sm:$0xff] %v1673_v35  ;;  %v2269_v26 = vunpack.c.h.bf16 %v1407_v28 }
  0x27   : > { %2242 = vst [vmem:[#allocation19_spill] sm:$0xff] %v1680_v60  ;;  %v1683_v36 = vld [vmem:[%s1473_s8 + $0xc8] sm:$0xff]  ;;  %v1690_v49 = vld [vmem:[%s1473_s8 + $0xd0] sm:$0xff]  ;;  %v1693_v32 = vld [vmem:[%s1473_s8 + $0xd8] sm:$0xff]  ;;  %v2265_v60 = vunpack.c.h.bf16 %v1397_v22 }
  0x28   : > { %2243 = vst [vmem:[#allocation20_spill] sm:$0xff] %v1683_v36  ;;  %2244 = vst [vmem:[#allocation21_spill] sm:$0xff] %v1690_v49  ;;  %v2263_v49 = vunpack.c.h.bf16 %v1394_v21  ;;  %v2268_v21 = vunpack.c.l.bf16 %v1407_v28 }
  0x29   : > { %2245 = vst [vmem:[#allocation22_spill] sm:$0xff] %v1693_v32  ;;  %v2260_v32 = vunpack.c.h.bf16 %v1391_v20  ;;  %v2266_v20 = vunpack.c.l.bf16 %v1404_v27 }
  0x2a   : > { %526 = vperm.xlu1 %1252, %v488_v15   ;;  %521 = vperm.xlu0 %1251, %v487_v16   ;;  %v1530_v15 = vld [vmem:[%s1473_s8 + $0x10] sm:$0xff]  ;;  %v1560_v16 = vld [vmem:[%s1473_s8 + $0x40] sm:$0xff] }
  0x2b   : > { %2226 = vst [vmem:[#allocation3_spill] sm:$0xff] %v1560_v16 }
  0x89   : > { %v390_v38 = vpop.permute.xlu1 %389  ;;  %v380_v30 = vpop.permute.xlu0 %379 }
  0x8a   : > { %v1709_v35 = vmul.f32 %v390_v38, %v2246_v23  ;;  %v1713_v62 = vmul.f32 %v390_v38, %v2248_v37  ;;  %v1717_v41 = vmul.f32 %v390_v38, %v2250_v29  ;;  %v1721_v36 = vmul.f32 %v390_v38, %v2252_v24 }
  0x8b   : > { %v1725_v48 = vmul.f32 %v390_v38, %v2254_v25  ;;  %v1729_v23 = vmul.f32 %v390_v38, %v2256_v31  ;;  %v1733_v37 = vmul.f32 %v390_v38, %v2258_v17  ;;  %v1737_v29 = vmul.f32 %v390_v38, %v2260_v32 }
  0x8c   : > { %2247 = vst [vmem:[#allocation23_spill] sm:$0xff] %v1709_v35  ;;  %2249 = vst [vmem:[#allocation24_spill] sm:$0xff] %v1713_v62  ;;  %v1741_v24 = vmul.f32 %v380_v30, %v2262_v18  ;;  %v1745_v25 = vmul.f32 %v380_v30, %v2263_v49  ;;  %v1749_v31 = vmul.f32 %v380_v30, %v2264_v19  ;;  %v2267_v38 = vunpack.c.h.bf16 %v1404_v27 }
  0x8d   : > { %2251 = vst [vmem:[#allocation25_spill] sm:$0xff] %v1717_v41  ;;  %2253 = vst [vmem:[#allocation26_spill] sm:$0xff] %v1721_v36  ;;  %v1753_v17 = vmul.f32 %v380_v30, %v2265_v60  ;;  %v1757_v32 = vmul.f32 %v380_v30, %v2266_v20  ;;  %v1765_v49 = vmul.f32 %v380_v30, %v2268_v21  ;;  %v395_v4 = vpop.permute.xlu1 %394  ;;  %v385_v22 = vpop.permute.xlu0 %384  ;;  %v2270_v60 = vunpack.c.l.bf16 %v1414_v33 }
  0x8e   : > { %2255 = vst [vmem:[#allocation27_spill] sm:$0xff] %v1725_v48  ;;  %2257 = vst [vmem:[#allocation28_spill] sm:$0xff] %v1729_v23  ;;  %v1761_v18 = vmul.f32 %v380_v30, %v2267_v38  ;;  %v1769_v19 = vmul.f32 %v380_v30, %v2269_v26  ;;  %v2271_v20 = vunpack.c.h.bf16 %v1414_v33  ;;  %v2272_v27 = vunpack.c.l.bf16 %v1417_v34 }
  0x8f   : > { %2259 = vst [vmem:[#allocation29_spill] sm:$0xff] %v1733_v37  ;;  %2261 = vst [vmem:[#allocation30_spill] sm:$0xff] %v1737_v29  ;;  %v1773_v53 = vmul.f32 %v395_v4, %v2270_v60  ;;  %v2273_v21 = vunpack.c.h.bf16 %v1417_v34  ;;  %v2274_v26 = vunpack.c.l.bf16 %v1424_v39  ;;  %v2275_v30 = vunpack.c.h.bf16 %v1424_v39 }
  0x90   : > { %v1777_v16 = vmul.f32 %v395_v4, %v2271_v20  ;;  %v1781_v38 = vmul.f32 %v395_v4, %v2272_v27  ;;  %v2276_v33 = vunpack.c.l.bf16 %v1427_v40  ;;  %v2277_v37 = vunpack.c.h.bf16 %v1427_v40 }
  0x91   : > { %v1785_v29 = vmul.f32 %v395_v4, %v2273_v21  ;;  %v1789_v28 = vmul.f32 %v395_v4, %v2274_v26  ;;  %v1793_v60 = vmul.f32 %v395_v4, %v2275_v30  ;;  %v2278_v34 = vunpack.c.l.bf16 %v1434_v45 }
  0x92   : > { %v1797_v20 = vmul.f32 %v395_v4, %v2276_v33  ;;  %v1801_v27 = vmul.f32 %v395_v4, %v2277_v37  ;;  %v2279_v23 = vunpack.c.h.bf16 %v1434_v45  ;;  %v2280_v26 = vunpack.c.l.bf16 %v1437_v46  ;;  %v405_v45 = vpop.permute.xlu1 %404 }
  0x93   : > { %v425_v21 = vmul.f32 %v385_v22, %v2278_v34  ;;  %v2281_v39 = vunpack.c.h.bf16 %v1437_v46  ;;  %v2282_v41 = vunpack.c.l.bf16 %v1444_v51  ;;  %v2283_v62 = vunpack.c.h.bf16 %v1444_v51 }
  0x94   : > { %v426_v48 = vmul.f32 %v385_v22, %v2279_v23  ;;  %v427_v36 = vmul.f32 %v385_v22, %v2280_v26  ;;  %v2284_v4 = vunpack.c.l.bf16 %v1447_v52  ;;  %v2285_v34 = vunpack.c.h.bf16 %v1447_v52  ;;  %v400_v23 = vpop.permute.xlu0 %399 }
  0x95   : > { %v428_v30 = vmul.f32 %v385_v22, %v2281_v39  ;;  %v429_v33 = vmul.f32 %v385_v22, %v2282_v41  ;;  %v430_v40 = vmul.f32 %v385_v22, %v2283_v62  ;;  %v1821_v26 = vmul.f32 %v405_v45, %v2286_v55 }
  0x96   : > { %v431_v37 = vmul.f32 %v385_v22, %v2284_v4  ;;  %v432_v35 = vmul.f32 %v385_v22, %v2285_v34  ;;  %v2287_v46 = vunpack.c.h.bf16 %v1454_v57  ;;  %v2289_v41 = vunpack.c.l.bf16 %v1457_v58 }
  0x97   : > { %v2290_v62 = vunpack.c.h.bf16 %v1457_v58  ;;  %v2292_v52 = vunpack.c.l.bf16 %v1464_v63  ;;  %v2293_v34 = vunpack.c.h.bf16 %v1464_v63  ;;  %v2295_v57 = vunpack.c.l.bf16 %v1467_v0 }
  0x98   : > { %v1825_v39 = vmul.f32 %v405_v45, %v2287_v46  ;;  %v1829_v51 = vmul.f32 %v405_v45, %v2289_v41  ;;  %v2297_v58 = vunpack.c.l.bf16 %v1480_v5  ;;  %v2300_v63 = vunpack.c.l.bf16 %v1483_v6 }
  0x99   : > { %v1833_v4 = vmul.f32 %v405_v45, %v2290_v62  ;;  %v1837_v22 = vmul.f32 %v405_v45, %v2292_v52  ;;  %v1841_v55 = vmul.f32 %v405_v45, %v2293_v34  ;;  %v1845_v46 = vmul.f32 %v405_v45, %v2295_v57 }
  0x9a   : > { %2288 = vst [vmem:[#allocation31_spill] sm:$0xff] %v1825_v39  ;;  %v2296_v39 = vunpack.c.h.bf16 %v1467_v0  ;;  %v1853_v62 = vmul.f32 %v400_v23, %v2297_v58  ;;  %v1861_v34 = vmul.f32 %v400_v23, %v2300_v63  ;;  %v2304_v0 = vunpack.c.l.bf16 %v1490_v11 }
  0x9b   : > { %2291 = vst [vmem:[#allocation32_spill] sm:$0xff] %v1833_v4  ;;  %2294 = vst [vmem:[#allocation33_spill] sm:$0xff] %v1841_v55  ;;  %v2298_v4 = vunpack.c.h.bf16 %v1480_v5  ;;  %v2302_v55 = vunpack.c.h.bf16 %v1483_v6  ;;  %v2307_v5 = vunpack.c.l.bf16 %v1493_v12  ;;  %v410_v6 = vpop.permute.xlu0 %409 }
  0x9c   : > { %v1849_v41 = vmul.f32 %v405_v45, %v2296_v39  ;;  %2301 = vst [vmem:[#allocation35_spill] sm:$0xff] %v1861_v34  ;;  %v1869_v45 = vmul.f32 %v400_v23, %v2304_v0  ;;  %v2306_v39 = vunpack.c.h.bf16 %v1490_v11  ;;  %v415_v34 = vpop.permute.xlu1 %414  ;;  %v2311_v0 = vunpack.c.h.bf16 %v1580_v2 }
  0x9d   : > { %v1857_v52 = vmul.f32 %v400_v23, %v2298_v4  ;;  %v1865_v57 = vmul.f32 %v400_v23, %v2302_v55  ;;  %v1877_v4 = vmul.f32 %v400_v23, %v2307_v5  ;;  %v2310_v55 = vunpack.c.l.bf16 %v1580_v2 }
  0x9e   : > { %2305 = vst [vmem:[#allocation37_spill] sm:$0xff] %v1869_v45  ;;  %v1873_v58 = vmul.f32 %v400_v23, %v2306_v39  ;;  %v1889_v45 = vmul.f32 %v415_v34, %v2311_v0  ;;  %v2313_v11 = vunpack.c.l.bf16 %v1583_v47  ;;  %v2314_v5 = vunpack.c.h.bf16 %v1583_v47 }
  0x9f   : > { %2299 = vst [vmem:[#allocation34_spill] sm:$0xff] %v1857_v52  ;;  %2303 = vst [vmem:[#allocation36_spill] sm:$0xff] %v1865_v57  ;;  %v2309_v52 = vunpack.c.h.bf16 %v1493_v12  ;;  %v1885_v57 = vmul.f32 %v415_v34, %v2310_v55  ;;  %v2316_v12 = vunpack.c.l.bf16 %v1590_v44  ;;  %v2319_v2 = vunpack.c.l.bf16 %v1593_v56 }
  0xa0   : > { %2308 = vst [vmem:[#allocation38_spill] sm:$0xff] %v1877_v4  ;;  %2312 = vst [vmem:[#allocation39_spill] sm:$0xff] %v1889_v45  ;;  %v1893_v39 = vmul.f32 %v415_v34, %v2313_v11  ;;  %v1897_v4 = vmul.f32 %v415_v34, %v2314_v5  ;;  %v2321_v45 = vunpack.c.h.bf16 %v1593_v56  ;;  %v2323_v47 = vunpack.c.l.bf16 %v1600_v42 }
  0xa1   : > { %v1881_v63 = vmul.f32 %v400_v23, %v2309_v52  ;;  %v1901_v23 = vmul.f32 %v415_v34, %v2316_v12  ;;  %v2317_v52 = vunpack.c.h.bf16 %v1590_v44  ;;  %v1909_v0 = vmul.f32 %v415_v34, %v2319_v2 }
  0xa2   : > { %2315 = vst [vmem:[#allocation40_spill] sm:$0xff] %v1897_v4  ;;  %v1913_v11 = vmul.f32 %v415_v34, %v2321_v45  ;;  %v1917_v5 = vmul.f32 %v410_v6, %v2323_v47  ;;  %v2325_v4 = vunpack.c.h.bf16 %v1600_v42  ;;  %v2327_v44 = vunpack.c.l.bf16 %v1603_v54 }
  0xa3   : > { %v1905_v55 = vmul.f32 %v415_v34, %v2317_v52  ;;  %2320 = vst [vmem:[#allocation42_spill] sm:$0xff] %v1909_v0  ;;  %v497_v0 = vpop.permute.xlu1 %496  ;;  %v2331_v56 = vunpack.c.l.bf16 %v1610_v43  ;;  %v2333_v45 = vunpack.c.h.bf16 %v1610_v43  ;;  %v2335_v42 = vunpack.c.l.bf16 %v1613_v50 }
  0xa4   : > { %2322 = vst [vmem:[#allocation43_spill] sm:$0xff] %v1913_v11  ;;  %2324 = vst [vmem:[#allocation44_spill] sm:$0xff] %v1917_v5  ;;  %v1921_v12 = vmul.f32 %v410_v6, %v2325_v4  ;;  %v1925_v52 = vmul.f32 %v410_v6, %v2327_v44  ;;  %v2337_v44 = vunpack.c.h.bf16 %v1613_v50  ;;  %v541_v5 = vadd.f32 %v497_v0, %v429_v33 }
  0xa5   : > { %2318 = vst [vmem:[#allocation41_spill] sm:$0xff] %v1905_v55  ;;  %v2329_v55 = vunpack.c.h.bf16 %v1603_v54  ;;  %v1933_v34 = vmul.f32 %v410_v6, %v2331_v56  ;;  %v1937_v47 = vmul.f32 %v410_v6, %v2333_v45  ;;  %v1941_v4 = vmul.f32 %v410_v6, %v2335_v42 }
  0xa6   : > { %2326 = vst [vmem:[#allocation45_spill] sm:$0xff] %v1921_v12  ;;  %2328 = vst [vmem:[#allocation46_spill] sm:$0xff] %v1925_v52  ;;  %v1945_v52 = vmul.f32 %v410_v6, %v2337_v44  ;;  %v537_v54 = vadd.f32 %v497_v0, %v425_v21  ;;  %v540_v12 = vadd.f32 %v497_v0, %v428_v30  ;;  %v2338_v43 = vunpack.c.l.bf16 %v1500_v8 }
  0xa7   : > { %v1929_v2 = vmul.f32 %v410_v6, %v2329_v55  ;;  %2332 = vst [vmem:[#allocation48_spill] sm:$0xff] %v1933_v34  ;;  %2334 = vst [vmem:[#allocation49_spill] sm:$0xff] %v1937_v47  ;;  %v538_v55 = vadd.f32 %v497_v0, %v426_v48  ;;  %v542_v11 = vadd.f32 %v497_v0, %v430_v40  ;;  %v2339_v47 = vunpack.c.h.bf16 %v1500_v8  ;;  %v492_v8 = vpop.permute.xlu0 %491 }
  0xa8   : > { %2336 = vst [vmem:[#allocation50_spill] sm:$0xff] %v1941_v4  ;;  %v543_v56 = vadd.f32 %v497_v0, %v431_v37  ;;  %v544_v34 = vadd.f32 %v497_v0, %v432_v35  ;;  %v697_v45 = vadd.f32 %v2338_v43, %v537_v54  ;;  %v2340_v4 = vunpack.c.l.bf16 %v1503_v7 }
  0xa9   : > { %2330 = vst [vmem:[#allocation47_spill] sm:$0xff] %v1929_v2  ;;  %v539_v2 = vadd.f32 %v497_v0, %v427_v36  ;;  %v698_v42 = vadd.f32 %v2339_v47, %v538_v55  ;;  %v2341_v6 = vunpack.c.h.bf16 %v1503_v7  ;;  %v2342_v36 = vunpack.c.l.bf16 %v1510_v14 }
  0xaa   : > { %v2343_v30 = vunpack.c.h.bf16 %v1510_v14  ;;  %v2344_v35 = vunpack.c.l.bf16 %v1513_v3  ;;  %v2345_v37 = vunpack.c.h.bf16 %v1513_v3  ;;  %v761_v47 = vmax.f32 %v697_v45, 0.0 }
  0xab   : > { %v699_v50 = vadd.f32 %v2340_v4, %v539_v2  ;;  %v700_v21 = vadd.f32 %v2341_v6, %v540_v12  ;;  %v701_v48 = vadd.f32 %v2342_v36, %v541_v5  ;;  %v762_v44 = vmax.f32 %v698_v42, 0.0 }
  0xac   : > { %v702_v33 = vadd.f32 %v2343_v30, %v542_v11  ;;  %v703_v40 = vadd.f32 %v2344_v35, %v543_v56  ;;  %v704_v0 = vadd.f32 %v2345_v37, %v544_v34  ;;  %v529_v34 = vadd.f32 %v492_v8, %v1741_v24 }
  0xad   : > { %v763_v54 = vmax.f32 %v699_v50, 0.0  ;;  %v764_v2 = vmax.f32 %v700_v21, 0.0  ;;  %v765_v7 = vmax.f32 %v701_v48, 0.0  ;;  %v1198_v3 = vpack.c.bf16 %v762_v44, %v761_v47 }
  0xae   : > { %v766_v14 = vmax.f32 %v702_v33, 0.0  ;;  %v767_v11 = vmax.f32 %v703_v40, 0.0  ;;  %v768_v5 = vmax.f32 %v704_v0, 0.0  ;;  %v530_v4 = vadd.f32 %v492_v8, %v1745_v25 }
  0xaf   : > { %v1199_v12 = vpack.c.bf16 %v764_v2, %v763_v54  ;;  %v531_v43 = vadd.f32 %v492_v8, %v1749_v31  ;;  %v532_v45 = vadd.f32 %v492_v8, %v1753_v17  ;;  %1013 = vst [vmem:[%s1967_s11 + $0x20] sm:$0xff] %v1198_v3  ;;  %v533_v42 = vadd.f32 %v492_v8, %v1757_v32 }
  0xb0   : > { %v1200_v55 = vpack.c.bf16 %v766_v14, %v765_v7  ;;  %v1201_v56 = vpack.c.bf16 %v768_v5, %v767_v11  ;;  %v534_v50 = vadd.f32 %v492_v8, %v1761_v18  ;;  %v535_v6 = vadd.f32 %v492_v8, %v1765_v49 }
  0xb1   : > { %1014 = vst [vmem:[%s1967_s11 + $0x28] sm:$0xff] %v1199_v12  ;;  %v536_v21 = vadd.f32 %v492_v8, %v1769_v19  ;;  %v2346_v24 = vunpack.c.l.bf16 %v1520_v9  ;;  %v2347_v36 = vunpack.c.h.bf16 %v1520_v9  ;;  %v2348_v17 = vunpack.c.l.bf16 %v1523_v1  ;;  %v507_v9 = vpop.permute.xlu1 %506 }
  0xb2   : > { %1015 = vst [vmem:[%s1967_s11 + $0x30] sm:$0xff] %v1200_v55  ;;  %1016 = vst [vmem:[%s1967_s11 + $0x38] sm:$0xff] %v1201_v56  ;;  %v2349_v30 = vunpack.c.h.bf16 %v1523_v1  ;;  %v2350_v18 = vunpack.c.l.bf16 %v1530_v15  ;;  %v2351_v49 = vunpack.c.h.bf16 %v1530_v15  ;;  %v2352_v35 = vunpack.c.l.bf16 %v1533_v61 }
  0xb3   : > { %v689_v25 = vadd.f32 %v2346_v24, %v529_v34  ;;  %v690_v31 = vadd.f32 %v2347_v36, %v530_v4  ;;  %v691_v48 = vadd.f32 %v2348_v17, %v531_v43  ;;  %v2353_v37 = vunpack.c.h.bf16 %v1533_v61  ;;  %v2360_v24 = vld [vmem:[#allocation2_spill] sm:$0xff] }
  0xb4   : > { %v692_v32 = vadd.f32 %v2349_v30, %v532_v45  ;;  %v693_v33 = vadd.f32 %v2350_v18, %v533_v42  ;;  %v694_v19 = vadd.f32 %v2351_v49, %v534_v50  ;;  %v695_v40 = vadd.f32 %v2352_v35, %v535_v6 }
  0xb5   : > { %v696_v0 = vadd.f32 %v2353_v37, %v536_v21  ;;  %v753_v8 = vmax.f32 %v689_v25, 0.0  ;;  %v754_v47 = vmax.f32 %v690_v31, 0.0  ;;  %v755_v44 = vmax.f32 %v691_v48, 0.0 }
  0xb6   : > { %v756_v1 = vmax.f32 %v692_v32, 0.0  ;;  %v757_v54 = vmax.f32 %v693_v33, 0.0  ;;  %v758_v2 = vmax.f32 %v694_v19, 0.0  ;;  %v759_v7 = vmax.f32 %v695_v40, 0.0  ;;  %v2363_v40 = vld [vmem:[#allocation23_spill] sm:$0xff] }
  0xb7   : > { %v760_v14 = vmax.f32 %v696_v0, 0.0  ;;  %v1194_v15 = vpack.c.bf16 %v754_v47, %v753_v8  ;;  %v553_v5 = vadd.f32 %v507_v9, %v1773_v53  ;;  %v554_v61 = vadd.f32 %v507_v9, %v1777_v16  ;;  %v2364_v0 = vld [vmem:[#allocation24_spill] sm:$0xff] }
  0xb8   : > { %v1195_v11 = vpack.c.bf16 %v756_v1, %v755_v44  ;;  %v1196_v3 = vpack.c.bf16 %v758_v2, %v757_v54  ;;  %v555_v34 = vadd.f32 %v507_v9, %v1781_v38  ;;  %v556_v4 = vadd.f32 %v507_v9, %v1785_v29  ;;  %v2365_v44 = vld [vmem:[#allocation25_spill] sm:$0xff]  ;;  %v2366_v54 = vld [vmem:[#allocation26_spill] sm:$0xff] }
  0xb9   : > { %v1197_v12 = vpack.c.bf16 %v760_v14, %v759_v7  ;;  %1009 = vst [vmem:[%s1967_s11] sm:$0xff] %v1194_v15  ;;  %v557_v55 = vadd.f32 %v507_v9, %v1789_v28  ;;  %v558_v56 = vadd.f32 %v507_v9, %v1793_v60  ;;  %v559_v43 = vadd.f32 %v507_v9, %v1797_v20  ;;  %v2367_v7 = vld [vmem:[#allocation27_spill] sm:$0xff]  ;;  %v2368_v15 = vld [vmem:[#allocation28_spill] sm:$0xff] }
  0xba   : > { %1010 = vst [vmem:[%s1967_s11 + $0x8] sm:$0xff] %v1195_v11  ;;  %v560_v45 = vadd.f32 %v507_v9, %v1801_v27  ;;  %1011 = vst [vmem:[%s1967_s11 + $0x10] sm:$0xff] %v1196_v3  ;;  %v2354_v53 = vunpack.c.l.bf16 %v1540_v13  ;;  %v2355_v42 = vunpack.c.h.bf16 %v1540_v13  ;;  %v2356_v29 = vunpack.c.l.bf16 %v1543_v59  ;;  %v502_v13 = vpop.permute.xlu0 %501  ;;  %v2370_v3 = vld [vmem:[#allocation30_spill] sm:$0xff] }
  0xbb   : > { %1012 = vst [vmem:[%s1967_s11 + $0x18] sm:$0xff] %v1197_v12  ;;  %v2357_v6 = vunpack.c.h.bf16 %v1543_v59  ;;  %v2358_v60 = vunpack.c.l.bf16 %v1550_v10  ;;  %v2359_v20 = vunpack.c.h.bf16 %v1550_v10  ;;  %v2361_v25 = vunpack.c.l.bf16 %v2360_v24 }
  0xbc   : > { %v713_v16 = vadd.f32 %v2354_v53, %v553_v5  ;;  %v714_v38 = vadd.f32 %v2355_v42, %v554_v61  ;;  %v715_v50 = vadd.f32 %v2356_v29, %v555_v34  ;;  %v2362_v31 = vunpack.c.h.bf16 %v2360_v24  ;;  %v2369_v5 = vld [vmem:[#allocation29_spill] sm:$0xff]  ;;  %v2371_v34 = vld [vmem:[#allocation3_spill] sm:$0xff] }
  0xbd   : > { %v716_v28 = vadd.f32 %v2357_v6, %v556_v4  ;;  %v717_v21 = vadd.f32 %v2358_v60, %v557_v55  ;;  %v718_v27 = vadd.f32 %v2359_v20, %v558_v56  ;;  %v719_v36 = vadd.f32 %v2361_v25, %v559_v43  ;;  %v2377_v29 = vld [vmem:[#allocation5_spill] sm:$0xff] }
  0xbe   : > { %v720_v17 = vadd.f32 %v2362_v31, %v560_v45  ;;  %v777_v48 = vmax.f32 %v713_v16, 0.0  ;;  %v778_v30 = vmax.f32 %v714_v38, 0.0  ;;  %v779_v32 = vmax.f32 %v715_v50, 0.0  ;;  %v2374_v45 = vld [vmem:[#allocation4_spill] sm:$0xff] }
  0xbf   : > { %v780_v59 = vmax.f32 %v716_v28, 0.0  ;;  %v781_v18 = vmax.f32 %v717_v21, 0.0  ;;  %v782_v33 = vmax.f32 %v718_v27, 0.0  ;;  %v783_v49 = vmax.f32 %v719_v36, 0.0  ;;  %v2380_v21 = vld [vmem:[#allocation6_spill] sm:$0xff]  ;;  %v517_v36 = vpop.permute.xlu1 %516 }
  0xc0   : > { %v784_v19 = vmax.f32 %v720_v17, 0.0  ;;  %v1206_v10 = vpack.c.bf16 %v778_v30, %v777_v48  ;;  %v545_v37 = vadd.f32 %v502_v13, %v2363_v40  ;;  %v546_v9 = vadd.f32 %v502_v13, %v2364_v0 }
  0xc1   : > { %v1207_v35 = vpack.c.bf16 %v780_v59, %v779_v32  ;;  %v1208_v8 = vpack.c.bf16 %v782_v33, %v781_v18  ;;  %v547_v1 = vadd.f32 %v502_v13, %v2365_v44  ;;  %v548_v2 = vadd.f32 %v502_v13, %v2366_v54  ;;  %v2385_v44 = vld [vmem:[#allocation33_spill] sm:$0xff] }
  0xc2   : > { %v1209_v47 = vpack.c.bf16 %v784_v19, %v783_v49  ;;  %1021 = vst [vmem:[%s1967_s11 + $0x60] sm:$0xff] %v1206_v10  ;;  %v549_v14 = vadd.f32 %v502_v13, %v2367_v7  ;;  %v550_v11 = vadd.f32 %v502_v13, %v2368_v15  ;;  %v551_v61 = vadd.f32 %v502_v13, %v2369_v5  ;;  %v2383_v10 = vld [vmem:[#allocation31_spill] sm:$0xff] }
  0xc3   : > { %1022 = vst [vmem:[%s1967_s11 + $0x68] sm:$0xff] %v1207_v35  ;;  %v552_v12 = vadd.f32 %v502_v13, %v2370_v3  ;;  %1023 = vst [vmem:[%s1967_s11 + $0x70] sm:$0xff] %v1208_v8  ;;  %v2372_v4 = vunpack.c.l.bf16 %v2371_v34  ;;  %v2373_v56 = vunpack.c.h.bf16 %v2371_v34  ;;  %v2375_v53 = vunpack.c.l.bf16 %v2374_v45 }
  0xc4   : > { %1024 = vst [vmem:[%s1967_s11 + $0x78] sm:$0xff] %v1209_v47  ;;  %v2376_v42 = vunpack.c.h.bf16 %v2374_v45  ;;  %v2378_v50 = vunpack.c.l.bf16 %v2377_v29  ;;  %v2379_v28 = vunpack.c.h.bf16 %v2377_v29  ;;  %v2381_v20 = vunpack.c.l.bf16 %v2380_v21 }
  0xc5   : > { %v705_v55 = vadd.f32 %v2372_v4, %v545_v37  ;;  %v706_v43 = vadd.f32 %v2373_v56, %v546_v9  ;;  %v707_v16 = vadd.f32 %v2375_v53, %v547_v1  ;;  %v2382_v24 = vunpack.c.h.bf16 %v2380_v21  ;;  %v2384_v9 = vld [vmem:[#allocation32_spill] sm:$0xff] }
  0xc6   : > { %v708_v38 = vadd.f32 %v2376_v42, %v548_v2  ;;  %v709_v6 = vadd.f32 %v2378_v50, %v549_v14  ;;  %v710_v60 = vadd.f32 %v2379_v28, %v550_v11  ;;  %v711_v27 = vadd.f32 %v2381_v20, %v551_v61  ;;  %v2389_v11 = vld [vmem:[#allocation8_spill] sm:$0xff] }
  0xc7   : > { %v712_v25 = vadd.f32 %v2382_v24, %v552_v12  ;;  %v769_v31 = vmax.f32 %v705_v55, 0.0  ;;  %v770_v17 = vmax.f32 %v706_v43, 0.0  ;;  %v771_v13 = vmax.f32 %v707_v16, 0.0  ;;  %v2392_v12 = vld [vmem:[#allocation9_spill] sm:$0xff]  ;;  %v2395_v55 = vld [vmem:[#allocation10_spill] sm:$0xff]  ;;  %v512_v16 = vpop.permute.xlu0 %511 }
  0xc8   : > { %v772_v48 = vmax.f32 %v708_v38, 0.0  ;;  %v773_v30 = vmax.f32 %v709_v6, 0.0  ;;  %v774_v32 = vmax.f32 %v710_v60, 0.0  ;;  %v775_v59 = vmax.f32 %v711_v27, 0.0 }
  0xc9   : > { %v776_v18 = vmax.f32 %v712_v25, 0.0  ;;  %v1202_v33 = vpack.c.bf16 %v770_v17, %v769_v31  ;;  %v569_v19 = vadd.f32 %v517_v36, %v1821_v26  ;;  %v570_v35 = vadd.f32 %v517_v36, %v2383_v10  ;;  %v2386_v26 = vld [vmem:[#allocation7_spill] sm:$0xff]  ;;  %v2398_v25 = vld [vmem:[#allocation34_spill] sm:$0xff] }
  0xca   : > { %v1203_v49 = vpack.c.bf16 %v772_v48, %v771_v13  ;;  %v1204_v40 = vpack.c.bf16 %v774_v32, %v773_v30  ;;  %v571_v0 = vadd.f32 %v517_v36, %v1829_v51  ;;  %v572_v8 = vadd.f32 %v517_v36, %v2384_v9  ;;  %v2399_v13 = vld [vmem:[#allocation35_spill] sm:$0xff]  ;;  %v2400_v30 = vld [vmem:[#allocation36_spill] sm:$0xff] }
  0xcb   : > { %v1205_v37 = vpack.c.bf16 %v776_v18, %v775_v59  ;;  %1017 = vst [vmem:[%s1967_s11 + $0x40] sm:$0xff] %v1202_v33  ;;  %v573_v47 = vadd.f32 %v517_v36, %v1837_v22  ;;  %v574_v1 = vadd.f32 %v517_v36, %v2385_v44  ;;  %v575_v54 = vadd.f32 %v517_v36, %v1845_v46  ;;  %v2401_v59 = vld [vmem:[#allocation37_spill] sm:$0xff]  ;;  %v2406_v9 = vld [vmem:[#allocation12_spill] sm:$0xff] }
  0xcc   : > { %1018 = vst [vmem:[%s1967_s11 + $0x48] sm:$0xff] %v1203_v49  ;;  %v576_v2 = vadd.f32 %v517_v36, %v1849_v41  ;;  %1019 = vst [vmem:[%s1967_s11 + $0x50] sm:$0xff] %v1204_v40  ;;  %v2387_v7 = vunpack.c.l.bf16 %v2386_v26  ;;  %v2388_v15 = vunpack.c.h.bf16 %v2386_v26  ;;  %v2390_v5 = vunpack.c.l.bf16 %v2389_v11  ;;  %v2402_v49 = vld [vmem:[#allocation38_spill] sm:$0xff] }
  0xcd   : > { %1020 = vst [vmem:[%s1967_s11 + $0x58] sm:$0xff] %v1205_v37  ;;  %v2391_v3 = vunpack.c.h.bf16 %v2389_v11  ;;  %v2393_v34 = vunpack.c.l.bf16 %v2392_v12  ;;  %v2394_v46 = vunpack.c.h.bf16 %v2392_v12  ;;  %v2396_v56 = vunpack.c.l.bf16 %v2395_v55 }
  0xce   : > { %v729_v14 = vadd.f32 %v2387_v7, %v569_v19  ;;  %v730_v51 = vadd.f32 %v2388_v15, %v570_v35  ;;  %v731_v61 = vadd.f32 %v2390_v5, %v571_v0  ;;  %v2397_v45 = vunpack.c.h.bf16 %v2395_v55  ;;  %v2412_v7 = vld [vmem:[#allocation14_spill] sm:$0xff]  ;;  %v527_v5 = vpop.permute.xlu1 %526 }
  0xcf   : > { %v732_v22 = vadd.f32 %v2391_v3, %v572_v8  ;;  %v733_v4 = vadd.f32 %v2393_v34, %v573_v47  ;;  %v734_v41 = vadd.f32 %v2394_v46, %v574_v1  ;;  %v735_v43 = vadd.f32 %v2396_v56, %v575_v54  ;;  %v2409_v54 = vld [vmem:[#allocation13_spill] sm:$0xff] }
  0xd0   : > { %v736_v53 = vadd.f32 %v2397_v45, %v576_v2  ;;  %v793_v42 = vmax.f32 %v729_v14, 0.0  ;;  %v794_v38 = vmax.f32 %v730_v51, 0.0  ;;  %v795_v29 = vmax.f32 %v731_v61, 0.0  ;;  %v2415_v45 = vld [vmem:[#allocation39_spill] sm:$0xff] }
  0xd1   : > { %v796_v50 = vmax.f32 %v732_v22, 0.0  ;;  %v797_v6 = vmax.f32 %v733_v4, 0.0  ;;  %v798_v28 = vmax.f32 %v734_v41, 0.0  ;;  %v799_v60 = vmax.f32 %v735_v43, 0.0 }
  0xd2   : > { %v800_v21 = vmax.f32 %v736_v53, 0.0  ;;  %v1214_v20 = vpack.c.bf16 %v794_v38, %v793_v42  ;;  %v561_v24 = vadd.f32 %v512_v16, %v1853_v62  ;;  %v562_v36 = vadd.f32 %v512_v16, %v2398_v25  ;;  %v2403_v62 = vld [vmem:[#allocation11_spill] sm:$0xff] }
  0xd3   : > { %v1215_v27 = vpack.c.bf16 %v796_v50, %v795_v29  ;;  %v1216_v31 = vpack.c.bf16 %v798_v28, %v797_v6  ;;  %v563_v48 = vadd.f32 %v512_v16, %v2399_v13  ;;  %v564_v32 = vadd.f32 %v512_v16, %v2400_v30  ;;  %v2416_v29 = vld [vmem:[#allocation40_spill] sm:$0xff]  ;;  %v2417_v28 = vld [vmem:[#allocation41_spill] sm:$0xff] }
  0xd4   : > { %v1217_v17 = vpack.c.bf16 %v800_v21, %v799_v60  ;;  %1029 = vst [vmem:[%s1967_s11 + $0xa0] sm:$0xff] %v1214_v20  ;;  %v565_v18 = vadd.f32 %v512_v16, %v2401_v59  ;;  %v566_v33 = vadd.f32 %v512_v16, %v1873_v58  ;;  %v567_v19 = vadd.f32 %v512_v16, %v2402_v49  ;;  %v2418_v21 = vld [vmem:[#allocation42_spill] sm:$0xff] }
  0xd5   : > { %1030 = vst [vmem:[%s1967_s11 + $0xa8] sm:$0xff] %v1215_v27  ;;  %v568_v10 = vadd.f32 %v512_v16, %v1881_v63  ;;  %1031 = vst [vmem:[%s1967_s11 + $0xb0] sm:$0xff] %v1216_v31  ;;  %v2404_v35 = vunpack.c.l.bf16 %v2403_v62  ;;  %v2405_v37 = vunpack.c.h.bf16 %v2403_v62  ;;  %v2407_v8 = vunpack.c.l.bf16 %v2406_v9  ;;  %v2419_v27 = vld [vmem:[#allocation43_spill] sm:$0xff] }
  0xd6   : > { %1032 = vst [vmem:[%s1967_s11 + $0xb8] sm:$0xff] %v1217_v17  ;;  %v2408_v44 = vunpack.c.h.bf16 %v2406_v9  ;;  %v2410_v58 = vunpack.c.l.bf16 %v2409_v54  ;;  %v2411_v26 = vunpack.c.h.bf16 %v2409_v54  ;;  %v2413_v14 = vunpack.c.l.bf16 %v2412_v7  ;;  %v2423_v17 = vld [vmem:[#allocation16_spill] sm:$0xff] }
  0xd7   : > { %v721_v40 = vadd.f32 %v2404_v35, %v561_v24  ;;  %v722_v0 = vadd.f32 %v2405_v37, %v562_v36  ;;  %v723_v47 = vadd.f32 %v2407_v8, %v563_v48  ;;  %v2414_v51 = vunpack.c.h.bf16 %v2412_v7  ;;  %v522_v37 = vpop.permute.xlu0 %521 }
  0xd8   : > { %v724_v1 = vadd.f32 %v2408_v44, %v564_v32  ;;  %v725_v2 = vadd.f32 %v2410_v58, %v565_v18  ;;  %v726_v63 = vadd.f32 %v2411_v26, %v566_v33  ;;  %v727_v15 = vadd.f32 %v2413_v14, %v567_v19  ;;  %v2426_v32 = vld [vmem:[#allocation17_spill] sm:$0xff]  ;;  %v2429_v19 = vld [vmem:[#allocation18_spill] sm:$0xff] }
  0xd9   : > { %v728_v11 = vadd.f32 %v2414_v51, %v568_v10  ;;  %v785_v61 = vmax.f32 %v721_v40, 0.0  ;;  %v786_v3 = vmax.f32 %v722_v0, 0.0  ;;  %v787_v22 = vmax.f32 %v723_v47, 0.0  ;;  %v2433_v14 = vld [vmem:[#allocation45_spill] sm:$0xff] }
  0xda   : > { %v788_v12 = vmax.f32 %v724_v1, 0.0  ;;  %v789_v34 = vmax.f32 %v725_v2, 0.0  ;;  %v790_v4 = vmax.f32 %v726_v63, 0.0  ;;  %v791_v46 = vmax.f32 %v727_v15, 0.0  ;;  %v2432_v63 = vld [vmem:[#allocation44_spill] sm:$0xff] }
  0xdb   : > { %v792_v41 = vmax.f32 %v728_v11, 0.0  ;;  %v1210_v55 = vpack.c.bf16 %v786_v3, %v785_v61  ;;  %v585_v43 = vadd.f32 %v527_v5, %v1885_v57  ;;  %v586_v53 = vadd.f32 %v527_v5, %v2415_v45  ;;  %v2420_v57 = vld [vmem:[#allocation15_spill] sm:$0xff] }
  0xdc   : > { %v1211_v56 = vpack.c.bf16 %v788_v12, %v787_v22  ;;  %v1212_v16 = vpack.c.bf16 %v790_v4, %v789_v34  ;;  %v587_v38 = vadd.f32 %v527_v5, %v1893_v39  ;;  %v588_v50 = vadd.f32 %v527_v5, %v2416_v29  ;;  %v2435_v3 = vld [vmem:[#allocation47_spill] sm:$0xff]  ;;  %v2436_v12 = vld [vmem:[#allocation48_spill] sm:$0xff]  ;;  %v2437_v4 = vld [vmem:[#allocation49_spill] sm:$0xff] }
  0xdd   : > { %v1213_v42 = vpack.c.bf16 %v792_v41, %v791_v46  ;;  %1025 = vst [vmem:[%s1967_s11 + $0x80] sm:$0xff] %v1210_v55  ;;  %v589_v6 = vadd.f32 %v527_v5, %v1901_v23  ;;  %v590_v60 = vadd.f32 %v527_v5, %v2417_v28  ;;  %v591_v20 = vadd.f32 %v527_v5, %v2418_v21  ;;  %v2438_v41 = vld [vmem:[#allocation50_spill] sm:$0xff] }
  0xde   : > { %1026 = vst [vmem:[%s1967_s11 + $0x88] sm:$0xff] %v1211_v56  ;;  %v592_v24 = vadd.f32 %v527_v5, %v2419_v27  ;;  %1027 = vst [vmem:[%s1967_s11 + $0x90] sm:$0xff] %v1212_v16  ;;  %v2421_v25 = vunpack.c.l.bf16 %v2420_v57  ;;  %v2422_v31 = vunpack.c.h.bf16 %v2420_v57  ;;  %v2424_v13 = vunpack.c.l.bf16 %v2423_v17  ;;  %v2434_v5 = vld [vmem:[#allocation46_spill] sm:$0xff] }
  0xdf   : > { %1028 = vst [vmem:[%s1967_s11 + $0x98] sm:$0xff] %v1213_v42  ;;  %v2425_v30 = vunpack.c.h.bf16 %v2423_v17  ;;  %v2427_v59 = vunpack.c.l.bf16 %v2426_v32  ;;  %v2428_v33 = vunpack.c.h.bf16 %v2426_v32  ;;  %v2430_v10 = vunpack.c.l.bf16 %v2429_v19 }
  0xe0   : > { %v745_v36 = vadd.f32 %v2421_v25, %v585_v43  ;;  %v746_v39 = vadd.f32 %v2422_v31, %v586_v53  ;;  %v747_v48 = vadd.f32 %v2424_v13, %v587_v38  ;;  %v2431_v35 = vunpack.c.h.bf16 %v2429_v19  ;;  %v2439_v43 = vld [vmem:[#allocation19_spill] sm:$0xff]  ;;  %v2442_v38 = vld [vmem:[#allocation20_spill] sm:$0xff] }
  0xe1   : > { %v748_v23 = vadd.f32 %v2425_v30, %v588_v50  ;;  %v749_v18 = vadd.f32 %v2427_v59, %v589_v6  ;;  %v750_v49 = vadd.f32 %v2428_v33, %v590_v60  ;;  %v751_v62 = vadd.f32 %v2430_v10, %v591_v20  ;;  %v2445_v60 = vld [vmem:[#allocation21_spill] sm:$0xff] }
  0xe2   : > { %v752_v40 = vadd.f32 %v2431_v35, %v592_v24  ;;  %v809_v0 = vmax.f32 %v745_v36, 0.0  ;;  %v810_v9 = vmax.f32 %v746_v39, 0.0  ;;  %v811_v8 = vmax.f32 %v747_v48, 0.0  ;;  %v2448_v24 = vld [vmem:[#allocation22_spill] sm:$0xff] }
  0xe3   : > { %v812_v47 = vmax.f32 %v748_v23, 0.0  ;;  %v813_v44 = vmax.f32 %v749_v18, 0.0  ;;  %v814_v1 = vmax.f32 %v750_v49, 0.0  ;;  %v815_v54 = vmax.f32 %v751_v62, 0.0 }
  0xe4   : > { %v816_v58 = vmax.f32 %v752_v40, 0.0  ;;  %v1222_v2 = vpack.c.bf16 %v810_v9, %v809_v0  ;;  %v577_v7 = vadd.f32 %v522_v37, %v2432_v63  ;;  %v578_v15 = vadd.f32 %v522_v37, %v2433_v14 }
  0xe5   : > { %v1223_v26 = vpack.c.bf16 %v812_v47, %v811_v8  ;;  %v1224_v51 = vpack.c.bf16 %v814_v1, %v813_v44  ;;  %v579_v61 = vadd.f32 %v522_v37, %v2434_v5  ;;  %v580_v22 = vadd.f32 %v522_v37, %v2435_v3 }
  0xe6   : > { %v1225_v11 = vpack.c.bf16 %v816_v58, %v815_v54  ;;  %1037 = vst [vmem:[%s1967_s11 + $0xe0] sm:$0xff] %v1222_v2  ;;  %v581_v34 = vadd.f32 %v522_v37, %v2436_v12  ;;  %v582_v46 = vadd.f32 %v522_v37, %v2437_v4  ;;  %v583_v55 = vadd.f32 %v522_v37, %v2438_v41 }
  0xe7   : > { %1038 = vst [vmem:[%s1967_s11 + $0xe8] sm:$0xff] %v1223_v26  ;;  %v584_v56 = vadd.f32 %v522_v37, %v1945_v52  ;;  %1039 = vst [vmem:[%s1967_s11 + $0xf0] sm:$0xff] %v1224_v51  ;;  %v2440_v45 = vunpack.c.l.bf16 %v2439_v43  ;;  %v2441_v16 = vunpack.c.h.bf16 %v2439_v43  ;;  %v2443_v29 = vunpack.c.l.bf16 %v2442_v38 }
  0xe8   : > { %1040 = vst [vmem:[%s1967_s11 + $0xf8] sm:$0xff] %v1225_v11  ;;  %v2444_v6 = vunpack.c.h.bf16 %v2442_v38  ;;  %v2446_v21 = vunpack.c.l.bf16 %v2445_v60  ;;  %v2447_v27 = vunpack.c.h.bf16 %v2445_v60  ;;  %v2449_v57 = vunpack.c.l.bf16 %v2448_v24 }
  0xe9   : > { %v737_v53 = vadd.f32 %v2440_v45, %v577_v7  ;;  %v738_v42 = vadd.f32 %v2441_v16, %v578_v15  ;;  %v739_v50 = vadd.f32 %v2443_v29, %v579_v61  ;;  %v2450_v36 = vunpack.c.h.bf16 %v2448_v24 }
  0xea   : > { %v740_v28 = vadd.f32 %v2444_v6, %v580_v22  ;;  %v741_v20 = vadd.f32 %v2446_v21, %v581_v34  ;;  %v742_v52 = vadd.f32 %v2447_v27, %v582_v46  ;;  %v743_v25 = vadd.f32 %v2449_v57, %v583_v55 }
  0xeb   : > { %v744_v31 = vadd.f32 %v2450_v36, %v584_v56  ;;  %v801_v39 = vmax.f32 %v737_v53, 0.0  ;;  %v802_v17 = vmax.f32 %v738_v42, 0.0  ;;  %v803_v13 = vmax.f32 %v739_v50, 0.0 }
  0xec   : > { %v804_v48 = vmax.f32 %v740_v28, 0.0  ;;  %v805_v30 = vmax.f32 %v741_v20, 0.0  ;;  %v806_v23 = vmax.f32 %v742_v52, 0.0  ;;  %v807_v32 = vmax.f32 %v743_v25, 0.0 }
  0xed   : > { %v808_v59 = vmax.f32 %v744_v31, 0.0  ;;  %v1218_v18 = vpack.c.bf16 %v802_v17, %v801_v39 }
  0xee   : > { %v1219_v33 = vpack.c.bf16 %v804_v48, %v803_v13  ;;  %v1220_v49 = vpack.c.bf16 %v806_v23, %v805_v30 }
  0xef   : > { %v1221_v19 = vpack.c.bf16 %v808_v59, %v807_v32  ;;  %1033 = vst [vmem:[%s1967_s11 + $0xc0] sm:$0xff] %v1218_v18 }
  0xf0   : > { %1034 = vst [vmem:[%s1967_s11 + $0xc8] sm:$0xff] %v1219_v33  ;;  %1035 = vst [vmem:[%s1967_s11 + $0xd0] sm:$0xff] %v1220_v49 }
  0xf1   : > { %1036 = vst [vmem:[%s1967_s11 + $0xd8] sm:$0xff] %v1221_v19 }
  0xf2 PF: > { %s14_s17 = sadd.s32 1, %s1275_s17   ;;  %s2451_s15 = smov %s1271_s16 }
  0xf3   : > { %p11_p5 = scmp.ge.s32.totalorder %s14_s17, 4   ;;  %s2452_s16 = smov %s2454_s18 }
  0xf5   :  { %13 = sbr.rel (!%p11_p5) target bundleno = 2 (0x2), region = 69 }

// kernel: salt_unet_forward.7
= control target key start
LH: loop header
LB: loop body
LE: loop exit
PB: predicated region body
PF: predicated region fallthrough
CT: control target
= control target key end

     0   :  { %s1191_s18 = smov 0   ;;  %s1193_s19 = smov 0   ;;  %s1878_s0 = inlined_call_operand.vmem [shape: bf16[2,128,256], index: 0, kind: input, shape index: {}]   ;;  %s1879_s1 = inlined_call_operand.vmem [shape: bf16[2,128,256], index: 1, kind: input, shape index: {}]   ;;  %s1880_s2 = inlined_call_operand.vmem [shape: f32[128,1], index: 2, kind: input, shape index: {}]   ;;  %s1881_s3 = inlined_call_operand.vmem [shape: f32[128,1], index: 3, kind: input, shape index: {}]   ;;  %s1882_s4 = inlined_call_operand.vmem [shape: f32[128,1], index: 4, kind: input, shape index: {}]   ;;  %s1883_s5 = inlined_call_operand.vmem [shape: bf16[2,128,256], index: 5, kind: output, shape index: {}]  }
   0x1   :  { %s1195_s20 = smov 0  }
   0x2 LB: > { %s27_s21 = sadd.s32 1, %s1154_s19  ;;  %p1065_p0 = scmp.ge.s32.totalorder %s1158_s20, 1  ;;  %s1158_s20 = sphi %s1195_s20, %s15_s20   ;;  %s1154_s19 = sphi %s1193_s19, %s1997_s19   ;;  %s1150_s18 = sphi %s1191_s18, %s1996_s18  }
   0x3   : > { %p29_p1 = scmp.ge.s32.totalorder %s27_s21, 2  ;;  %p225_p2 = scmp.lt.s32.totalorder %s1158_s20, 3 }
   0x5   : > { %s1999_s21 = smov (%p29_p1, %s27_s21), 0  ;;  %p226_p3 = pnand %p1065_p0, %p225_p2 }
   0x7   : > { %229 = sbr.rel (%p226_p3) target bundleno = 247 (0xf7), region = 40 }
   0xc   : > { %v350_v0 = vld [vmem:[%s1880_s2 + $0x10] sm:$0xff]  ;;  %v348_v1 = vld [vmem:[%s1880_s2] sm:$0xff]  ;;  %v1160_v2 = vmov 0   ;;  %v351_v3 = vld [vmem:[%s1880_s2 + $0x18] sm:$0xff]  ;;  %p271_p4 = scmp.lt.s32.totalorder %s1150_s18, 1 }
   0xd   : > { %1135 = vset.pattern.permute.xlu1 %v1160_v2  ;;  %1134 = vset.pattern.permute.xlu0 %v1160_v2  ;;  %v349_v4 = vld [vmem:[%s1880_s2 + $0x8] sm:$0xff]  ;;  %v352_v6 = vld [vmem:[%s1880_s2 + $0x20] sm:$0xff]  ;;  %v355_v7 = vld [vmem:[%s1880_s2 + $0x38] sm:$0xff] }
   0xe   : > { %376 = vperm.xlu1 %1135, %v350_v0   ;;  %366 = vperm.xlu0 %1134, %v348_v1   ;;  %v353_v5 = vld [vmem:[%s1880_s2 + $0x28] sm:$0xff]  ;;  %v354_v8 = vld [vmem:[%s1880_s2 + $0x30] sm:$0xff]  ;;  %v356_v10 = vld [vmem:[%s1880_s2 + $0x40] sm:$0xff]  ;;  %s2001_s18 = smov (!%p271_p4, %s1150_s18), 1 }
   0xf   : > { %v357_v9 = vld [vmem:[%s1880_s2 + $0x48] sm:$0xff]  ;;  %v359_v11 = vld [vmem:[%s1880_s2 + $0x58] sm:$0xff]  ;;  %v358_v12 = vld [vmem:[%s1880_s2 + $0x50] sm:$0xff]  ;;  %s1385_s9 = sshll.u32 %s2001_s18, 7 }
  0x10   : > { %v361_v13 = vld [vmem:[%s1880_s2 + $0x68] sm:$0xff]  ;;  %v360_v14 = vld [vmem:[%s1880_s2 + $0x60] sm:$0xff]  ;;  %v363_v15 = vld [vmem:[%s1880_s2 + $0x78] sm:$0xff]  ;;  %s1395_s12 = scalar_lea.vmem %s1878_s0, %s1385_s9  ;;  %s1452_s14 = scalar_lea.vmem %s1879_s1, %s1385_s9 }
  0x11   : > { %v362_v16 = vld [vmem:[%s1880_s2 + $0x70] sm:$0xff]  ;;  %v525_v17 = vld [vmem:[%s1881_s3 + $0x8] sm:$0xff]  ;;  %v524_v18 = vld [vmem:[%s1881_s3] sm:$0xff]  ;;  %s1783_s17 = scalar_lea.vmem %s1883_s5, %s1385_s9 }
  0x12   : > { %381 = vperm.xlu1 %1135, %v351_v3   ;;  %371 = vperm.xlu0 %1134, %v349_v4   ;;  %v527_v19 = vld [vmem:[%s1881_s3 + $0x18] sm:$0xff]  ;;  %v526_v20 = vld [vmem:[%s1881_s3 + $0x10] sm:$0xff]  ;;  %v529_v21 = vld [vmem:[%s1881_s3 + $0x28] sm:$0xff] }
  0x13   : > { %v528_v22 = vld [vmem:[%s1881_s3 + $0x20] sm:$0xff]  ;;  %v531_v23 = vld [vmem:[%s1881_s3 + $0x38] sm:$0xff]  ;;  %v530_v24 = vld [vmem:[%s1881_s3 + $0x30] sm:$0xff] }
  0x14   : > { %v533_v25 = vld [vmem:[%s1881_s3 + $0x48] sm:$0xff]  ;;  %v532_v26 = vld [vmem:[%s1881_s3 + $0x40] sm:$0xff]  ;;  %v535_v27 = vld [vmem:[%s1881_s3 + $0x58] sm:$0xff] }
  0x15   : > { %v534_v28 = vld [vmem:[%s1881_s3 + $0x50] sm:$0xff]  ;;  %v537_v29 = vld [vmem:[%s1881_s3 + $0x68] sm:$0xff]  ;;  %v536_v30 = vld [vmem:[%s1881_s3 + $0x60] sm:$0xff] }
  0x16   : > { %391 = vperm.xlu1 %1135, %v353_v5   ;;  %386 = vperm.xlu0 %1134, %v352_v6   ;;  %v539_v31 = vld [vmem:[%s1881_s3 + $0x78] sm:$0xff]  ;;  %v538_v32 = vld [vmem:[%s1881_s3 + $0x70] sm:$0xff]  ;;  %v685_v33 = vld [vmem:[%s1882_s4 + $0x8] sm:$0xff] }
  0x17   : > { %v684_v34 = vld [vmem:[%s1882_s4] sm:$0xff]  ;;  %v687_v35 = vld [vmem:[%s1882_s4 + $0x18] sm:$0xff]  ;;  %v686_v36 = vld [vmem:[%s1882_s4 + $0x10] sm:$0xff] }
  0x18   : > { %v689_v37 = vld [vmem:[%s1882_s4 + $0x28] sm:$0xff]  ;;  %v688_v38 = vld [vmem:[%s1882_s4 + $0x20] sm:$0xff]  ;;  %v691_v39 = vld [vmem:[%s1882_s4 + $0x38] sm:$0xff] }
  0x19   : > { %v690_v40 = vld [vmem:[%s1882_s4 + $0x30] sm:$0xff]  ;;  %v693_v41 = vld [vmem:[%s1882_s4 + $0x48] sm:$0xff]  ;;  %v692_v42 = vld [vmem:[%s1882_s4 + $0x40] sm:$0xff] }
  0x1a   : > { %401 = vperm.xlu1 %1135, %v355_v7   ;;  %396 = vperm.xlu0 %1134, %v354_v8   ;;  %v695_v43 = vld [vmem:[%s1882_s4 + $0x58] sm:$0xff]  ;;  %v694_v44 = vld [vmem:[%s1882_s4 + $0x50] sm:$0xff]  ;;  %v697_v45 = vld [vmem:[%s1882_s4 + $0x68] sm:$0xff] }
  0x1b   : > { %v696_v46 = vld [vmem:[%s1882_s4 + $0x60] sm:$0xff]  ;;  %v699_v47 = vld [vmem:[%s1882_s4 + $0x78] sm:$0xff]  ;;  %v698_v48 = vld [vmem:[%s1882_s4 + $0x70] sm:$0xff] }
  0x1c   : > { %v1398_v1 = vld [vmem:[%s1395_s12 + $0x10] sm:$0xff]  ;;  %v1405_v4 = vld [vmem:[%s1395_s12] sm:$0xff]  ;;  %v1408_v5 = vld [vmem:[%s1395_s12 + $0x18] sm:$0xff] }
  0x1d   : > { %v1411_v6 = vld [vmem:[%s1395_s12 + $0x8] sm:$0xff]  ;;  %v1571_v8 = vld [vmem:[%s1452_s14 + $0x70] sm:$0xff] }
  0x1e   : > { %411 = vperm.xlu1 %1135, %v357_v9   ;;  %406 = vperm.xlu0 %1134, %v356_v10   ;;  %v1414_v7 = vld [vmem:[%s1395_s12 + $0x28] sm:$0xff]  ;;  %v1419_v10 = vld [vmem:[%s1395_s12 + $0x20] sm:$0xff]  ;;  %1907 = vst [vmem:[#allocation9_spill] sm:$0xff] %v1571_v8  ;;  %v1911_v9 = vunpack.c.h.bf16 %v1405_v4 }
  0x22   : > { %421 = vperm.xlu1 %1135, %v359_v11   ;;  %416 = vperm.xlu0 %1134, %v358_v12   ;;  %v1422_v11 = vld [vmem:[%s1395_s12 + $0x38] sm:$0xff] }
  0x26   : > { %431 = vperm.xlu1 %1135, %v361_v13   ;;  %426 = vperm.xlu0 %1134, %v360_v14   ;;  %v1909_v13 = vunpack.c.h.bf16 %v1398_v1 }
  0x2a   : > { %441 = vperm.xlu1 %1135, %v363_v15   ;;  %436 = vperm.xlu0 %1134, %v362_v16   ;;  %v1429_v16 = vld [vmem:[%s1395_s12 + $0x30] sm:$0xff] }
  0x2b   : > { %v1547_v15 = vld [vmem:[%s1452_s14 + $0x50] sm:$0xff] }
  0x2e   : > { %547 = vperm.xlu1 %1135, %v525_v17   ;;  %542 = vperm.xlu0 %1134, %v524_v18   ;;  %v1432_v17 = vld [vmem:[%s1395_s12 + $0x48] sm:$0xff] }
  0x32   : > { %557 = vperm.xlu1 %1135, %v527_v19   ;;  %552 = vperm.xlu0 %1134, %v526_v20  }
  0x36   : > { %567 = vperm.xlu1 %1135, %v529_v21   ;;  %562 = vperm.xlu0 %1134, %v528_v22   ;;  %v1557_v22 = vld [vmem:[%s1452_s14 + $0x60] sm:$0xff]  ;;  %v1560_v21 = vld [vmem:[%s1452_s14 + $0x78] sm:$0xff] }
  0x37   : > { %1903 = vst [vmem:[#allocation5_spill] sm:$0xff] %v1557_v22  ;;  %1904 = vst [vmem:[#allocation6_spill] sm:$0xff] %v1560_v21  ;;  %v1912_v21 = vunpack.c.l.bf16 %v1408_v5  ;;  %v1919_v22 = vunpack.c.h.bf16 %v1419_v10 }
  0x3a   : > { %577 = vperm.xlu1 %1135, %v531_v23   ;;  %572 = vperm.xlu0 %1134, %v530_v24   ;;  %v1443_v24 = vld [vmem:[%s1395_s12 + $0x40] sm:$0xff]  ;;  %v1540_v23 = vld [vmem:[%s1452_s14 + $0x58] sm:$0xff] }
  0x3b   : > { %1902 = vst [vmem:[#allocation4_spill] sm:$0xff] %v1540_v23 }
  0x3e   : > { %587 = vperm.xlu1 %1135, %v533_v25   ;;  %582 = vperm.xlu0 %1134, %v532_v26   ;;  %v1446_v25 = vld [vmem:[%s1395_s12 + $0x58] sm:$0xff] }
  0x42   : > { %597 = vperm.xlu1 %1135, %v535_v27   ;;  %592 = vperm.xlu0 %1134, %v534_v28   ;;  %v1530_v27 = vld [vmem:[%s1452_s14 + $0x48] sm:$0xff] }
  0x43   : > { %1901 = vst [vmem:[#allocation3_spill] sm:$0xff] %v1530_v27 }
  0x46   : > { %607 = vperm.xlu1 %1135, %v537_v29   ;;  %602 = vperm.xlu0 %1134, %v536_v30   ;;  %v1459_v30 = vld [vmem:[%s1395_s12 + $0x50] sm:$0xff]  ;;  %v1908_v29 = vunpack.c.l.bf16 %v1398_v1  ;;  %v1913_v1 = vunpack.c.h.bf16 %v1408_v5  ;;  %v1917_v5 = vunpack.c.h.bf16 %v1414_v7 }
  0x4a   : > { %617 = vperm.xlu1 %1135, %v539_v31   ;;  %612 = vperm.xlu0 %1134, %v538_v32   ;;  %v1462_v31 = vld [vmem:[%s1395_s12 + $0x68] sm:$0xff] }
  0x4e   : > { %707 = vperm.xlu1 %1135, %v685_v33   ;;  %702 = vperm.xlu0 %1134, %v684_v34   ;;  %v1506_v33 = vld [vmem:[%s1452_s14 + $0x28] sm:$0xff]  ;;  %v1516_v34 = vld [vmem:[%s1452_s14 + $0x38] sm:$0xff] }
  0x52   : > { %717 = vperm.xlu1 %1135, %v687_v35   ;;  %712 = vperm.xlu0 %1134, %v686_v36   ;;  %v1469_v36 = vld [vmem:[%s1395_s12 + $0x60] sm:$0xff] }
  0x53   : > { %v1513_v35 = vld [vmem:[%s1452_s14 + $0x20] sm:$0xff] }
  0x56   : > { %727 = vperm.xlu1 %1135, %v689_v37   ;;  %722 = vperm.xlu0 %1134, %v688_v38   ;;  %v1472_v37 = vld [vmem:[%s1395_s12 + $0x78] sm:$0xff]  ;;  %v1527_v38 = vld [vmem:[%s1452_s14 + $0x30] sm:$0xff] }
  0x5a   : > { %737 = vperm.xlu1 %1135, %v691_v39   ;;  %732 = vperm.xlu0 %1134, %v690_v40   ;;  %v1496_v39 = vld [vmem:[%s1452_s14 + $0x18] sm:$0xff]  ;;  %v1537_v40 = vld [vmem:[%s1452_s14 + $0x40] sm:$0xff] }
  0x5e   : > { %747 = vperm.xlu1 %1135, %v693_v41   ;;  %742 = vperm.xlu0 %1134, %v692_v42   ;;  %v1479_v42 = vld [vmem:[%s1395_s12 + $0x70] sm:$0xff]  ;;  %v1493_v41 = vld [vmem:[%s1452_s14] sm:$0xff] }
  0x5f   : > { %1900 = vst [vmem:[#allocation2_spill] sm:$0xff] %v1479_v42 }
  0x62   : > { %757 = vperm.xlu1 %1135, %v695_v43   ;;  %752 = vperm.xlu0 %1134, %v694_v44   ;;  %v1482_v43 = vld [vmem:[%s1452_s14 + $0x8] sm:$0xff] }
  0x66   : > { %767 = vperm.xlu1 %1135, %v697_v45   ;;  %762 = vperm.xlu0 %1134, %v696_v46   ;;  %v1550_v46 = vld [vmem:[%s1452_s14 + $0x68] sm:$0xff] }
  0x6a   : > { %777 = vperm.xlu1 %1135, %v699_v47   ;;  %772 = vperm.xlu0 %1134, %v698_v48   ;;  %v1503_v47 = vld [vmem:[%s1452_s14 + $0x10] sm:$0xff] }
  0x89   : > { %v1355_v49 = vpop.permute.xlu1 %376  ;;  %v1357_v50 = vpop.permute.xlu0 %366 }
  0x8a   : > { %v448_v23 = vmul.f32 %v1355_v49, %v1908_v29  ;;  %v449_v14 = vmul.f32 %v1355_v49, %v1909_v13  ;;  %v445_v28 = vmul.f32 %v1357_v50, %v1911_v9  ;;  %v1916_v9 = vunpack.c.l.bf16 %v1414_v7 }
  0x8d   : > { %v1359_v51 = vpop.permute.xlu1 %381  ;;  %v1361_v52 = vpop.permute.xlu0 %371 }
  0x8e   : > { %v450_v29 = vmul.f32 %v1359_v51, %v1912_v21  ;;  %v451_v49 = vmul.f32 %v1359_v51, %v1913_v1  ;;  %v1918_v1 = vunpack.c.l.bf16 %v1419_v10  ;;  %v1923_v10 = vunpack.c.h.bf16 %v1429_v16 }
  0x91   : > { %v1363_v53 = vpop.permute.xlu1 %391  ;;  %v1365_v54 = vpop.permute.xlu0 %386 }
  0x92   : > { %v454_v21 = vmul.f32 %v1363_v53, %v1916_v9  ;;  %v455_v51 = vmul.f32 %v1363_v53, %v1917_v5  ;;  %v452_v8 = vmul.f32 %v1365_v54, %v1918_v1  ;;  %v1922_v53 = vunpack.c.l.bf16 %v1429_v16 }
  0x93   : > { %v1926_v1 = vunpack.c.l.bf16 %v1443_v24  ;;  %v1927_v16 = vunpack.c.h.bf16 %v1443_v24 }
  0x95   : > { %v1367_v55 = vpop.permute.xlu1 %401  ;;  %v1369_v56 = vpop.permute.xlu0 %396 }
  0x96   : > { %v1638_v9 = vmul.f32 %v1369_v56, %v1922_v53 }
  0x99   : > { %v1371_v57 = vpop.permute.xlu1 %411  ;;  %v1373_v58 = vpop.permute.xlu0 %406 }
  0x9d   : > { %v1376_v59 = vpop.permute.xlu1 %421  ;;  %v1378_v60 = vpop.permute.xlu0 %416 }
  0xa1   : > { %v1381_v61 = vpop.permute.xlu1 %431  ;;  %v1383_v62 = vpop.permute.xlu0 %426 }
  0xa5   : > { %v1387_v63 = vpop.permute.xlu1 %441  ;;  %v1389_v0 = vpop.permute.xlu0 %436 }
  0xa9   : > { %v1400_v2 = vpop.permute.xlu1 %547  ;;  %v1402_v3 = vpop.permute.xlu0 %542 }
  0xad   : > { %v1434_v18 = vpop.permute.xlu1 %557  ;;  %v1436_v19 = vpop.permute.xlu0 %552 }
  0xb1   : > { %v1484_v44 = vpop.permute.xlu1 %567  ;;  %v1486_v45 = vpop.permute.xlu0 %562 }
  0xb5   : > { %v1522_v48 = vpop.permute.xlu1 %577  ;;  %v1524_v32 = vpop.permute.xlu0 %572 }
  0xb9   : > { %v1562_v20 = vpop.permute.xlu1 %587  ;;  %v1564_v12 = vpop.permute.xlu0 %582 }
  0xba   : > { %1905 = vst [vmem:[#allocation7_spill] sm:$0xff] %v1562_v20  ;;  %1906 = vst [vmem:[#allocation8_spill] sm:$0xff] %v1564_v12  ;;  %v1910_v12 = vunpack.c.l.bf16 %v1405_v4  ;;  %v1914_v20 = vunpack.c.l.bf16 %v1411_v6  ;;  %v1915_v4 = vunpack.c.h.bf16 %v1411_v6  ;;  %v1920_v6 = vunpack.c.l.bf16 %v1422_v11 }
  0xbc   : > { %v444_v26 = vmul.f32 %v1357_v50, %v1910_v12  ;;  %v446_v12 = vmul.f32 %v1361_v52, %v1914_v20  ;;  %v447_v50 = vmul.f32 %v1361_v52, %v1915_v4  ;;  %v1623_v20 = vmul.f32 %v1365_v54, %v1919_v22 }
  0xbd   : > { %v1601_v13 = vpop.permute.xlu1 %597  ;;  %v1603_v27 = vpop.permute.xlu0 %592  ;;  %v1628_v52 = vmul.f32 %v1367_v55, %v1920_v6  ;;  %v1921_v4 = vunpack.c.h.bf16 %v1422_v11  ;;  %v1643_v54 = vmul.f32 %v1369_v56, %v1923_v10  ;;  %v1924_v22 = vunpack.c.l.bf16 %v1432_v17 }
  0xbe   : > { %v1925_v11 = vunpack.c.h.bf16 %v1432_v17  ;;  %v1658_v6 = vmul.f32 %v1373_v58, %v1926_v1  ;;  %v1663_v56 = vmul.f32 %v1373_v58, %v1927_v16  ;;  %v1929_v17 = vunpack.c.h.bf16 %v1446_v25 }
  0xbf   : > { %v1633_v7 = vmul.f32 %v1367_v55, %v1921_v4  ;;  %v1648_v5 = vmul.f32 %v1371_v57, %v1924_v22  ;;  %v1928_v4 = vunpack.c.l.bf16 %v1446_v25  ;;  %v1932_v58 = vunpack.c.h.bf16 %v1459_v30 }
  0xc0   : > { %v1653_v55 = vmul.f32 %v1371_v57, %v1925_v11  ;;  %v1673_v57 = vmul.f32 %v1376_v59, %v1929_v17  ;;  %v1931_v11 = vunpack.c.l.bf16 %v1459_v30  ;;  %v1933_v16 = vunpack.c.l.bf16 %v1482_v43 }
  0xc1   : > { %v1668_v53 = vmul.f32 %v1376_v59, %v1928_v4  ;;  %v1675_v10 = vpop.permute.xlu1 %607  ;;  %v1677_v22 = vpop.permute.xlu0 %602  ;;  %v1687_v1 = vmul.f32 %v1378_v60, %v1932_v58  ;;  %v1934_v59 = vunpack.c.h.bf16 %v1482_v43  ;;  %v1935_v17 = vunpack.c.l.bf16 %v1462_v31 }
  0xc2   : > { %1930 = vst [vmem:[#allocation10_spill] sm:$0xff] %v1677_v22  ;;  %v1682_v24 = vmul.f32 %v1378_v60, %v1931_v11  ;;  %v622_v25 = vmul.f32 %v1400_v2, %v1933_v16  ;;  %v1937_v11 = vunpack.c.h.bf16 %v1462_v31  ;;  %v1938_v60 = vunpack.c.l.bf16 %v1493_v41 }
  0xc3   : > { %v623_v4 = vmul.f32 %v1400_v2, %v1934_v59  ;;  %v1698_v22 = vmul.f32 %v1381_v61, %v1935_v17  ;;  %v1939_v16 = vunpack.c.h.bf16 %v1493_v41  ;;  %v1940_v2 = vunpack.c.l.bf16 %v1496_v39 }
  0xc4   : > { %v1703_v30 = vmul.f32 %v1381_v61, %v1937_v11  ;;  %v620_v58 = vmul.f32 %v1402_v3, %v1938_v60  ;;  %v1941_v17 = vunpack.c.h.bf16 %v1496_v39  ;;  %v1942_v31 = vunpack.c.l.bf16 %v1503_v47 }
  0xc5   : > { %1936 = vst [vmem:[#allocation11_spill] sm:$0xff] %v1698_v22  ;;  %v621_v43 = vmul.f32 %v1402_v3, %v1939_v16  ;;  %v626_v59 = vmul.f32 %v1434_v18, %v1940_v2  ;;  %v1943_v11 = vunpack.c.h.bf16 %v1503_v47  ;;  %v1944_v41 = vunpack.c.l.bf16 %v1469_v36 }
  0xc6   : > { %v627_v22 = vmul.f32 %v1434_v18, %v1941_v17  ;;  %v624_v61 = vmul.f32 %v1436_v19, %v1942_v31  ;;  %v1946_v16 = vunpack.c.h.bf16 %v1469_v36  ;;  %v1948_v18 = vunpack.c.l.bf16 %v1472_v37  ;;  %v1743_v31 = vpop.permute.xlu0 %612 }
  0xc7   : > { %v625_v60 = vmul.f32 %v1436_v19, %v1943_v11  ;;  %v1726_v3 = vmul.f32 %v1383_v62, %v1944_v41  ;;  %v1950_v17 = vunpack.c.l.bf16 %v1506_v33  ;;  %v1741_v19 = vpop.permute.xlu1 %617  ;;  %1952 = vst [vmem:[#allocation16_spill] sm:$0xff] %v1743_v31  ;;  %v1953_v11 = vunpack.c.h.bf16 %v1472_v37 }
  0xc8   : > { %v1731_v2 = vmul.f32 %v1383_v62, %v1946_v16  ;;  %v1736_v39 = vmul.f32 %v1387_v63, %v1948_v18  ;;  %1951 = vst [vmem:[#allocation15_spill] sm:$0xff] %v1741_v19  ;;  %v1955_v62 = vunpack.c.l.bf16 %v1479_v42  ;;  %v654_v16 = vadd.f32 %v622_v25, %v446_v12 }
  0xc9   : > { %1945 = vst [vmem:[#allocation12_spill] sm:$0xff] %v1726_v3  ;;  %v630_v47 = vmul.f32 %v1484_v44, %v1950_v17  ;;  %v1748_v36 = vmul.f32 %v1387_v63, %v1953_v11  ;;  %v655_v18 = vadd.f32 %v623_v4, %v447_v50  ;;  %v652_v19 = vadd.f32 %v620_v58, %v444_v26 }
  0xca   : > { %1947 = vst [vmem:[#allocation13_spill] sm:$0xff] %v1731_v2  ;;  %1949 = vst [vmem:[#allocation14_spill] sm:$0xff] %v1736_v39  ;;  %v1753_v41 = vmul.f32 %v1389_v0, %v1955_v62  ;;  %v1956_v39 = vunpack.c.h.bf16 %v1506_v33  ;;  %v1957_v2 = vunpack.c.l.bf16 %v1513_v35  ;;  %v653_v37 = vadd.f32 %v621_v43, %v445_v28  ;;  %v703_v26 = vpop.permute.xlu0 %702 }
  0xcb   : > { %1954 = vst [vmem:[#allocation17_spill] sm:$0xff] %v1748_v36  ;;  %v658_v3 = vadd.f32 %v626_v59, %v450_v29  ;;  %v659_v63 = vadd.f32 %v627_v22, %v451_v49  ;;  %v656_v11 = vadd.f32 %v624_v61, %v448_v23  ;;  %v657_v36 = vadd.f32 %v625_v60, %v449_v14  ;;  %v708_v25 = vpop.permute.xlu1 %707  ;;  %v1963_v61 = vld [vmem:[#allocation3_spill] sm:$0xff] }
  0xcc   : > { %v631_v17 = vmul.f32 %v1484_v44, %v1956_v39  ;;  %v628_v31 = vmul.f32 %v1486_v45, %v1957_v2  ;;  %v1958_v42 = vunpack.c.h.bf16 %v1513_v35  ;;  %v1959_v12 = vunpack.c.l.bf16 %v1516_v34  ;;  %v1965_v60 = vld [vmem:[#allocation7_spill] sm:$0xff] }
  0xcd   : > { %v1960_v44 = vunpack.c.h.bf16 %v1516_v34  ;;  %v662_v28 = vadd.f32 %v630_v47, %v454_v21  ;;  %v782_v29 = vadd.f32 %v708_v25, %v654_v16  ;;  %v783_v49 = vadd.f32 %v708_v25, %v655_v18 }
  0xce   : > { %v629_v62 = vmul.f32 %v1486_v45, %v1958_v42  ;;  %v634_v33 = vmul.f32 %v1522_v48, %v1959_v12  ;;  %v780_v23 = vadd.f32 %v703_v26, %v652_v19  ;;  %v781_v14 = vadd.f32 %v703_v26, %v653_v37  ;;  %v713_v39 = vpop.permute.xlu0 %712  ;;  %v1968_v26 = vld [vmem:[#allocation8_spill] sm:$0xff] }
  0xcf   : > { %v635_v50 = vmul.f32 %v1522_v48, %v1960_v44  ;;  %v1961_v35 = vunpack.c.l.bf16 %v1527_v38  ;;  %v1962_v45 = vunpack.c.h.bf16 %v1527_v38  ;;  %v663_v4 = vadd.f32 %v631_v17, %v455_v51  ;;  %v718_v38 = vpop.permute.xlu1 %717 }
  0xd0   : > { %v660_v34 = vadd.f32 %v628_v31, %v452_v8  ;;  %v814_v58 = vmax.f32 %v782_v29, 0.0  ;;  %v815_v48 = vmax.f32 %v783_v49, 0.0  ;;  %v812_v43 = vmax.f32 %v780_v23, 0.0 }
  0xd1   : > { %v632_v42 = vmul.f32 %v1524_v32, %v1961_v35  ;;  %v633_v22 = vmul.f32 %v1524_v32, %v1962_v45  ;;  %v813_v59 = vmax.f32 %v781_v14, 0.0  ;;  %v1964_v21 = vunpack.c.l.bf16 %v1963_v61  ;;  %v1970_v35 = vld [vmem:[#allocation4_spill] sm:$0xff] }
  0xd2   : > { %v661_v32 = vadd.f32 %v629_v62, %v1623_v20  ;;  %v666_v8 = vadd.f32 %v634_v33, %v1628_v52  ;;  %v667_v51 = vadd.f32 %v635_v50, %v1633_v7  ;;  %v1094_v47 = vpack.c.bf16 %v815_v48, %v814_v58  ;;  %v723_v50 = vpop.permute.xlu0 %722 }
  0xd3   : > { %v638_v2 = vmul.f32 %v1965_v60, %v1964_v21  ;;  %v1093_v19 = vpack.c.bf16 %v813_v59, %v812_v43  ;;  %v786_v31 = vadd.f32 %v718_v38, %v658_v3  ;;  %v787_v16 = vadd.f32 %v718_v38, %v659_v63 }
  0xd4   : > { %v1966_v18 = vunpack.c.h.bf16 %v1963_v61  ;;  %v784_v37 = vadd.f32 %v713_v39, %v656_v11  ;;  %v785_v12 = vadd.f32 %v713_v39, %v657_v36  ;;  %v664_v44 = vadd.f32 %v632_v42, %v1638_v9  ;;  %941 = vst [vmem:[%s1783_s17 + $0x8] sm:$0xff] %v1094_v47  ;;  %v728_v36 = vpop.permute.xlu1 %727 }
  0xd5   : > { %v1967_v25 = vunpack.c.l.bf16 %v1537_v40  ;;  %940 = vst [vmem:[%s1783_s17] sm:$0xff] %v1093_v19  ;;  %v818_v52 = vmax.f32 %v786_v31, 0.0  ;;  %v819_v7 = vmax.f32 %v787_v16, 0.0  ;;  %v665_v62 = vadd.f32 %v633_v22, %v1643_v54 }
  0xd6   : > { %v639_v17 = vmul.f32 %v1965_v60, %v1966_v18  ;;  %v1969_v3 = vunpack.c.h.bf16 %v1537_v40  ;;  %v816_v33 = vmax.f32 %v784_v37, 0.0  ;;  %v817_v11 = vmax.f32 %v785_v12, 0.0  ;;  %v733_v21 = vpop.permute.xlu0 %732 }
  0xd7   : > { %v636_v20 = vmul.f32 %v1968_v26, %v1967_v25  ;;  %v670_v9 = vadd.f32 %v638_v2, %v1648_v5  ;;  %v1096_v29 = vpack.c.bf16 %v819_v7, %v818_v52  ;;  %v790_v49 = vadd.f32 %v728_v36, %v662_v28 }
  0xd8   : > { %v637_v63 = vmul.f32 %v1968_v26, %v1969_v3  ;;  %v791_v23 = vadd.f32 %v728_v36, %v663_v4  ;;  %v788_v14 = vadd.f32 %v723_v50, %v660_v34  ;;  %v1971_v42 = vunpack.c.l.bf16 %v1970_v35  ;;  %v738_v61 = vpop.permute.xlu1 %737 }
  0xd9   : > { %v1095_v45 = vpack.c.bf16 %v817_v11, %v816_v33  ;;  %v789_v40 = vadd.f32 %v723_v50, %v661_v32  ;;  %v671_v22 = vadd.f32 %v639_v17, %v1653_v55  ;;  %v1972_v58 = vunpack.c.h.bf16 %v1970_v35  ;;  %943 = vst [vmem:[%s1783_s17 + $0x18] sm:$0xff] %v1096_v29 }
  0xda   : > { %v642_v54 = vmul.f32 %v1601_v13, %v1971_v42  ;;  %v822_v43 = vmax.f32 %v790_v49, 0.0  ;;  %v823_v59 = vmax.f32 %v791_v23, 0.0  ;;  %v820_v5 = vmax.f32 %v788_v14, 0.0  ;;  %v1981_v14 = vld [vmem:[#allocation11_spill] sm:$0xff] }
  0xdb   : > { %v643_v48 = vmul.f32 %v1601_v13, %v1972_v58  ;;  %v1973_v28 = vunpack.c.l.bf16 %v1547_v15  ;;  %942 = vst [vmem:[%s1783_s17 + $0x10] sm:$0xff] %v1095_v45  ;;  %v821_v34 = vmax.f32 %v789_v40, 0.0  ;;  %v668_v60 = vadd.f32 %v636_v20, %v1658_v6  ;;  %v743_v20 = vpop.permute.xlu0 %742  ;;  %v1983_v58 = vld [vmem:[#allocation6_spill] sm:$0xff] }
  0xdc   : > { %v669_v55 = vadd.f32 %v637_v63, %v1663_v56  ;;  %v1098_v2 = vpack.c.bf16 %v823_v59, %v822_v43  ;;  %v794_v13 = vadd.f32 %v738_v61, %v666_v8  ;;  %v795_v38 = vadd.f32 %v738_v61, %v667_v51  ;;  %v748_v26 = vpop.permute.xlu1 %747  ;;  %v1985_v43 = vld [vmem:[#allocation15_spill] sm:$0xff]  ;;  %v1987_v61 = vld [vmem:[#allocation9_spill] sm:$0xff] }
  0xdd   : > { %v640_v4 = vmul.f32 %v1603_v27, %v1973_v28  ;;  %v792_v39 = vadd.f32 %v733_v21, %v664_v44  ;;  %v1974_v32 = vunpack.c.h.bf16 %v1547_v15  ;;  %v1097_v19 = vpack.c.bf16 %v821_v34, %v820_v5  ;;  %v1979_v44 = vld [vmem:[#allocation10_spill] sm:$0xff] }
  0xde   : > { %v793_v31 = vadd.f32 %v733_v21, %v665_v62  ;;  %v674_v16 = vadd.f32 %v642_v54, %v1668_v53  ;;  %945 = vst [vmem:[%s1783_s17 + $0x28] sm:$0xff] %v1098_v2  ;;  %v826_v18 = vmax.f32 %v794_v13, 0.0  ;;  %v827_v17 = vmax.f32 %v795_v38, 0.0  ;;  %v1990_v38 = vld [vmem:[#allocation2_spill] sm:$0xff] }
  0xdf   : > { %v641_v47 = vmul.f32 %v1603_v27, %v1974_v32  ;;  %v824_v37 = vmax.f32 %v792_v39, 0.0  ;;  %v675_v6 = vadd.f32 %v643_v48, %v1673_v57  ;;  %v1975_v56 = vunpack.c.l.bf16 %v1550_v46  ;;  %v1977_v27 = vld [vmem:[#allocation5_spill] sm:$0xff]  ;;  %944 = vst [vmem:[%s1783_s17 + $0x20] sm:$0xff] %v1097_v19  ;;  %v753_v23 = vpop.permute.xlu0 %752 }
  0xe0   : > { %v1976_v51 = vunpack.c.h.bf16 %v1550_v46  ;;  %v1978_v12 = vunpack.c.l.bf16 %v1977_v27  ;;  %v825_v53 = vmax.f32 %v793_v31, 0.0  ;;  %v1100_v52 = vpack.c.bf16 %v827_v17, %v826_v18  ;;  %v1993_v17 = vld [vmem:[#allocation13_spill] sm:$0xff] }
  0xe1   : > { %v646_v8 = vmul.f32 %v1675_v10, %v1975_v56  ;;  %v798_v57 = vadd.f32 %v748_v26, %v670_v9  ;;  %v799_v7 = vadd.f32 %v748_v26, %v671_v22  ;;  %v796_v62 = vadd.f32 %v743_v20, %v668_v60  ;;  %v758_v9 = vpop.permute.xlu1 %757 }
  0xe2   : > { %v647_v15 = vmul.f32 %v1675_v10, %v1976_v51  ;;  %v644_v25 = vmul.f32 %v1979_v44, %v1978_v12  ;;  %v1099_v3 = vpack.c.bf16 %v825_v53, %v824_v37  ;;  %v797_v63 = vadd.f32 %v743_v20, %v669_v55  ;;  %947 = vst [vmem:[%s1783_s17 + $0x38] sm:$0xff] %v1100_v52  ;;  %v1994_v12 = vld [vmem:[#allocation14_spill] sm:$0xff] }
  0xe3   : > { %v672_v46 = vadd.f32 %v640_v4, %v1682_v24  ;;  %v673_v33 = vadd.f32 %v641_v47, %v1687_v1  ;;  %v1980_v10 = vunpack.c.h.bf16 %v1977_v27  ;;  %v830_v36 = vmax.f32 %v798_v57, 0.0  ;;  %v1982_v24 = vld [vmem:[#allocation12_spill] sm:$0xff]  ;;  %v763_v18 = vpop.permute.xlu0 %762 }
  0xe4   : > { %v831_v50 = vmax.f32 %v799_v7, 0.0  ;;  %v828_v29 = vmax.f32 %v796_v62, 0.0  ;;  %946 = vst [vmem:[%s1783_s17 + $0x30] sm:$0xff] %v1099_v3  ;;  %v829_v49 = vmax.f32 %v797_v63, 0.0  ;;  %v678_v35 = vadd.f32 %v646_v8, %v1981_v14 }
  0xe5   : > { %v645_v11 = vmul.f32 %v1979_v44, %v1980_v10  ;;  %v679_v42 = vadd.f32 %v647_v15, %v1703_v30  ;;  %v676_v54 = vadd.f32 %v644_v25, %v1982_v24  ;;  %v802_v45 = vadd.f32 %v758_v9, %v674_v16  ;;  %v1989_v30 = vld [vmem:[#allocation16_spill] sm:$0xff]  ;;  %v768_v16 = vpop.permute.xlu1 %767 }
  0xe6   : > { %v1102_v1 = vpack.c.bf16 %v831_v50, %v830_v36  ;;  %v803_v40 = vadd.f32 %v758_v9, %v675_v6  ;;  %v800_v22 = vadd.f32 %v753_v23, %v672_v46  ;;  %v1984_v48 = vunpack.c.l.bf16 %v1983_v58 }
  0xe7   : > { %v1986_v5 = vunpack.c.h.bf16 %v1983_v58  ;;  %v1101_v4 = vpack.c.bf16 %v829_v49, %v828_v29  ;;  %v801_v34 = vadd.f32 %v753_v23, %v673_v33  ;;  %v1988_v21 = vunpack.c.l.bf16 %v1987_v61  ;;  %v773_v62 = vpop.permute.xlu0 %772 }
  0xe8   : > { %v650_v59 = vmul.f32 %v1985_v43, %v1984_v48  ;;  %949 = vst [vmem:[%s1783_s17 + $0x48] sm:$0xff] %v1102_v1  ;;  %v834_v55 = vmax.f32 %v802_v45, 0.0  ;;  %v835_v2 = vmax.f32 %v803_v40, 0.0  ;;  %v832_v13 = vmax.f32 %v800_v22, 0.0 }
  0xe9   : > { %v651_v28 = vmul.f32 %v1985_v43, %v1986_v5  ;;  %v648_v60 = vmul.f32 %v1989_v30, %v1988_v21  ;;  %v1991_v39 = vunpack.c.h.bf16 %v1990_v38  ;;  %v1992_v47 = vunpack.c.h.bf16 %v1987_v61  ;;  %948 = vst [vmem:[%s1783_s17 + $0x40] sm:$0xff] %v1101_v4  ;;  %v778_v7 = vpop.permute.xlu1 %777 }
  0xea   : > { %v833_v31 = vmax.f32 %v801_v34, 0.0  ;;  %v677_v37 = vadd.f32 %v645_v11, %v1993_v17  ;;  %v1104_v6 = vpack.c.bf16 %v835_v2, %v834_v55  ;;  %v806_v56 = vadd.f32 %v768_v16, %v678_v35 }
  0xeb   : > { %v473_v32 = vmul.f32 %v1389_v0, %v1991_v39  ;;  %v649_v19 = vmul.f32 %v1989_v30, %v1992_v47  ;;  %v807_v8 = vadd.f32 %v768_v16, %v679_v42  ;;  %v804_v51 = vadd.f32 %v763_v18, %v676_v54  ;;  %v1995_v0 = vld [vmem:[#allocation17_spill] sm:$0xff] }
  0xec   : > { %v1103_v15 = vpack.c.bf16 %v833_v31, %v832_v13  ;;  %v805_v27 = vadd.f32 %v763_v18, %v677_v37  ;;  %v682_v44 = vadd.f32 %v650_v59, %v1994_v12  ;;  %v683_v25 = vadd.f32 %v651_v28, %v1995_v0  ;;  %951 = vst [vmem:[%s1783_s17 + $0x58] sm:$0xff] %v1104_v6 }
  0xed   : > { %v838_v53 = vmax.f32 %v806_v56, 0.0  ;;  %v839_v26 = vmax.f32 %v807_v8, 0.0  ;;  %v836_v20 = vmax.f32 %v804_v51, 0.0  ;;  %v680_v52 = vadd.f32 %v648_v60, %v1753_v41 }
  0xee   : > { %950 = vst [vmem:[%s1783_s17 + $0x50] sm:$0xff] %v1103_v15  ;;  %v837_v57 = vmax.f32 %v805_v27, 0.0  ;;  %v681_v3 = vadd.f32 %v649_v19, %v473_v32  ;;  %v810_v46 = vadd.f32 %v778_v7, %v682_v44  ;;  %v811_v33 = vadd.f32 %v778_v7, %v683_v25 }
  0xef   : > { %v1106_v63 = vpack.c.bf16 %v839_v26, %v838_v53  ;;  %v808_v10 = vadd.f32 %v773_v62, %v680_v52 }
  0xf0   : > { %v1105_v11 = vpack.c.bf16 %v837_v57, %v836_v20  ;;  %v809_v36 = vadd.f32 %v773_v62, %v681_v3  ;;  %v842_v50 = vmax.f32 %v810_v46, 0.0  ;;  %v843_v29 = vmax.f32 %v811_v33, 0.0 }
  0xf1   : > { %953 = vst [vmem:[%s1783_s17 + $0x68] sm:$0xff] %v1106_v63  ;;  %v840_v49 = vmax.f32 %v808_v10, 0.0 }
  0xf2   : > { %952 = vst [vmem:[%s1783_s17 + $0x60] sm:$0xff] %v1105_v11  ;;  %v841_v41 = vmax.f32 %v809_v36, 0.0  ;;  %v1108_v9 = vpack.c.bf16 %v843_v29, %v842_v50 }
  0xf4   : > { %v1107_v23 = vpack.c.bf16 %v841_v41, %v840_v49  ;;  %955 = vst [vmem:[%s1783_s17 + $0x78] sm:$0xff] %v1108_v9 }
  0xf6   : > { %954 = vst [vmem:[%s1783_s17 + $0x70] sm:$0xff] %v1107_v23 }
  0xf7 PF: > { %s15_s20 = sadd.s32 1, %s1158_s20   ;;  %s1996_s18 = smov %s1154_s19 }
  0xf8   : > { %p12_p5 = scmp.ge.s32.totalorder %s15_s20, 4   ;;  %s1997_s19 = smov %s1999_s21 }
  0xfa   :  { %14 = sbr.rel (!%p12_p5) target bundleno = 2 (0x2), region = 73 }

// kernel: salt_unet_forward.8
= control target key start
LH: loop header
LB: loop body
LE: loop exit
PB: predicated region body
PF: predicated region fallthrough
CT: control target
= control target key end

     0   :  { %s1031_s15 = smov 0   ;;  %s1033_s16 = smov 0   ;;  %s1564_s0 = inlined_call_operand.vmem [shape: bf16[2,128,256], index: 0, kind: input, shape index: {}]   ;;  %s1565_s1 = inlined_call_operand.vmem [shape: bf16[2,128,256], index: 1, kind: input, shape index: {}]   ;;  %s1566_s2 = inlined_call_operand.vmem [shape: f32[128,1], index: 2, kind: input, shape index: {}]   ;;  %s1567_s3 = inlined_call_operand.vmem [shape: f32[128,1], index: 3, kind: input, shape index: {}]   ;;  %s1568_s4 = inlined_call_operand.vmem [shape: bf16[2,128,256], index: 4, kind: output, shape index: {}]  }
   0x1   :  { %s1035_s17 = smov 0  }
   0x2 LB: > { %s26_s18 = sadd.s32 1, %s999_s16  ;;  %p910_p0 = scmp.ge.s32.totalorder %s1003_s17, 1  ;;  %s1003_s17 = sphi %s1035_s17, %s14_s17   ;;  %s999_s16 = sphi %s1033_s16, %s1625_s16   ;;  %s995_s15 = sphi %s1031_s15, %s1624_s15  }
   0x3   : > { %p28_p1 = scmp.ge.s32.totalorder %s26_s18, 2  ;;  %p200_p2 = scmp.lt.s32.totalorder %s1003_s17, 3 }
   0x5   : > { %s1627_s18 = smov (%p28_p1, %s26_s18), 0  ;;  %p201_p3 = pnand %p910_p0, %p200_p2 }
   0x6   : > { %p244_p4 = scmp.lt.s32.totalorder (!%p201_p3), %s995_s15, 1 }
   0x7   : > { %204 = sbr.rel (%p201_p3) target bundleno = 218 (0xda), region = 36 }
   0xc   : > { %v323_v0 = vld [vmem:[%s1566_s2 + $0x10] sm:$0xff]  ;;  %v321_v1 = vld [vmem:[%s1566_s2] sm:$0xff]  ;;  %v1005_v2 = vmov 0   ;;  %v324_v3 = vld [vmem:[%s1566_s2 + $0x18] sm:$0xff]  ;;  %s1629_s15 = smov (!%p244_p4, %s995_s15), 1 }
   0xd   : > { %980 = vset.pattern.permute.xlu1 %v1005_v2  ;;  %979 = vset.pattern.permute.xlu0 %v1005_v2  ;;  %v322_v4 = vld [vmem:[%s1566_s2 + $0x8] sm:$0xff]  ;;  %v325_v6 = vld [vmem:[%s1566_s2 + $0x20] sm:$0xff]  ;;  %v328_v7 = vld [vmem:[%s1566_s2 + $0x38] sm:$0xff]  ;;  %s1157_s13 = sshll.u32 %s1629_s15, 7 }
   0xe   : > { %349 = vperm.xlu1 %980, %v323_v0   ;;  %339 = vperm.xlu0 %979, %v321_v1   ;;  %v326_v5 = vld [vmem:[%s1566_s2 + $0x28] sm:$0xff]  ;;  %v327_v8 = vld [vmem:[%s1566_s2 + $0x30] sm:$0xff]  ;;  %v329_v10 = vld [vmem:[%s1566_s2 + $0x40] sm:$0xff]  ;;  %s1163_s20 = scalar_lea.vmem %s1564_s0, %s1157_s13  ;;  %s1229_s22 = scalar_lea.vmem %s1565_s1, %s1157_s13 }
   0xf   : > { %v330_v9 = vld [vmem:[%s1566_s2 + $0x48] sm:$0xff]  ;;  %v332_v11 = vld [vmem:[%s1566_s2 + $0x58] sm:$0xff]  ;;  %v331_v12 = vld [vmem:[%s1566_s2 + $0x50] sm:$0xff]  ;;  %s1435_s25 = scalar_lea.vmem %s1568_s4, %s1157_s13 }
  0x10   : > { %v334_v13 = vld [vmem:[%s1566_s2 + $0x68] sm:$0xff]  ;;  %v333_v14 = vld [vmem:[%s1566_s2 + $0x60] sm:$0xff]  ;;  %v336_v15 = vld [vmem:[%s1566_s2 + $0x78] sm:$0xff] }
  0x11   : > { %v335_v16 = vld [vmem:[%s1566_s2 + $0x70] sm:$0xff]  ;;  %v450_v17 = vld [vmem:[%s1567_s3 + $0x8] sm:$0xff]  ;;  %v449_v18 = vld [vmem:[%s1567_s3] sm:$0xff] }
  0x12   : > { %354 = vperm.xlu1 %980, %v324_v3   ;;  %344 = vperm.xlu0 %979, %v322_v4   ;;  %v452_v19 = vld [vmem:[%s1567_s3 + $0x18] sm:$0xff]  ;;  %v451_v20 = vld [vmem:[%s1567_s3 + $0x10] sm:$0xff]  ;;  %v454_v21 = vld [vmem:[%s1567_s3 + $0x28] sm:$0xff] }
  0x13   : > { %v453_v22 = vld [vmem:[%s1567_s3 + $0x20] sm:$0xff]  ;;  %v456_v23 = vld [vmem:[%s1567_s3 + $0x38] sm:$0xff]  ;;  %v455_v24 = vld [vmem:[%s1567_s3 + $0x30] sm:$0xff] }
  0x14   : > { %v458_v25 = vld [vmem:[%s1567_s3 + $0x48] sm:$0xff]  ;;  %v457_v26 = vld [vmem:[%s1567_s3 + $0x40] sm:$0xff]  ;;  %v460_v27 = vld [vmem:[%s1567_s3 + $0x58] sm:$0xff] }
  0x15   : > { %v459_v28 = vld [vmem:[%s1567_s3 + $0x50] sm:$0xff]  ;;  %v462_v29 = vld [vmem:[%s1567_s3 + $0x68] sm:$0xff]  ;;  %v461_v30 = vld [vmem:[%s1567_s3 + $0x60] sm:$0xff] }
  0x16   : > { %364 = vperm.xlu1 %980, %v326_v5   ;;  %359 = vperm.xlu0 %979, %v325_v6   ;;  %v464_v31 = vld [vmem:[%s1567_s3 + $0x78] sm:$0xff]  ;;  %v463_v32 = vld [vmem:[%s1567_s3 + $0x70] sm:$0xff]  ;;  %v1173_v40 = vld [vmem:[%s1163_s20] sm:$0xff] }
  0x17   : > { %v1170_v39 = vld [vmem:[%s1163_s20 + $0x10] sm:$0xff]  ;;  %v1176_v41 = vld [vmem:[%s1163_s20 + $0x18] sm:$0xff]  ;;  %v1179_v42 = vld [vmem:[%s1163_s20 + $0x8] sm:$0xff]  ;;  %v289_v49 = vunpack.c.l.bf16 %v1173_v40  ;;  %v290_v50 = vunpack.c.h.bf16 %v1173_v40 }
  0x18   : > { %v1186_v45 = vld [vmem:[%s1163_s20 + $0x28] sm:$0xff]  ;;  %v1189_v46 = vld [vmem:[%s1163_s20 + $0x20] sm:$0xff]  ;;  %v293_v47 = vunpack.c.l.bf16 %v1170_v39  ;;  %v294_v48 = vunpack.c.h.bf16 %v1170_v39  ;;  %v1196_v51 = vld [vmem:[%s1163_s20 + $0x38] sm:$0xff]  ;;  %v295_v53 = vunpack.c.l.bf16 %v1176_v41  ;;  %v296_v54 = vunpack.c.h.bf16 %v1176_v41 }
  0x19   : > { %v1199_v52 = vld [vmem:[%s1163_s20 + $0x30] sm:$0xff]  ;;  %v291_v55 = vunpack.c.l.bf16 %v1179_v42  ;;  %v1206_v57 = vld [vmem:[%s1163_s20 + $0x48] sm:$0xff]  ;;  %v1209_v58 = vld [vmem:[%s1163_s20 + $0x40] sm:$0xff]  ;;  %v1569_v39 = vunpack.c.h.bf16 %v1179_v42  ;;  %v1570_v40 = vunpack.c.l.bf16 %v1186_v45  ;;  %v1572_v41 = vunpack.c.l.bf16 %v1189_v46 }
  0x1a   : > { %374 = vperm.xlu1 %980, %v328_v7   ;;  %369 = vperm.xlu0 %979, %v327_v8   ;;  %v1220_v1 = vld [vmem:[%s1163_s20 + $0x58] sm:$0xff]  ;;  %v1223_v2 = vld [vmem:[%s1163_s20 + $0x50] sm:$0xff]  ;;  %v1236_v7 = vld [vmem:[%s1163_s20 + $0x68] sm:$0xff] }
  0x1b   : > { %v1239_v8 = vld [vmem:[%s1163_s20 + $0x60] sm:$0xff]  ;;  %v1324_v5 = vld [vmem:[%s1229_s22 + $0x68] sm:$0xff]  ;;  %v1334_v62 = vld [vmem:[%s1229_s22 + $0x78] sm:$0xff] }
  0x1c   : > { %v619_v4 = vunpack.c.l.bf16 %v1324_v5 }
  0x1e   : > { %384 = vperm.xlu1 %980, %v330_v9   ;;  %379 = vperm.xlu0 %979, %v329_v10  }
  0x22   : > { %394 = vperm.xlu1 %980, %v332_v11   ;;  %389 = vperm.xlu0 %979, %v331_v12   ;;  %v1300_v12 = vld [vmem:[%s1229_s22 + $0x48] sm:$0xff]  ;;  %v1303_v11 = vld [vmem:[%s1229_s22 + $0x40] sm:$0xff] }
  0x26   : > { %404 = vperm.xlu1 %980, %v334_v13   ;;  %399 = vperm.xlu0 %979, %v333_v14   ;;  %v1246_v13 = vld [vmem:[%s1163_s20 + $0x78] sm:$0xff]  ;;  %v1249_v14 = vld [vmem:[%s1163_s20 + $0x70] sm:$0xff] }
  0x2a   : > { %414 = vperm.xlu1 %980, %v336_v15   ;;  %409 = vperm.xlu0 %979, %v335_v16   ;;  %v1314_v15 = vld [vmem:[%s1229_s22 + $0x58] sm:$0xff] }
  0x2e   : > { %472 = vperm.xlu1 %980, %v450_v17   ;;  %467 = vperm.xlu0 %979, %v449_v18   ;;  %v1293_v17 = vld [vmem:[%s1229_s22 + $0x30] sm:$0xff] }
  0x2f   : > { %v1317_v18 = vld [vmem:[%s1229_s22 + $0x50] sm:$0xff] }
  0x32   : > { %482 = vperm.xlu1 %980, %v452_v19   ;;  %477 = vperm.xlu0 %979, %v451_v20   ;;  %v1256_v19 = vld [vmem:[%s1229_s22 + $0x8] sm:$0xff]  ;;  %v1259_v20 = vld [vmem:[%s1229_s22] sm:$0xff] }
  0x36   : > { %492 = vperm.xlu1 %980, %v454_v21   ;;  %487 = vperm.xlu0 %979, %v453_v22  }
  0x3a   : > { %502 = vperm.xlu1 %980, %v456_v23   ;;  %497 = vperm.xlu0 %979, %v455_v24   ;;  %v1280_v24 = vld [vmem:[%s1229_s22 + $0x28] sm:$0xff]  ;;  %v1283_v23 = vld [vmem:[%s1229_s22 + $0x20] sm:$0xff] }
  0x3e   : > { %512 = vperm.xlu1 %980, %v458_v25   ;;  %507 = vperm.xlu0 %979, %v457_v26   ;;  %v1337_v25 = vld [vmem:[%s1229_s22 + $0x70] sm:$0xff] }
  0x42   : > { %522 = vperm.xlu1 %980, %v460_v27   ;;  %517 = vperm.xlu0 %979, %v459_v28   ;;  %v1270_v27 = vld [vmem:[%s1229_s22 + $0x18] sm:$0xff]  ;;  %v1273_v28 = vld [vmem:[%s1229_s22 + $0x10] sm:$0xff] }
  0x46   : > { %532 = vperm.xlu1 %980, %v462_v29   ;;  %527 = vperm.xlu0 %979, %v461_v30   ;;  %v1290_v30 = vld [vmem:[%s1229_s22 + $0x38] sm:$0xff] }
  0x4a   : > { %542 = vperm.xlu1 %980, %v464_v31   ;;  %537 = vperm.xlu0 %979, %v463_v32   ;;  %v1327_v32 = vld [vmem:[%s1229_s22 + $0x60] sm:$0xff] }
  0x4b   : > { %v617_v31 = vunpack.c.l.bf16 %v1327_v32 }
  0x89   : > { %v1148_v33 = vpop.permute.xlu1 %349  ;;  %v1150_v34 = vpop.permute.xlu0 %339 }
  0x8a   : > { %v421_v56 = vmul.f32 %v1148_v33, %v293_v47  ;;  %v422_v3 = vmul.f32 %v1148_v33, %v294_v48  ;;  %v417_v59 = vmul.f32 %v1150_v34, %v289_v49  ;;  %v418_v29 = vmul.f32 %v1150_v34, %v290_v50 }
  0x8b   : > { %v1571_v49 = vunpack.c.h.bf16 %v1186_v45 }
  0x8d   : > { %v1153_v35 = vpop.permute.xlu1 %354  ;;  %v1155_v36 = vpop.permute.xlu0 %344 }
  0x8e   : > { %v423_v61 = vmul.f32 %v1153_v35, %v295_v53  ;;  %v424_v47 = vmul.f32 %v1153_v35, %v296_v54  ;;  %v419_v33 = vmul.f32 %v1155_v36, %v291_v55  ;;  %v420_v48 = vmul.f32 %v1155_v36, %v1569_v39 }
  0x8f   : > { %v1573_v53 = vunpack.c.h.bf16 %v1189_v46 }
  0x91   : > { %v1165_v37 = vpop.permute.xlu1 %364  ;;  %v1167_v38 = vpop.permute.xlu0 %359 }
  0x92   : > { %v427_v34 = vmul.f32 %v1165_v37, %v1570_v40  ;;  %v428_v50 = vmul.f32 %v1165_v37, %v1571_v49  ;;  %v425_v35 = vmul.f32 %v1167_v38, %v1572_v41  ;;  %v426_v54 = vmul.f32 %v1167_v38, %v1573_v53 }
  0x93   : > { %v1574_v40 = vunpack.c.l.bf16 %v1196_v51  ;;  %v1575_v37 = vunpack.c.h.bf16 %v1196_v51  ;;  %v1576_v41 = vunpack.c.l.bf16 %v1199_v52  ;;  %v1577_v38 = vunpack.c.h.bf16 %v1199_v52 }
  0x94   : > { %v1583_v52 = vunpack.c.h.bf16 %v1206_v57 }
  0x95   : > { %v1181_v43 = vpop.permute.xlu1 %374  ;;  %v1183_v44 = vpop.permute.xlu0 %369 }
  0x96   : > { %v431_v45 = vmul.f32 %v1181_v43, %v1574_v40  ;;  %v432_v49 = vmul.f32 %v1181_v43, %v1575_v37  ;;  %v429_v46 = vmul.f32 %v1183_v44, %v1576_v41  ;;  %v1581_v43 = vunpack.c.h.bf16 %v1259_v20 }
  0x97   : > { %v1582_v40 = vunpack.c.l.bf16 %v1206_v57 }
  0x99   : > { %v1215_v63 = vpop.permute.xlu1 %384  ;;  %v1217_v0 = vpop.permute.xlu0 %379 }
  0x9a   : > { %v1414_v37 = vmul.f32 %v1215_v63, %v1582_v40  ;;  %v1588_v40 = vunpack.c.l.bf16 %v1270_v27 }
  0x9d   : > { %v1261_v21 = vpop.permute.xlu1 %394  ;;  %v1263_v22 = vpop.permute.xlu0 %389 }
  0xa1   : > { %v1305_v10 = vpop.permute.xlu1 %404  ;;  %v1307_v9 = vpop.permute.xlu0 %399 }
  0xa5   : > { %v1343_v60 = vpop.permute.xlu1 %414  ;;  %v1345_v16 = vpop.permute.xlu0 %409 }
  0xa9   : > { %v473_v55 = vpop.permute.xlu1 %472  ;;  %v468_v42 = vpop.permute.xlu0 %467 }
  0xaa   : > { %v547_v26 = vadd.f32 %v473_v55, %v419_v33  ;;  %v548_v36 = vadd.f32 %v473_v55, %v420_v48  ;;  %v545_v39 = vadd.f32 %v468_v42, %v417_v59  ;;  %v546_v6 = vadd.f32 %v468_v42, %v418_v29 }
  0xab   : > { %v430_v33 = vmul.f32 %v1183_v44, %v1577_v38  ;;  %v1578_v59 = vunpack.c.l.bf16 %v1256_v19  ;;  %v1579_v48 = vunpack.c.h.bf16 %v1256_v19  ;;  %v1580_v55 = vunpack.c.l.bf16 %v1259_v20 }
  0xac   : > { %v626_v42 = vadd.f32 %v1581_v43, %v546_v6  ;;  %v1419_v44 = vmul.f32 %v1215_v63, %v1583_v52 }
  0xad   : > { %v627_v29 = vadd.f32 %v1578_v59, %v547_v26  ;;  %v628_v53 = vadd.f32 %v1579_v48, %v548_v36  ;;  %v625_v51 = vadd.f32 %v1580_v55, %v545_v39  ;;  %v1584_v26 = vunpack.c.l.bf16 %v1209_v58  ;;  %v483_v6 = vpop.permute.xlu1 %482  ;;  %v478_v39 = vpop.permute.xlu0 %477 }
  0xae   : > { %v1585_v36 = vunpack.c.h.bf16 %v1209_v58  ;;  %v658_v48 = vmax.f32 %v626_v42, 0.0  ;;  %v551_v57 = vadd.f32 %v483_v6, %v423_v61  ;;  %v552_v63 = vadd.f32 %v483_v6, %v424_v47 }
  0xaf   : > { %v1424_v19 = vmul.f32 %v1217_v0, %v1584_v26  ;;  %v659_v41 = vmax.f32 %v627_v29, 0.0  ;;  %v660_v38 = vmax.f32 %v628_v53, 0.0  ;;  %v657_v59 = vmax.f32 %v625_v51, 0.0 }
  0xb0   : > { %v1429_v20 = vmul.f32 %v1217_v0, %v1585_v36  ;;  %v549_v55 = vadd.f32 %v478_v39, %v421_v56  ;;  %v550_v58 = vadd.f32 %v478_v39, %v422_v3  ;;  %v1586_v0 = vunpack.c.l.bf16 %v1220_v1 }
  0xb1   : > { %v1587_v29 = vunpack.c.h.bf16 %v1220_v1  ;;  %v939_v51 = vpack.c.bf16 %v660_v38, %v659_v41  ;;  %v938_v42 = vpack.c.bf16 %v658_v48, %v657_v59  ;;  %v631_v52 = vadd.f32 %v1588_v40, %v551_v57  ;;  %v493_v6 = vpop.permute.xlu1 %492  ;;  %v488_v39 = vpop.permute.xlu0 %487 }
  0xb2   : > { %v1440_v43 = vmul.f32 %v1261_v21, %v1586_v0  ;;  %v1589_v61 = vunpack.c.h.bf16 %v1270_v27  ;;  %v1590_v56 = vunpack.c.l.bf16 %v1273_v28  ;;  %v1591_v26 = vunpack.c.h.bf16 %v1273_v28 }
  0xb3   : > { %v1445_v53 = vmul.f32 %v1261_v21, %v1587_v29  ;;  %786 = vst [vmem:[%s1435_s25 + $0x8] sm:$0xff] %v939_v51  ;;  %785 = vst [vmem:[%s1435_s25] sm:$0xff] %v938_v42  ;;  %v555_v1 = vadd.f32 %v493_v6, %v427_v34  ;;  %v556_v21 = vadd.f32 %v493_v6, %v428_v50  ;;  %v663_v59 = vmax.f32 %v631_v52, 0.0 }
  0xb4   : > { %v632_v47 = vadd.f32 %v1589_v61, %v552_v63  ;;  %v629_v3 = vadd.f32 %v1590_v56, %v549_v55  ;;  %v630_v36 = vadd.f32 %v1591_v26, %v550_v58  ;;  %v553_v41 = vadd.f32 %v488_v39, %v425_v35 }
  0xb5   : > { %v554_v38 = vadd.f32 %v488_v39, %v426_v54  ;;  %v1592_v63 = vunpack.c.l.bf16 %v1280_v24  ;;  %v1593_v28 = vunpack.c.h.bf16 %v1280_v24  ;;  %v1594_v0 = vunpack.c.l.bf16 %v1283_v23  ;;  %v503_v61 = vpop.permute.xlu1 %502 }
  0xb6   : > { %v664_v48 = vmax.f32 %v632_v47, 0.0  ;;  %v661_v57 = vmax.f32 %v629_v3, 0.0  ;;  %v662_v27 = vmax.f32 %v630_v36, 0.0  ;;  %v1595_v34 = vunpack.c.h.bf16 %v1283_v23  ;;  %v498_v47 = vpop.permute.xlu0 %497 }
  0xb7   : > { %v635_v55 = vadd.f32 %v1592_v63, %v555_v1  ;;  %v636_v58 = vadd.f32 %v1593_v28, %v556_v21  ;;  %v633_v29 = vadd.f32 %v1594_v0, %v553_v41  ;;  %v1596_v35 = vunpack.c.l.bf16 %v1223_v2 }
  0xb8   : > { %v634_v50 = vadd.f32 %v1595_v34, %v554_v38  ;;  %v1597_v51 = vunpack.c.h.bf16 %v1223_v2  ;;  %v941_v40 = vpack.c.bf16 %v664_v48, %v663_v59  ;;  %v940_v52 = vpack.c.bf16 %v662_v27, %v661_v57 }
  0xb9   : > { %v437_v54 = vmul.f32 %v1263_v22, %v1596_v35  ;;  %v667_v24 = vmax.f32 %v635_v55, 0.0  ;;  %v668_v56 = vmax.f32 %v636_v58, 0.0  ;;  %v665_v3 = vmax.f32 %v633_v29, 0.0  ;;  %v513_v63 = vpop.permute.xlu1 %512 }
  0xba   : > { %v438_v42 = vmul.f32 %v1263_v22, %v1597_v51  ;;  %v666_v26 = vmax.f32 %v634_v50, 0.0  ;;  %788 = vst [vmem:[%s1435_s25 + $0x18] sm:$0xff] %v941_v40  ;;  %787 = vst [vmem:[%s1435_s25 + $0x10] sm:$0xff] %v940_v52  ;;  %v559_v23 = vadd.f32 %v503_v61, %v431_v45  ;;  %v560_v36 = vadd.f32 %v503_v61, %v432_v49  ;;  %v508_v55 = vpop.permute.xlu0 %507 }
  0xbb   : > { %v557_v6 = vadd.f32 %v498_v47, %v429_v46  ;;  %v558_v39 = vadd.f32 %v498_v47, %v430_v33  ;;  %v1598_v2 = vunpack.c.l.bf16 %v1236_v7  ;;  %v1599_v1 = vunpack.c.h.bf16 %v1236_v7 }
  0xbc   : > { %v943_v41 = vpack.c.bf16 %v668_v56, %v667_v24  ;;  %v942_v38 = vpack.c.bf16 %v666_v26, %v665_v3  ;;  %v1600_v59 = vunpack.c.l.bf16 %v1290_v30  ;;  %v1601_v57 = vunpack.c.h.bf16 %v1290_v30 }
  0xbd   : > { %v443_v22 = vmul.f32 %v1305_v10, %v1598_v2  ;;  %v444_v21 = vmul.f32 %v1305_v10, %v1599_v1  ;;  %v1602_v45 = vunpack.c.l.bf16 %v1293_v17  ;;  %v1603_v46 = vunpack.c.h.bf16 %v1293_v17  ;;  %v523_v3 = vpop.permute.xlu1 %522 }
  0xbe   : > { %v639_v48 = vadd.f32 %v1600_v59, %v559_v23  ;;  %v640_v27 = vadd.f32 %v1601_v57, %v560_v36  ;;  %790 = vst [vmem:[%s1435_s25 + $0x28] sm:$0xff] %v943_v41  ;;  %789 = vst [vmem:[%s1435_s25 + $0x20] sm:$0xff] %v942_v38  ;;  %v563_v7 = vadd.f32 %v513_v63, %v1414_v37  ;;  %v1604_v17 = vunpack.c.l.bf16 %v1300_v12  ;;  %v518_v26 = vpop.permute.xlu0 %517 }
  0xbf   : > { %v637_v49 = vadd.f32 %v1602_v45, %v557_v6  ;;  %v638_v33 = vadd.f32 %v1603_v46, %v558_v39  ;;  %v564_v10 = vadd.f32 %v513_v63, %v1419_v44  ;;  %v561_v28 = vadd.f32 %v508_v55, %v1424_v19 }
  0xc0   : > { %v562_v58 = vadd.f32 %v508_v55, %v1429_v20  ;;  %v671_v30 = vmax.f32 %v639_v48, 0.0  ;;  %v672_v0 = vmax.f32 %v640_v27, 0.0  ;;  %v643_v50 = vadd.f32 %v1604_v17, %v563_v7 }
  0xc1   : > { %v669_v29 = vmax.f32 %v637_v49, 0.0  ;;  %v670_v34 = vmax.f32 %v638_v33, 0.0  ;;  %v1605_v35 = vunpack.c.h.bf16 %v1300_v12  ;;  %v1606_v37 = vunpack.c.l.bf16 %v1303_v11  ;;  %v533_v46 = vpop.permute.xlu1 %532 }
  0xc2   : > { %v1607_v44 = vunpack.c.h.bf16 %v1303_v11  ;;  %v1608_v20 = vunpack.c.l.bf16 %v1239_v8  ;;  %v1609_v61 = vunpack.c.h.bf16 %v1239_v8  ;;  %v945_v24 = vpack.c.bf16 %v672_v0, %v671_v30  ;;  %v528_v33 = vpop.permute.xlu0 %527 }
  0xc3   : > { %v644_v51 = vadd.f32 %v1605_v35, %v564_v10  ;;  %v641_v40 = vadd.f32 %v1606_v37, %v561_v28  ;;  %v944_v56 = vpack.c.bf16 %v670_v34, %v669_v29  ;;  %v675_v12 = vmax.f32 %v643_v50, 0.0 }
  0xc4   : > { %v642_v19 = vadd.f32 %v1607_v44, %v562_v58  ;;  %v441_v52 = vmul.f32 %v1307_v9, %v1608_v20  ;;  %v442_v47 = vmul.f32 %v1307_v9, %v1609_v61  ;;  %792 = vst [vmem:[%s1435_s25 + $0x38] sm:$0xff] %v945_v24  ;;  %v567_v11 = vadd.f32 %v523_v3, %v1440_v43 }
  0xc5   : > { %v676_v23 = vmax.f32 %v644_v51, 0.0  ;;  %v673_v36 = vmax.f32 %v641_v40, 0.0  ;;  %791 = vst [vmem:[%s1435_s25 + $0x30] sm:$0xff] %v944_v56  ;;  %v568_v39 = vadd.f32 %v523_v3, %v1445_v53  ;;  %v565_v2 = vadd.f32 %v518_v26, %v437_v54 }
  0xc6   : > { %v674_v6 = vmax.f32 %v642_v19, 0.0  ;;  %v566_v8 = vadd.f32 %v518_v26, %v438_v42  ;;  %v1610_v9 = vunpack.c.l.bf16 %v1246_v13  ;;  %v1611_v41 = vunpack.c.h.bf16 %v1246_v13  ;;  %v538_v37 = vpop.permute.xlu0 %537 }
  0xc7   : > { %v947_v59 = vpack.c.bf16 %v676_v23, %v675_v12  ;;  %v1612_v57 = vunpack.c.l.bf16 %v1314_v15  ;;  %v1613_v45 = vunpack.c.h.bf16 %v1314_v15  ;;  %v1614_v53 = vunpack.c.l.bf16 %v1317_v18 }
  0xc8   : > { %v447_v1 = vmul.f32 %v1343_v60, %v1610_v9  ;;  %v448_v38 = vmul.f32 %v1343_v60, %v1611_v41  ;;  %v946_v48 = vpack.c.bf16 %v674_v6, %v673_v36  ;;  %v1615_v42 = vunpack.c.h.bf16 %v1317_v18 }
  0xc9   : > { %v647_v27 = vadd.f32 %v1612_v57, %v567_v11  ;;  %v648_v43 = vadd.f32 %v1613_v45, %v568_v39  ;;  %v645_v54 = vadd.f32 %v1614_v53, %v565_v2  ;;  %794 = vst [vmem:[%s1435_s25 + $0x48] sm:$0xff] %v947_v59  ;;  %v571_v13 = vadd.f32 %v533_v46, %v443_v22 }
  0xca   : > { %v646_v49 = vadd.f32 %v1615_v42, %v566_v8  ;;  %793 = vst [vmem:[%s1435_s25 + $0x40] sm:$0xff] %v946_v48  ;;  %v572_v60 = vadd.f32 %v533_v46, %v444_v21  ;;  %v569_v63 = vadd.f32 %v528_v33, %v441_v52  ;;  %v570_v55 = vadd.f32 %v528_v33, %v442_v47 }
  0xcb   : > { %v679_v7 = vmax.f32 %v647_v27, 0.0  ;;  %v680_v10 = vmax.f32 %v648_v43, 0.0  ;;  %v677_v28 = vmax.f32 %v645_v54, 0.0  ;;  %v651_v58 = vadd.f32 %v619_v4, %v571_v13  ;;  %v543_v4 = vpop.permute.xlu1 %542 }
  0xcc   : > { %v678_v15 = vmax.f32 %v646_v49, 0.0  ;;  %v1616_v18 = vunpack.c.h.bf16 %v1324_v5  ;;  %v649_v0 = vadd.f32 %v617_v31, %v569_v63  ;;  %v1617_v22 = vunpack.c.h.bf16 %v1327_v32 }
  0xcd   : > { %v1618_v29 = vunpack.c.l.bf16 %v1249_v14  ;;  %v1619_v17 = vunpack.c.h.bf16 %v1249_v14  ;;  %v949_v35 = vpack.c.bf16 %v680_v10, %v679_v7  ;;  %v683_v5 = vmax.f32 %v651_v58, 0.0 }
  0xce   : > { %v652_v30 = vadd.f32 %v1616_v18, %v572_v60  ;;  %v650_v21 = vadd.f32 %v1617_v22, %v570_v55  ;;  %v948_v51 = vpack.c.bf16 %v678_v15, %v677_v28  ;;  %v681_v31 = vmax.f32 %v649_v0, 0.0 }
  0xcf   : > { %v445_v34 = vmul.f32 %v1345_v16, %v1618_v29  ;;  %v446_v50 = vmul.f32 %v1345_v16, %v1619_v17  ;;  %796 = vst [vmem:[%s1435_s25 + $0x58] sm:$0xff] %v949_v35  ;;  %v575_v32 = vadd.f32 %v543_v4, %v447_v1  ;;  %v576_v19 = vadd.f32 %v543_v4, %v448_v38 }
  0xd0   : > { %v684_v40 = vmax.f32 %v652_v30, 0.0  ;;  %v682_v44 = vmax.f32 %v650_v21, 0.0  ;;  %795 = vst [vmem:[%s1435_s25 + $0x50] sm:$0xff] %v948_v51  ;;  %v1620_v61 = vunpack.c.l.bf16 %v1334_v62  ;;  %v1621_v24 = vunpack.c.h.bf16 %v1334_v62 }
  0xd1   : > { %v573_v20 = vadd.f32 %v538_v37, %v445_v34  ;;  %v574_v52 = vadd.f32 %v538_v37, %v446_v50  ;;  %v1622_v3 = vunpack.c.l.bf16 %v1337_v25  ;;  %v1623_v12 = vunpack.c.h.bf16 %v1337_v25 }
  0xd2   : > { %v951_v14 = vpack.c.bf16 %v684_v40, %v683_v5  ;;  %v950_v16 = vpack.c.bf16 %v682_v44, %v681_v31  ;;  %v655_v47 = vadd.f32 %v1620_v61, %v575_v32  ;;  %v656_v56 = vadd.f32 %v1621_v24, %v576_v19 }
  0xd3   : > { %v653_v26 = vadd.f32 %v1622_v3, %v573_v20  ;;  %v654_v23 = vadd.f32 %v1623_v12, %v574_v52 }
  0xd4   : > { %798 = vst [vmem:[%s1435_s25 + $0x68] sm:$0xff] %v951_v14  ;;  %797 = vst [vmem:[%s1435_s25 + $0x60] sm:$0xff] %v950_v16  ;;  %v687_v36 = vmax.f32 %v655_v47, 0.0  ;;  %v688_v6 = vmax.f32 %v656_v56, 0.0 }
  0xd5   : > { %v685_v11 = vmax.f32 %v653_v26, 0.0  ;;  %v686_v39 = vmax.f32 %v654_v23, 0.0 }
  0xd6   : > { %v953_v2 = vpack.c.bf16 %v688_v6, %v687_v36 }
  0xd7   : > { %v952_v8 = vpack.c.bf16 %v686_v39, %v685_v11 }
  0xd8   : > { %800 = vst [vmem:[%s1435_s25 + $0x78] sm:$0xff] %v953_v2 }
  0xd9   : > { %799 = vst [vmem:[%s1435_s25 + $0x70] sm:$0xff] %v952_v8 }
  0xda PF: > { %s14_s17 = sadd.s32 1, %s1003_s17   ;;  %s1624_s15 = smov %s999_s16 }
  0xdb   : > { %p11_p5 = scmp.ge.s32.totalorder %s14_s17, 4   ;;  %s1625_s16 = smov %s1627_s18 }
  0xdd   :  { %13 = sbr.rel (!%p11_p5) target bundleno = 2 (0x2), region = 69 }

// kernel: salt_unet_forward.9
= control target key start
LH: loop header
LB: loop body
LE: loop exit
PB: predicated region body
PF: predicated region fallthrough
CT: control target
= control target key end

     0   :  { %s9824_s0 = inlined_call_operand.vmem [shape: bf16[2,256,4096], index: 0, kind: input, shape index: {}]   ;;  %s9825_s1 = inlined_call_operand.vmem [shape: f32[256,1], index: 1, kind: input, shape index: {}]   ;;  %s9826_s2 = inlined_call_operand.vmem [shape: f32[256,1], index: 2, kind: input, shape index: {}]   ;;  %s9827_s3 = inlined_call_operand.<no memory space> [shape: f32[1,1], index: 3, kind: input, shape index: {}]   ;;  %s9828_s4 = inlined_call_operand.vmem [shape: f32[2,1,4096], index: 4, kind: output, shape index: {}]  }
   0x1   :  { %v9_v0 = vstv %s9827_s3 }
   0x2   :  { %10 = vst [vmem:[#allocation2] sm:$0x1] %v9_v0 }
   0x3   :  { %s4427_s17 = smov 0   ;;  %s4429_s18 = smov 0  }
   0x4   :  { %s4431_s19 = smov 0   ;;  %s4433_s20 = smov 0  }
   0x5   :  { %s4435_s21 = smov 0   ;;  %s4437_s22 = smov 0  }
   0x6   :  { %s4439_s23 = smov 0  }
   0x7 LB: > { %s25_s3 = sadd.s32 1, %s4387_s21  ;;  %s28_s24 = sadd.s32 1, %s4391_s22  ;;  %s4395_s23 = sphi %s4439_s23, %s16_s23   ;;  %s4391_s22 = sphi %s4437_s22, %s12347_s22   ;;  %s4387_s21 = sphi %s4435_s21, %s12346_s21   ;;  %s4383_s20 = sphi %s4433_s20, %s12345_s20   ;;  %s4379_s19 = sphi %s4431_s19, %s12344_s19   ;;  %s4375_s18 = sphi %s4429_s18, %s12343_s18   ;;  %s4371_s17 = sphi %s4427_s17, %s12342_s17  }
   0x8   : > { %p26_p0 = scmp.ge.s32.totalorder %s25_s3, 2  ;;  %p44_p1 = scmp.ne.s32.totalorder %s4375_s18, %s4371_s17 }
   0x9   : > { %p45_p2 = scmp.eq.s32.totalorder %s4395_s23, 0  ;;  %s37_s28 = sadd.s32 1, %s4375_s18 }
   0xa   : > { %s12349_s3 = smov (%p26_p0, %s25_s3), 0  ;;  %s12351_s24 = smov (!%p26_p0, %s28_s24), %s4391_s22 }
   0xb   : > { %p46_p3 = por %p45_p2, %p44_p1  ;;  %p30_p4 = scmp.ge.s32.totalorder %s12351_s24, 2 }
   0xc   : > { %s33_s25 = ssub.s32 %s4387_s21, %s12349_s3  ;;  %p4270_p6 = scmp.ge.s32.totalorder %s4395_s23, 4 }
   0xd   : > { %s12353_s24 = smov (%p30_p4, %s12351_s24), 0 }
   0xe   : > { %s32_s26 = ssub.s32 %s4391_s22, %s12353_s24  ;;  %170 = sbr.rel (%p4270_p6) target bundleno = 154 (0x9a), region = 28 }
   0xf   : > { %s34_s27 = sor.u32 %s33_s25, %s32_s26 }
  0x10   : > { %p35_p5 = scmp.eq.s32.totalorder %s34_s27, 0 }
  0x12   : > { %s4478_s29 = scalar_select %p35_p5, %s4375_s18, %s37_s28  }
  0x13   : > { %173 = sbr.rel (!%p46_p3) target bundleno = 154 (0x9a), region = 32  ;;  %s175_s30 = sand.u32 (%p46_p3), 1, %s4375_s18  }
  0x14   : > { %s4272_s5 = sshll.u32 (%p46_p3), %s4387_s21, 4  ;;  %s4271_s6 = sshll.u32 (%p46_p3), %s175_s30, 11 }
  0x15   : > { %s4273_s7 = sshll.u32 (%p46_p3), %s4391_s22, 10  ;;  %s4492_s13 = scalar_lea.vmem (%p46_p3), [#allocation3], %s4271_s6 }
  0x16   : > { %s180_s8 = sadd.s32 (%p46_p3), %s4273_s7, %s4272_s5 }
  0x17   : > { %s4274_s9 = sshll.u32 (%p46_p3), %s180_s8, 2 }
  0x18   : > { %s4487_s12 = scalar_lea.vmem %s9824_s0, %s4274_s9 }
  0x19   : > { %v195_v1 = vld [vmem:[%s4487_s12] sm:$0xff]  ;;  %v197_v2 = vld [vmem:[%s4487_s12 + $0x8] sm:$0xff]  ;;  %v199_v3 = vld [vmem:[%s4487_s12 + $0x10] sm:$0xff] }
  0x1a   : > { %196 = vst [vmem:[%s4492_s13] sm:$0xff] %v195_v1  ;;  %198 = vst [vmem:[%s4492_s13 + $0x8] sm:$0xff] %v197_v2  ;;  %v201_v4 = vld [vmem:[%s4487_s12 + $0x18] sm:$0xff]  ;;  %v203_v5 = vld [vmem:[%s4487_s12 + $0x20] sm:$0xff] }
  0x1b   : > { %200 = vst [vmem:[%s4492_s13 + $0x10] sm:$0xff] %v199_v3  ;;  %v205_v6 = vld [vmem:[%s4487_s12 + $0x28] sm:$0xff]  ;;  %202 = vst [vmem:[%s4492_s13 + $0x18] sm:$0xff] %v201_v4  ;;  %v207_v7 = vld [vmem:[%s4487_s12 + $0x30] sm:$0xff] }
  0x1c   : > { %204 = vst [vmem:[%s4492_s13 + $0x20] sm:$0xff] %v203_v5  ;;  %206 = vst [vmem:[%s4492_s13 + $0x28] sm:$0xff] %v205_v6  ;;  %v209_v8 = vld [vmem:[%s4487_s12 + $0x38] sm:$0xff]  ;;  %v211_v9 = vld [vmem:[%s4487_s12 + $0x80] sm:$0xff] }
  0x1d   : > { %208 = vst [vmem:[%s4492_s13 + $0x30] sm:$0xff] %v207_v7  ;;  %210 = vst [vmem:[%s4492_s13 + $0x38] sm:$0xff] %v209_v8  ;;  %v213_v10 = vld [vmem:[%s4487_s12 + $0x88] sm:$0xff]  ;;  %v215_v11 = vld [vmem:[%s4487_s12 + $0x90] sm:$0xff] }
  0x1e   : > { %212 = vst [vmem:[%s4492_s13 + $0x40] sm:$0xff] %v211_v9  ;;  %v217_v12 = vld [vmem:[%s4487_s12 + $0x98] sm:$0xff]  ;;  %214 = vst [vmem:[%s4492_s13 + $0x48] sm:$0xff] %v213_v10  ;;  %v219_v13 = vld [vmem:[%s4487_s12 + $0xa0] sm:$0xff] }
  0x1f   : > { %216 = vst [vmem:[%s4492_s13 + $0x50] sm:$0xff] %v215_v11  ;;  %218 = vst [vmem:[%s4492_s13 + $0x58] sm:$0xff] %v217_v12  ;;  %v221_v14 = vld [vmem:[%s4487_s12 + $0xa8] sm:$0xff]  ;;  %v223_v15 = vld [vmem:[%s4487_s12 + $0xb0] sm:$0xff] }
  0x20   : > { %220 = vst [vmem:[%s4492_s13 + $0x60] sm:$0xff] %v219_v13  ;;  %222 = vst [vmem:[%s4492_s13 + $0x68] sm:$0xff] %v221_v14  ;;  %v225_v16 = vld [vmem:[%s4487_s12 + $0xb8] sm:$0xff]  ;;  %v227_v17 = vld [vmem:[%s4487_s12 + $0x100] sm:$0xff] }
  0x21   : > { %224 = vst [vmem:[%s4492_s13 + $0x70] sm:$0xff] %v223_v15  ;;  %v229_v18 = vld [vmem:[%s4487_s12 + $0x108] sm:$0xff]  ;;  %226 = vst [vmem:[%s4492_s13 + $0x78] sm:$0xff] %v225_v16  ;;  %v231_v19 = vld [vmem:[%s4487_s12 + $0x110] sm:$0xff] }
  0x22   : > { %228 = vst [vmem:[%s4492_s13 + $0x80] sm:$0xff] %v227_v17  ;;  %230 = vst [vmem:[%s4492_s13 + $0x88] sm:$0xff] %v229_v18  ;;  %v233_v20 = vld [vmem:[%s4487_s12 + $0x118] sm:$0xff]  ;;  %v235_v21 = vld [vmem:[%s4487_s12 + $0x120] sm:$0xff] }
  0x23   : > { %232 = vst [vmem:[%s4492_s13 + $0x90] sm:$0xff] %v231_v19  ;;  %234 = vst [vmem:[%s4492_s13 + $0x98] sm:$0xff] %v233_v20  ;;  %v237_v22 = vld [vmem:[%s4487_s12 + $0x128] sm:$0xff]  ;;  %v239_v23 = vld [vmem:[%s4487_s12 + $0x130] sm:$0xff] }
  0x24   : > { %236 = vst [vmem:[%s4492_s13 + $0xa0] sm:$0xff] %v235_v21  ;;  %v241_v24 = vld [vmem:[%s4487_s12 + $0x138] sm:$0xff]  ;;  %238 = vst [vmem:[%s4492_s13 + $0xa8] sm:$0xff] %v237_v22  ;;  %v243_v25 = vld [vmem:[%s4487_s12 + $0x180] sm:$0xff] }
  0x25   : > { %240 = vst [vmem:[%s4492_s13 + $0xb0] sm:$0xff] %v239_v23  ;;  %242 = vst [vmem:[%s4492_s13 + $0xb8] sm:$0xff] %v241_v24  ;;  %v245_v26 = vld [vmem:[%s4487_s12 + $0x188] sm:$0xff]  ;;  %v247_v27 = vld [vmem:[%s4487_s12 + $0x190] sm:$0xff] }
  0x26   : > { %244 = vst [vmem:[%s4492_s13 + $0xc0] sm:$0xff] %v243_v25  ;;  %246 = vst [vmem:[%s4492_s13 + $0xc8] sm:$0xff] %v245_v26  ;;  %v249_v28 = vld [vmem:[%s4487_s12 + $0x198] sm:$0xff]  ;;  %v251_v29 = vld [vmem:[%s4487_s12 + $0x1a0] sm:$0xff] }
  0x27   : > { %248 = vst [vmem:[%s4492_s13 + $0xd0] sm:$0xff] %v247_v27  ;;  %v253_v30 = vld [vmem:[%s4487_s12 + $0x1a8] sm:$0xff]  ;;  %250 = vst [vmem:[%s4492_s13 + $0xd8] sm:$0xff] %v249_v28  ;;  %v255_v31 = vld [vmem:[%s4487_s12 + $0x1b0] sm:$0xff] }
  0x28   : > { %252 = vst [vmem:[%s4492_s13 + $0xe0] sm:$0xff] %v251_v29  ;;  %254 = vst [vmem:[%s4492_s13 + $0xe8] sm:$0xff] %v253_v30  ;;  %v257_v32 = vld [vmem:[%s4487_s12 + $0x1b8] sm:$0xff]  ;;  %v259_v33 = vld [vmem:[%s4487_s12 + $0x200] sm:$0xff] }
  0x29   : > { %256 = vst [vmem:[%s4492_s13 + $0xf0] sm:$0xff] %v255_v31  ;;  %258 = vst [vmem:[%s4492_s13 + $0xf8] sm:$0xff] %v257_v32  ;;  %v261_v34 = vld [vmem:[%s4487_s12 + $0x208] sm:$0xff]  ;;  %v263_v35 = vld [vmem:[%s4487_s12 + $0x210] sm:$0xff] }
  0x2a   : > { %260 = vst [vmem:[%s4492_s13 + $0x100] sm:$0xff] %v259_v33  ;;  %v265_v36 = vld [vmem:[%s4487_s12 + $0x218] sm:$0xff]  ;;  %262 = vst [vmem:[%s4492_s13 + $0x108] sm:$0xff] %v261_v34  ;;  %v267_v37 = vld [vmem:[%s4487_s12 + $0x220] sm:$0xff] }
  0x2b   : > { %264 = vst [vmem:[%s4492_s13 + $0x110] sm:$0xff] %v263_v35  ;;  %266 = vst [vmem:[%s4492_s13 + $0x118] sm:$0xff] %v265_v36  ;;  %v269_v38 = vld [vmem:[%s4487_s12 + $0x228] sm:$0xff]  ;;  %v271_v39 = vld [vmem:[%s4487_s12 + $0x230] sm:$0xff] }
  0x2c   : > { %268 = vst [vmem:[%s4492_s13 + $0x120] sm:$0xff] %v267_v37  ;;  %270 = vst [vmem:[%s4492_s13 + $0x128] sm:$0xff] %v269_v38  ;;  %v273_v40 = vld [vmem:[%s4487_s12 + $0x238] sm:$0xff]  ;;  %v275_v41 = vld [vmem:[%s4487_s12 + $0x280] sm:$0xff] }
  0x2d   : > { %272 = vst [vmem:[%s4492_s13 + $0x130] sm:$0xff] %v271_v39  ;;  %v277_v42 = vld [vmem:[%s4487_s12 + $0x288] sm:$0xff]  ;;  %274 = vst [vmem:[%s4492_s13 + $0x138] sm:$0xff] %v273_v40  ;;  %v279_v43 = vld [vmem:[%s4487_s12 + $0x290] sm:$0xff] }
  0x2e   : > { %276 = vst [vmem:[%s4492_s13 + $0x140] sm:$0xff] %v275_v41  ;;  %278 = vst [vmem:[%s4492_s13 + $0x148] sm:$0xff] %v277_v42  ;;  %v281_v44 = vld [vmem:[%s4487_s12 + $0x298] sm:$0xff]  ;;  %v283_v45 = vld [vmem:[%s4487_s12 + $0x2a0] sm:$0xff] }
  0x2f   : > { %280 = vst [vmem:[%s4492_s13 + $0x150] sm:$0xff] %v279_v43  ;;  %282 = vst [vmem:[%s4492_s13 + $0x158] sm:$0xff] %v281_v44  ;;  %v285_v46 = vld [vmem:[%s4487_s12 + $0x2a8] sm:$0xff]  ;;  %v287_v47 = vld [vmem:[%s4487_s12 + $0x2b0] sm:$0xff] }
  0x30   : > { %284 = vst [vmem:[%s4492_s13 + $0x160] sm:$0xff] %v283_v45  ;;  %v289_v48 = vld [vmem:[%s4487_s12 + $0x2b8] sm:$0xff]  ;;  %286 = vst [vmem:[%s4492_s13 + $0x168] sm:$0xff] %v285_v46  ;;  %v291_v49 = vld [vmem:[%s4487_s12 + $0x300] sm:$0xff] }
  0x31   : > { %288 = vst [vmem:[%s4492_s13 + $0x170] sm:$0xff] %v287_v47  ;;  %290 = vst [vmem:[%s4492_s13 + $0x178] sm:$0xff] %v289_v48  ;;  %v293_v50 = vld [vmem:[%s4487_s12 + $0x308] sm:$0xff]  ;;  %v295_v51 = vld [vmem:[%s4487_s12 + $0x310] sm:$0xff] }
  0x32   : > { %292 = vst [vmem:[%s4492_s13 + $0x180] sm:$0xff] %v291_v49  ;;  %294 = vst [vmem:[%s4492_s13 + $0x188] sm:$0xff] %v293_v50  ;;  %v297_v52 = vld [vmem:[%s4487_s12 + $0x318] sm:$0xff]  ;;  %v299_v53 = vld [vmem:[%s4487_s12 + $0x320] sm:$0xff] }
  0x33   : > { %296 = vst [vmem:[%s4492_s13 + $0x190] sm:$0xff] %v295_v51  ;;  %v301_v54 = vld [vmem:[%s4487_s12 + $0x328] sm:$0xff]  ;;  %298 = vst [vmem:[%s4492_s13 + $0x198] sm:$0xff] %v297_v52  ;;  %v303_v55 = vld [vmem:[%s4487_s12 + $0x330] sm:$0xff] }
  0x34   : > { %300 = vst [vmem:[%s4492_s13 + $0x1a0] sm:$0xff] %v299_v53  ;;  %302 = vst [vmem:[%s4492_s13 + $0x1a8] sm:$0xff] %v301_v54  ;;  %v305_v56 = vld [vmem:[%s4487_s12 + $0x338] sm:$0xff]  ;;  %v307_v57 = vld [vmem:[%s4487_s12 + $0x380] sm:$0xff] }
  0x35   : > { %304 = vst [vmem:[%s4492_s13 + $0x1b0] sm:$0xff] %v303_v55  ;;  %306 = vst [vmem:[%s4492_s13 + $0x1b8] sm:$0xff] %v305_v56  ;;  %v309_v58 = vld [vmem:[%s4487_s12 + $0x388] sm:$0xff]  ;;  %v311_v59 = vld [vmem:[%s4487_s12 + $0x390] sm:$0xff] }
  0x36   : > { %308 = vst [vmem:[%s4492_s13 + $0x1c0] sm:$0xff] %v307_v57  ;;  %v313_v60 = vld [vmem:[%s4487_s12 + $0x398] sm:$0xff]  ;;  %310 = vst [vmem:[%s4492_s13 + $0x1c8] sm:$0xff] %v309_v58  ;;  %v315_v61 = vld [vmem:[%s4487_s12 + $0x3a0] sm:$0xff] }
  0x37   : > { %312 = vst [vmem:[%s4492_s13 + $0x1d0] sm:$0xff] %v311_v59  ;;  %314 = vst [vmem:[%s4492_s13 + $0x1d8] sm:$0xff] %v313_v60  ;;  %v317_v62 = vld [vmem:[%s4487_s12 + $0x3a8] sm:$0xff]  ;;  %v319_v63 = vld [vmem:[%s4487_s12 + $0x3b0] sm:$0xff] }
  0x38   : > { %316 = vst [vmem:[%s4492_s13 + $0x1e0] sm:$0xff] %v315_v61  ;;  %318 = vst [vmem:[%s4492_s13 + $0x1e8] sm:$0xff] %v317_v62  ;;  %v321_v0 = vld [vmem:[%s4487_s12 + $0x3b8] sm:$0xff]  ;;  %v323_v1 = vld [vmem:[%s4487_s12 + $0x400] sm:$0xff] }
  0x39   : > { %320 = vst [vmem:[%s4492_s13 + $0x1f0] sm:$0xff] %v319_v63  ;;  %v325_v2 = vld [vmem:[%s4487_s12 + $0x408] sm:$0xff]  ;;  %322 = vst [vmem:[%s4492_s13 + $0x1f8] sm:$0xff] %v321_v0  ;;  %v327_v3 = vld [vmem:[%s4487_s12 + $0x410] sm:$0xff] }
  0x3a   : > { %324 = vst [vmem:[%s4492_s13 + $0x200] sm:$0xff] %v323_v1  ;;  %326 = vst [vmem:[%s4492_s13 + $0x208] sm:$0xff] %v325_v2  ;;  %v329_v4 = vld [vmem:[%s4487_s12 + $0x418] sm:$0xff]  ;;  %v331_v5 = vld [vmem:[%s4487_s12 + $0x420] sm:$0xff] }
  0x3b   : > { %328 = vst [vmem:[%s4492_s13 + $0x210] sm:$0xff] %v327_v3  ;;  %330 = vst [vmem:[%s4492_s13 + $0x218] sm:$0xff] %v329_v4  ;;  %v333_v6 = vld [vmem:[%s4487_s12 + $0x428] sm:$0xff]  ;;  %v335_v7 = vld [vmem:[%s4487_s12 + $0x430] sm:$0xff] }
  0x3c   : > { %332 = vst [vmem:[%s4492_s13 + $0x220] sm:$0xff] %v331_v5  ;;  %v337_v8 = vld [vmem:[%s4487_s12 + $0x438] sm:$0xff]  ;;  %334 = vst [vmem:[%s4492_s13 + $0x228] sm:$0xff] %v333_v6  ;;  %v339_v9 = vld [vmem:[%s4487_s12 + $0x480] sm:$0xff] }
  0x3d   : > { %336 = vst [vmem:[%s4492_s13 + $0x230] sm:$0xff] %v335_v7  ;;  %338 = vst [vmem:[%s4492_s13 + $0x238] sm:$0xff] %v337_v8  ;;  %v341_v10 = vld [vmem:[%s4487_s12 + $0x488] sm:$0xff]  ;;  %v343_v11 = vld [vmem:[%s4487_s12 + $0x490] sm:$0xff] }
  0x3e   : > { %340 = vst [vmem:[%s4492_s13 + $0x240] sm:$0xff] %v339_v9  ;;  %342 = vst [vmem:[%s4492_s13 + $0x248] sm:$0xff] %v341_v10  ;;  %v345_v12 = vld [vmem:[%s4487_s12 + $0x498] sm:$0xff]  ;;  %v347_v13 = vld [vmem:[%s4487_s12 + $0x4a0] sm:$0xff] }
  0x3f   : > { %344 = vst [vmem:[%s4492_s13 + $0x250] sm:$0xff] %v343_v11  ;;  %v349_v14 = vld [vmem:[%s4487_s12 + $0x4a8] sm:$0xff]  ;;  %346 = vst [vmem:[%s4492_s13 + $0x258] sm:$0xff] %v345_v12  ;;  %v351_v15 = vld [vmem:[%s4487_s12 + $0x4b0] sm:$0xff] }
  0x40   : > { %348 = vst [vmem:[%s4492_s13 + $0x260] sm:$0xff] %v347_v13  ;;  %350 = vst [vmem:[%s4492_s13 + $0x268] sm:$0xff] %v349_v14  ;;  %v353_v16 = vld [vmem:[%s4487_s12 + $0x4b8] sm:$0xff]  ;;  %v355_v17 = vld [vmem:[%s4487_s12 + $0x500] sm:$0xff] }
  0x41   : > { %352 = vst [vmem:[%s4492_s13 + $0x270] sm:$0xff] %v351_v15  ;;  %354 = vst [vmem:[%s4492_s13 + $0x278] sm:$0xff] %v353_v16  ;;  %v357_v18 = vld [vmem:[%s4487_s12 + $0x508] sm:$0xff]  ;;  %v359_v19 = vld [vmem:[%s4487_s12 + $0x510] sm:$0xff] }
  0x42   : > { %356 = vst [vmem:[%s4492_s13 + $0x280] sm:$0xff] %v355_v17  ;;  %v361_v20 = vld [vmem:[%s4487_s12 + $0x518] sm:$0xff]  ;;  %358 = vst [vmem:[%s4492_s13 + $0x288] sm:$0xff] %v357_v18  ;;  %v363_v21 = vld [vmem:[%s4487_s12 + $0x520] sm:$0xff] }
  0x43   : > { %360 = vst [vmem:[%s4492_s13 + $0x290] sm:$0xff] %v359_v19  ;;  %362 = vst [vmem:[%s4492_s13 + $0x298] sm:$0xff] %v361_v20  ;;  %v365_v22 = vld [vmem:[%s4487_s12 + $0x528] sm:$0xff]  ;;  %v367_v23 = vld [vmem:[%s4487_s12 + $0x530] sm:$0xff] }
  0x44   : > { %364 = vst [vmem:[%s4492_s13 + $0x2a0] sm:$0xff] %v363_v21  ;;  %366 = vst [vmem:[%s4492_s13 + $0x2a8] sm:$0xff] %v365_v22  ;;  %v369_v24 = vld [vmem:[%s4487_s12 + $0x538] sm:$0xff]  ;;  %v371_v25 = vld [vmem:[%s4487_s12 + $0x580] sm:$0xff] }
  0x45   : > { %368 = vst [vmem:[%s4492_s13 + $0x2b0] sm:$0xff] %v367_v23  ;;  %v373_v26 = vld [vmem:[%s4487_s12 + $0x588] sm:$0xff]  ;;  %370 = vst [vmem:[%s4492_s13 + $0x2b8] sm:$0xff] %v369_v24  ;;  %v375_v27 = vld [vmem:[%s4487_s12 + $0x590] sm:$0xff] }
  0x46   : > { %372 = vst [vmem:[%s4492_s13 + $0x2c0] sm:$0xff] %v371_v25  ;;  %374 = vst [vmem:[%s4492_s13 + $0x2c8] sm:$0xff] %v373_v26  ;;  %v377_v28 = vld [vmem:[%s4487_s12 + $0x598] sm:$0xff]  ;;  %v379_v29 = vld [vmem:[%s4487_s12 + $0x5a0] sm:$0xff] }
  0x47   : > { %376 = vst [vmem:[%s4492_s13 + $0x2d0] sm:$0xff] %v375_v27  ;;  %378 = vst [vmem:[%s4492_s13 + $0x2d8] sm:$0xff] %v377_v28  ;;  %v381_v30 = vld [vmem:[%s4487_s12 + $0x5a8] sm:$0xff]  ;;  %v383_v31 = vld [vmem:[%s4487_s12 + $0x5b0] sm:$0xff] }
  0x48   : > { %380 = vst [vmem:[%s4492_s13 + $0x2e0] sm:$0xff] %v379_v29  ;;  %v385_v32 = vld [vmem:[%s4487_s12 + $0x5b8] sm:$0xff]  ;;  %382 = vst [vmem:[%s4492_s13 + $0x2e8] sm:$0xff] %v381_v30  ;;  %v387_v33 = vld [vmem:[%s4487_s12 + $0x600] sm:$0xff] }
  0x49   : > { %384 = vst [vmem:[%s4492_s13 + $0x2f0] sm:$0xff] %v383_v31  ;;  %386 = vst [vmem:[%s4492_s13 + $0x2f8] sm:$0xff] %v385_v32  ;;  %v389_v34 = vld [vmem:[%s4487_s12 + $0x608] sm:$0xff]  ;;  %v391_v35 = vld [vmem:[%s4487_s12 + $0x610] sm:$0xff] }
  0x4a   : > { %388 = vst [vmem:[%s4492_s13 + $0x300] sm:$0xff] %v387_v33  ;;  %390 = vst [vmem:[%s4492_s13 + $0x308] sm:$0xff] %v389_v34  ;;  %v393_v36 = vld [vmem:[%s4487_s12 + $0x618] sm:$0xff]  ;;  %v395_v37 = vld [vmem:[%s4487_s12 + $0x620] sm:$0xff] }
  0x4b   : > { %392 = vst [vmem:[%s4492_s13 + $0x310] sm:$0xff] %v391_v35  ;;  %v397_v38 = vld [vmem:[%s4487_s12 + $0x628] sm:$0xff]  ;;  %394 = vst [vmem:[%s4492_s13 + $0x318] sm:$0xff] %v393_v36  ;;  %v399_v39 = vld [vmem:[%s4487_s12 + $0x630] sm:$0xff] }
  0x4c   : > { %396 = vst [vmem:[%s4492_s13 + $0x320] sm:$0xff] %v395_v37  ;;  %398 = vst [vmem:[%s4492_s13 + $0x328] sm:$0xff] %v397_v38  ;;  %v401_v40 = vld [vmem:[%s4487_s12 + $0x638] sm:$0xff]  ;;  %v403_v41 = vld [vmem:[%s4487_s12 + $0x680] sm:$0xff] }
  0x4d   : > { %400 = vst [vmem:[%s4492_s13 + $0x330] sm:$0xff] %v399_v39  ;;  %402 = vst [vmem:[%s4492_s13 + $0x338] sm:$0xff] %v401_v40  ;;  %v405_v42 = vld [vmem:[%s4487_s12 + $0x688] sm:$0xff]  ;;  %v407_v43 = vld [vmem:[%s4487_s12 + $0x690] sm:$0xff] }
  0x4e   : > { %404 = vst [vmem:[%s4492_s13 + $0x340] sm:$0xff] %v403_v41  ;;  %v409_v44 = vld [vmem:[%s4487_s12 + $0x698] sm:$0xff]  ;;  %406 = vst [vmem:[%s4492_s13 + $0x348] sm:$0xff] %v405_v42  ;;  %v411_v45 = vld [vmem:[%s4487_s12 + $0x6a0] sm:$0xff] }
  0x4f   : > { %408 = vst [vmem:[%s4492_s13 + $0x350] sm:$0xff] %v407_v43  ;;  %410 = vst [vmem:[%s4492_s13 + $0x358] sm:$0xff] %v409_v44  ;;  %v413_v46 = vld [vmem:[%s4487_s12 + $0x6a8] sm:$0xff]  ;;  %v415_v47 = vld [vmem:[%s4487_s12 + $0x6b0] sm:$0xff] }
  0x50   : > { %412 = vst [vmem:[%s4492_s13 + $0x360] sm:$0xff] %v411_v45  ;;  %414 = vst [vmem:[%s4492_s13 + $0x368] sm:$0xff] %v413_v46  ;;  %v417_v48 = vld [vmem:[%s4487_s12 + $0x6b8] sm:$0xff]  ;;  %v419_v49 = vld [vmem:[%s4487_s12 + $0x700] sm:$0xff] }
  0x51   : > { %416 = vst [vmem:[%s4492_s13 + $0x370] sm:$0xff] %v415_v47  ;;  %v421_v50 = vld [vmem:[%s4487_s12 + $0x708] sm:$0xff]  ;;  %418 = vst [vmem:[%s4492_s13 + $0x378] sm:$0xff] %v417_v48  ;;  %v423_v51 = vld [vmem:[%s4487_s12 + $0x710] sm:$0xff] }
  0x52   : > { %420 = vst [vmem:[%s4492_s13 + $0x380] sm:$0xff] %v419_v49  ;;  %422 = vst [vmem:[%s4492_s13 + $0x388] sm:$0xff] %v421_v50  ;;  %v425_v52 = vld [vmem:[%s4487_s12 + $0x718] sm:$0xff]  ;;  %v427_v53 = vld [vmem:[%s4487_s12 + $0x720] sm:$0xff] }
  0x53   : > { %424 = vst [vmem:[%s4492_s13 + $0x390] sm:$0xff] %v423_v51  ;;  %426 = vst [vmem:[%s4492_s13 + $0x398] sm:$0xff] %v425_v52  ;;  %v429_v54 = vld [vmem:[%s4487_s12 + $0x728] sm:$0xff]  ;;  %v431_v55 = vld [vmem:[%s4487_s12 + $0x730] sm:$0xff] }
  0x54   : > { %428 = vst [vmem:[%s4492_s13 + $0x3a0] sm:$0xff] %v427_v53  ;;  %v433_v56 = vld [vmem:[%s4487_s12 + $0x738] sm:$0xff]  ;;  %430 = vst [vmem:[%s4492_s13 + $0x3a8] sm:$0xff] %v429_v54  ;;  %v435_v57 = vld [vmem:[%s4487_s12 + $0x780] sm:$0xff] }
  0x55   : > { %432 = vst [vmem:[%s4492_s13 + $0x3b0] sm:$0xff] %v431_v55  ;;  %434 = vst [vmem:[%s4492_s13 + $0x3b8] sm:$0xff] %v433_v56  ;;  %v437_v58 = vld [vmem:[%s4487_s12 + $0x788] sm:$0xff]  ;;  %v439_v59 = vld [vmem:[%s4487_s12 + $0x790] sm:$0xff] }
  0x56   : > { %436 = vst [vmem:[%s4492_s13 + $0x3c0] sm:$0xff] %v435_v57  ;;  %438 = vst [vmem:[%s4492_s13 + $0x3c8] sm:$0xff] %v437_v58  ;;  %v441_v60 = vld [vmem:[%s4487_s12 + $0x798] sm:$0xff]  ;;  %v443_v61 = vld [vmem:[%s4487_s12 + $0x7a0] sm:$0xff] }
  0x57   : > { %440 = vst [vmem:[%s4492_s13 + $0x3d0] sm:$0xff] %v439_v59  ;;  %v445_v62 = vld [vmem:[%s4487_s12 + $0x7a8] sm:$0xff]  ;;  %442 = vst [vmem:[%s4492_s13 + $0x3d8] sm:$0xff] %v441_v60  ;;  %v447_v63 = vld [vmem:[%s4487_s12 + $0x7b0] sm:$0xff] }
  0x58   : > { %444 = vst [vmem:[%s4492_s13 + $0x3e0] sm:$0xff] %v443_v61  ;;  %446 = vst [vmem:[%s4492_s13 + $0x3e8] sm:$0xff] %v445_v62  ;;  %v449_v0 = vld [vmem:[%s4487_s12 + $0x7b8] sm:$0xff]  ;;  %v451_v1 = vld [vmem:[%s4487_s12 + $0x800] sm:$0xff] }
  0x59   : > { %448 = vst [vmem:[%s4492_s13 + $0x3f0] sm:$0xff] %v447_v63  ;;  %450 = vst [vmem:[%s4492_s13 + $0x3f8] sm:$0xff] %v449_v0  ;;  %v453_v2 = vld [vmem:[%s4487_s12 + $0x808] sm:$0xff]  ;;  %v455_v3 = vld [vmem:[%s4487_s12 + $0x810] sm:$0xff] }
  0x5a   : > { %452 = vst [vmem:[%s4492_s13 + $0x400] sm:$0xff] %v451_v1  ;;  %v457_v4 = vld [vmem:[%s4487_s12 + $0x818] sm:$0xff]  ;;  %454 = vst [vmem:[%s4492_s13 + $0x408] sm:$0xff] %v453_v2  ;;  %v459_v5 = vld [vmem:[%s4487_s12 + $0x820] sm:$0xff] }
  0x5b   : > { %456 = vst [vmem:[%s4492_s13 + $0x410] sm:$0xff] %v455_v3  ;;  %458 = vst [vmem:[%s4492_s13 + $0x418] sm:$0xff] %v457_v4  ;;  %v461_v6 = vld [vmem:[%s4487_s12 + $0x828] sm:$0xff]  ;;  %v463_v7 = vld [vmem:[%s4487_s12 + $0x830] sm:$0xff] }
  0x5c   : > { %460 = vst [vmem:[%s4492_s13 + $0x420] sm:$0xff] %v459_v5  ;;  %462 = vst [vmem:[%s4492_s13 + $0x428] sm:$0xff] %v461_v6  ;;  %v465_v8 = vld [vmem:[%s4487_s12 + $0x838] sm:$0xff]  ;;  %v467_v9 = vld [vmem:[%s4487_s12 + $0x880] sm:$0xff] }
  0x5d   : > { %464 = vst [vmem:[%s4492_s13 + $0x430] sm:$0xff] %v463_v7  ;;  %v469_v10 = vld [vmem:[%s4487_s12 + $0x888] sm:$0xff]  ;;  %466 = vst [vmem:[%s4492_s13 + $0x438] sm:$0xff] %v465_v8  ;;  %v471_v11 = vld [vmem:[%s4487_s12 + $0x890] sm:$0xff] }
  0x5e   : > { %468 = vst [vmem:[%s4492_s13 + $0x440] sm:$0xff] %v467_v9  ;;  %470 = vst [vmem:[%s4492_s13 + $0x448] sm:$0xff] %v469_v10  ;;  %v473_v12 = vld [vmem:[%s4487_s12 + $0x898] sm:$0xff]  ;;  %v475_v13 = vld [vmem:[%s4487_s12 + $0x8a0] sm:$0xff] }
  0x5f   : > { %472 = vst [vmem:[%s4492_s13 + $0x450] sm:$0xff] %v471_v11  ;;  %474 = vst [vmem:[%s4492_s13 + $0x458] sm:$0xff] %v473_v12  ;;  %v477_v14 = vld [vmem:[%s4487_s12 + $0x8a8] sm:$0xff]  ;;  %v479_v15 = vld [vmem:[%s4487_s12 + $0x8b0] sm:$0xff] }
  0x60   : > { %476 = vst [vmem:[%s4492_s13 + $0x460] sm:$0xff] %v475_v13  ;;  %v481_v16 = vld [vmem:[%s4487_s12 + $0x8b8] sm:$0xff]  ;;  %478 = vst [vmem:[%s4492_s13 + $0x468] sm:$0xff] %v477_v14  ;;  %v483_v17 = vld [vmem:[%s4487_s12 + $0x900] sm:$0xff] }
  0x61   : > { %480 = vst [vmem:[%s4492_s13 + $0x470] sm:$0xff] %v479_v15  ;;  %482 = vst [vmem:[%s4492_s13 + $0x478] sm:$0xff] %v481_v16  ;;  %v485_v18 = vld [vmem:[%s4487_s12 + $0x908] sm:$0xff]  ;;  %v487_v19 = vld [vmem:[%s4487_s12 + $0x910] sm:$0xff] }
  0x62   : > { %484 = vst [vmem:[%s4492_s13 + $0x480] sm:$0xff] %v483_v17  ;;  %486 = vst [vmem:[%s4492_s13 + $0x488] sm:$0xff] %v485_v18  ;;  %v489_v20 = vld [vmem:[%s4487_s12 + $0x918] sm:$0xff]  ;;  %v491_v21 = vld [vmem:[%s4487_s12 + $0x920] sm:$0xff] }
  0x63   : > { %488 = vst [vmem:[%s4492_s13 + $0x490] sm:$0xff] %v487_v19  ;;  %v493_v22 = vld [vmem:[%s4487_s12 + $0x928] sm:$0xff]  ;;  %490 = vst [vmem:[%s4492_s13 + $0x498] sm:$0xff] %v489_v20  ;;  %v495_v23 = vld [vmem:[%s4487_s12 + $0x930] sm:$0xff] }
  0x64   : > { %492 = vst [vmem:[%s4492_s13 + $0x4a0] sm:$0xff] %v491_v21  ;;  %494 = vst [vmem:[%s4492_s13 + $0x4a8] sm:$0xff] %v493_v22  ;;  %v497_v24 = vld [vmem:[%s4487_s12 + $0x938] sm:$0xff]  ;;  %v499_v25 = vld [vmem:[%s4487_s12 + $0x980] sm:$0xff] }
  0x65   : > { %496 = vst [vmem:[%s4492_s13 + $0x4b0] sm:$0xff] %v495_v23  ;;  %498 = vst [vmem:[%s4492_s13 + $0x4b8] sm:$0xff] %v497_v24  ;;  %v501_v26 = vld [vmem:[%s4487_s12 + $0x988] sm:$0xff]  ;;  %v503_v27 = vld [vmem:[%s4487_s12 + $0x990] sm:$0xff] }
  0x66   : > { %500 = vst [vmem:[%s4492_s13 + $0x4c0] sm:$0xff] %v499_v25  ;;  %v505_v28 = vld [vmem:[%s4487_s12 + $0x998] sm:$0xff]  ;;  %502 = vst [vmem:[%s4492_s13 + $0x4c8] sm:$0xff] %v501_v26  ;;  %v507_v29 = vld [vmem:[%s4487_s12 + $0x9a0] sm:$0xff] }
  0x67   : > { %504 = vst [vmem:[%s4492_s13 + $0x4d0] sm:$0xff] %v503_v27  ;;  %506 = vst [vmem:[%s4492_s13 + $0x4d8] sm:$0xff] %v505_v28  ;;  %v509_v30 = vld [vmem:[%s4487_s12 + $0x9a8] sm:$0xff]  ;;  %v511_v31 = vld [vmem:[%s4487_s12 + $0x9b0] sm:$0xff] }
  0x68   : > { %508 = vst [vmem:[%s4492_s13 + $0x4e0] sm:$0xff] %v507_v29  ;;  %510 = vst [vmem:[%s4492_s13 + $0x4e8] sm:$0xff] %v509_v30  ;;  %v513_v32 = vld [vmem:[%s4487_s12 + $0x9b8] sm:$0xff]  ;;  %v515_v33 = vld [vmem:[%s4487_s12 + $0xa00] sm:$0xff] }
  0x69   : > { %512 = vst [vmem:[%s4492_s13 + $0x4f0] sm:$0xff] %v511_v31  ;;  %v517_v34 = vld [vmem:[%s4487_s12 + $0xa08] sm:$0xff]  ;;  %514 = vst [vmem:[%s4492_s13 + $0x4f8] sm:$0xff] %v513_v32  ;;  %v519_v35 = vld [vmem:[%s4487_s12 + $0xa10] sm:$0xff] }
  0x6a   : > { %516 = vst [vmem:[%s4492_s13 + $0x500] sm:$0xff] %v515_v33  ;;  %518 = vst [vmem:[%s4492_s13 + $0x508] sm:$0xff] %v517_v34  ;;  %v521_v36 = vld [vmem:[%s4487_s12 + $0xa18] sm:$0xff]  ;;  %v523_v37 = vld [vmem:[%s4487_s12 + $0xa20] sm:$0xff] }
  0x6b   : > { %520 = vst [vmem:[%s4492_s13 + $0x510] sm:$0xff] %v519_v35  ;;  %522 = vst [vmem:[%s4492_s13 + $0x518] sm:$0xff] %v521_v36  ;;  %v525_v38 = vld [vmem:[%s4487_s12 + $0xa28] sm:$0xff]  ;;  %v527_v39 = vld [vmem:[%s4487_s12 + $0xa30] sm:$0xff] }
  0x6c   : > { %524 = vst [vmem:[%s4492_s13 + $0x520] sm:$0xff] %v523_v37  ;;  %v529_v40 = vld [vmem:[%s4487_s12 + $0xa38] sm:$0xff]  ;;  %526 = vst [vmem:[%s4492_s13 + $0x528] sm:$0xff] %v525_v38  ;;  %v531_v41 = vld [vmem:[%s4487_s12 + $0xa80] sm:$0xff] }
  0x6d   : > { %528 = vst [vmem:[%s4492_s13 + $0x530] sm:$0xff] %v527_v39  ;;  %530 = vst [vmem:[%s4492_s13 + $0x538] sm:$0xff] %v529_v40  ;;  %v533_v42 = vld [vmem:[%s4487_s12 + $0xa88] sm:$0xff]  ;;  %v535_v43 = vld [vmem:[%s4487_s12 + $0xa90] sm:$0xff] }
  0x6e   : > { %532 = vst [vmem:[%s4492_s13 + $0x540] sm:$0xff] %v531_v41  ;;  %534 = vst [vmem:[%s4492_s13 + $0x548] sm:$0xff] %v533_v42  ;;  %v537_v44 = vld [vmem:[%s4487_s12 + $0xa98] sm:$0xff]  ;;  %v539_v45 = vld [vmem:[%s4487_s12 + $0xaa0] sm:$0xff] }
  0x6f   : > { %536 = vst [vmem:[%s4492_s13 + $0x550] sm:$0xff] %v535_v43  ;;  %v541_v46 = vld [vmem:[%s4487_s12 + $0xaa8] sm:$0xff]  ;;  %538 = vst [vmem:[%s4492_s13 + $0x558] sm:$0xff] %v537_v44  ;;  %v543_v47 = vld [vmem:[%s4487_s12 + $0xab0] sm:$0xff] }
  0x70   : > { %540 = vst [vmem:[%s4492_s13 + $0x560] sm:$0xff] %v539_v45  ;;  %542 = vst [vmem:[%s4492_s13 + $0x568] sm:$0xff] %v541_v46  ;;  %v545_v48 = vld [vmem:[%s4487_s12 + $0xab8] sm:$0xff]  ;;  %v547_v49 = vld [vmem:[%s4487_s12 + $0xb00] sm:$0xff] }
  0x71   : > { %544 = vst [vmem:[%s4492_s13 + $0x570] sm:$0xff] %v543_v47  ;;  %546 = vst [vmem:[%s4492_s13 + $0x578] sm:$0xff] %v545_v48  ;;  %v549_v50 = vld [vmem:[%s4487_s12 + $0xb08] sm:$0xff]  ;;  %v551_v51 = vld [vmem:[%s4487_s12 + $0xb10] sm:$0xff] }
  0x72   : > { %548 = vst [vmem:[%s4492_s13 + $0x580] sm:$0xff] %v547_v49  ;;  %v553_v52 = vld [vmem:[%s4487_s12 + $0xb18] sm:$0xff]  ;;  %550 = vst [vmem:[%s4492_s13 + $0x588] sm:$0xff] %v549_v50  ;;  %v555_v53 = vld [vmem:[%s4487_s12 + $0xb20] sm:$0xff] }
  0x73   : > { %552 = vst [vmem:[%s4492_s13 + $0x590] sm:$0xff] %v551_v51  ;;  %554 = vst [vmem:[%s4492_s13 + $0x598] sm:$0xff] %v553_v52  ;;  %v557_v54 = vld [vmem:[%s4487_s12 + $0xb28] sm:$0xff]  ;;  %v559_v55 = vld [vmem:[%s4487_s12 + $0xb30] sm:$0xff] }
  0x74   : > { %556 = vst [vmem:[%s4492_s13 + $0x5a0] sm:$0xff] %v555_v53  ;;  %558 = vst [vmem:[%s4492_s13 + $0x5a8] sm:$0xff] %v557_v54  ;;  %v561_v56 = vld [vmem:[%s4487_s12 + $0xb38] sm:$0xff]  ;;  %v563_v57 = vld [vmem:[%s4487_s12 + $0xb80] sm:$0xff] }
  0x75   : > { %560 = vst [vmem:[%s4492_s13 + $0x5b0] sm:$0xff] %v559_v55  ;;  %v565_v58 = vld [vmem:[%s4487_s12 + $0xb88] sm:$0xff]  ;;  %562 = vst [vmem:[%s4492_s13 + $0x5b8] sm:$0xff] %v561_v56  ;;  %v567_v59 = vld [vmem:[%s4487_s12 + $0xb90] sm:$0xff] }
  0x76   : > { %564 = vst [vmem:[%s4492_s13 + $0x5c0] sm:$0xff] %v563_v57  ;;  %566 = vst [vmem:[%s4492_s13 + $0x5c8] sm:$0xff] %v565_v58  ;;  %v569_v60 = vld [vmem:[%s4487_s12 + $0xb98] sm:$0xff]  ;;  %v571_v61 = vld [vmem:[%s4487_s12 + $0xba0] sm:$0xff] }
  0x77   : > { %568 = vst [vmem:[%s4492_s13 + $0x5d0] sm:$0xff] %v567_v59  ;;  %570 = vst [vmem:[%s4492_s13 + $0x5d8] sm:$0xff] %v569_v60  ;;  %v573_v62 = vld [vmem:[%s4487_s12 + $0xba8] sm:$0xff]  ;;  %v575_v63 = vld [vmem:[%s4487_s12 + $0xbb0] sm:$0xff] }
  0x78   : > { %572 = vst [vmem:[%s4492_s13 + $0x5e0] sm:$0xff] %v571_v61  ;;  %v577_v0 = vld [vmem:[%s4487_s12 + $0xbb8] sm:$0xff]  ;;  %574 = vst [vmem:[%s4492_s13 + $0x5e8] sm:$0xff] %v573_v62  ;;  %v579_v1 = vld [vmem:[%s4487_s12 + $0xc00] sm:$0xff] }
  0x79   : > { %576 = vst [vmem:[%s4492_s13 + $0x5f0] sm:$0xff] %v575_v63  ;;  %578 = vst [vmem:[%s4492_s13 + $0x5f8] sm:$0xff] %v577_v0  ;;  %v581_v2 = vld [vmem:[%s4487_s12 + $0xc08] sm:$0xff]  ;;  %v583_v3 = vld [vmem:[%s4487_s12 + $0xc10] sm:$0xff] }
  0x7a   : > { %580 = vst [vmem:[%s4492_s13 + $0x600] sm:$0xff] %v579_v1  ;;  %582 = vst [vmem:[%s4492_s13 + $0x608] sm:$0xff] %v581_v2  ;;  %v585_v4 = vld [vmem:[%s4487_s12 + $0xc18] sm:$0xff]  ;;  %v587_v5 = vld [vmem:[%s4487_s12 + $0xc20] sm:$0xff] }
  0x7b   : > { %584 = vst [vmem:[%s4492_s13 + $0x610] sm:$0xff] %v583_v3  ;;  %v589_v6 = vld [vmem:[%s4487_s12 + $0xc28] sm:$0xff]  ;;  %586 = vst [vmem:[%s4492_s13 + $0x618] sm:$0xff] %v585_v4  ;;  %v591_v7 = vld [vmem:[%s4487_s12 + $0xc30] sm:$0xff] }
  0x7c   : > { %588 = vst [vmem:[%s4492_s13 + $0x620] sm:$0xff] %v587_v5  ;;  %590 = vst [vmem:[%s4492_s13 + $0x628] sm:$0xff] %v589_v6  ;;  %v593_v8 = vld [vmem:[%s4487_s12 + $0xc38] sm:$0xff]  ;;  %v595_v9 = vld [vmem:[%s4487_s12 + $0xc80] sm:$0xff] }
  0x7d   : > { %592 = vst [vmem:[%s4492_s13 + $0x630] sm:$0xff] %v591_v7  ;;  %594 = vst [vmem:[%s4492_s13 + $0x638] sm:$0xff] %v593_v8  ;;  %v597_v10 = vld [vmem:[%s4487_s12 + $0xc88] sm:$0xff]  ;;  %v599_v11 = vld [vmem:[%s4487_s12 + $0xc90] sm:$0xff] }
  0x7e   : > { %596 = vst [vmem:[%s4492_s13 + $0x640] sm:$0xff] %v595_v9  ;;  %v601_v12 = vld [vmem:[%s4487_s12 + $0xc98] sm:$0xff]  ;;  %598 = vst [vmem:[%s4492_s13 + $0x648] sm:$0xff] %v597_v10  ;;  %v603_v13 = vld [vmem:[%s4487_s12 + $0xca0] sm:$0xff] }
  0x7f   : > { %600 = vst [vmem:[%s4492_s13 + $0x650] sm:$0xff] %v599_v11  ;;  %602 = vst [vmem:[%s4492_s13 + $0x658] sm:$0xff] %v601_v12  ;;  %v605_v14 = vld [vmem:[%s4487_s12 + $0xca8] sm:$0xff]  ;;  %v607_v15 = vld [vmem:[%s4487_s12 + $0xcb0] sm:$0xff] }
  0x80   : > { %604 = vst [vmem:[%s4492_s13 + $0x660] sm:$0xff] %v603_v13  ;;  %606 = vst [vmem:[%s4492_s13 + $0x668] sm:$0xff] %v605_v14  ;;  %v609_v16 = vld [vmem:[%s4487_s12 + $0xcb8] sm:$0xff]  ;;  %v611_v17 = vld [vmem:[%s4487_s12 + $0xd00] sm:$0xff] }
  0x81   : > { %608 = vst [vmem:[%s4492_s13 + $0x670] sm:$0xff] %v607_v15  ;;  %v613_v18 = vld [vmem:[%s4487_s12 + $0xd08] sm:$0xff]  ;;  %610 = vst [vmem:[%s4492_s13 + $0x678] sm:$0xff] %v609_v16  ;;  %v615_v19 = vld [vmem:[%s4487_s12 + $0xd10] sm:$0xff] }
  0x82   : > { %612 = vst [vmem:[%s4492_s13 + $0x680] sm:$0xff] %v611_v17  ;;  %614 = vst [vmem:[%s4492_s13 + $0x688] sm:$0xff] %v613_v18  ;;  %v617_v20 = vld [vmem:[%s4487_s12 + $0xd18] sm:$0xff]  ;;  %v619_v21 = vld [vmem:[%s4487_s12 + $0xd20] sm:$0xff] }
  0x83   : > { %616 = vst [vmem:[%s4492_s13 + $0x690] sm:$0xff] %v615_v19  ;;  %618 = vst [vmem:[%s4492_s13 + $0x698] sm:$0xff] %v617_v20  ;;  %v621_v22 = vld [vmem:[%s4487_s12 + $0xd28] sm:$0xff]  ;;  %v623_v23 = vld [vmem:[%s4487_s12 + $0xd30] sm:$0xff] }
  0x84   : > { %620 = vst [vmem:[%s4492_s13 + $0x6a0] sm:$0xff] %v619_v21  ;;  %v625_v24 = vld [vmem:[%s4487_s12 + $0xd38] sm:$0xff]  ;;  %622 = vst [vmem:[%s4492_s13 + $0x6a8] sm:$0xff] %v621_v22  ;;  %v627_v25 = vld [vmem:[%s4487_s12 + $0xd80] sm:$0xff] }
  0x85   : > { %624 = vst [vmem:[%s4492_s13 + $0x6b0] sm:$0xff] %v623_v23  ;;  %626 = vst [vmem:[%s4492_s13 + $0x6b8] sm:$0xff] %v625_v24  ;;  %v629_v26 = vld [vmem:[%s4487_s12 + $0xd88] sm:$0xff]  ;;  %v631_v27 = vld [vmem:[%s4487_s12 + $0xd90] sm:$0xff] }
  0x86   : > { %628 = vst [vmem:[%s4492_s13 + $0x6c0] sm:$0xff] %v627_v25  ;;  %630 = vst [vmem:[%s4492_s13 + $0x6c8] sm:$0xff] %v629_v26  ;;  %v633_v28 = vld [vmem:[%s4487_s12 + $0xd98] sm:$0xff]  ;;  %v635_v29 = vld [vmem:[%s4487_s12 + $0xda0] sm:$0xff] }
  0x87   : > { %632 = vst [vmem:[%s4492_s13 + $0x6d0] sm:$0xff] %v631_v27  ;;  %v637_v30 = vld [vmem:[%s4487_s12 + $0xda8] sm:$0xff]  ;;  %634 = vst [vmem:[%s4492_s13 + $0x6d8] sm:$0xff] %v633_v28  ;;  %v639_v31 = vld [vmem:[%s4487_s12 + $0xdb0] sm:$0xff] }
  0x88   : > { %636 = vst [vmem:[%s4492_s13 + $0x6e0] sm:$0xff] %v635_v29  ;;  %638 = vst [vmem:[%s4492_s13 + $0x6e8] sm:$0xff] %v637_v30  ;;  %v641_v32 = vld [vmem:[%s4487_s12 + $0xdb8] sm:$0xff]  ;;  %v643_v33 = vld [vmem:[%s4487_s12 + $0xe00] sm:$0xff] }
  0x89   : > { %640 = vst [vmem:[%s4492_s13 + $0x6f0] sm:$0xff] %v639_v31  ;;  %642 = vst [vmem:[%s4492_s13 + $0x6f8] sm:$0xff] %v641_v32  ;;  %v645_v34 = vld [vmem:[%s4487_s12 + $0xe08] sm:$0xff]  ;;  %v647_v35 = vld [vmem:[%s4487_s12 + $0xe10] sm:$0xff] }
  0x8a   : > { %644 = vst [vmem:[%s4492_s13 + $0x700] sm:$0xff] %v643_v33  ;;  %v649_v36 = vld [vmem:[%s4487_s12 + $0xe18] sm:$0xff]  ;;  %646 = vst [vmem:[%s4492_s13 + $0x708] sm:$0xff] %v645_v34  ;;  %v651_v37 = vld [vmem:[%s4487_s12 + $0xe20] sm:$0xff] }
  0x8b   : > { %648 = vst [vmem:[%s4492_s13 + $0x710] sm:$0xff] %v647_v35  ;;  %650 = vst [vmem:[%s4492_s13 + $0x718] sm:$0xff] %v649_v36  ;;  %v653_v38 = vld [vmem:[%s4487_s12 + $0xe28] sm:$0xff]  ;;  %v655_v39 = vld [vmem:[%s4487_s12 + $0xe30] sm:$0xff] }
  0x8c   : > { %652 = vst [vmem:[%s4492_s13 + $0x720] sm:$0xff] %v651_v37  ;;  %654 = vst [vmem:[%s4492_s13 + $0x728] sm:$0xff] %v653_v38  ;;  %v657_v40 = vld [vmem:[%s4487_s12 + $0xe38] sm:$0xff]  ;;  %v659_v41 = vld [vmem:[%s4487_s12 + $0xe80] sm:$0xff] }
  0x8d   : > { %656 = vst [vmem:[%s4492_s13 + $0x730] sm:$0xff] %v655_v39  ;;  %v661_v42 = vld [vmem:[%s4487_s12 + $0xe88] sm:$0xff]  ;;  %658 = vst [vmem:[%s4492_s13 + $0x738] sm:$0xff] %v657_v40  ;;  %v663_v43 = vld [vmem:[%s4487_s12 + $0xe90] sm:$0xff] }
  0x8e   : > { %660 = vst [vmem:[%s4492_s13 + $0x740] sm:$0xff] %v659_v41  ;;  %662 = vst [vmem:[%s4492_s13 + $0x748] sm:$0xff] %v661_v42  ;;  %v665_v44 = vld [vmem:[%s4487_s12 + $0xe98] sm:$0xff]  ;;  %v667_v45 = vld [vmem:[%s4487_s12 + $0xea0] sm:$0xff] }
  0x8f   : > { %664 = vst [vmem:[%s4492_s13 + $0x750] sm:$0xff] %v663_v43  ;;  %666 = vst [vmem:[%s4492_s13 + $0x758] sm:$0xff] %v665_v44  ;;  %v669_v46 = vld [vmem:[%s4487_s12 + $0xea8] sm:$0xff]  ;;  %v671_v47 = vld [vmem:[%s4487_s12 + $0xeb0] sm:$0xff] }
  0x90   : > { %668 = vst [vmem:[%s4492_s13 + $0x760] sm:$0xff] %v667_v45  ;;  %v673_v48 = vld [vmem:[%s4487_s12 + $0xeb8] sm:$0xff]  ;;  %670 = vst [vmem:[%s4492_s13 + $0x768] sm:$0xff] %v669_v46  ;;  %v675_v49 = vld [vmem:[%s4487_s12 + $0xf00] sm:$0xff] }
  0x91   : > { %672 = vst [vmem:[%s4492_s13 + $0x770] sm:$0xff] %v671_v47  ;;  %674 = vst [vmem:[%s4492_s13 + $0x778] sm:$0xff] %v673_v48  ;;  %v677_v50 = vld [vmem:[%s4487_s12 + $0xf08] sm:$0xff]  ;;  %v679_v51 = vld [vmem:[%s4487_s12 + $0xf10] sm:$0xff] }
  0x92   : > { %676 = vst [vmem:[%s4492_s13 + $0x780] sm:$0xff] %v675_v49  ;;  %678 = vst [vmem:[%s4492_s13 + $0x788] sm:$0xff] %v677_v50  ;;  %v681_v52 = vld [vmem:[%s4487_s12 + $0xf18] sm:$0xff]  ;;  %v683_v53 = vld [vmem:[%s4487_s12 + $0xf20] sm:$0xff] }
  0x93   : > { %680 = vst [vmem:[%s4492_s13 + $0x790] sm:$0xff] %v679_v51  ;;  %v685_v54 = vld [vmem:[%s4487_s12 + $0xf28] sm:$0xff]  ;;  %682 = vst [vmem:[%s4492_s13 + $0x798] sm:$0xff] %v681_v52  ;;  %v687_v55 = vld [vmem:[%s4487_s12 + $0xf30] sm:$0xff] }
  0x94   : > { %684 = vst [vmem:[%s4492_s13 + $0x7a0] sm:$0xff] %v683_v53  ;;  %686 = vst [vmem:[%s4492_s13 + $0x7a8] sm:$0xff] %v685_v54  ;;  %v689_v56 = vld [vmem:[%s4487_s12 + $0xf38] sm:$0xff]  ;;  %v691_v57 = vld [vmem:[%s4487_s12 + $0xf80] sm:$0xff] }
  0x95   : > { %688 = vst [vmem:[%s4492_s13 + $0x7b0] sm:$0xff] %v687_v55  ;;  %690 = vst [vmem:[%s4492_s13 + $0x7b8] sm:$0xff] %v689_v56  ;;  %v693_v58 = vld [vmem:[%s4487_s12 + $0xf88] sm:$0xff]  ;;  %v695_v59 = vld [vmem:[%s4487_s12 + $0xf90] sm:$0xff] }
  0x96   : > { %692 = vst [vmem:[%s4492_s13 + $0x7c0] sm:$0xff] %v691_v57  ;;  %v697_v60 = vld [vmem:[%s4487_s12 + $0xf98] sm:$0xff]  ;;  %694 = vst [vmem:[%s4492_s13 + $0x7c8] sm:$0xff] %v693_v58  ;;  %v699_v61 = vld [vmem:[%s4487_s12 + $0xfa0] sm:$0xff] }
  0x97   : > { %696 = vst [vmem:[%s4492_s13 + $0x7d0] sm:$0xff] %v695_v59  ;;  %698 = vst [vmem:[%s4492_s13 + $0x7d8] sm:$0xff] %v697_v60  ;;  %v701_v62 = vld [vmem:[%s4487_s12 + $0xfa8] sm:$0xff]  ;;  %v703_v63 = vld [vmem:[%s4487_s12 + $0xfb0] sm:$0xff] }
  0x98   : > { %700 = vst [vmem:[%s4492_s13 + $0x7e0] sm:$0xff] %v699_v61  ;;  %702 = vst [vmem:[%s4492_s13 + $0x7e8] sm:$0xff] %v701_v62  ;;  %v705_v0 = vld [vmem:[%s4487_s12 + $0xfb8] sm:$0xff] }
  0x99   : > { %704 = vst [vmem:[%s4492_s13 + $0x7f0] sm:$0xff] %v703_v63  ;;  %706 = vst [vmem:[%s4492_s13 + $0x7f8] sm:$0xff] %v705_v0 }
  0x9a PF: > { %p4275_p7 = scmp.ge.s32.totalorder %s4395_s23, 1  ;;  %p711_p8 = scmp.lt.s32.totalorder %s4395_s23, 5 }
  0x9c   : > { %p712_p9 = pnand %p4275_p7, %p711_p8 }
  0x9e   : > { %715 = sbr.rel (%p712_p9) target bundleno = 968 (0x3c8), region = 55 }
  0xa3   : > { %v1526_v1 = vld [vmem:[%s9825_s1 + $0x10] sm:$0xff]  ;;  %v1524_v2 = vld [vmem:[%s9825_s1] sm:$0xff]  ;;  %v4397_v3 = vmov 0   ;;  %v1527_v4 = vld [vmem:[%s9825_s1 + $0x18] sm:$0xff]  ;;  %s718_s6 = sand.u32 1, %s4371_s17   ;;  %p748_p10 = scmp.lt.s32.totalorder %s4383_s20, 1 }
  0xa4   : > { %4340 = vset.pattern.permute.xlu1 %v4397_v3  ;;  %4339 = vset.pattern.permute.xlu0 %v4397_v3  ;;  %v1525_v5 = vld [vmem:[%s9825_s1 + $0x8] sm:$0xff]  ;;  %v1528_v7 = vld [vmem:[%s9825_s1 + $0x20] sm:$0xff]  ;;  %v1531_v8 = vld [vmem:[%s9825_s1 + $0x38] sm:$0xff]  ;;  %s4276_s11 = sshll.u32 %s718_s6, 11 }
  0xa5   : > { %1568 = vperm.xlu1 %4340, %v1526_v1   ;;  %1558 = vperm.xlu0 %4339, %v1524_v2   ;;  %v1529_v6 = vld [vmem:[%s9825_s1 + $0x28] sm:$0xff]  ;;  %v1530_v9 = vld [vmem:[%s9825_s1 + $0x30] sm:$0xff]  ;;  %v1532_v11 = vld [vmem:[%s9825_s1 + $0x40] sm:$0xff]  ;;  %s5108_s17 = scalar_lea.vmem [#allocation3], %s4276_s11  ;;  %s12355_s20 = smov (!%p748_p10, %s4383_s20), 1 }
  0xa6   : > { %v1533_v10 = vld [vmem:[%s9825_s1 + $0x48] sm:$0xff]  ;;  %v1535_v12 = vld [vmem:[%s9825_s1 + $0x58] sm:$0xff]  ;;  %v1534_v13 = vld [vmem:[%s9825_s1 + $0x50] sm:$0xff] }
  0xa7   : > { %v1537_v14 = vld [vmem:[%s9825_s1 + $0x68] sm:$0xff]  ;;  %v1536_v15 = vld [vmem:[%s9825_s1 + $0x60] sm:$0xff]  ;;  %v1539_v16 = vld [vmem:[%s9825_s1 + $0x78] sm:$0xff] }
  0xa8   : > { %v1538_v17 = vld [vmem:[%s9825_s1 + $0x70] sm:$0xff]  ;;  %v1541_v18 = vld [vmem:[%s9825_s1 + $0x88] sm:$0xff]  ;;  %v1540_v19 = vld [vmem:[%s9825_s1 + $0x80] sm:$0xff] }
  0xa9   : > { %1573 = vperm.xlu1 %4340, %v1527_v4   ;;  %1563 = vperm.xlu0 %4339, %v1525_v5   ;;  %v1543_v20 = vld [vmem:[%s9825_s1 + $0x98] sm:$0xff]  ;;  %v1542_v21 = vld [vmem:[%s9825_s1 + $0x90] sm:$0xff]  ;;  %v1545_v22 = vld [vmem:[%s9825_s1 + $0xa8] sm:$0xff] }
  0xaa   : > { %v1544_v23 = vld [vmem:[%s9825_s1 + $0xa0] sm:$0xff]  ;;  %v1547_v24 = vld [vmem:[%s9825_s1 + $0xb8] sm:$0xff]  ;;  %v1546_v25 = vld [vmem:[%s9825_s1 + $0xb0] sm:$0xff] }
  0xab   : > { %v1549_v26 = vld [vmem:[%s9825_s1 + $0xc8] sm:$0xff]  ;;  %v1548_v27 = vld [vmem:[%s9825_s1 + $0xc0] sm:$0xff]  ;;  %v1551_v28 = vld [vmem:[%s9825_s1 + $0xd8] sm:$0xff] }
  0xac   : > { %v1550_v29 = vld [vmem:[%s9825_s1 + $0xd0] sm:$0xff]  ;;  %v2741_v30 = vld [vmem:[%s9826_s2 + $0x8] sm:$0xff]  ;;  %v2740_v31 = vld [vmem:[%s9826_s2] sm:$0xff] }
  0xad   : > { %1583 = vperm.xlu1 %4340, %v1529_v6   ;;  %1578 = vperm.xlu0 %4339, %v1528_v7   ;;  %v2743_v32 = vld [vmem:[%s9826_s2 + $0x18] sm:$0xff]  ;;  %v2742_v33 = vld [vmem:[%s9826_s2 + $0x10] sm:$0xff]  ;;  %v2745_v34 = vld [vmem:[%s9826_s2 + $0x28] sm:$0xff] }
  0xae   : > { %v2744_v35 = vld [vmem:[%s9826_s2 + $0x20] sm:$0xff]  ;;  %v5114_v37 = vld [vmem:[%s5108_s17 + $0x88] sm:$0xff]  ;;  %v5117_v38 = vld [vmem:[%s5108_s17 + $0x90] sm:$0xff] }
  0xaf   : > { %v5111_v36 = vld [vmem:[%s5108_s17 + $0x80] sm:$0xff]  ;;  %v5120_v39 = vld [vmem:[%s5108_s17 + $0x98] sm:$0xff]  ;;  %v5129_v42 = vld [vmem:[%s5108_s17 + $0xa8] sm:$0xff] }
  0xb0   : > { %v2747_v40 = vld [vmem:[%s9826_s2 + $0x38] sm:$0xff]  ;;  %v5126_v41 = vld [vmem:[%s5108_s17 + $0xa0] sm:$0xff]  ;;  %v2746_v43 = vld [vmem:[%s9826_s2 + $0x30] sm:$0xff] }
  0xb1   : > { %1593 = vperm.xlu1 %4340, %v1531_v8   ;;  %1588 = vperm.xlu0 %4339, %v1530_v9   ;;  %v5135_v44 = vld [vmem:[%s5108_s17 + $0xb0] sm:$0xff]  ;;  %v5138_v45 = vld [vmem:[%s5108_s17 + $0xb8] sm:$0xff]  ;;  %v5149_v54 = vld [vmem:[%s5108_s17] sm:$0xff] }
  0xb2   : > { %v5152_v55 = vld [vmem:[%s5108_s17 + $0x8] sm:$0xff]  ;;  %v5159_v60 = vld [vmem:[%s5108_s17 + $0x10] sm:$0xff]  ;;  %v5162_v61 = vld [vmem:[%s5108_s17 + $0x18] sm:$0xff] }
  0xb3   : > { %v2749_v62 = vld [vmem:[%s9826_s2 + $0x48] sm:$0xff]  ;;  %v2748_v5 = vld [vmem:[%s9826_s2 + $0x40] sm:$0xff]  ;;  %v5181_v6 = vld [vmem:[%s5108_s17 + $0x30] sm:$0xff] }
  0xb4   : > { %v5172_v3 = vld [vmem:[%s5108_s17 + $0x20] sm:$0xff]  ;;  %v5175_v4 = vld [vmem:[%s5108_s17 + $0x28] sm:$0xff]  ;;  %v5184_v7 = vld [vmem:[%s5108_s17 + $0x38] sm:$0xff] }
  0xb5   : > { %1603 = vperm.xlu1 %4340, %v1533_v10   ;;  %1598 = vperm.xlu0 %4339, %v1532_v11   ;;  %v5313_v11 = vld [vmem:[%s5108_s17 + $0x168] sm:$0xff]  ;;  %v5333_v0 = vld [vmem:[%s5108_s17 + $0x100] sm:$0xff]  ;;  %v5343_v10 = vld [vmem:[%s5108_s17 + $0x110] sm:$0xff] }
  0xb6   : > { %v5336_v63 = vld [vmem:[%s5108_s17 + $0x108] sm:$0xff]  ;;  %v5346_v2 = vld [vmem:[%s5108_s17 + $0x118] sm:$0xff]  ;;  %v5356_v9 = vld [vmem:[%s5108_s17 + $0x120] sm:$0xff] }
  0xb7   : > { %v2757_v1 = vld [vmem:[%s9826_s2 + $0x88] sm:$0xff]  ;;  %10413 = vst [vmem:[#allocation4_spill] sm:$0xff] %v5356_v9  ;;  %v5389_v58 = vld [vmem:[%s5108_s17 + $0x1d0] sm:$0xff]  ;;  %v5392_v53 = vld [vmem:[%s5108_s17 + $0x1d8] sm:$0xff] }
  0xb8   : > { %v5359_v59 = vld [vmem:[%s5108_s17 + $0x128] sm:$0xff]  ;;  %v5379_v51 = vld [vmem:[%s5108_s17 + $0x1c0] sm:$0xff]  ;;  %10419 = vst [vmem:[#allocation10_spill] sm:$0xff] %v5389_v58  ;;  %10420 = vst [vmem:[#allocation11_spill] sm:$0xff] %v5392_v53 }
  0xb9   : > { %1613 = vperm.xlu1 %4340, %v1535_v12   ;;  %1608 = vperm.xlu0 %4339, %v1534_v13   ;;  %v5287_v13 = vld [vmem:[%s5108_s17 + $0x140] sm:$0xff]  ;;  %v5290_v12 = vld [vmem:[%s5108_s17 + $0x148] sm:$0xff]  ;;  %10414 = vst [vmem:[#allocation5_spill] sm:$0xff] %v5359_v59  ;;  %10417 = vst [vmem:[#allocation8_spill] sm:$0xff] %v5379_v51 }
  0xba   : > { %v5382_v50 = vld [vmem:[%s5108_s17 + $0x1c8] sm:$0xff]  ;;  %v2759_v52 = vld [vmem:[%s9826_s2 + $0x98] sm:$0xff]  ;;  %v5402_v57 = vld [vmem:[%s5108_s17 + $0x1e0] sm:$0xff] }
  0xbb   : > { %10418 = vst [vmem:[#allocation9_spill] sm:$0xff] %v5382_v50  ;;  %10421 = vst [vmem:[#allocation12_spill] sm:$0xff] %v5402_v57  ;;  %v5405_v49 = vld [vmem:[%s5108_s17 + $0x1e8] sm:$0xff]  ;;  %v5425_v59 = vld [vmem:[%s5108_s17 + $0x180] sm:$0xff] }
  0xbc   : > { %10422 = vst [vmem:[#allocation13_spill] sm:$0xff] %v5405_v49  ;;  %10425 = vst [vmem:[#allocation16_spill] sm:$0xff] %v5425_v59  ;;  %v5428_v9 = vld [vmem:[%s5108_s17 + $0x188] sm:$0xff]  ;;  %v5435_v48 = vld [vmem:[%s5108_s17 + $0x190] sm:$0xff] }
  0xbd   : > { %1623 = vperm.xlu1 %4340, %v1537_v14   ;;  %1618 = vperm.xlu0 %4339, %v1536_v15   ;;  %v5300_v15 = vld [vmem:[%s5108_s17 + $0x158] sm:$0xff]  ;;  %10426 = vst [vmem:[#allocation17_spill] sm:$0xff] %v5428_v9  ;;  %10427 = vst [vmem:[#allocation18_spill] sm:$0xff] %v5435_v48  ;;  %v5448_v47 = vld [vmem:[%s5108_s17 + $0x1a0] sm:$0xff] }
  0xbe   : > { %v2755_v14 = vld [vmem:[%s9826_s2 + $0x78] sm:$0xff]  ;;  %10429 = vst [vmem:[#allocation20_spill] sm:$0xff] %v5448_v47  ;;  %v5451_v49 = vld [vmem:[%s5108_s17 + $0x1a8] sm:$0xff]  ;;  %v5471_v50 = vld [vmem:[%s5108_s17 + $0x240] sm:$0xff] }
  0xbf   : > { %10430 = vst [vmem:[#allocation21_spill] sm:$0xff] %v5451_v49  ;;  %v5460_v8 = vld [vmem:[%s5108_s17 + $0x1b8] sm:$0xff]  ;;  %10433 = vst [vmem:[#allocation24_spill] sm:$0xff] %v5471_v50  ;;  %v5474_v51 = vld [vmem:[%s5108_s17 + $0x248] sm:$0xff] }
  0xc0   : > { %10432 = vst [vmem:[#allocation23_spill] sm:$0xff] %v5460_v8  ;;  %10434 = vst [vmem:[#allocation25_spill] sm:$0xff] %v5474_v51  ;;  %v5484_v53 = vld [vmem:[%s5108_s17 + $0x258] sm:$0xff]  ;;  %v5497_v49 = vld [vmem:[%s5108_s17 + $0x268] sm:$0xff] }
  0xc1   : > { %1633 = vperm.xlu1 %4340, %v1539_v16   ;;  %1628 = vperm.xlu0 %4339, %v1538_v17   ;;  %v5195_v16 = vld [vmem:[%s5108_s17 + $0xc0] sm:$0xff]  ;;  %v5198_v17 = vld [vmem:[%s5108_s17 + $0xc8] sm:$0xff]  ;;  %10436 = vst [vmem:[#allocation27_spill] sm:$0xff] %v5484_v53  ;;  %v2763_v58 = vld [vmem:[%s9826_s2 + $0xb8] sm:$0xff] }
  0xc2   : > { %10438 = vst [vmem:[#allocation29_spill] sm:$0xff] %v5497_v49  ;;  %v5506_v56 = vld [vmem:[%s5108_s17 + $0x278] sm:$0xff]  ;;  %v5517_v9 = vld [vmem:[%s5108_s17 + $0x200] sm:$0xff]  ;;  %v5520_v59 = vld [vmem:[%s5108_s17 + $0x208] sm:$0xff] }
  0xc3   : > { %10440 = vst [vmem:[#allocation31_spill] sm:$0xff] %v5506_v56  ;;  %10441 = vst [vmem:[#allocation32_spill] sm:$0xff] %v5517_v9  ;;  %v5527_v8 = vld [vmem:[%s5108_s17 + $0x210] sm:$0xff]  ;;  %v2765_v48 = vld [vmem:[%s9826_s2 + $0xc8] sm:$0xff] }
  0xc4   : > { %10442 = vst [vmem:[#allocation33_spill] sm:$0xff] %v5520_v59  ;;  %10443 = vst [vmem:[#allocation34_spill] sm:$0xff] %v5527_v8  ;;  %v5543_v49 = vld [vmem:[%s5108_s17 + $0x228] sm:$0xff]  ;;  %v5552_v46 = vld [vmem:[%s5108_s17 + $0x238] sm:$0xff] }
  0xc5   : > { %1643 = vperm.xlu1 %4340, %v1541_v18   ;;  %1638 = vperm.xlu0 %4339, %v1540_v19   ;;  %v5310_v19 = vld [vmem:[%s5108_s17 + $0x160] sm:$0xff]  ;;  %v5414_v18 = vld [vmem:[%s5108_s17 + $0x1f8] sm:$0xff]  ;;  %10446 = vst [vmem:[#allocation37_spill] sm:$0xff] %v5543_v49  ;;  %10448 = vst [vmem:[#allocation39_spill] sm:$0xff] %v5552_v46 }
  0xc6   : > { %10424 = vst [vmem:[#allocation15_spill] sm:$0xff] %v5414_v18  ;;  %v5481_v18 = vld [vmem:[%s5108_s17 + $0x250] sm:$0xff]  ;;  %v5563_v51 = vld [vmem:[%s5108_s17 + $0x2c0] sm:$0xff]  ;;  %v5566_v50 = vld [vmem:[%s5108_s17 + $0x2c8] sm:$0xff] }
  0xc7   : > { %10435 = vst [vmem:[#allocation26_spill] sm:$0xff] %v5481_v18  ;;  %10449 = vst [vmem:[#allocation40_spill] sm:$0xff] %v5563_v51  ;;  %v5573_v56 = vld [vmem:[%s5108_s17 + $0x2d0] sm:$0xff]  ;;  %v5576_v53 = vld [vmem:[%s5108_s17 + $0x2d8] sm:$0xff] }
  0xc8   : > { %10450 = vst [vmem:[#allocation41_spill] sm:$0xff] %v5566_v50  ;;  %10451 = vst [vmem:[#allocation42_spill] sm:$0xff] %v5573_v56  ;;  %v2766_v18 = vld [vmem:[%s9826_s2 + $0xd0] sm:$0xff]  ;;  %v5598_v57 = vld [vmem:[%s5108_s17 + $0x2f8] sm:$0xff] }
  0xc9   : > { %1653 = vperm.xlu1 %4340, %v1543_v20   ;;  %1648 = vperm.xlu0 %4339, %v1542_v21   ;;  %v5267_v21 = vld [vmem:[%s5108_s17 + $0x68] sm:$0xff]  ;;  %v5297_v20 = vld [vmem:[%s5108_s17 + $0x150] sm:$0xff]  ;;  %10452 = vst [vmem:[#allocation43_spill] sm:$0xff] %v5576_v53  ;;  %10456 = vst [vmem:[#allocation47_spill] sm:$0xff] %v5598_v57 }
  0xca   : > { %v5589_v49 = vld [vmem:[%s5108_s17 + $0x2e8] sm:$0xff]  ;;  %v5609_v59 = vld [vmem:[%s5108_s17 + $0x280] sm:$0xff]  ;;  %v5619_v46 = vld [vmem:[%s5108_s17 + $0x290] sm:$0xff] }
  0xcb   : > { %10454 = vst [vmem:[#allocation45_spill] sm:$0xff] %v5589_v49  ;;  %10457 = vst [vmem:[#allocation48_spill] sm:$0xff] %v5609_v59  ;;  %v5612_v9 = vld [vmem:[%s5108_s17 + $0x288] sm:$0xff]  ;;  %v2767_v8 = vld [vmem:[%s9826_s2 + $0xd8] sm:$0xff] }
  0xcc   : > { %10458 = vst [vmem:[#allocation49_spill] sm:$0xff] %v5612_v9  ;;  %10459 = vst [vmem:[#allocation50_spill] sm:$0xff] %v5619_v46  ;;  %v5635_v49 = vld [vmem:[%s5108_s17 + $0x2a8] sm:$0xff]  ;;  %v5644_v47 = vld [vmem:[%s5108_s17 + $0x2b8] sm:$0xff] }
  0xcd   : > { %1663 = vperm.xlu1 %4340, %v1545_v22   ;;  %1658 = vperm.xlu0 %4339, %v1544_v23   ;;  %v5205_v22 = vld [vmem:[%s5108_s17 + $0xd0] sm:$0xff]  ;;  %v5208_v23 = vld [vmem:[%s5108_s17 + $0xd8] sm:$0xff]  ;;  %10462 = vst [vmem:[#allocation53_spill] sm:$0xff] %v5635_v49  ;;  %10464 = vst [vmem:[#allocation55_spill] sm:$0xff] %v5644_v47 }
  0xce   : > { %v5655_v50 = vld [vmem:[%s5108_s17 + $0x340] sm:$0xff]  ;;  %v5658_v51 = vld [vmem:[%s5108_s17 + $0x348] sm:$0xff]  ;;  %v5665_v57 = vld [vmem:[%s5108_s17 + $0x350] sm:$0xff] }
  0xcf   : > { %10465 = vst [vmem:[#allocation56_spill] sm:$0xff] %v5655_v50  ;;  %10466 = vst [vmem:[#allocation57_spill] sm:$0xff] %v5658_v51  ;;  %v5668_v53 = vld [vmem:[%s5108_s17 + $0x358] sm:$0xff]  ;;  %v5681_v49 = vld [vmem:[%s5108_s17 + $0x368] sm:$0xff] }
  0xd0   : > { %10467 = vst [vmem:[#allocation58_spill] sm:$0xff] %v5665_v57  ;;  %10468 = vst [vmem:[#allocation59_spill] sm:$0xff] %v5668_v53  ;;  %v2768_v56 = vld [vmem:[%s9826_s2 + $0xe0] sm:$0xff]  ;;  %v5704_v59 = vld [vmem:[%s5108_s17 + $0x308] sm:$0xff] }
  0xd1   : > { %1673 = vperm.xlu1 %4340, %v1547_v24   ;;  %1668 = vperm.xlu0 %4339, %v1546_v25   ;;  %v2751_v24 = vld [vmem:[%s9826_s2 + $0x58] sm:$0xff]  ;;  %v5244_v25 = vld [vmem:[%s5108_s17 + $0x48] sm:$0xff]  ;;  %10470 = vst [vmem:[#allocation61_spill] sm:$0xff] %v5681_v49  ;;  %v5701_v9 = vld [vmem:[%s5108_s17 + $0x300] sm:$0xff] }
  0xd2   : > { %10473 = vst [vmem:[#allocation64_spill] sm:$0xff] %v5701_v9  ;;  %10474 = vst [vmem:[#allocation65_spill] sm:$0xff] %v5704_v59  ;;  %v5711_v47 = vld [vmem:[%s5108_s17 + $0x310] sm:$0xff]  ;;  %v2769_v46 = vld [vmem:[%s9826_s2 + $0xe8] sm:$0xff] }
  0xd3   : > { %10475 = vst [vmem:[#allocation66_spill] sm:$0xff] %v5711_v47  ;;  %v5727_v49 = vld [vmem:[%s5108_s17 + $0x328] sm:$0xff]  ;;  %v5747_v51 = vld [vmem:[%s5108_s17 + $0x3c0] sm:$0xff]  ;;  %v5760_v53 = vld [vmem:[%s5108_s17 + $0x3d8] sm:$0xff] }
  0xd4   : > { %10478 = vst [vmem:[#allocation69_spill] sm:$0xff] %v5727_v49  ;;  %10481 = vst [vmem:[#allocation72_spill] sm:$0xff] %v5747_v51  ;;  %v5750_v50 = vld [vmem:[%s5108_s17 + $0x3c8] sm:$0xff]  ;;  %v5793_v47 = vld [vmem:[%s5108_s17 + $0x380] sm:$0xff] }
  0xd5   : > { %1683 = vperm.xlu1 %4340, %v1549_v26   ;;  %1678 = vperm.xlu0 %4339, %v1548_v27   ;;  %v5241_v26 = vld [vmem:[%s5108_s17 + $0x40] sm:$0xff]  ;;  %10482 = vst [vmem:[#allocation73_spill] sm:$0xff] %v5750_v50  ;;  %10484 = vst [vmem:[#allocation75_spill] sm:$0xff] %v5760_v53  ;;  %v5819_v49 = vld [vmem:[%s5108_s17 + $0x3b0] sm:$0xff]  ;;  %v10499_v50 = vunpack.c.l.bf16 %v5111_v36  ;;  %v10509_v53 = vunpack.c.h.bf16 %v5117_v38 }
  0xd6   : > { %v2753_v27 = vld [vmem:[%s9826_s2 + $0x68] sm:$0xff]  ;;  %10489 = vst [vmem:[#allocation80_spill] sm:$0xff] %v5793_v47  ;;  %10495 = vst [vmem:[#allocation86_spill] sm:$0xff] %v5819_v49  ;;  %v10525_v49 = vunpack.c.h.bf16 %v5135_v44  ;;  %v10531_v47 = vunpack.c.l.bf16 %v5149_v54 }
  0xd7   : > { %v5833_v51 = vld [vmem:[%s5108_s17 + $0x440] sm:$0xff]  ;;  %v5836_v59 = vld [vmem:[%s5108_s17 + $0x448] sm:$0xff] }
  0xd8   : > { %10497 = vst [vmem:[#allocation88_spill] sm:$0xff] %v5833_v51  ;;  %10498 = vst [vmem:[#allocation89_spill] sm:$0xff] %v5836_v59  ;;  %v10513_v59 = vunpack.c.h.bf16 %v5120_v39  ;;  %v10517_v51 = vunpack.c.h.bf16 %v5126_v41 }
  0xd9   : > { %1693 = vperm.xlu1 %4340, %v1551_v28   ;;  %1688 = vperm.xlu0 %4339, %v1550_v29   ;;  %v5218_v29 = vld [vmem:[%s5108_s17 + $0xe0] sm:$0xff]  ;;  %v5254_v28 = vld [vmem:[%s5108_s17 + $0x58] sm:$0xff] }
  0xdd   : > { %2779 = vperm.xlu1 %4340, %v2741_v30   ;;  %2774 = vperm.xlu0 %4339, %v2740_v31   ;;  %v5221_v30 = vld [vmem:[%s5108_s17 + $0xe8] sm:$0xff] }
  0xde   : > { %v2750_v31 = vld [vmem:[%s9826_s2 + $0x50] sm:$0xff] }
  0xe1   : > { %2789 = vperm.xlu1 %4340, %v2743_v32   ;;  %2784 = vperm.xlu0 %4339, %v2742_v33   ;;  %v5227_v32 = vld [vmem:[%s5108_s17 + $0xf0] sm:$0xff]  ;;  %v5230_v33 = vld [vmem:[%s5108_s17 + $0xf8] sm:$0xff] }
  0xe5   : > { %2799 = vperm.xlu1 %4340, %v2745_v34   ;;  %2794 = vperm.xlu0 %4339, %v2744_v35   ;;  %v5276_v35 = vld [vmem:[%s5108_s17 + $0x78] sm:$0xff]  ;;  %v10507_v34 = vunpack.c.l.bf16 %v5117_v38  ;;  %v10519_v38 = vunpack.c.l.bf16 %v5129_v42 }
  0xe9   : > { %2809 = vperm.xlu1 %4340, %v2747_v40   ;;  %2804 = vperm.xlu0 %4339, %v2746_v43   ;;  %v5251_v43 = vld [vmem:[%s5108_s17 + $0x50] sm:$0xff]  ;;  %v5322_v40 = vld [vmem:[%s5108_s17 + $0x178] sm:$0xff] }
  0xed   : > { %2819 = vperm.xlu1 %4340, %v2749_v62   ;;  %2814 = vperm.xlu0 %4339, %v2748_v5   ;;  %v5264_v62 = vld [vmem:[%s5108_s17 + $0x60] sm:$0xff]  ;;  %v5368_v5 = vld [vmem:[%s5108_s17 + $0x138] sm:$0xff] }
  0xee   : > { %10416 = vst [vmem:[#allocation7_spill] sm:$0xff] %v5368_v5  ;;  %v5438_v5 = vld [vmem:[%s5108_s17 + $0x198] sm:$0xff] }
  0xef   : > { %10428 = vst [vmem:[#allocation19_spill] sm:$0xff] %v5438_v5  ;;  %v5530_v5 = vld [vmem:[%s5108_s17 + $0x218] sm:$0xff] }
  0xf0   : > { %10444 = vst [vmem:[#allocation35_spill] sm:$0xff] %v5530_v5  ;;  %v5622_v5 = vld [vmem:[%s5108_s17 + $0x298] sm:$0xff] }
  0xf1   : > { %2829 = vperm.xlu1 %4340, %v2751_v24   ;;  %2824 = vperm.xlu0 %4339, %v2750_v31   ;;  %v2752_v24 = vld [vmem:[%s9826_s2 + $0x60] sm:$0xff]  ;;  %v5273_v31 = vld [vmem:[%s5108_s17 + $0x70] sm:$0xff]  ;;  %10460 = vst [vmem:[#allocation51_spill] sm:$0xff] %v5622_v5 }
  0xf2   : > { %v5714_v5 = vld [vmem:[%s5108_s17 + $0x318] sm:$0xff] }
  0xf3   : > { %10476 = vst [vmem:[#allocation67_spill] sm:$0xff] %v5714_v5  ;;  %v5813_v5 = vld [vmem:[%s5108_s17 + $0x3a0] sm:$0xff] }
  0xf4   : > { %10493 = vst [vmem:[#allocation84_spill] sm:$0xff] %v5813_v5  ;;  %v10529_v5 = vunpack.c.h.bf16 %v5138_v45 }
  0xf5   : > { %2839 = vperm.xlu1 %4340, %v2753_v27   ;;  %2834 = vperm.xlu0 %4339, %v2752_v24   ;;  %v2754_v27 = vld [vmem:[%s9826_s2 + $0x70] sm:$0xff] }
  0xf6   : > { %v5319_v24 = vld [vmem:[%s5108_s17 + $0x170] sm:$0xff] }
  0xf9   : > { %2849 = vperm.xlu1 %4340, %v2755_v14   ;;  %2844 = vperm.xlu0 %4339, %v2754_v27   ;;  %v2756_v14 = vld [vmem:[%s9826_s2 + $0x80] sm:$0xff]  ;;  %v5365_v27 = vld [vmem:[%s5108_s17 + $0x130] sm:$0xff] }
  0xfa   : > { %10415 = vst [vmem:[#allocation6_spill] sm:$0xff] %v5365_v27  ;;  %v2761_v27 = vld [vmem:[%s9826_s2 + $0xa8] sm:$0xff] }
  0xfd   : > { %2859 = vperm.xlu1 %4340, %v2757_v1   ;;  %2854 = vperm.xlu0 %4339, %v2756_v14   ;;  %v2758_v1 = vld [vmem:[%s9826_s2 + $0x90] sm:$0xff] }
  0xfe   : > { %v5411_v14 = vld [vmem:[%s5108_s17 + $0x1f0] sm:$0xff] }
  0xff   : > { %10423 = vst [vmem:[#allocation14_spill] sm:$0xff] %v5411_v14  ;;  %v5494_v14 = vld [vmem:[%s5108_s17 + $0x260] sm:$0xff] }
 0x100   : > { %10437 = vst [vmem:[#allocation28_spill] sm:$0xff] %v5494_v14  ;;  %v5690_v14 = vld [vmem:[%s5108_s17 + $0x378] sm:$0xff] }
 0x101   : > { %2869 = vperm.xlu1 %4340, %v2759_v52   ;;  %2864 = vperm.xlu0 %4339, %v2758_v1   ;;  %v2760_v52 = vld [vmem:[%s9826_s2 + $0xa0] sm:$0xff]  ;;  %v5457_v1 = vld [vmem:[%s5108_s17 + $0x1b0] sm:$0xff]  ;;  %10472 = vst [vmem:[#allocation63_spill] sm:$0xff] %v5690_v14 }
 0x102   : > { %10431 = vst [vmem:[#allocation22_spill] sm:$0xff] %v5457_v1  ;;  %v5540_v1 = vld [vmem:[%s5108_s17 + $0x220] sm:$0xff] }
 0x103   : > { %10445 = vst [vmem:[#allocation36_spill] sm:$0xff] %v5540_v1  ;;  %v5736_v1 = vld [vmem:[%s5108_s17 + $0x338] sm:$0xff]  ;;  %v5767_v14 = vld [vmem:[%s5108_s17 + $0x3e0] sm:$0xff] }
 0x104   : > { %10480 = vst [vmem:[#allocation71_spill] sm:$0xff] %v5736_v1  ;;  %10485 = vst [vmem:[#allocation76_spill] sm:$0xff] %v5767_v14  ;;  %v2770_v1 = vld [vmem:[%s9826_s2 + $0xf0] sm:$0xff] }
 0x105   : > { %2879 = vperm.xlu1 %4340, %v2761_v27   ;;  %2874 = vperm.xlu0 %4339, %v2760_v52   ;;  %v2762_v27 = vld [vmem:[%s9826_s2 + $0xb0] sm:$0xff] }
 0x106   : > { %v5503_v52 = vld [vmem:[%s5108_s17 + $0x270] sm:$0xff] }
 0x107   : > { %10439 = vst [vmem:[#allocation30_spill] sm:$0xff] %v5503_v52  ;;  %v5586_v52 = vld [vmem:[%s5108_s17 + $0x2e0] sm:$0xff] }
 0x108   : > { %10453 = vst [vmem:[#allocation44_spill] sm:$0xff] %v5586_v52  ;;  %v5796_v52 = vld [vmem:[%s5108_s17 + $0x388] sm:$0xff] }
 0x109   : > { %2889 = vperm.xlu1 %4340, %v2763_v58   ;;  %2884 = vperm.xlu0 %4339, %v2762_v27   ;;  %v2764_v58 = vld [vmem:[%s9826_s2 + $0xc0] sm:$0xff]  ;;  %v5549_v27 = vld [vmem:[%s5108_s17 + $0x230] sm:$0xff]  ;;  %10490 = vst [vmem:[#allocation81_spill] sm:$0xff] %v5796_v52  ;;  %v10534_v52 = vunpack.c.h.bf16 %v5152_v55 }
 0x10a   : > { %10447 = vst [vmem:[#allocation38_spill] sm:$0xff] %v5549_v27  ;;  %v5632_v27 = vld [vmem:[%s5108_s17 + $0x2a0] sm:$0xff] }
 0x10b   : > { %10461 = vst [vmem:[#allocation52_spill] sm:$0xff] %v5632_v27  ;;  %v5757_v27 = vld [vmem:[%s5108_s17 + $0x3d0] sm:$0xff] }
 0x10c   : > { %10483 = vst [vmem:[#allocation74_spill] sm:$0xff] %v5757_v27  ;;  %v5803_v27 = vld [vmem:[%s5108_s17 + $0x390] sm:$0xff] }
 0x10d   : > { %2899 = vperm.xlu1 %4340, %v2765_v48   ;;  %2894 = vperm.xlu0 %4339, %v2764_v58   ;;  %v1552_v48 = vld [vmem:[%s9825_s1 + $0xe0] sm:$0xff]  ;;  %v5595_v58 = vld [vmem:[%s5108_s17 + $0x2f0] sm:$0xff]  ;;  %10491 = vst [vmem:[#allocation82_spill] sm:$0xff] %v5803_v27 }
 0x10e   : > { %10455 = vst [vmem:[#allocation46_spill] sm:$0xff] %v5595_v58  ;;  %v5678_v58 = vld [vmem:[%s5108_s17 + $0x360] sm:$0xff] }
 0x10f   : > { %10469 = vst [vmem:[#allocation60_spill] sm:$0xff] %v5678_v58  ;;  %v2771_v58 = vld [vmem:[%s9826_s2 + $0xf8] sm:$0xff] }
 0x111   : > { %2904 = vperm.xlu1 %4340, %v2766_v18   ;;  %1698 = vperm.xlu0 %4339, %v1552_v48   ;;  %v1553_v18 = vld [vmem:[%s9825_s1 + $0xe8] sm:$0xff]  ;;  %v5641_v48 = vld [vmem:[%s5108_s17 + $0x2b0] sm:$0xff] }
 0x112   : > { %10463 = vst [vmem:[#allocation54_spill] sm:$0xff] %v5641_v48  ;;  %v5724_v48 = vld [vmem:[%s5108_s17 + $0x320] sm:$0xff] }
 0x113   : > { %10477 = vst [vmem:[#allocation68_spill] sm:$0xff] %v5724_v48  ;;  %v5806_v48 = vld [vmem:[%s5108_s17 + $0x398] sm:$0xff] }
 0x114   : > { %10492 = vst [vmem:[#allocation83_spill] sm:$0xff] %v5806_v48 }
 0x115   : > { %2909 = vperm.xlu1 %4340, %v2767_v8   ;;  %1703 = vperm.xlu0 %4339, %v1553_v18   ;;  %v1554_v8 = vld [vmem:[%s9825_s1 + $0xf0] sm:$0xff] }
 0x116   : > { %v5687_v18 = vld [vmem:[%s5108_s17 + $0x370] sm:$0xff] }
 0x117   : > { %10471 = vst [vmem:[#allocation62_spill] sm:$0xff] %v5687_v18  ;;  %v5770_v18 = vld [vmem:[%s5108_s17 + $0x3e8] sm:$0xff] }
 0x118   : > { %10486 = vst [vmem:[#allocation77_spill] sm:$0xff] %v5770_v18  ;;  %v5822_v18 = vld [vmem:[%s5108_s17 + $0x3b8] sm:$0xff] }
 0x119   : > { %2914 = vperm.xlu1 %4340, %v2768_v56   ;;  %1708 = vperm.xlu0 %4339, %v1554_v8   ;;  %v1555_v56 = vld [vmem:[%s9825_s1 + $0xf8] sm:$0xff]  ;;  %10496 = vst [vmem:[#allocation87_spill] sm:$0xff] %v5822_v18  ;;  %v10521_v18 = vunpack.c.h.bf16 %v5129_v42 }
 0x11a   : > { %v5733_v8 = vld [vmem:[%s5108_s17 + $0x330] sm:$0xff] }
 0x11b   : > { %10479 = vst [vmem:[#allocation70_spill] sm:$0xff] %v5733_v8  ;;  %v5816_v8 = vld [vmem:[%s5108_s17 + $0x3a8] sm:$0xff] }
 0x11c   : > { %10494 = vst [vmem:[#allocation85_spill] sm:$0xff] %v5816_v8 }
 0x11d   : > { %2919 = vperm.xlu1 %4340, %v2769_v46   ;;  %1713 = vperm.xlu0 %4339, %v1555_v56   ;;  %v5776_v46 = vld [vmem:[%s5108_s17 + $0x3f0] sm:$0xff]  ;;  %v5779_v56 = vld [vmem:[%s5108_s17 + $0x3f8] sm:$0xff] }
 0x11e   : > { %10487 = vst [vmem:[#allocation78_spill] sm:$0xff] %v5776_v46  ;;  %10488 = vst [vmem:[#allocation79_spill] sm:$0xff] %v5779_v56  ;;  %v4036_v46 = vld [vmem:[#allocation2] sm:$0x1]  ;;  %v10501_v56 = vunpack.c.h.bf16 %v5111_v36  ;;  %v10511_v36 = vunpack.c.l.bf16 %v5120_v39  ;;  %v10523_v39 = vunpack.c.l.bf16 %v5135_v44  ;;  %v10535_v44 = vunpack.c.l.bf16 %v5159_v60 }
 0x120   : > { %v1569_v48 = vpop.permute.xlu1 %1568  ;;  %v1559_v9 = vpop.permute.xlu0 %1558 }
 0x121   : > { %2929 = vperm.xlu1 %4340, %v2771_v58   ;;  %2924 = vperm.xlu0 %4339, %v2770_v1   ;;  %v5852_v8 = vadd.f32 %v1569_v48, %v10499_v50  ;;  %v5856_v57 = vadd.f32 %v1569_v48, %v10501_v56  ;;  %v10503_v1 = vunpack.c.l.bf16 %v5114_v37  ;;  %v5868_v58 = vadd.f32 %v1569_v48, %v10507_v34 }
 0x122   : > { %v5872_v50 = vadd.f32 %v1569_v48, %v10509_v53  ;;  %v5876_v56 = vadd.f32 %v1569_v48, %v10511_v36  ;;  %v5888_v34 = vadd.f32 %v1569_v48, %v10517_v51  ;;  %v5892_v53 = vadd.f32 %v1569_v48, %v10519_v38 }
 0x123   : > { %10500 = vst [vmem:[#allocation90_spill] sm:$0xff] %v5852_v8  ;;  %10502 = vst [vmem:[#allocation91_spill] sm:$0xff] %v5856_v57  ;;  %v5860_v14 = vadd.f32 %v1569_v48, %v10503_v1  ;;  %v5880_v1 = vadd.f32 %v1569_v48, %v10513_v59  ;;  %v5896_v36 = vadd.f32 %v1569_v48, %v10521_v18  ;;  %v10579_v57 = vunpack.c.l.bf16 %v5241_v26 }
 0x124   : > { %10508 = vst [vmem:[#allocation94_spill] sm:$0xff] %v5868_v58  ;;  %10510 = vst [vmem:[#allocation95_spill] sm:$0xff] %v5872_v50  ;;  %v5900_v59 = vadd.f32 %v1569_v48, %v10523_v39  ;;  %v5912_v38 = vadd.f32 %v1569_v48, %v10529_v5  ;;  %v5944_v18 = vadd.f32 %v1559_v9, %v10534_v52  ;;  %v10569_v50 = vunpack.c.h.bf16 %v5221_v30  ;;  %v1564_v8 = vpop.permute.xlu0 %1563 }
 0x125   : > { %4039 = vperm.xlu0 %4339, %v4036_v46   ;;  %10504 = vst [vmem:[#allocation92_spill] sm:$0xff] %v5860_v14  ;;  %v10505_v46 = vunpack.c.h.bf16 %v5114_v37  ;;  %10512 = vst [vmem:[#allocation96_spill] sm:$0xff] %v5876_v56  ;;  %v10515_v37 = vunpack.c.l.bf16 %v5126_v41  ;;  %v10527_v41 = vunpack.c.l.bf16 %v5138_v45  ;;  %v10532_v45 = vunpack.c.h.bf16 %v5149_v54 }
 0x126   : > { %10514 = vst [vmem:[#allocation97_spill] sm:$0xff] %v5880_v1  ;;  %10518 = vst [vmem:[#allocation99_spill] sm:$0xff] %v5888_v34  ;;  %v5948_v39 = vadd.f32 %v1559_v9, %v10535_v44  ;;  %v10537_v54 = vunpack.c.l.bf16 %v5162_v61  ;;  %v10547_v34 = vunpack.c.l.bf16 %v5195_v16  ;;  %v10561_v1 = vunpack.c.h.bf16 %v5208_v23 }
 0x127   : > { %v5864_v27 = vadd.f32 %v1569_v48, %v10505_v46  ;;  %v5884_v46 = vadd.f32 %v1569_v48, %v10515_v37  ;;  %10520 = vst [vmem:[#allocation100_spill] sm:$0xff] %v5892_v53  ;;  %10522 = vst [vmem:[#allocation101_spill] sm:$0xff] %v5896_v36  ;;  %v5904_v37 = vadd.f32 %v1569_v48, %v10525_v49  ;;  %v10536_v49 = vunpack.c.h.bf16 %v5159_v60 }
 0x128   : > { %10524 = vst [vmem:[#allocation102_spill] sm:$0xff] %v5900_v59  ;;  %v5908_v51 = vadd.f32 %v1569_v48, %v10527_v41  ;;  %10530 = vst [vmem:[#allocation105_spill] sm:$0xff] %v5912_v38  ;;  %v5932_v41 = vadd.f32 %v1559_v9, %v10531_v47  ;;  %v5936_v42 = vadd.f32 %v1559_v9, %v10532_v45  ;;  %v10533_v48 = vunpack.c.l.bf16 %v5152_v55 }
 0x129   : > { %10506 = vst [vmem:[#allocation93_spill] sm:$0xff] %v5864_v27  ;;  %10516 = vst [vmem:[#allocation98_spill] sm:$0xff] %v5884_v46  ;;  %v5952_v47 = vadd.f32 %v1559_v9, %v10536_v49  ;;  %v5956_v45 = vadd.f32 %v1559_v9, %v10537_v54  ;;  %v10538_v38 = vunpack.c.h.bf16 %v5162_v61  ;;  %v10539_v55 = vunpack.c.l.bf16 %v5172_v3  ;;  %v1574_v46 = vpop.permute.xlu1 %1573 }
 0x12a   : > { %10526 = vst [vmem:[#allocation103_spill] sm:$0xff] %v5904_v37  ;;  %10528 = vst [vmem:[#allocation104_spill] sm:$0xff] %v5908_v51  ;;  %v5940_v5 = vadd.f32 %v1559_v9, %v10533_v48  ;;  %v10540_v51 = vunpack.c.h.bf16 %v5172_v3  ;;  %v10541_v60 = vunpack.c.l.bf16 %v5175_v4  ;;  %v10542_v37 = vunpack.c.h.bf16 %v5175_v4 }
 0x12b   : > { %v5960_v48 = vadd.f32 %v1559_v9, %v10538_v38  ;;  %v5964_v52 = vadd.f32 %v1559_v9, %v10539_v55  ;;  %v10543_v61 = vunpack.c.l.bf16 %v5181_v6  ;;  %v10544_v59 = vunpack.c.h.bf16 %v5181_v6 }
 0x12c   : > { %v5968_v44 = vadd.f32 %v1559_v9, %v10540_v51  ;;  %v5972_v49 = vadd.f32 %v1559_v9, %v10541_v60  ;;  %v5976_v54 = vadd.f32 %v1559_v9, %v10542_v37  ;;  %v10545_v3 = vunpack.c.l.bf16 %v5184_v7 }
 0x12d   : > { %v5980_v38 = vadd.f32 %v1559_v9, %v10543_v61  ;;  %v5984_v55 = vadd.f32 %v1559_v9, %v10544_v59  ;;  %v10546_v36 = vunpack.c.h.bf16 %v5184_v7  ;;  %v10549_v7 = vunpack.c.h.bf16 %v5195_v16 }
 0x12e   : > { %v5988_v51 = vadd.f32 %v1559_v9, %v10545_v3  ;;  %v6012_v3 = vadd.f32 %v1574_v46, %v10547_v34  ;;  %v10553_v53 = vunpack.c.h.bf16 %v5198_v17  ;;  %v10555_v6 = vunpack.c.l.bf16 %v5205_v22 }
 0x12f   : > { %v5992_v60 = vadd.f32 %v1559_v9, %v10546_v36  ;;  %v6016_v4 = vadd.f32 %v1574_v46, %v10549_v7  ;;  %v10551_v36 = vunpack.c.l.bf16 %v5198_v17  ;;  %v10557_v59 = vunpack.c.h.bf16 %v5205_v22 }
 0x130   : > { %10548 = vst [vmem:[#allocation106_spill] sm:$0xff] %v6012_v3  ;;  %v6024_v37 = vadd.f32 %v1574_v46, %v10553_v53  ;;  %v6028_v61 = vadd.f32 %v1574_v46, %v10555_v6  ;;  %v10559_v16 = vunpack.c.l.bf16 %v5208_v23  ;;  %v10563_v17 = vunpack.c.l.bf16 %v5218_v29  ;;  %v1579_v3 = vpop.permute.xlu0 %1578 }
 0x131   : > { %10550 = vst [vmem:[#allocation107_spill] sm:$0xff] %v6016_v4  ;;  %v6020_v9 = vadd.f32 %v1574_v46, %v10551_v36  ;;  %v6032_v34 = vadd.f32 %v1574_v46, %v10557_v59  ;;  %v6040_v36 = vadd.f32 %v1574_v46, %v10561_v1  ;;  %v10565_v56 = vunpack.c.h.bf16 %v5218_v29 }
 0x132   : > { %10554 = vst [vmem:[#allocation109_spill] sm:$0xff] %v6024_v37  ;;  %10556 = vst [vmem:[#allocation110_spill] sm:$0xff] %v6028_v61  ;;  %v6036_v7 = vadd.f32 %v1574_v46, %v10559_v16  ;;  %v6044_v53 = vadd.f32 %v1574_v46, %v10563_v17  ;;  %v10567_v22 = vunpack.c.l.bf16 %v5221_v30  ;;  %v6056_v16 = vadd.f32 %v1574_v46, %v10569_v50 }
 0x133   : > { %10552 = vst [vmem:[#allocation108_spill] sm:$0xff] %v6020_v9  ;;  %10558 = vst [vmem:[#allocation111_spill] sm:$0xff] %v6032_v34  ;;  %v6048_v6 = vadd.f32 %v1574_v46, %v10565_v56  ;;  %v10571_v23 = vunpack.c.l.bf16 %v5227_v32  ;;  %v10573_v58 = vunpack.c.h.bf16 %v5227_v32  ;;  %v10575_v29 = vunpack.c.l.bf16 %v5230_v33 }
 0x134   : > { %10560 = vst [vmem:[#allocation112_spill] sm:$0xff] %v6036_v7  ;;  %10562 = vst [vmem:[#allocation113_spill] sm:$0xff] %v6040_v36  ;;  %v6052_v59 = vadd.f32 %v1574_v46, %v10567_v22  ;;  %v10577_v27 = vunpack.c.h.bf16 %v5230_v33  ;;  %v10580_v33 = vunpack.c.h.bf16 %v5241_v26  ;;  %v10582_v14 = vunpack.c.h.bf16 %v5244_v25 }
 0x135   : > { %10564 = vst [vmem:[#allocation114_spill] sm:$0xff] %v6044_v53  ;;  %10566 = vst [vmem:[#allocation115_spill] sm:$0xff] %v6048_v6  ;;  %v6060_v1 = vadd.f32 %v1574_v46, %v10571_v23  ;;  %v6064_v17 = vadd.f32 %v1574_v46, %v10573_v58  ;;  %v6068_v56 = vadd.f32 %v1574_v46, %v10575_v29  ;;  %v10583_v32 = vunpack.c.l.bf16 %v5251_v43  ;;  %v1584_v53 = vpop.permute.xlu1 %1583 }
 0x136   : > { %10568 = vst [vmem:[#allocation116_spill] sm:$0xff] %v6052_v59  ;;  %10570 = vst [vmem:[#allocation117_spill] sm:$0xff] %v6056_v16  ;;  %v6072_v22 = vadd.f32 %v1574_v46, %v10577_v27  ;;  %v6092_v29 = vadd.f32 %v1564_v8, %v10579_v57  ;;  %v6096_v30 = vadd.f32 %v1564_v8, %v10580_v33  ;;  %v10581_v46 = vunpack.c.l.bf16 %v5244_v25 }
 0x137   : > { %10572 = vst [vmem:[#allocation118_spill] sm:$0xff] %v6060_v1  ;;  %10574 = vst [vmem:[#allocation119_spill] sm:$0xff] %v6064_v17  ;;  %v6104_v50 = vadd.f32 %v1564_v8, %v10582_v14  ;;  %v6108_v23 = vadd.f32 %v1564_v8, %v10583_v32  ;;  %v10584_v58 = vunpack.c.h.bf16 %v5251_v43  ;;  %v10585_v26 = vunpack.c.l.bf16 %v5254_v28 }
 0x138   : > { %10576 = vst [vmem:[#allocation120_spill] sm:$0xff] %v6068_v56  ;;  %10578 = vst [vmem:[#allocation121_spill] sm:$0xff] %v6072_v22  ;;  %v6100_v27 = vadd.f32 %v1564_v8, %v10581_v46  ;;  %v10586_v22 = vunpack.c.h.bf16 %v5254_v28  ;;  %v10587_v25 = vunpack.c.l.bf16 %v5264_v62  ;;  %v10588_v56 = vunpack.c.h.bf16 %v5264_v62 }
 0x139   : > { %v6112_v57 = vadd.f32 %v1564_v8, %v10584_v58  ;;  %v6116_v33 = vadd.f32 %v1564_v8, %v10585_v26  ;;  %v10589_v43 = vunpack.c.l.bf16 %v5267_v21  ;;  %v10590_v17 = vunpack.c.h.bf16 %v5267_v21 }
 0x13a   : > { %v6120_v46 = vadd.f32 %v1564_v8, %v10586_v22  ;;  %v6124_v14 = vadd.f32 %v1564_v8, %v10587_v25  ;;  %v6128_v32 = vadd.f32 %v1564_v8, %v10588_v56  ;;  %v10591_v28 = vunpack.c.l.bf16 %v5273_v31 }
 0x13b   : > { %v6132_v58 = vadd.f32 %v1564_v8, %v10589_v43  ;;  %v6136_v26 = vadd.f32 %v1564_v8, %v10590_v17  ;;  %v10592_v1 = vunpack.c.h.bf16 %v5273_v31  ;;  %v10593_v62 = vunpack.c.l.bf16 %v5276_v35 }
 0x13c   : > { %v6140_v22 = vadd.f32 %v1564_v8, %v10591_v28  ;;  %v10594_v16 = vunpack.c.h.bf16 %v5276_v35  ;;  %v10595_v6 = vunpack.c.l.bf16 %v5287_v13  ;;  %v10596_v35 = vunpack.c.h.bf16 %v5287_v13 }
 0x13d   : > { %v6144_v25 = vadd.f32 %v1564_v8, %v10592_v1  ;;  %v6148_v56 = vadd.f32 %v1564_v8, %v10593_v62  ;;  %v10598_v59 = vunpack.c.h.bf16 %v5290_v12  ;;  %v10599_v31 = vunpack.c.l.bf16 %v5297_v20 }
 0x13e   : > { %v6152_v43 = vadd.f32 %v1564_v8, %v10594_v16  ;;  %v6172_v62 = vadd.f32 %v1584_v53, %v10595_v6  ;;  %v6176_v21 = vadd.f32 %v1584_v53, %v10596_v35  ;;  %v10597_v16 = vunpack.c.l.bf16 %v5290_v12 }
 0x13f   : > { %v6184_v17 = vadd.f32 %v1584_v53, %v10598_v59  ;;  %v6188_v28 = vadd.f32 %v1584_v53, %v10599_v31  ;;  %v10601_v1 = vunpack.c.h.bf16 %v5297_v20  ;;  %v10603_v13 = vunpack.c.l.bf16 %v5300_v15 }
 0x140   : > { %v6180_v8 = vadd.f32 %v1584_v53, %v10597_v16  ;;  %v10605_v36 = vunpack.c.h.bf16 %v5300_v15  ;;  %v10607_v12 = vunpack.c.l.bf16 %v5310_v19  ;;  %v10609_v7 = vunpack.c.h.bf16 %v5310_v19 }
 0x141   : > { %10600 = vst [vmem:[#allocation122_spill] sm:$0xff] %v6188_v28  ;;  %v6192_v6 = vadd.f32 %v1584_v53, %v10601_v1  ;;  %v6196_v35 = vadd.f32 %v1584_v53, %v10603_v13  ;;  %v10611_v20 = vunpack.c.l.bf16 %v5313_v11  ;;  %v10613_v34 = vunpack.c.h.bf16 %v5313_v11  ;;  %v1594_v28 = vpop.permute.xlu1 %1593 }
 0x142   : > { %v6200_v16 = vadd.f32 %v1584_v53, %v10605_v36  ;;  %v6204_v59 = vadd.f32 %v1584_v53, %v10607_v12  ;;  %v6208_v31 = vadd.f32 %v1584_v53, %v10609_v7  ;;  %v10615_v15 = vunpack.c.l.bf16 %v5319_v24 }
 0x143   : > { %10602 = vst [vmem:[#allocation123_spill] sm:$0xff] %v6192_v6  ;;  %10604 = vst [vmem:[#allocation124_spill] sm:$0xff] %v6196_v35  ;;  %v6212_v1 = vadd.f32 %v1584_v53, %v10611_v20  ;;  %v6216_v13 = vadd.f32 %v1584_v53, %v10613_v34  ;;  %v10617_v61 = vunpack.c.h.bf16 %v5319_v24  ;;  %v10619_v19 = vunpack.c.l.bf16 %v5322_v40  ;;  %v10659_v6 = vld [vmem:[#allocation8_spill] sm:$0xff] }
 0x144   : > { %10606 = vst [vmem:[#allocation125_spill] sm:$0xff] %v6200_v16  ;;  %10608 = vst [vmem:[#allocation126_spill] sm:$0xff] %v6204_v59  ;;  %v6220_v36 = vadd.f32 %v1584_v53, %v10615_v15  ;;  %v10621_v37 = vunpack.c.h.bf16 %v5322_v40  ;;  %v10623_v4 = vunpack.c.l.bf16 %v5333_v0  ;;  %v10625_v40 = vunpack.c.h.bf16 %v5333_v0  ;;  %v10654_v59 = vld [vmem:[#allocation7_spill] sm:$0xff] }
 0x145   : > { %10610 = vst [vmem:[#allocation127_spill] sm:$0xff] %v6208_v31  ;;  %10612 = vst [vmem:[#allocation128_spill] sm:$0xff] %v6212_v1  ;;  %v6224_v12 = vadd.f32 %v1584_v53, %v10617_v61  ;;  %v6228_v7 = vadd.f32 %v1584_v53, %v10619_v19  ;;  %v10629_v9 = vunpack.c.h.bf16 %v5336_v63  ;;  %v10631_v24 = vunpack.c.l.bf16 %v5343_v10  ;;  %v10649_v1 = vld [vmem:[#allocation6_spill] sm:$0xff] }
 0x146   : > { %10614 = vst [vmem:[#allocation129_spill] sm:$0xff] %v6216_v13  ;;  %10616 = vst [vmem:[#allocation130_spill] sm:$0xff] %v6220_v36  ;;  %v6232_v20 = vadd.f32 %v1584_v53, %v10621_v37  ;;  %v6252_v19 = vadd.f32 %v1579_v3, %v10623_v4  ;;  %v6256_v11 = vadd.f32 %v1579_v3, %v10625_v40  ;;  %v10627_v53 = vunpack.c.l.bf16 %v5336_v63  ;;  %v10644_v36 = vld [vmem:[#allocation5_spill] sm:$0xff] }
 0x147   : > { %10618 = vst [vmem:[#allocation131_spill] sm:$0xff] %v6224_v12  ;;  %10620 = vst [vmem:[#allocation132_spill] sm:$0xff] %v6228_v7  ;;  %v6264_v34 = vadd.f32 %v1579_v3, %v10629_v9  ;;  %v6268_v15 = vadd.f32 %v1579_v3, %v10631_v24  ;;  %v10633_v61 = vunpack.c.h.bf16 %v5343_v10  ;;  %v10635_v0 = vunpack.c.l.bf16 %v5346_v2  ;;  %v10639_v7 = vld [vmem:[#allocation4_spill] sm:$0xff] }
 0x148   : > { %10622 = vst [vmem:[#allocation133_spill] sm:$0xff] %v6232_v20  ;;  %10624 = vst [vmem:[#allocation134_spill] sm:$0xff] %v6252_v19  ;;  %v6260_v37 = vadd.f32 %v1579_v3, %v10627_v53  ;;  %v10637_v20 = vunpack.c.h.bf16 %v5346_v2  ;;  %v10640_v63 = vunpack.c.l.bf16 %v10639_v7  ;;  %v10642_v12 = vunpack.c.h.bf16 %v10639_v7  ;;  %v1589_v19 = vpop.permute.xlu0 %1588 }
 0x149   : > { %10626 = vst [vmem:[#allocation135_spill] sm:$0xff] %v6256_v11  ;;  %10630 = vst [vmem:[#allocation137_spill] sm:$0xff] %v6264_v34  ;;  %v6272_v4 = vadd.f32 %v1579_v3, %v10633_v61  ;;  %v6276_v40 = vadd.f32 %v1579_v3, %v10635_v0  ;;  %v10645_v10 = vunpack.c.l.bf16 %v10644_v36  ;;  %v10647_v13 = vunpack.c.h.bf16 %v10644_v36  ;;  %v10699_v11 = vld [vmem:[#allocation16_spill] sm:$0xff] }
 0x14a   : > { %10628 = vst [vmem:[#allocation136_spill] sm:$0xff] %v6260_v37  ;;  %10632 = vst [vmem:[#allocation138_spill] sm:$0xff] %v6268_v15  ;;  %v6280_v53 = vadd.f32 %v1579_v3, %v10637_v20  ;;  %v6284_v9 = vadd.f32 %v1579_v3, %v10640_v63  ;;  %v6288_v24 = vadd.f32 %v1579_v3, %v10642_v12  ;;  %v10650_v2 = vunpack.c.l.bf16 %v10649_v1  ;;  %v10694_v15 = vld [vmem:[#allocation15_spill] sm:$0xff] }
 0x14b   : > { %10634 = vst [vmem:[#allocation139_spill] sm:$0xff] %v6272_v4  ;;  %10636 = vst [vmem:[#allocation140_spill] sm:$0xff] %v6276_v40  ;;  %v6292_v61 = vadd.f32 %v1579_v3, %v10645_v10  ;;  %v6296_v0 = vadd.f32 %v1579_v3, %v10647_v13  ;;  %v10652_v31 = vunpack.c.h.bf16 %v10649_v1  ;;  %v10655_v7 = vunpack.c.l.bf16 %v10654_v59  ;;  %v10689_v40 = vld [vmem:[#allocation14_spill] sm:$0xff] }
 0x14c   : > { %10638 = vst [vmem:[#allocation141_spill] sm:$0xff] %v6280_v53  ;;  %10641 = vst [vmem:[#allocation4_spill] sm:$0xff] %v6284_v9  ;;  %v6300_v20 = vadd.f32 %v1579_v3, %v10650_v2  ;;  %v10657_v16 = vunpack.c.h.bf16 %v10654_v59  ;;  %v10660_v36 = vunpack.c.l.bf16 %v10659_v6  ;;  %v10669_v2 = vld [vmem:[#allocation10_spill] sm:$0xff]  ;;  %v10692_v4 = vunpack.c.h.bf16 %v10689_v40 }
 0x14d   : > { %10643 = vst [vmem:[#allocation142_spill] sm:$0xff] %v6288_v24  ;;  %10646 = vst [vmem:[#allocation5_spill] sm:$0xff] %v6292_v61  ;;  %v6304_v63 = vadd.f32 %v1579_v3, %v10652_v31  ;;  %v6308_v12 = vadd.f32 %v1579_v3, %v10655_v7  ;;  %v10670_v1 = vunpack.c.l.bf16 %v10669_v2  ;;  %v10672_v31 = vunpack.c.h.bf16 %v10669_v2  ;;  %v10684_v24 = vld [vmem:[#allocation13_spill] sm:$0xff] }
 0x14e   : > { %10648 = vst [vmem:[#allocation143_spill] sm:$0xff] %v6296_v0  ;;  %10651 = vst [vmem:[#allocation6_spill] sm:$0xff] %v6300_v20  ;;  %v6312_v10 = vadd.f32 %v1579_v3, %v10657_v16  ;;  %v6332_v7 = vadd.f32 %v1594_v28, %v10660_v36  ;;  %v10662_v3 = vunpack.c.h.bf16 %v10659_v6  ;;  %v10664_v16 = vld [vmem:[#allocation9_spill] sm:$0xff]  ;;  %v10679_v20 = vld [vmem:[#allocation12_spill] sm:$0xff]  ;;  %v10685_v2 = vunpack.c.l.bf16 %v10684_v24 }
 0x14f   : > { %10653 = vst [vmem:[#allocation144_spill] sm:$0xff] %v6304_v63  ;;  %10656 = vst [vmem:[#allocation7_spill] sm:$0xff] %v6308_v12  ;;  %v10665_v59 = vunpack.c.l.bf16 %v10664_v16  ;;  %v10667_v35 = vunpack.c.h.bf16 %v10664_v16  ;;  %v6348_v12 = vadd.f32 %v1594_v28, %v10670_v1  ;;  %v6352_v36 = vadd.f32 %v1594_v28, %v10672_v31 }
 0x150   : > { %10658 = vst [vmem:[#allocation145_spill] sm:$0xff] %v6312_v10  ;;  %10661 = vst [vmem:[#allocation8_spill] sm:$0xff] %v6332_v7  ;;  %v6336_v9 = vadd.f32 %v1594_v28, %v10662_v3  ;;  %v10674_v10 = vld [vmem:[#allocation11_spill] sm:$0xff]  ;;  %v10680_v16 = vunpack.c.l.bf16 %v10679_v20  ;;  %v10682_v0 = vunpack.c.h.bf16 %v10679_v20  ;;  %v6372_v31 = vadd.f32 %v1594_v28, %v10685_v2  ;;  %v1604_v7 = vpop.permute.xlu1 %1603 }
 0x151   : > { %v6340_v61 = vadd.f32 %v1594_v28, %v10665_v59  ;;  %v6344_v13 = vadd.f32 %v1594_v28, %v10667_v35  ;;  %10671 = vst [vmem:[#allocation10_spill] sm:$0xff] %v6348_v12  ;;  %10673 = vst [vmem:[#allocation148_spill] sm:$0xff] %v6352_v36  ;;  %v10675_v6 = vunpack.c.l.bf16 %v10674_v10  ;;  %v10677_v63 = vunpack.c.h.bf16 %v10674_v10  ;;  %v10734_v12 = vld [vmem:[#allocation23_spill] sm:$0xff] }
 0x152   : > { %10663 = vst [vmem:[#allocation146_spill] sm:$0xff] %v6336_v9  ;;  %v6364_v35 = vadd.f32 %v1594_v28, %v10680_v16  ;;  %v6368_v1 = vadd.f32 %v1594_v28, %v10682_v0  ;;  %10686 = vst [vmem:[#allocation13_spill] sm:$0xff] %v6372_v31  ;;  %v10687_v53 = vunpack.c.h.bf16 %v10684_v24  ;;  %v10690_v10 = vunpack.c.l.bf16 %v10689_v40  ;;  %v10739_v9 = vld [vmem:[#allocation24_spill] sm:$0xff] }
 0x153   : > { %10666 = vst [vmem:[#allocation9_spill] sm:$0xff] %v6340_v61  ;;  %10668 = vst [vmem:[#allocation147_spill] sm:$0xff] %v6344_v13  ;;  %v6356_v3 = vadd.f32 %v1594_v28, %v10675_v6  ;;  %v6360_v59 = vadd.f32 %v1594_v28, %v10677_v63  ;;  %v6384_v16 = vadd.f32 %v1594_v28, %v10692_v4  ;;  %v10695_v20 = vunpack.c.l.bf16 %v10694_v15 }
 0x154   : > { %10681 = vst [vmem:[#allocation12_spill] sm:$0xff] %v6364_v35  ;;  %10683 = vst [vmem:[#allocation150_spill] sm:$0xff] %v6368_v1  ;;  %v6376_v6 = vadd.f32 %v1594_v28, %v10687_v53  ;;  %v6380_v63 = vadd.f32 %v1594_v28, %v10690_v10  ;;  %v10697_v34 = vunpack.c.h.bf16 %v10694_v15  ;;  %v10700_v24 = vunpack.c.l.bf16 %v10699_v11  ;;  %v10709_v10 = vld [vmem:[#allocation18_spill] sm:$0xff]  ;;  %v10724_v1 = vld [vmem:[#allocation21_spill] sm:$0xff] }
 0x155   : > { %10676 = vst [vmem:[#allocation11_spill] sm:$0xff] %v6356_v3  ;;  %10678 = vst [vmem:[#allocation149_spill] sm:$0xff] %v6360_v59  ;;  %v6388_v0 = vadd.f32 %v1594_v28, %v10695_v20  ;;  %v10710_v40 = vunpack.c.l.bf16 %v10709_v10  ;;  %v10712_v4 = vunpack.c.h.bf16 %v10709_v10  ;;  %v10725_v10 = vunpack.c.l.bf16 %v10724_v1  ;;  %v10729_v3 = vld [vmem:[#allocation22_spill] sm:$0xff] }
 0x156   : > { %10688 = vst [vmem:[#allocation151_spill] sm:$0xff] %v6376_v6  ;;  %10691 = vst [vmem:[#allocation14_spill] sm:$0xff] %v6380_v63  ;;  %v6392_v2 = vadd.f32 %v1594_v28, %v10697_v34  ;;  %v6412_v20 = vadd.f32 %v1589_v19, %v10700_v24  ;;  %v10702_v28 = vunpack.c.h.bf16 %v10699_v11  ;;  %v10704_v34 = vld [vmem:[#allocation17_spill] sm:$0xff]  ;;  %v10719_v63 = vld [vmem:[#allocation20_spill] sm:$0xff]  ;;  %v10727_v59 = vunpack.c.h.bf16 %v10724_v1 }
 0x157   : > { %10693 = vst [vmem:[#allocation152_spill] sm:$0xff] %v6384_v16  ;;  %10696 = vst [vmem:[#allocation15_spill] sm:$0xff] %v6388_v0  ;;  %v10705_v15 = vunpack.c.l.bf16 %v10704_v34  ;;  %v10707_v37 = vunpack.c.h.bf16 %v10704_v34  ;;  %v6428_v0 = vadd.f32 %v1589_v19, %v10710_v40  ;;  %v6432_v24 = vadd.f32 %v1589_v19, %v10712_v4 }
 0x158   : > { %10698 = vst [vmem:[#allocation153_spill] sm:$0xff] %v6392_v2  ;;  %10701 = vst [vmem:[#allocation16_spill] sm:$0xff] %v6412_v20  ;;  %v6416_v35 = vadd.f32 %v1589_v19, %v10702_v28  ;;  %v10714_v2 = vld [vmem:[#allocation19_spill] sm:$0xff]  ;;  %v10720_v34 = vunpack.c.l.bf16 %v10719_v63  ;;  %v10722_v6 = vunpack.c.h.bf16 %v10719_v63  ;;  %v6452_v4 = vadd.f32 %v1589_v19, %v10725_v10  ;;  %v1599_v20 = vpop.permute.xlu0 %1598 }
 0x159   : > { %v6420_v31 = vadd.f32 %v1589_v19, %v10705_v15  ;;  %v6424_v53 = vadd.f32 %v1589_v19, %v10707_v37  ;;  %10711 = vst [vmem:[#allocation18_spill] sm:$0xff] %v6428_v0  ;;  %10713 = vst [vmem:[#allocation156_spill] sm:$0xff] %v6432_v24  ;;  %v10715_v11 = vunpack.c.l.bf16 %v10714_v2  ;;  %v10717_v16 = vunpack.c.h.bf16 %v10714_v2  ;;  %v10774_v0 = vld [vmem:[#allocation31_spill] sm:$0xff] }
 0x15a   : > { %10703 = vst [vmem:[#allocation154_spill] sm:$0xff] %v6416_v35  ;;  %v6444_v37 = vadd.f32 %v1589_v19, %v10720_v34  ;;  %v6448_v40 = vadd.f32 %v1589_v19, %v10722_v6  ;;  %10726 = vst [vmem:[#allocation21_spill] sm:$0xff] %v6452_v4  ;;  %v10730_v2 = vunpack.c.l.bf16 %v10729_v3  ;;  %v10732_v36 = vunpack.c.h.bf16 %v10729_v3  ;;  %v10779_v35 = vld [vmem:[#allocation32_spill] sm:$0xff] }
 0x15b   : > { %10706 = vst [vmem:[#allocation17_spill] sm:$0xff] %v6420_v31  ;;  %10708 = vst [vmem:[#allocation155_spill] sm:$0xff] %v6424_v53  ;;  %v6436_v28 = vadd.f32 %v1589_v19, %v10715_v11  ;;  %v6440_v15 = vadd.f32 %v1589_v19, %v10717_v16  ;;  %v6456_v11 = vadd.f32 %v1589_v19, %v10727_v59  ;;  %v10735_v63 = vunpack.c.l.bf16 %v10734_v12 }
 0x15c   : > { %10721 = vst [vmem:[#allocation20_spill] sm:$0xff] %v6444_v37  ;;  %10723 = vst [vmem:[#allocation158_spill] sm:$0xff] %v6448_v40  ;;  %v6460_v16 = vadd.f32 %v1589_v19, %v10730_v2  ;;  %v6464_v34 = vadd.f32 %v1589_v19, %v10732_v36  ;;  %v10737_v13 = vunpack.c.h.bf16 %v10734_v12  ;;  %v10740_v1 = vunpack.c.l.bf16 %v10739_v9  ;;  %v10744_v12 = vld [vmem:[#allocation25_spill] sm:$0xff]  ;;  %v10749_v2 = vld [vmem:[#allocation26_spill] sm:$0xff] }
 0x15d   : > { %10716 = vst [vmem:[#allocation19_spill] sm:$0xff] %v6436_v28  ;;  %10718 = vst [vmem:[#allocation157_spill] sm:$0xff] %v6440_v15  ;;  %v6468_v6 = vadd.f32 %v1589_v19, %v10735_v63  ;;  %v10747_v61 = vunpack.c.h.bf16 %v10744_v12  ;;  %v10750_v3 = vunpack.c.l.bf16 %v10749_v2  ;;  %v10752_v36 = vunpack.c.h.bf16 %v10749_v2  ;;  %v10764_v40 = vld [vmem:[#allocation29_spill] sm:$0xff]  ;;  %v10769_v28 = vld [vmem:[#allocation30_spill] sm:$0xff] }
 0x15e   : > { %10728 = vst [vmem:[#allocation159_spill] sm:$0xff] %v6456_v11  ;;  %10731 = vst [vmem:[#allocation22_spill] sm:$0xff] %v6460_v16  ;;  %v6472_v10 = vadd.f32 %v1589_v19, %v10737_v13  ;;  %v6492_v63 = vadd.f32 %v1604_v7, %v10740_v1  ;;  %v10742_v19 = vunpack.c.h.bf16 %v10739_v9  ;;  %v10745_v13 = vunpack.c.l.bf16 %v10744_v12  ;;  %v10759_v16 = vld [vmem:[#allocation28_spill] sm:$0xff] }
 0x15f   : > { %10733 = vst [vmem:[#allocation160_spill] sm:$0xff] %v6464_v34  ;;  %10736 = vst [vmem:[#allocation23_spill] sm:$0xff] %v6468_v6  ;;  %v6504_v59 = vadd.f32 %v1604_v7, %v10747_v61  ;;  %v6508_v6 = vadd.f32 %v1604_v7, %v10750_v3  ;;  %v6512_v1 = vadd.f32 %v1604_v7, %v10752_v36  ;;  %v10760_v12 = vunpack.c.l.bf16 %v10759_v16 }
 0x160   : > { %10738 = vst [vmem:[#allocation161_spill] sm:$0xff] %v6472_v10  ;;  %10741 = vst [vmem:[#allocation24_spill] sm:$0xff] %v6492_v63  ;;  %v6496_v37 = vadd.f32 %v1604_v7, %v10742_v19  ;;  %v6500_v4 = vadd.f32 %v1604_v7, %v10745_v13  ;;  %v10754_v10 = vld [vmem:[#allocation27_spill] sm:$0xff]  ;;  %v10762_v11 = vunpack.c.h.bf16 %v10759_v16  ;;  %v10765_v2 = vunpack.c.l.bf16 %v10764_v40  ;;  %v1614_v63 = vpop.permute.xlu1 %1613 }
 0x161   : > { %10748 = vst [vmem:[#allocation163_spill] sm:$0xff] %v6504_v59  ;;  %10751 = vst [vmem:[#allocation26_spill] sm:$0xff] %v6508_v6  ;;  %v10755_v9 = vunpack.c.l.bf16 %v10754_v10  ;;  %v10757_v34 = vunpack.c.h.bf16 %v10754_v10  ;;  %v6524_v61 = vadd.f32 %v1604_v7, %v10760_v12  ;;  %v10767_v15 = vunpack.c.h.bf16 %v10764_v40  ;;  %v10814_v6 = vld [vmem:[#allocation39_spill] sm:$0xff] }
 0x162   : > { %10743 = vst [vmem:[#allocation162_spill] sm:$0xff] %v6496_v37  ;;  %10746 = vst [vmem:[#allocation25_spill] sm:$0xff] %v6500_v4  ;;  %v6528_v3 = vadd.f32 %v1604_v7, %v10762_v11  ;;  %v6532_v36 = vadd.f32 %v1604_v7, %v10765_v2  ;;  %v10770_v10 = vunpack.c.l.bf16 %v10769_v28  ;;  %v10772_v24 = vunpack.c.h.bf16 %v10769_v28  ;;  %v10819_v37 = vld [vmem:[#allocation40_spill] sm:$0xff] }
 0x163   : > { %10753 = vst [vmem:[#allocation164_spill] sm:$0xff] %v6512_v1  ;;  %v6516_v19 = vadd.f32 %v1604_v7, %v10755_v9  ;;  %v6520_v13 = vadd.f32 %v1604_v7, %v10757_v34  ;;  %10761 = vst [vmem:[#allocation28_spill] sm:$0xff] %v6524_v61  ;;  %v6536_v9 = vadd.f32 %v1604_v7, %v10767_v15  ;;  %v10775_v16 = vunpack.c.l.bf16 %v10774_v0 }
 0x164   : > { %10763 = vst [vmem:[#allocation166_spill] sm:$0xff] %v6528_v3  ;;  %10766 = vst [vmem:[#allocation29_spill] sm:$0xff] %v6532_v36  ;;  %v6540_v34 = vadd.f32 %v1604_v7, %v10770_v10  ;;  %v6544_v12 = vadd.f32 %v1604_v7, %v10772_v24  ;;  %v10777_v53 = vunpack.c.h.bf16 %v10774_v0  ;;  %v10780_v40 = vunpack.c.l.bf16 %v10779_v35  ;;  %v10784_v0 = vld [vmem:[#allocation33_spill] sm:$0xff]  ;;  %v10789_v10 = vld [vmem:[#allocation34_spill] sm:$0xff] }
 0x165   : > { %10756 = vst [vmem:[#allocation27_spill] sm:$0xff] %v6516_v19  ;;  %10758 = vst [vmem:[#allocation165_spill] sm:$0xff] %v6520_v13  ;;  %v6548_v11 = vadd.f32 %v1604_v7, %v10775_v16  ;;  %v10787_v31 = vunpack.c.h.bf16 %v10784_v0  ;;  %v10790_v28 = vunpack.c.l.bf16 %v10789_v10  ;;  %v10792_v24 = vunpack.c.h.bf16 %v10789_v10  ;;  %v10804_v3 = vld [vmem:[#allocation37_spill] sm:$0xff]  ;;  %v10809_v19 = vld [vmem:[#allocation38_spill] sm:$0xff] }
 0x166   : > { %10768 = vst [vmem:[#allocation167_spill] sm:$0xff] %v6536_v9  ;;  %10771 = vst [vmem:[#allocation30_spill] sm:$0xff] %v6540_v34  ;;  %v6552_v2 = vadd.f32 %v1604_v7, %v10777_v53  ;;  %v6572_v16 = vadd.f32 %v1599_v20, %v10780_v40  ;;  %v10782_v7 = vunpack.c.h.bf16 %v10779_v35  ;;  %v10785_v53 = vunpack.c.l.bf16 %v10784_v0  ;;  %v10799_v34 = vld [vmem:[#allocation36_spill] sm:$0xff] }
 0x167   : > { %10773 = vst [vmem:[#allocation168_spill] sm:$0xff] %v6544_v12  ;;  %10776 = vst [vmem:[#allocation31_spill] sm:$0xff] %v6548_v11  ;;  %v6584_v15 = vadd.f32 %v1599_v20, %v10787_v31  ;;  %v6588_v11 = vadd.f32 %v1599_v20, %v10790_v28  ;;  %v6592_v40 = vadd.f32 %v1599_v20, %v10792_v24  ;;  %v10800_v0 = vunpack.c.l.bf16 %v10799_v34 }
 0x168   : > { %10778 = vst [vmem:[#allocation169_spill] sm:$0xff] %v6552_v2  ;;  %10781 = vst [vmem:[#allocation32_spill] sm:$0xff] %v6572_v16  ;;  %v6576_v61 = vadd.f32 %v1599_v20, %v10782_v7  ;;  %v6580_v36 = vadd.f32 %v1599_v20, %v10785_v53  ;;  %v10794_v2 = vld [vmem:[#allocation35_spill] sm:$0xff]  ;;  %v10802_v9 = vunpack.c.h.bf16 %v10799_v34  ;;  %v10805_v10 = vunpack.c.l.bf16 %v10804_v3  ;;  %v1609_v16 = vpop.permute.xlu0 %1608 }
 0x169   : > { %10788 = vst [vmem:[#allocation171_spill] sm:$0xff] %v6584_v15  ;;  %10791 = vst [vmem:[#allocation34_spill] sm:$0xff] %v6588_v11  ;;  %v10795_v35 = vunpack.c.l.bf16 %v10794_v2  ;;  %v10797_v12 = vunpack.c.h.bf16 %v10794_v2  ;;  %v6604_v31 = vadd.f32 %v1599_v20, %v10800_v0  ;;  %v10807_v13 = vunpack.c.h.bf16 %v10804_v3  ;;  %v10854_v11 = vld [vmem:[#allocation47_spill] sm:$0xff] }
 0x16a   : > { %10783 = vst [vmem:[#allocation170_spill] sm:$0xff] %v6576_v61  ;;  %10786 = vst [vmem:[#allocation33_spill] sm:$0xff] %v6580_v36  ;;  %v6608_v28 = vadd.f32 %v1599_v20, %v10802_v9  ;;  %v6612_v24 = vadd.f32 %v1599_v20, %v10805_v10  ;;  %v10810_v2 = vunpack.c.l.bf16 %v10809_v19  ;;  %v10812_v1 = vunpack.c.h.bf16 %v10809_v19  ;;  %v10859_v61 = vld [vmem:[#allocation48_spill] sm:$0xff] }
 0x16b   : > { %10793 = vst [vmem:[#allocation172_spill] sm:$0xff] %v6592_v40  ;;  %v6596_v7 = vadd.f32 %v1599_v20, %v10795_v35  ;;  %v6600_v53 = vadd.f32 %v1599_v20, %v10797_v12  ;;  %10801 = vst [vmem:[#allocation36_spill] sm:$0xff] %v6604_v31  ;;  %v6616_v35 = vadd.f32 %v1599_v20, %v10807_v13  ;;  %v10815_v34 = vunpack.c.l.bf16 %v10814_v6 }
 0x16c   : > { %10803 = vst [vmem:[#allocation174_spill] sm:$0xff] %v6608_v28  ;;  %10806 = vst [vmem:[#allocation37_spill] sm:$0xff] %v6612_v24  ;;  %v6620_v12 = vadd.f32 %v1599_v20, %v10810_v2  ;;  %v6624_v0 = vadd.f32 %v1599_v20, %v10812_v1  ;;  %v10817_v59 = vunpack.c.h.bf16 %v10814_v6  ;;  %v10820_v3 = vunpack.c.l.bf16 %v10819_v37  ;;  %v10824_v6 = vld [vmem:[#allocation41_spill] sm:$0xff]  ;;  %v10829_v2 = vld [vmem:[#allocation42_spill] sm:$0xff] }
 0x16d   : > { %10796 = vst [vmem:[#allocation35_spill] sm:$0xff] %v6596_v7  ;;  %10798 = vst [vmem:[#allocation173_spill] sm:$0xff] %v6600_v53  ;;  %v6628_v9 = vadd.f32 %v1599_v20, %v10815_v34  ;;  %v10827_v4 = vunpack.c.h.bf16 %v10824_v6  ;;  %v10830_v19 = vunpack.c.l.bf16 %v10829_v2  ;;  %v10832_v1 = vunpack.c.h.bf16 %v10829_v2  ;;  %v10844_v28 = vld [vmem:[#allocation45_spill] sm:$0xff]  ;;  %v10849_v7 = vld [vmem:[#allocation46_spill] sm:$0xff] }
 0x16e   : > { %10808 = vst [vmem:[#allocation175_spill] sm:$0xff] %v6616_v35  ;;  %10811 = vst [vmem:[#allocation38_spill] sm:$0xff] %v6620_v12  ;;  %v6632_v10 = vadd.f32 %v1599_v20, %v10817_v59  ;;  %v6652_v34 = vadd.f32 %v1614_v63, %v10820_v3  ;;  %v10822_v20 = vunpack.c.h.bf16 %v10819_v37  ;;  %v10825_v59 = vunpack.c.l.bf16 %v10824_v6  ;;  %v10839_v12 = vld [vmem:[#allocation44_spill] sm:$0xff] }
 0x16f   : > { %10813 = vst [vmem:[#allocation176_spill] sm:$0xff] %v6624_v0  ;;  %10816 = vst [vmem:[#allocation39_spill] sm:$0xff] %v6628_v9  ;;  %v6664_v13 = vadd.f32 %v1614_v63, %v10827_v4  ;;  %v6668_v9 = vadd.f32 %v1614_v63, %v10830_v19  ;;  %v6672_v3 = vadd.f32 %v1614_v63, %v10832_v1  ;;  %v10840_v6 = vunpack.c.l.bf16 %v10839_v12 }
 0x170   : > { %10818 = vst [vmem:[#allocation177_spill] sm:$0xff] %v6632_v10  ;;  %10821 = vst [vmem:[#allocation40_spill] sm:$0xff] %v6652_v34  ;;  %v6656_v31 = vadd.f32 %v1614_v63, %v10822_v20  ;;  %v6660_v24 = vadd.f32 %v1614_v63, %v10825_v59  ;;  %v10834_v10 = vld [vmem:[#allocation43_spill] sm:$0xff]  ;;  %v10842_v35 = vunpack.c.h.bf16 %v10839_v12  ;;  %v10845_v2 = vunpack.c.l.bf16 %v10844_v28  ;;  %v1624_v34 = vpop.permute.xlu1 %1623 }
 0x171   : > { %10828 = vst [vmem:[#allocation179_spill] sm:$0xff] %v6664_v13  ;;  %10831 = vst [vmem:[#allocation42_spill] sm:$0xff] %v6668_v9  ;;  %v10835_v37 = vunpack.c.l.bf16 %v10834_v10  ;;  %v10837_v0 = vunpack.c.h.bf16 %v10834_v10  ;;  %v6684_v4 = vadd.f32 %v1614_v63, %v10840_v6  ;;  %v10847_v53 = vunpack.c.h.bf16 %v10844_v28  ;;  %v10894_v9 = vld [vmem:[#allocation55_spill] sm:$0xff] }
 0x172   : > { %10823 = vst [vmem:[#allocation178_spill] sm:$0xff] %v6656_v31  ;;  %10826 = vst [vmem:[#allocation41_spill] sm:$0xff] %v6660_v24  ;;  %v6688_v19 = vadd.f32 %v1614_v63, %v10842_v35  ;;  %v6692_v1 = vadd.f32 %v1614_v63, %v10845_v2  ;;  %v10850_v10 = vunpack.c.l.bf16 %v10849_v7  ;;  %v10852_v40 = vunpack.c.h.bf16 %v10849_v7  ;;  %v10899_v31 = vld [vmem:[#allocation56_spill] sm:$0xff] }
 0x173   : > { %10833 = vst [vmem:[#allocation180_spill] sm:$0xff] %v6672_v3  ;;  %v6676_v20 = vadd.f32 %v1614_v63, %v10835_v37  ;;  %v6680_v59 = vadd.f32 %v1614_v63, %v10837_v0  ;;  %10841 = vst [vmem:[#allocation44_spill] sm:$0xff] %v6684_v4  ;;  %v6696_v37 = vadd.f32 %v1614_v63, %v10847_v53  ;;  %v10855_v12 = vunpack.c.l.bf16 %v10854_v11 }
 0x174   : > { %10843 = vst [vmem:[#allocation182_spill] sm:$0xff] %v6688_v19  ;;  %10846 = vst [vmem:[#allocation45_spill] sm:$0xff] %v6692_v1  ;;  %v6700_v0 = vadd.f32 %v1614_v63, %v10850_v10  ;;  %v6704_v6 = vadd.f32 %v1614_v63, %v10852_v40  ;;  %v10857_v15 = vunpack.c.h.bf16 %v10854_v11  ;;  %v10860_v28 = vunpack.c.l.bf16 %v10859_v61  ;;  %v10864_v11 = vld [vmem:[#allocation49_spill] sm:$0xff]  ;;  %v10869_v10 = vld [vmem:[#allocation50_spill] sm:$0xff] }
 0x175   : > { %10836 = vst [vmem:[#allocation43_spill] sm:$0xff] %v6676_v20  ;;  %10838 = vst [vmem:[#allocation181_spill] sm:$0xff] %v6680_v59  ;;  %v6708_v35 = vadd.f32 %v1614_v63, %v10855_v12  ;;  %v10867_v36 = vunpack.c.h.bf16 %v10864_v11  ;;  %v10870_v7 = vunpack.c.l.bf16 %v10869_v10  ;;  %v10872_v40 = vunpack.c.h.bf16 %v10869_v10  ;;  %v10884_v19 = vld [vmem:[#allocation53_spill] sm:$0xff]  ;;  %v10889_v20 = vld [vmem:[#allocation54_spill] sm:$0xff] }
 0x176   : > { %10848 = vst [vmem:[#allocation183_spill] sm:$0xff] %v6696_v37  ;;  %10851 = vst [vmem:[#allocation46_spill] sm:$0xff] %v6700_v0  ;;  %v6712_v2 = vadd.f32 %v1614_v63, %v10857_v15  ;;  %v6732_v12 = vadd.f32 %v1609_v16, %v10860_v28  ;;  %v10862_v63 = vunpack.c.h.bf16 %v10859_v61  ;;  %v10865_v15 = vunpack.c.l.bf16 %v10864_v11  ;;  %v10879_v0 = vld [vmem:[#allocation52_spill] sm:$0xff] }
 0x177   : > { %10853 = vst [vmem:[#allocation184_spill] sm:$0xff] %v6704_v6  ;;  %10856 = vst [vmem:[#allocation47_spill] sm:$0xff] %v6708_v35  ;;  %v6744_v53 = vadd.f32 %v1609_v16, %v10867_v36  ;;  %v6748_v35 = vadd.f32 %v1609_v16, %v10870_v7  ;;  %v6752_v28 = vadd.f32 %v1609_v16, %v10872_v40  ;;  %v10880_v11 = vunpack.c.l.bf16 %v10879_v0 }
 0x178   : > { %10858 = vst [vmem:[#allocation185_spill] sm:$0xff] %v6712_v2  ;;  %10861 = vst [vmem:[#allocation48_spill] sm:$0xff] %v6732_v12  ;;  %v6736_v4 = vadd.f32 %v1609_v16, %v10862_v63  ;;  %v6740_v1 = vadd.f32 %v1609_v16, %v10865_v15  ;;  %v10874_v2 = vld [vmem:[#allocation51_spill] sm:$0xff]  ;;  %v10882_v37 = vunpack.c.h.bf16 %v10879_v0  ;;  %v10885_v10 = vunpack.c.l.bf16 %v10884_v19  ;;  %v1619_v12 = vpop.permute.xlu0 %1618 }
 0x179   : > { %10868 = vst [vmem:[#allocation187_spill] sm:$0xff] %v6744_v53  ;;  %10871 = vst [vmem:[#allocation50_spill] sm:$0xff] %v6748_v35  ;;  %v10875_v61 = vunpack.c.l.bf16 %v10874_v2  ;;  %v10877_v6 = vunpack.c.h.bf16 %v10874_v2  ;;  %v6764_v36 = vadd.f32 %v1609_v16, %v10880_v11  ;;  %v10887_v59 = vunpack.c.h.bf16 %v10884_v19  ;;  %v10934_v35 = vld [vmem:[#allocation63_spill] sm:$0xff] }
 0x17a   : > { %10863 = vst [vmem:[#allocation186_spill] sm:$0xff] %v6736_v4  ;;  %10866 = vst [vmem:[#allocation49_spill] sm:$0xff] %v6740_v1  ;;  %v6768_v7 = vadd.f32 %v1609_v16, %v10882_v37  ;;  %v6772_v40 = vadd.f32 %v1609_v16, %v10885_v10  ;;  %v10890_v2 = vunpack.c.l.bf16 %v10889_v20  ;;  %v10892_v3 = vunpack.c.h.bf16 %v10889_v20  ;;  %v10939_v4 = vld [vmem:[#allocation64_spill] sm:$0xff] }
 0x17b   : > { %10873 = vst [vmem:[#allocation188_spill] sm:$0xff] %v6752_v28  ;;  %v6756_v63 = vadd.f32 %v1609_v16, %v10875_v61  ;;  %v6760_v15 = vadd.f32 %v1609_v16, %v10877_v6  ;;  %10881 = vst [vmem:[#allocation52_spill] sm:$0xff] %v6764_v36  ;;  %v6776_v61 = vadd.f32 %v1609_v16, %v10887_v59  ;;  %v10895_v0 = vunpack.c.l.bf16 %v10894_v9 }
 0x17c   : > { %10883 = vst [vmem:[#allocation190_spill] sm:$0xff] %v6768_v7  ;;  %10886 = vst [vmem:[#allocation53_spill] sm:$0xff] %v6772_v40  ;;  %v6780_v6 = vadd.f32 %v1609_v16, %v10890_v2  ;;  %v6784_v11 = vadd.f32 %v1609_v16, %v10892_v3  ;;  %v10897_v13 = vunpack.c.h.bf16 %v10894_v9  ;;  %v10900_v19 = vunpack.c.l.bf16 %v10899_v31  ;;  %v10904_v9 = vld [vmem:[#allocation57_spill] sm:$0xff]  ;;  %v10909_v2 = vld [vmem:[#allocation58_spill] sm:$0xff] }
 0x17d   : > { %10876 = vst [vmem:[#allocation51_spill] sm:$0xff] %v6756_v63  ;;  %10878 = vst [vmem:[#allocation189_spill] sm:$0xff] %v6760_v15  ;;  %v6788_v37 = vadd.f32 %v1609_v16, %v10895_v0  ;;  %v10907_v24 = vunpack.c.h.bf16 %v10904_v9  ;;  %v10910_v20 = vunpack.c.l.bf16 %v10909_v2  ;;  %v10912_v3 = vunpack.c.h.bf16 %v10909_v2  ;;  %v10924_v7 = vld [vmem:[#allocation61_spill] sm:$0xff]  ;;  %v10929_v63 = vld [vmem:[#allocation62_spill] sm:$0xff] }
 0x17e   : > { %10888 = vst [vmem:[#allocation191_spill] sm:$0xff] %v6776_v61  ;;  %10891 = vst [vmem:[#allocation54_spill] sm:$0xff] %v6780_v6  ;;  %v6792_v10 = vadd.f32 %v1609_v16, %v10897_v13  ;;  %v6812_v0 = vadd.f32 %v1624_v34, %v10900_v19  ;;  %v10902_v16 = vunpack.c.h.bf16 %v10899_v31  ;;  %v10905_v13 = vunpack.c.l.bf16 %v10904_v9  ;;  %v10919_v6 = vld [vmem:[#allocation60_spill] sm:$0xff] }
 0x17f   : > { %10893 = vst [vmem:[#allocation192_spill] sm:$0xff] %v6784_v11  ;;  %10896 = vst [vmem:[#allocation55_spill] sm:$0xff] %v6788_v37  ;;  %v6824_v59 = vadd.f32 %v1624_v34, %v10907_v24  ;;  %v6828_v37 = vadd.f32 %v1624_v34, %v10910_v20  ;;  %v6832_v19 = vadd.f32 %v1624_v34, %v10912_v3  ;;  %v10920_v9 = vunpack.c.l.bf16 %v10919_v6 }
 0x180   : > { %10898 = vst [vmem:[#allocation193_spill] sm:$0xff] %v6792_v10  ;;  %10901 = vst [vmem:[#allocation56_spill] sm:$0xff] %v6812_v0  ;;  %v6816_v36 = vadd.f32 %v1624_v34, %v10902_v16  ;;  %v6820_v40 = vadd.f32 %v1624_v34, %v10905_v13  ;;  %v10914_v10 = vld [vmem:[#allocation59_spill] sm:$0xff]  ;;  %v10922_v61 = vunpack.c.h.bf16 %v10919_v6  ;;  %v10925_v2 = vunpack.c.l.bf16 %v10924_v7  ;;  %v1634_v0 = vpop.permute.xlu1 %1633 }
 0x181   : > { %10908 = vst [vmem:[#allocation195_spill] sm:$0xff] %v6824_v59  ;;  %10911 = vst [vmem:[#allocation58_spill] sm:$0xff] %v6828_v37  ;;  %v10915_v31 = vunpack.c.l.bf16 %v10914_v10  ;;  %v10917_v11 = vunpack.c.h.bf16 %v10914_v10  ;;  %v6844_v24 = vadd.f32 %v1624_v34, %v10920_v9  ;;  %v10927_v15 = vunpack.c.h.bf16 %v10924_v7  ;;  %v10974_v37 = vld [vmem:[#allocation71_spill] sm:$0xff] }
 0x182   : > { %10903 = vst [vmem:[#allocation194_spill] sm:$0xff] %v6816_v36  ;;  %10906 = vst [vmem:[#allocation57_spill] sm:$0xff] %v6820_v40  ;;  %v6848_v20 = vadd.f32 %v1624_v34, %v10922_v61  ;;  %v6852_v3 = vadd.f32 %v1624_v34, %v10925_v2  ;;  %v10930_v10 = vunpack.c.l.bf16 %v10929_v63  ;;  %v10932_v28 = vunpack.c.h.bf16 %v10929_v63  ;;  %v10979_v36 = vld [vmem:[#allocation72_spill] sm:$0xff] }
 0x183   : > { %10913 = vst [vmem:[#allocation196_spill] sm:$0xff] %v6832_v19  ;;  %v6836_v16 = vadd.f32 %v1624_v34, %v10915_v31  ;;  %v6840_v13 = vadd.f32 %v1624_v34, %v10917_v11  ;;  %10921 = vst [vmem:[#allocation60_spill] sm:$0xff] %v6844_v24  ;;  %v6856_v31 = vadd.f32 %v1624_v34, %v10927_v15  ;;  %v10935_v6 = vunpack.c.l.bf16 %v10934_v35 }
 0x184   : > { %10923 = vst [vmem:[#allocation198_spill] sm:$0xff] %v6848_v20  ;;  %10926 = vst [vmem:[#allocation61_spill] sm:$0xff] %v6852_v3  ;;  %v6860_v11 = vadd.f32 %v1624_v34, %v10930_v10  ;;  %v6864_v9 = vadd.f32 %v1624_v34, %v10932_v28  ;;  %v10937_v53 = vunpack.c.h.bf16 %v10934_v35  ;;  %v10940_v7 = vunpack.c.l.bf16 %v10939_v4  ;;  %v10944_v35 = vld [vmem:[#allocation65_spill] sm:$0xff]  ;;  %v10949_v10 = vld [vmem:[#allocation66_spill] sm:$0xff] }
 0x185   : > { %10916 = vst [vmem:[#allocation59_spill] sm:$0xff] %v6836_v16  ;;  %10918 = vst [vmem:[#allocation197_spill] sm:$0xff] %v6840_v13  ;;  %v6868_v61 = vadd.f32 %v1624_v34, %v10935_v6  ;;  %v10947_v1 = vunpack.c.h.bf16 %v10944_v35  ;;  %v10950_v63 = vunpack.c.l.bf16 %v10949_v10  ;;  %v10952_v28 = vunpack.c.h.bf16 %v10949_v10  ;;  %v10964_v20 = vld [vmem:[#allocation69_spill] sm:$0xff]  ;;  %v10969_v16 = vld [vmem:[#allocation70_spill] sm:$0xff] }
 0x186   : > { %10928 = vst [vmem:[#allocation199_spill] sm:$0xff] %v6856_v31  ;;  %10931 = vst [vmem:[#allocation62_spill] sm:$0xff] %v6860_v11  ;;  %v6872_v2 = vadd.f32 %v1624_v34, %v10937_v53  ;;  %v6892_v6 = vadd.f32 %v1619_v12, %v10940_v7  ;;  %v10942_v34 = vunpack.c.h.bf16 %v10939_v4  ;;  %v10945_v53 = vunpack.c.l.bf16 %v10944_v35  ;;  %v10959_v11 = vld [vmem:[#allocation68_spill] sm:$0xff] }
 0x187   : > { %10933 = vst [vmem:[#allocation200_spill] sm:$0xff] %v6864_v9  ;;  %10936 = vst [vmem:[#allocation63_spill] sm:$0xff] %v6868_v61  ;;  %v6904_v15 = vadd.f32 %v1619_v12, %v10947_v1  ;;  %v6908_v61 = vadd.f32 %v1619_v12, %v10950_v63  ;;  %v6912_v7 = vadd.f32 %v1619_v12, %v10952_v28  ;;  %v10960_v35 = vunpack.c.l.bf16 %v10959_v11 }
 0x188   : > { %10938 = vst [vmem:[#allocation201_spill] sm:$0xff] %v6872_v2  ;;  %10941 = vst [vmem:[#allocation64_spill] sm:$0xff] %v6892_v6  ;;  %v6896_v24 = vadd.f32 %v1619_v12, %v10942_v34  ;;  %v6900_v3 = vadd.f32 %v1619_v12, %v10945_v53  ;;  %v10954_v2 = vld [vmem:[#allocation67_spill] sm:$0xff]  ;;  %v10962_v31 = vunpack.c.h.bf16 %v10959_v11  ;;  %v10965_v10 = vunpack.c.l.bf16 %v10964_v20  ;;  %v1629_v6 = vpop.permute.xlu0 %1628 }
 0x189   : > { %10948 = vst [vmem:[#allocation203_spill] sm:$0xff] %v6904_v15  ;;  %10951 = vst [vmem:[#allocation66_spill] sm:$0xff] %v6908_v61  ;;  %v10955_v4 = vunpack.c.l.bf16 %v10954_v2  ;;  %v10957_v9 = vunpack.c.h.bf16 %v10954_v2  ;;  %v6924_v1 = vadd.f32 %v1619_v12, %v10960_v35  ;;  %v10967_v13 = vunpack.c.h.bf16 %v10964_v20  ;;  %v11014_v61 = vld [vmem:[#allocation79_spill] sm:$0xff] }
 0x18a   : > { %10943 = vst [vmem:[#allocation202_spill] sm:$0xff] %v6896_v24  ;;  %10946 = vst [vmem:[#allocation65_spill] sm:$0xff] %v6900_v3  ;;  %v6928_v63 = vadd.f32 %v1619_v12, %v10962_v31  ;;  %v6932_v28 = vadd.f32 %v1619_v12, %v10965_v10  ;;  %v10970_v2 = vunpack.c.l.bf16 %v10969_v16  ;;  %v10972_v19 = vunpack.c.h.bf16 %v10969_v16  ;;  %v11019_v24 = vld [vmem:[#allocation80_spill] sm:$0xff] }
 0x18b   : > { %10953 = vst [vmem:[#allocation204_spill] sm:$0xff] %v6912_v7  ;;  %v6916_v34 = vadd.f32 %v1619_v12, %v10955_v4  ;;  %v6920_v53 = vadd.f32 %v1619_v12, %v10957_v9  ;;  %10961 = vst [vmem:[#allocation68_spill] sm:$0xff] %v6924_v1  ;;  %v6936_v4 = vadd.f32 %v1619_v12, %v10967_v13  ;;  %v10975_v11 = vunpack.c.l.bf16 %v10974_v37 }
 0x18c   : > { %10963 = vst [vmem:[#allocation206_spill] sm:$0xff] %v6928_v63  ;;  %10966 = vst [vmem:[#allocation69_spill] sm:$0xff] %v6932_v28  ;;  %v6940_v9 = vadd.f32 %v1619_v12, %v10970_v2  ;;  %v6944_v35 = vadd.f32 %v1619_v12, %v10972_v19  ;;  %v10977_v59 = vunpack.c.h.bf16 %v10974_v37  ;;  %v10980_v20 = vunpack.c.l.bf16 %v10979_v36  ;;  %v10984_v37 = vld [vmem:[#allocation73_spill] sm:$0xff]  ;;  %v10989_v2 = vld [vmem:[#allocation74_spill] sm:$0xff] }
 0x18d   : > { %10956 = vst [vmem:[#allocation67_spill] sm:$0xff] %v6916_v34  ;;  %10958 = vst [vmem:[#allocation205_spill] sm:$0xff] %v6920_v53  ;;  %v6948_v31 = vadd.f32 %v1619_v12, %v10975_v11  ;;  %v10987_v40 = vunpack.c.h.bf16 %v10984_v37  ;;  %v10990_v16 = vunpack.c.l.bf16 %v10989_v2  ;;  %v10992_v19 = vunpack.c.h.bf16 %v10989_v2  ;;  %v11004_v63 = vld [vmem:[#allocation77_spill] sm:$0xff]  ;;  %v11009_v34 = vld [vmem:[#allocation78_spill] sm:$0xff] }
 0x18e   : > { %10968 = vst [vmem:[#allocation207_spill] sm:$0xff] %v6936_v4  ;;  %10971 = vst [vmem:[#allocation70_spill] sm:$0xff] %v6940_v9  ;;  %v6952_v10 = vadd.f32 %v1619_v12, %v10977_v59  ;;  %v6972_v11 = vadd.f32 %v1634_v0, %v10980_v20  ;;  %v10982_v12 = vunpack.c.h.bf16 %v10979_v36  ;;  %v10985_v59 = vunpack.c.l.bf16 %v10984_v37  ;;  %v10999_v9 = vld [vmem:[#allocation76_spill] sm:$0xff] }
 0x18f   : > { %10973 = vst [vmem:[#allocation208_spill] sm:$0xff] %v6944_v35  ;;  %10976 = vst [vmem:[#allocation71_spill] sm:$0xff] %v6948_v31  ;;  %v6984_v13 = vadd.f32 %v1634_v0, %v10987_v40  ;;  %v6988_v31 = vadd.f32 %v1634_v0, %v10990_v16  ;;  %v6992_v20 = vadd.f32 %v1634_v0, %v10992_v19  ;;  %v11000_v37 = vunpack.c.l.bf16 %v10999_v9 }
 0x190   : > { %10978 = vst [vmem:[#allocation209_spill] sm:$0xff] %v6952_v10  ;;  %10981 = vst [vmem:[#allocation72_spill] sm:$0xff] %v6972_v11  ;;  %v6976_v1 = vadd.f32 %v1634_v0, %v10982_v12  ;;  %v6980_v28 = vadd.f32 %v1634_v0, %v10985_v59  ;;  %v10994_v10 = vld [vmem:[#allocation75_spill] sm:$0xff]  ;;  %v11002_v4 = vunpack.c.h.bf16 %v10999_v9  ;;  %v11005_v2 = vunpack.c.l.bf16 %v11004_v63 }
 0x191   : > { %10988 = vst [vmem:[#allocation211_spill] sm:$0xff] %v6984_v13  ;;  %10991 = vst [vmem:[#allocation74_spill] sm:$0xff] %v6988_v31  ;;  %v10995_v36 = vunpack.c.l.bf16 %v10994_v10  ;;  %v10997_v35 = vunpack.c.h.bf16 %v10994_v10  ;;  %v7004_v40 = vadd.f32 %v1634_v0, %v11000_v37  ;;  %v11007_v53 = vunpack.c.h.bf16 %v11004_v63 }
 0x192   : > { %10983 = vst [vmem:[#allocation210_spill] sm:$0xff] %v6976_v1  ;;  %10986 = vst [vmem:[#allocation73_spill] sm:$0xff] %v6980_v28  ;;  %v7008_v16 = vadd.f32 %v1634_v0, %v11002_v4  ;;  %v7012_v19 = vadd.f32 %v1634_v0, %v11005_v2  ;;  %v11010_v10 = vunpack.c.l.bf16 %v11009_v34  ;;  %v11012_v7 = vunpack.c.h.bf16 %v11009_v34  ;;  %v895_v28 = vld [vmem:[%s5108_s17 + $0x458] sm:$0xff] }
 0x193   : > { %10993 = vst [vmem:[#allocation212_spill] sm:$0xff] %v6992_v20  ;;  %v6996_v12 = vadd.f32 %v1634_v0, %v10995_v36  ;;  %v7000_v59 = vadd.f32 %v1634_v0, %v10997_v35  ;;  %11001 = vst [vmem:[#allocation76_spill] sm:$0xff] %v7004_v40  ;;  %v7016_v36 = vadd.f32 %v1634_v0, %v11007_v53  ;;  %v11015_v9 = vunpack.c.l.bf16 %v11014_v61 }
 0x194   : > { %11003 = vst [vmem:[#allocation214_spill] sm:$0xff] %v7008_v16  ;;  %11006 = vst [vmem:[#allocation77_spill] sm:$0xff] %v7012_v19  ;;  %v7020_v35 = vadd.f32 %v1634_v0, %v11010_v10  ;;  %v7024_v37 = vadd.f32 %v1634_v0, %v11012_v7  ;;  %v11017_v15 = vunpack.c.h.bf16 %v11014_v61  ;;  %v11020_v63 = vunpack.c.l.bf16 %v11019_v24  ;;  %v11024_v61 = vld [vmem:[#allocation81_spill] sm:$0xff]  ;;  %v11029_v10 = vld [vmem:[#allocation82_spill] sm:$0xff] }
 0x195   : > { %10996 = vst [vmem:[#allocation75_spill] sm:$0xff] %v6996_v12  ;;  %10998 = vst [vmem:[#allocation213_spill] sm:$0xff] %v7000_v59  ;;  %v7028_v4 = vadd.f32 %v1634_v0, %v11015_v9  ;;  %v11027_v3 = vunpack.c.h.bf16 %v11024_v61  ;;  %v11030_v34 = vunpack.c.l.bf16 %v11029_v10  ;;  %v11032_v7 = vunpack.c.h.bf16 %v11029_v10  ;;  %v11044_v10 = vld [vmem:[#allocation85_spill] sm:$0xff] }
 0x196   : > { %11008 = vst [vmem:[#allocation215_spill] sm:$0xff] %v7016_v36  ;;  %11011 = vst [vmem:[#allocation78_spill] sm:$0xff] %v7020_v35  ;;  %v7032_v2 = vadd.f32 %v1634_v0, %v11017_v15  ;;  %v7052_v9 = vadd.f32 %v1629_v6, %v11020_v63  ;;  %v11022_v0 = vunpack.c.h.bf16 %v11019_v24  ;;  %v11025_v15 = vunpack.c.l.bf16 %v11024_v61  ;;  %v11039_v35 = vld [vmem:[#allocation84_spill] sm:$0xff] }
 0x197   : > { %11013 = vst [vmem:[#allocation216_spill] sm:$0xff] %v7024_v37  ;;  %11016 = vst [vmem:[#allocation79_spill] sm:$0xff] %v7028_v4  ;;  %v7064_v53 = vadd.f32 %v1629_v6, %v11027_v3  ;;  %v7068_v4 = vadd.f32 %v1629_v6, %v11030_v34  ;;  %v7072_v63 = vadd.f32 %v1629_v6, %v11032_v7  ;;  %v11040_v61 = vunpack.c.l.bf16 %v11039_v35 }
 0x198   : > { %11018 = vst [vmem:[#allocation217_spill] sm:$0xff] %v7032_v2  ;;  %11021 = vst [vmem:[#allocation80_spill] sm:$0xff] %v7052_v9  ;;  %v7056_v40 = vadd.f32 %v1629_v6, %v11022_v0  ;;  %v7060_v19 = vadd.f32 %v1629_v6, %v11025_v15  ;;  %v11034_v2 = vld [vmem:[#allocation83_spill] sm:$0xff]  ;;  %v11042_v36 = vunpack.c.h.bf16 %v11039_v35  ;;  %v11045_v7 = vunpack.c.l.bf16 %v11044_v10 }
 0x199   : > { %11028 = vst [vmem:[#allocation219_spill] sm:$0xff] %v7064_v53  ;;  %11031 = vst [vmem:[#allocation82_spill] sm:$0xff] %v7068_v4  ;;  %v11035_v24 = vunpack.c.l.bf16 %v11034_v2  ;;  %v11037_v37 = vunpack.c.h.bf16 %v11034_v2  ;;  %v7084_v3 = vadd.f32 %v1629_v6, %v11040_v61  ;;  %v11054_v35 = vld [vmem:[#allocation87_spill] sm:$0xff]  ;;  %v896_v53 = vld [vmem:[%s5108_s17 + $0x460] sm:$0xff] }
 0x19a   : > { %11023 = vst [vmem:[#allocation218_spill] sm:$0xff] %v7056_v40  ;;  %11026 = vst [vmem:[#allocation81_spill] sm:$0xff] %v7060_v19  ;;  %v7088_v34 = vadd.f32 %v1629_v6, %v11042_v36  ;;  %v7092_v16 = vadd.f32 %v1629_v6, %v11045_v7  ;;  %v11055_v36 = vunpack.c.l.bf16 %v11054_v35  ;;  %v11057_v13 = vunpack.c.h.bf16 %v11054_v35 }
 0x19b   : > { %11033 = vst [vmem:[#allocation220_spill] sm:$0xff] %v7072_v63  ;;  %v7076_v0 = vadd.f32 %v1629_v6, %v11035_v24  ;;  %v7080_v15 = vadd.f32 %v1629_v6, %v11037_v37  ;;  %11041 = vst [vmem:[#allocation84_spill] sm:$0xff] %v7084_v3  ;;  %v11047_v24 = vunpack.c.h.bf16 %v11044_v10  ;;  %v11049_v37 = vld [vmem:[#allocation86_spill] sm:$0xff]  ;;  %v1644_v63 = vpop.permute.xlu1 %1643 }
 0x19c   : > { %11043 = vst [vmem:[#allocation222_spill] sm:$0xff] %v7088_v34  ;;  %11046 = vst [vmem:[#allocation85_spill] sm:$0xff] %v7092_v16  ;;  %v11050_v2 = vunpack.c.l.bf16 %v11049_v37  ;;  %v11052_v61 = vunpack.c.h.bf16 %v11049_v37  ;;  %v7108_v31 = vadd.f32 %v1629_v6, %v11055_v36  ;;  %v7112_v7 = vadd.f32 %v1629_v6, %v11057_v13  ;;  %v894_v13 = vld [vmem:[%s5108_s17 + $0x450] sm:$0xff]  ;;  %v11059_v36 = vld [vmem:[#allocation88_spill] sm:$0xff] }
 0x19d   : > { %11036 = vst [vmem:[#allocation83_spill] sm:$0xff] %v7076_v0  ;;  %11038 = vst [vmem:[#allocation221_spill] sm:$0xff] %v7080_v15  ;;  %v7096_v59 = vadd.f32 %v1629_v6, %v11047_v24  ;;  %v898_v15 = vld [vmem:[%s5108_s17 + $0x470] sm:$0xff]  ;;  %v899_v0 = vld [vmem:[%s5108_s17 + $0x478] sm:$0xff]  ;;  %v1288_v10 = vunpack.c.l.bf16 %v894_v13  ;;  %v1289_v3 = vunpack.c.h.bf16 %v894_v13  ;;  %v1290_v24 = vunpack.c.l.bf16 %v895_v28 }
 0x19e   : > { %v7100_v12 = vadd.f32 %v1629_v6, %v11050_v2  ;;  %v7104_v20 = vadd.f32 %v1629_v6, %v11052_v61  ;;  %11056 = vst [vmem:[#allocation87_spill] sm:$0xff] %v7108_v31  ;;  %11058 = vst [vmem:[#allocation225_spill] sm:$0xff] %v7112_v7  ;;  %v897_v61 = vld [vmem:[%s5108_s17 + $0x468] sm:$0xff]  ;;  %v1291_v34 = vunpack.c.h.bf16 %v895_v28  ;;  %v1292_v2 = vunpack.c.l.bf16 %v896_v53 }
 0x19f   : > { %11048 = vst [vmem:[#allocation223_spill] sm:$0xff] %v7096_v59  ;;  %v1293_v16 = vunpack.c.h.bf16 %v896_v53  ;;  %v1294_v37 = vunpack.c.l.bf16 %v897_v61  ;;  %v1295_v59 = vunpack.c.h.bf16 %v897_v61  ;;  %v1296_v19 = vunpack.c.l.bf16 %v898_v15  ;;  %v11064_v31 = vld [vmem:[#allocation89_spill] sm:$0xff] }
 0x1a0   : > { %11051 = vst [vmem:[#allocation86_spill] sm:$0xff] %v7100_v12  ;;  %11053 = vst [vmem:[#allocation224_spill] sm:$0xff] %v7104_v20  ;;  %v1297_v40 = vunpack.c.h.bf16 %v898_v15  ;;  %v1298_v4 = vunpack.c.l.bf16 %v899_v0  ;;  %v1299_v12 = vunpack.c.h.bf16 %v899_v0  ;;  %v11060_v20 = vunpack.c.l.bf16 %v11059_v36 }
 0x1a1   : > { %v11062_v6 = vunpack.c.h.bf16 %v11059_v36  ;;  %v11065_v13 = vunpack.c.l.bf16 %v11064_v31  ;;  %v11067_v28 = vunpack.c.h.bf16 %v11064_v31  ;;  %v7152_v61 = vadd.f32 %v1644_v63, %v1288_v10 }
 0x1a2   : > { %v7138_v35 = vadd.f32 %v1644_v63, %v11060_v20  ;;  %v7154_v15 = vadd.f32 %v1644_v63, %v1289_v3  ;;  %v7156_v0 = vadd.f32 %v1644_v63, %v1290_v24  ;;  %v7158_v20 = vadd.f32 %v1644_v63, %v1291_v34  ;;  %v887_v34 = vld [vmem:[%s5108_s17 + $0x418] sm:$0xff] }
 0x1a3   : > { %v7142_v7 = vadd.f32 %v1644_v63, %v11062_v6  ;;  %v7146_v9 = vadd.f32 %v1644_v63, %v11065_v13  ;;  %v7150_v53 = vadd.f32 %v1644_v63, %v11067_v28  ;;  %11069 = vst [vmem:[#allocation228_spill] sm:$0xff] %v7152_v61  ;;  %v7160_v1 = vadd.f32 %v1644_v63, %v1292_v2  ;;  %v890_v61 = vld [vmem:[%s5108_s17 + $0x430] sm:$0xff]  ;;  %v891_v28 = vld [vmem:[%s5108_s17 + $0x438] sm:$0xff] }
 0x1a4   : > { %11061 = vst [vmem:[#allocation88_spill] sm:$0xff] %v7138_v35  ;;  %11070 = vst [vmem:[#allocation229_spill] sm:$0xff] %v7154_v15  ;;  %v7162_v36 = vadd.f32 %v1644_v63, %v1293_v16  ;;  %v7164_v6 = vadd.f32 %v1644_v63, %v1294_v37  ;;  %v7166_v13 = vadd.f32 %v1644_v63, %v1295_v59  ;;  %v886_v16 = vld [vmem:[%s5108_s17 + $0x410] sm:$0xff]  ;;  %v889_v15 = vld [vmem:[%s5108_s17 + $0x428] sm:$0xff] }
 0x1a5   : > { %11063 = vst [vmem:[#allocation226_spill] sm:$0xff] %v7142_v7  ;;  %11066 = vst [vmem:[#allocation89_spill] sm:$0xff] %v7146_v9  ;;  %v7168_v31 = vadd.f32 %v1644_v63, %v1296_v19  ;;  %v7170_v10 = vadd.f32 %v1644_v63, %v1297_v40  ;;  %v7172_v3 = vadd.f32 %v1644_v63, %v1298_v4  ;;  %v884_v4 = vld [vmem:[%s5108_s17 + $0x400] sm:$0xff]  ;;  %v1272_v59 = vunpack.c.l.bf16 %v886_v16 }
 0x1a6   : > { %11068 = vst [vmem:[#allocation227_spill] sm:$0xff] %v7150_v53  ;;  %11071 = vst [vmem:[#allocation230_spill] sm:$0xff] %v7156_v0  ;;  %v7174_v24 = vadd.f32 %v1644_v63, %v1299_v12  ;;  %v885_v63 = vld [vmem:[%s5108_s17 + $0x408] sm:$0xff]  ;;  %v1269_v2 = vunpack.c.h.bf16 %v884_v4  ;;  %v1274_v53 = vunpack.c.l.bf16 %v887_v34  ;;  %v1275_v9 = vunpack.c.h.bf16 %v887_v34 }
 0x1a7   : > { %11072 = vst [vmem:[#allocation231_spill] sm:$0xff] %v7158_v20  ;;  %11073 = vst [vmem:[#allocation232_spill] sm:$0xff] %v7160_v1  ;;  %v888_v20 = vld [vmem:[%s5108_s17 + $0x420] sm:$0xff]  ;;  %v1268_v1 = vunpack.c.l.bf16 %v884_v4  ;;  %v1271_v37 = vunpack.c.h.bf16 %v885_v63  ;;  %v1278_v19 = vunpack.c.l.bf16 %v889_v15  ;;  %v1280_v0 = vunpack.c.l.bf16 %v890_v61 }
 0x1a8   : > { %11074 = vst [vmem:[#allocation233_spill] sm:$0xff] %v7162_v36  ;;  %11075 = vst [vmem:[#allocation234_spill] sm:$0xff] %v7164_v6  ;;  %v1270_v36 = vunpack.c.l.bf16 %v885_v63  ;;  %v1639_v6 = vpop.permute.xlu0 %1638  ;;  %v1276_v40 = vunpack.c.l.bf16 %v888_v20  ;;  %v1282_v12 = vunpack.c.l.bf16 %v891_v28 }
 0x1a9   : > { %11076 = vst [vmem:[#allocation235_spill] sm:$0xff] %v7166_v13  ;;  %11077 = vst [vmem:[#allocation236_spill] sm:$0xff] %v7168_v31  ;;  %v1273_v13 = vunpack.c.h.bf16 %v886_v16  ;;  %v1277_v31 = vunpack.c.h.bf16 %v888_v20  ;;  %v7200_v7 = vadd.f32 %v1639_v6, %v1268_v1  ;;  %v7202_v35 = vadd.f32 %v1639_v6, %v1269_v2 }
 0x1aa   : > { %11078 = vst [vmem:[#allocation237_spill] sm:$0xff] %v7170_v10  ;;  %11079 = vst [vmem:[#allocation238_spill] sm:$0xff] %v7172_v3  ;;  %v1279_v10 = vunpack.c.h.bf16 %v889_v15  ;;  %v1281_v3 = vunpack.c.h.bf16 %v890_v61  ;;  %v7204_v4 = vadd.f32 %v1639_v6, %v1270_v36  ;;  %v7206_v63 = vadd.f32 %v1639_v6, %v1271_v37 }
 0x1ab   : > { %11080 = vst [vmem:[#allocation239_spill] sm:$0xff] %v7174_v24  ;;  %v1283_v24 = vunpack.c.h.bf16 %v891_v28  ;;  %11081 = vst [vmem:[#allocation240_spill] sm:$0xff] %v7200_v7  ;;  %v7208_v11 = vadd.f32 %v1639_v6, %v1272_v59  ;;  %v7210_v16 = vadd.f32 %v1639_v6, %v1273_v13  ;;  %v7212_v34 = vadd.f32 %v1639_v6, %v1274_v53  ;;  %v910_v59 = vld [vmem:[%s5108_s17 + $0x4d0] sm:$0xff] }
 0x1ac   : > { %11082 = vst [vmem:[#allocation241_spill] sm:$0xff] %v7202_v35  ;;  %11083 = vst [vmem:[#allocation242_spill] sm:$0xff] %v7204_v4  ;;  %v7214_v20 = vadd.f32 %v1639_v6, %v1275_v9  ;;  %v7216_v15 = vadd.f32 %v1639_v6, %v1276_v40  ;;  %v7218_v61 = vadd.f32 %v1639_v6, %v1277_v31  ;;  %v911_v31 = vld [vmem:[%s5108_s17 + $0x4d8] sm:$0xff] }
 0x1ad   : > { %11084 = vst [vmem:[#allocation243_spill] sm:$0xff] %v7206_v63  ;;  %11085 = vst [vmem:[#allocation244_spill] sm:$0xff] %v7208_v11  ;;  %v7220_v1 = vadd.f32 %v1639_v6, %v1278_v19  ;;  %v7222_v36 = vadd.f32 %v1639_v6, %v1279_v10  ;;  %v7224_v2 = vadd.f32 %v1639_v6, %v1280_v0  ;;  %v909_v19 = vld [vmem:[%s5108_s17 + $0x4c8] sm:$0xff]  ;;  %v1320_v10 = vunpack.c.l.bf16 %v910_v59 }
 0x1ae   : > { %11086 = vst [vmem:[#allocation245_spill] sm:$0xff] %v7210_v16  ;;  %11087 = vst [vmem:[#allocation246_spill] sm:$0xff] %v7212_v34  ;;  %v7226_v37 = vadd.f32 %v1639_v6, %v1281_v3  ;;  %v7228_v13 = vadd.f32 %v1639_v6, %v1282_v12  ;;  %v7230_v53 = vadd.f32 %v1639_v6, %v1283_v24  ;;  %v908_v24 = vld [vmem:[%s5108_s17 + $0x4c0] sm:$0xff]  ;;  %v913_v34 = vld [vmem:[%s5108_s17 + $0x4e8] sm:$0xff]  ;;  %v1319_v40 = vunpack.c.h.bf16 %v909_v19 }
 0x1af   : > { %11088 = vst [vmem:[#allocation247_spill] sm:$0xff] %v7214_v20  ;;  %11089 = vst [vmem:[#allocation248_spill] sm:$0xff] %v7216_v15  ;;  %v912_v20 = vld [vmem:[%s5108_s17 + $0x4e0] sm:$0xff]  ;;  %v914_v16 = vld [vmem:[%s5108_s17 + $0x4f0] sm:$0xff]  ;;  %v1316_v15 = vunpack.c.l.bf16 %v908_v24  ;;  %v1317_v28 = vunpack.c.h.bf16 %v908_v24  ;;  %v1322_v11 = vunpack.c.l.bf16 %v911_v31  ;;  %v1323_v63 = vunpack.c.h.bf16 %v911_v31 }
 0x1b0   : > { %11090 = vst [vmem:[#allocation249_spill] sm:$0xff] %v7218_v61  ;;  %11091 = vst [vmem:[#allocation250_spill] sm:$0xff] %v7220_v1  ;;  %v915_v12 = vld [vmem:[%s5108_s17 + $0x4f8] sm:$0xff]  ;;  %v1318_v61 = vunpack.c.l.bf16 %v909_v19  ;;  %v1654_v1 = vpop.permute.xlu1 %1653  ;;  %v1324_v0 = vunpack.c.l.bf16 %v912_v20  ;;  %v1326_v3 = vunpack.c.l.bf16 %v913_v34  ;;  %v1328_v9 = vunpack.c.l.bf16 %v914_v16 }
 0x1b1   : > { %11092 = vst [vmem:[#allocation251_spill] sm:$0xff] %v7222_v36  ;;  %11093 = vst [vmem:[#allocation252_spill] sm:$0xff] %v7224_v2  ;;  %v1321_v36 = vunpack.c.h.bf16 %v910_v59  ;;  %v1325_v2 = vunpack.c.h.bf16 %v912_v20  ;;  %v1330_v6 = vunpack.c.l.bf16 %v915_v12  ;;  %v7256_v4 = vadd.f32 %v1654_v1, %v1316_v15 }
 0x1b2   : > { %11094 = vst [vmem:[#allocation253_spill] sm:$0xff] %v7226_v37  ;;  %11095 = vst [vmem:[#allocation254_spill] sm:$0xff] %v7228_v13  ;;  %v1327_v37 = vunpack.c.h.bf16 %v913_v34  ;;  %v1329_v13 = vunpack.c.h.bf16 %v914_v16  ;;  %v7258_v35 = vadd.f32 %v1654_v1, %v1317_v28  ;;  %v7260_v24 = vadd.f32 %v1654_v1, %v1318_v61 }
 0x1b3   : > { %11096 = vst [vmem:[#allocation255_spill] sm:$0xff] %v7230_v53  ;;  %v1331_v53 = vunpack.c.h.bf16 %v915_v12  ;;  %11097 = vst [vmem:[#allocation256_spill] sm:$0xff] %v7256_v4  ;;  %v7262_v19 = vadd.f32 %v1654_v1, %v1319_v40  ;;  %v7264_v7 = vadd.f32 %v1654_v1, %v1320_v10  ;;  %v7266_v59 = vadd.f32 %v1654_v1, %v1321_v36  ;;  %v907_v12 = vld [vmem:[%s5108_s17 + $0x4b8] sm:$0xff] }
 0x1b4   : > { %11098 = vst [vmem:[#allocation257_spill] sm:$0xff] %v7258_v35  ;;  %11099 = vst [vmem:[#allocation258_spill] sm:$0xff] %v7260_v24  ;;  %v7268_v31 = vadd.f32 %v1654_v1, %v1322_v11  ;;  %v7270_v20 = vadd.f32 %v1654_v1, %v1323_v63  ;;  %v7272_v34 = vadd.f32 %v1654_v1, %v1324_v0  ;;  %v902_v0 = vld [vmem:[%s5108_s17 + $0x490] sm:$0xff] }
 0x1b5   : > { %11100 = vst [vmem:[#allocation259_spill] sm:$0xff] %v7262_v19  ;;  %11101 = vst [vmem:[#allocation260_spill] sm:$0xff] %v7264_v7  ;;  %v7274_v16 = vadd.f32 %v1654_v1, %v1325_v2  ;;  %v7276_v15 = vadd.f32 %v1654_v1, %v1326_v3  ;;  %v7278_v61 = vadd.f32 %v1654_v1, %v1327_v37  ;;  %v903_v2 = vld [vmem:[%s5108_s17 + $0x498] sm:$0xff]  ;;  %v1304_v37 = vunpack.c.l.bf16 %v902_v0 }
 0x1b6   : > { %11102 = vst [vmem:[#allocation261_spill] sm:$0xff] %v7266_v59  ;;  %11103 = vst [vmem:[#allocation262_spill] sm:$0xff] %v7268_v31  ;;  %v7280_v40 = vadd.f32 %v1654_v1, %v1328_v9  ;;  %v7282_v10 = vadd.f32 %v1654_v1, %v1329_v13  ;;  %v7284_v36 = vadd.f32 %v1654_v1, %v1330_v6  ;;  %v901_v6 = vld [vmem:[%s5108_s17 + $0x488] sm:$0xff]  ;;  %v906_v59 = vld [vmem:[%s5108_s17 + $0x4b0] sm:$0xff]  ;;  %v1306_v7 = vunpack.c.l.bf16 %v903_v2 }
 0x1b7   : > { %11104 = vst [vmem:[#allocation263_spill] sm:$0xff] %v7270_v20  ;;  %11105 = vst [vmem:[#allocation264_spill] sm:$0xff] %v7272_v34  ;;  %v7286_v11 = vadd.f32 %v1654_v1, %v1331_v53  ;;  %v900_v53 = vld [vmem:[%s5108_s17 + $0x480] sm:$0xff]  ;;  %v905_v31 = vld [vmem:[%s5108_s17 + $0x4a8] sm:$0xff]  ;;  %v1303_v3 = vunpack.c.h.bf16 %v901_v6  ;;  %v1307_v19 = vunpack.c.h.bf16 %v903_v2  ;;  %v1312_v63 = vunpack.c.l.bf16 %v906_v59 }
 0x1b8   : > { %11106 = vst [vmem:[#allocation265_spill] sm:$0xff] %v7274_v16  ;;  %11107 = vst [vmem:[#allocation266_spill] sm:$0xff] %v7276_v15  ;;  %v904_v20 = vld [vmem:[%s5108_s17 + $0x4a0] sm:$0xff]  ;;  %v1300_v34 = vunpack.c.l.bf16 %v900_v53  ;;  %v1301_v28 = vunpack.c.h.bf16 %v900_v53  ;;  %v1302_v16 = vunpack.c.l.bf16 %v901_v6  ;;  %v1649_v15 = vpop.permute.xlu0 %1648  ;;  %v1310_v9 = vunpack.c.l.bf16 %v905_v31 }
 0x1b9   : > { %11108 = vst [vmem:[#allocation267_spill] sm:$0xff] %v7278_v61  ;;  %11109 = vst [vmem:[#allocation268_spill] sm:$0xff] %v7280_v40  ;;  %v1305_v61 = vunpack.c.h.bf16 %v902_v0  ;;  %v1308_v13 = vunpack.c.l.bf16 %v904_v20  ;;  %v1309_v40 = vunpack.c.h.bf16 %v904_v20  ;;  %v1314_v1 = vunpack.c.l.bf16 %v907_v12 }
 0x1ba   : > { %11110 = vst [vmem:[#allocation269_spill] sm:$0xff] %v7282_v10  ;;  %11111 = vst [vmem:[#allocation270_spill] sm:$0xff] %v7284_v36  ;;  %v1311_v10 = vunpack.c.h.bf16 %v905_v31  ;;  %v1313_v36 = vunpack.c.h.bf16 %v906_v59  ;;  %v7312_v24 = vadd.f32 %v1649_v15, %v1300_v34  ;;  %v7314_v35 = vadd.f32 %v1649_v15, %v1301_v28 }
 0x1bb   : > { %11112 = vst [vmem:[#allocation271_spill] sm:$0xff] %v7286_v11  ;;  %v1315_v11 = vunpack.c.h.bf16 %v907_v12  ;;  %v7316_v53 = vadd.f32 %v1649_v15, %v1302_v16  ;;  %v7318_v6 = vadd.f32 %v1649_v15, %v1303_v3  ;;  %v7320_v4 = vadd.f32 %v1649_v15, %v1304_v37  ;;  %v931_v12 = vld [vmem:[%s5108_s17 + $0x578] sm:$0xff] }
 0x1bc   : > { %11113 = vst [vmem:[#allocation272_spill] sm:$0xff] %v7312_v24  ;;  %11114 = vst [vmem:[#allocation273_spill] sm:$0xff] %v7314_v35  ;;  %v7322_v0 = vadd.f32 %v1649_v15, %v1305_v61  ;;  %v7324_v2 = vadd.f32 %v1649_v15, %v1306_v7  ;;  %v7326_v20 = vadd.f32 %v1649_v15, %v1307_v19 }
 0x1bd   : > { %11115 = vst [vmem:[#allocation274_spill] sm:$0xff] %v7316_v53  ;;  %11116 = vst [vmem:[#allocation275_spill] sm:$0xff] %v7318_v6  ;;  %v7328_v31 = vadd.f32 %v1649_v15, %v1308_v13  ;;  %v7330_v59 = vadd.f32 %v1649_v15, %v1309_v40  ;;  %v7332_v34 = vadd.f32 %v1649_v15, %v1310_v9  ;;  %v926_v13 = vld [vmem:[%s5108_s17 + $0x550] sm:$0xff]  ;;  %v927_v40 = vld [vmem:[%s5108_s17 + $0x558] sm:$0xff] }
 0x1be   : > { %11117 = vst [vmem:[#allocation276_spill] sm:$0xff] %v7320_v4  ;;  %11118 = vst [vmem:[#allocation277_spill] sm:$0xff] %v7322_v0  ;;  %v7334_v16 = vadd.f32 %v1649_v15, %v1311_v10  ;;  %v7336_v3 = vadd.f32 %v1649_v15, %v1312_v63  ;;  %v7338_v37 = vadd.f32 %v1649_v15, %v1313_v36  ;;  %v930_v0 = vld [vmem:[%s5108_s17 + $0x570] sm:$0xff]  ;;  %v1352_v10 = vunpack.c.l.bf16 %v926_v13 }
 0x1bf   : > { %11119 = vst [vmem:[#allocation278_spill] sm:$0xff] %v7324_v2  ;;  %11120 = vst [vmem:[#allocation279_spill] sm:$0xff] %v7326_v20  ;;  %v7340_v61 = vadd.f32 %v1649_v15, %v1314_v1  ;;  %v7342_v7 = vadd.f32 %v1649_v15, %v1315_v11  ;;  %v924_v11 = vld [vmem:[%s5108_s17 + $0x540] sm:$0xff]  ;;  %v925_v1 = vld [vmem:[%s5108_s17 + $0x548] sm:$0xff]  ;;  %v1354_v4 = vunpack.c.l.bf16 %v927_v40  ;;  %v1355_v6 = vunpack.c.h.bf16 %v927_v40 }
 0x1c0   : > { %11121 = vst [vmem:[#allocation280_spill] sm:$0xff] %v7328_v31  ;;  %11122 = vst [vmem:[#allocation281_spill] sm:$0xff] %v7330_v59  ;;  %v928_v20 = vld [vmem:[%s5108_s17 + $0x560] sm:$0xff]  ;;  %v929_v2 = vld [vmem:[%s5108_s17 + $0x568] sm:$0xff]  ;;  %v1348_v31 = vunpack.c.l.bf16 %v924_v11  ;;  %v1349_v28 = vunpack.c.h.bf16 %v924_v11  ;;  %v1350_v59 = vunpack.c.l.bf16 %v925_v1  ;;  %v1351_v9 = vunpack.c.h.bf16 %v925_v1 }
 0x1c1   : > { %11123 = vst [vmem:[#allocation282_spill] sm:$0xff] %v7332_v34  ;;  %11124 = vst [vmem:[#allocation283_spill] sm:$0xff] %v7334_v16  ;;  %v1664_v34 = vpop.permute.xlu1 %1663  ;;  %v1353_v16 = vunpack.c.h.bf16 %v926_v13  ;;  %v1356_v36 = vunpack.c.l.bf16 %v928_v20  ;;  %v1358_v63 = vunpack.c.l.bf16 %v929_v2  ;;  %v1360_v19 = vunpack.c.l.bf16 %v930_v0 }
 0x1c2   : > { %11125 = vst [vmem:[#allocation284_spill] sm:$0xff] %v7336_v3  ;;  %11126 = vst [vmem:[#allocation285_spill] sm:$0xff] %v7338_v37  ;;  %v1357_v3 = vunpack.c.h.bf16 %v928_v20  ;;  %v1359_v37 = vunpack.c.h.bf16 %v929_v2  ;;  %v1362_v15 = vunpack.c.l.bf16 %v931_v12  ;;  %v7368_v53 = vadd.f32 %v1664_v34, %v1348_v31 }
 0x1c3   : > { %11127 = vst [vmem:[#allocation286_spill] sm:$0xff] %v7340_v61  ;;  %11128 = vst [vmem:[#allocation287_spill] sm:$0xff] %v7342_v7  ;;  %v1361_v61 = vunpack.c.h.bf16 %v930_v0  ;;  %v1363_v7 = vunpack.c.h.bf16 %v931_v12  ;;  %v7370_v35 = vadd.f32 %v1664_v34, %v1349_v28  ;;  %v7372_v11 = vadd.f32 %v1664_v34, %v1350_v59  ;;  %v923_v12 = vld [vmem:[%s5108_s17 + $0x538] sm:$0xff] }
 0x1c4   : > { %11129 = vst [vmem:[#allocation288_spill] sm:$0xff] %v7368_v53  ;;  %v7374_v1 = vadd.f32 %v1664_v34, %v1351_v9  ;;  %v7376_v24 = vadd.f32 %v1664_v34, %v1352_v10  ;;  %v7378_v13 = vadd.f32 %v1664_v34, %v1353_v16  ;;  %v7380_v40 = vadd.f32 %v1664_v34, %v1354_v4 }
 0x1c5   : > { %11130 = vst [vmem:[#allocation289_spill] sm:$0xff] %v7370_v35  ;;  %11131 = vst [vmem:[#allocation290_spill] sm:$0xff] %v7372_v11  ;;  %v7382_v20 = vadd.f32 %v1664_v34, %v1355_v6  ;;  %v7384_v2 = vadd.f32 %v1664_v34, %v1356_v36  ;;  %v7386_v0 = vadd.f32 %v1664_v34, %v1357_v3  ;;  %v918_v36 = vld [vmem:[%s5108_s17 + $0x510] sm:$0xff]  ;;  %v919_v3 = vld [vmem:[%s5108_s17 + $0x518] sm:$0xff] }
 0x1c6   : > { %11132 = vst [vmem:[#allocation291_spill] sm:$0xff] %v7374_v1  ;;  %11133 = vst [vmem:[#allocation292_spill] sm:$0xff] %v7376_v24  ;;  %v7388_v31 = vadd.f32 %v1664_v34, %v1358_v63  ;;  %v7390_v59 = vadd.f32 %v1664_v34, %v1359_v37  ;;  %v7392_v9 = vadd.f32 %v1664_v34, %v1360_v19  ;;  %v1336_v37 = vunpack.c.l.bf16 %v918_v36 }
 0x1c7   : > { %11134 = vst [vmem:[#allocation293_spill] sm:$0xff] %v7378_v13  ;;  %11135 = vst [vmem:[#allocation294_spill] sm:$0xff] %v7380_v40  ;;  %v7394_v10 = vadd.f32 %v1664_v34, %v1361_v61  ;;  %v7396_v16 = vadd.f32 %v1664_v34, %v1362_v15  ;;  %v7398_v4 = vadd.f32 %v1664_v34, %v1363_v7  ;;  %v916_v7 = vld [vmem:[%s5108_s17 + $0x500] sm:$0xff]  ;;  %v917_v15 = vld [vmem:[%s5108_s17 + $0x508] sm:$0xff]  ;;  %v1338_v24 = vunpack.c.l.bf16 %v919_v3 }
 0x1c8   : > { %11136 = vst [vmem:[#allocation295_spill] sm:$0xff] %v7382_v20  ;;  %11137 = vst [vmem:[#allocation296_spill] sm:$0xff] %v7384_v2  ;;  %v920_v20 = vld [vmem:[%s5108_s17 + $0x520] sm:$0xff]  ;;  %v921_v40 = vld [vmem:[%s5108_s17 + $0x528] sm:$0xff]  ;;  %v1332_v2 = vunpack.c.l.bf16 %v916_v7  ;;  %v1333_v28 = vunpack.c.h.bf16 %v916_v7  ;;  %v1335_v63 = vunpack.c.h.bf16 %v917_v15  ;;  %v1339_v1 = vunpack.c.h.bf16 %v919_v3 }
 0x1c9   : > { %11138 = vst [vmem:[#allocation297_spill] sm:$0xff] %v7386_v0  ;;  %11139 = vst [vmem:[#allocation298_spill] sm:$0xff] %v7388_v31  ;;  %v922_v13 = vld [vmem:[%s5108_s17 + $0x530] sm:$0xff]  ;;  %v1334_v0 = vunpack.c.l.bf16 %v917_v15  ;;  %v1659_v31 = vpop.permute.xlu0 %1658  ;;  %v1340_v61 = vunpack.c.l.bf16 %v920_v20  ;;  %v1342_v19 = vunpack.c.l.bf16 %v921_v40  ;;  %v1346_v34 = vunpack.c.l.bf16 %v923_v12 }
 0x1ca   : > { %11140 = vst [vmem:[#allocation299_spill] sm:$0xff] %v7390_v59  ;;  %11141 = vst [vmem:[#allocation300_spill] sm:$0xff] %v7392_v9  ;;  %v1337_v59 = vunpack.c.h.bf16 %v918_v36  ;;  %v1341_v9 = vunpack.c.h.bf16 %v920_v20  ;;  %v1344_v6 = vunpack.c.l.bf16 %v922_v13  ;;  %v7424_v11 = vadd.f32 %v1659_v31, %v1332_v2 }
 0x1cb   : > { %11142 = vst [vmem:[#allocation301_spill] sm:$0xff] %v7394_v10  ;;  %11143 = vst [vmem:[#allocation302_spill] sm:$0xff] %v7396_v16  ;;  %v1343_v10 = vunpack.c.h.bf16 %v921_v40  ;;  %v1345_v16 = vunpack.c.h.bf16 %v922_v13  ;;  %v7426_v35 = vadd.f32 %v1659_v31, %v1333_v28  ;;  %v7428_v7 = vadd.f32 %v1659_v31, %v1334_v0 }
 0x1cc   : > { %11144 = vst [vmem:[#allocation303_spill] sm:$0xff] %v7398_v4  ;;  %v1347_v4 = vunpack.c.h.bf16 %v923_v12  ;;  %11145 = vst [vmem:[#allocation304_spill] sm:$0xff] %v7424_v11  ;;  %v7430_v15 = vadd.f32 %v1659_v31, %v1335_v63  ;;  %v7432_v53 = vadd.f32 %v1659_v31, %v1336_v37  ;;  %v7434_v36 = vadd.f32 %v1659_v31, %v1337_v59  ;;  %v947_v12 = vld [vmem:[%s5108_s17 + $0x5f8] sm:$0xff] }
 0x1cd   : > { %11146 = vst [vmem:[#allocation305_spill] sm:$0xff] %v7426_v35  ;;  %11147 = vst [vmem:[#allocation306_spill] sm:$0xff] %v7428_v7  ;;  %v7436_v3 = vadd.f32 %v1659_v31, %v1338_v24  ;;  %v7438_v20 = vadd.f32 %v1659_v31, %v1339_v1  ;;  %v7440_v40 = vadd.f32 %v1659_v31, %v1340_v61  ;;  %v942_v61 = vld [vmem:[%s5108_s17 + $0x5d0] sm:$0xff] }
 0x1ce   : > { %11148 = vst [vmem:[#allocation307_spill] sm:$0xff] %v7430_v15  ;;  %11149 = vst [vmem:[#allocation308_spill] sm:$0xff] %v7432_v53  ;;  %v7442_v13 = vadd.f32 %v1659_v31, %v1341_v9  ;;  %v7444_v2 = vadd.f32 %v1659_v31, %v1342_v19  ;;  %v7446_v0 = vadd.f32 %v1659_v31, %v1343_v10  ;;  %v943_v9 = vld [vmem:[%s5108_s17 + $0x5d8] sm:$0xff]  ;;  %v1384_v10 = vunpack.c.l.bf16 %v942_v61 }
 0x1cf   : > { %11150 = vst [vmem:[#allocation309_spill] sm:$0xff] %v7434_v36  ;;  %11151 = vst [vmem:[#allocation310_spill] sm:$0xff] %v7436_v3  ;;  %v7448_v63 = vadd.f32 %v1659_v31, %v1344_v6  ;;  %v7450_v37 = vadd.f32 %v1659_v31, %v1345_v16  ;;  %v7452_v59 = vadd.f32 %v1659_v31, %v1346_v34  ;;  %v941_v34 = vld [vmem:[%s5108_s17 + $0x5c8] sm:$0xff]  ;;  %v946_v36 = vld [vmem:[%s5108_s17 + $0x5f0] sm:$0xff]  ;;  %v1386_v53 = vunpack.c.l.bf16 %v943_v9 }
 0x1d0   : > { %11152 = vst [vmem:[#allocation311_spill] sm:$0xff] %v7438_v20  ;;  %11153 = vst [vmem:[#allocation312_spill] sm:$0xff] %v7440_v40  ;;  %v7454_v24 = vadd.f32 %v1659_v31, %v1347_v4  ;;  %v940_v4 = vld [vmem:[%s5108_s17 + $0x5c0] sm:$0xff]  ;;  %v945_v3 = vld [vmem:[%s5108_s17 + $0x5e8] sm:$0xff]  ;;  %v1383_v19 = vunpack.c.h.bf16 %v941_v34  ;;  %v1387_v15 = vunpack.c.h.bf16 %v943_v9  ;;  %v1392_v1 = vunpack.c.l.bf16 %v946_v36 }
 0x1d1   : > { %11154 = vst [vmem:[#allocation313_spill] sm:$0xff] %v7442_v13  ;;  %11155 = vst [vmem:[#allocation314_spill] sm:$0xff] %v7444_v2  ;;  %v944_v20 = vld [vmem:[%s5108_s17 + $0x5e0] sm:$0xff]  ;;  %v1380_v40 = vunpack.c.l.bf16 %v940_v4  ;;  %v1381_v28 = vunpack.c.h.bf16 %v940_v4  ;;  %v1382_v13 = vunpack.c.l.bf16 %v941_v34  ;;  %v1674_v2 = vpop.permute.xlu1 %1673  ;;  %v1390_v6 = vunpack.c.l.bf16 %v945_v3 }
 0x1d2   : > { %11156 = vst [vmem:[#allocation315_spill] sm:$0xff] %v7446_v0  ;;  %11157 = vst [vmem:[#allocation316_spill] sm:$0xff] %v7448_v63  ;;  %v1385_v0 = vunpack.c.h.bf16 %v942_v61  ;;  %v1388_v16 = vunpack.c.l.bf16 %v944_v20  ;;  %v1389_v63 = vunpack.c.h.bf16 %v944_v20  ;;  %v1394_v31 = vunpack.c.l.bf16 %v947_v12 }
 0x1d3   : > { %11158 = vst [vmem:[#allocation317_spill] sm:$0xff] %v7450_v37  ;;  %11159 = vst [vmem:[#allocation318_spill] sm:$0xff] %v7452_v59  ;;  %v1391_v37 = vunpack.c.h.bf16 %v945_v3  ;;  %v1393_v59 = vunpack.c.h.bf16 %v946_v36  ;;  %v7480_v7 = vadd.f32 %v1674_v2, %v1380_v40  ;;  %v7482_v35 = vadd.f32 %v1674_v2, %v1381_v28 }
 0x1d4   : > { %11160 = vst [vmem:[#allocation319_spill] sm:$0xff] %v7454_v24  ;;  %v1395_v24 = vunpack.c.h.bf16 %v947_v12  ;;  %v7484_v4 = vadd.f32 %v1674_v2, %v1382_v13  ;;  %v7486_v34 = vadd.f32 %v1674_v2, %v1383_v19  ;;  %v7488_v11 = vadd.f32 %v1674_v2, %v1384_v10  ;;  %v939_v12 = vld [vmem:[%s5108_s17 + $0x5b8] sm:$0xff] }
 0x1d5   : > { %11161 = vst [vmem:[#allocation320_spill] sm:$0xff] %v7480_v7  ;;  %11162 = vst [vmem:[#allocation321_spill] sm:$0xff] %v7482_v35  ;;  %v7490_v61 = vadd.f32 %v1674_v2, %v1385_v0  ;;  %v7492_v9 = vadd.f32 %v1674_v2, %v1386_v53  ;;  %v7494_v20 = vadd.f32 %v1674_v2, %v1387_v15 }
 0x1d6   : > { %11163 = vst [vmem:[#allocation322_spill] sm:$0xff] %v7484_v4  ;;  %11164 = vst [vmem:[#allocation323_spill] sm:$0xff] %v7486_v34  ;;  %v7496_v3 = vadd.f32 %v1674_v2, %v1388_v16  ;;  %v7498_v36 = vadd.f32 %v1674_v2, %v1389_v63  ;;  %v7500_v40 = vadd.f32 %v1674_v2, %v1390_v6  ;;  %v934_v16 = vld [vmem:[%s5108_s17 + $0x590] sm:$0xff]  ;;  %v935_v63 = vld [vmem:[%s5108_s17 + $0x598] sm:$0xff] }
 0x1d7   : > { %11165 = vst [vmem:[#allocation324_spill] sm:$0xff] %v7488_v11  ;;  %11166 = vst [vmem:[#allocation325_spill] sm:$0xff] %v7490_v61  ;;  %v7502_v13 = vadd.f32 %v1674_v2, %v1391_v37  ;;  %v7504_v19 = vadd.f32 %v1674_v2, %v1392_v1  ;;  %v7506_v10 = vadd.f32 %v1674_v2, %v1393_v59  ;;  %v938_v61 = vld [vmem:[%s5108_s17 + $0x5b0] sm:$0xff]  ;;  %v1368_v37 = vunpack.c.l.bf16 %v934_v16 }
 0x1d8   : > { %11167 = vst [vmem:[#allocation326_spill] sm:$0xff] %v7492_v9  ;;  %11168 = vst [vmem:[#allocation327_spill] sm:$0xff] %v7494_v20  ;;  %v7508_v0 = vadd.f32 %v1674_v2, %v1394_v31  ;;  %v7510_v53 = vadd.f32 %v1674_v2, %v1395_v24  ;;  %v932_v24 = vld [vmem:[%s5108_s17 + $0x580] sm:$0xff]  ;;  %v933_v31 = vld [vmem:[%s5108_s17 + $0x588] sm:$0xff]  ;;  %v1370_v11 = vunpack.c.l.bf16 %v935_v63  ;;  %v1371_v34 = vunpack.c.h.bf16 %v935_v63 }
 0x1d9   : > { %11169 = vst [vmem:[#allocation328_spill] sm:$0xff] %v7496_v3  ;;  %11170 = vst [vmem:[#allocation329_spill] sm:$0xff] %v7498_v36  ;;  %v936_v20 = vld [vmem:[%s5108_s17 + $0x5a0] sm:$0xff]  ;;  %v937_v9 = vld [vmem:[%s5108_s17 + $0x5a8] sm:$0xff]  ;;  %v1364_v3 = vunpack.c.l.bf16 %v932_v24  ;;  %v1365_v28 = vunpack.c.h.bf16 %v932_v24  ;;  %v1366_v36 = vunpack.c.l.bf16 %v933_v31  ;;  %v1367_v6 = vunpack.c.h.bf16 %v933_v31 }
 0x1da   : > { %11171 = vst [vmem:[#allocation330_spill] sm:$0xff] %v7500_v40  ;;  %11172 = vst [vmem:[#allocation331_spill] sm:$0xff] %v7502_v13  ;;  %v1669_v40 = vpop.permute.xlu0 %1668  ;;  %v1369_v13 = vunpack.c.h.bf16 %v934_v16  ;;  %v1372_v59 = vunpack.c.l.bf16 %v936_v20  ;;  %v1374_v1 = vunpack.c.l.bf16 %v937_v9  ;;  %v1376_v15 = vunpack.c.l.bf16 %v938_v61 }
 0x1db   : > { %11173 = vst [vmem:[#allocation332_spill] sm:$0xff] %v7504_v19  ;;  %11174 = vst [vmem:[#allocation333_spill] sm:$0xff] %v7506_v10  ;;  %v1373_v19 = vunpack.c.h.bf16 %v936_v20  ;;  %v1375_v10 = vunpack.c.h.bf16 %v937_v9  ;;  %v1378_v2 = vunpack.c.l.bf16 %v939_v12  ;;  %v7536_v4 = vadd.f32 %v1669_v40, %v1364_v3 }
 0x1dc   : > { %11175 = vst [vmem:[#allocation334_spill] sm:$0xff] %v7508_v0  ;;  %11176 = vst [vmem:[#allocation335_spill] sm:$0xff] %v7510_v53  ;;  %v1377_v0 = vunpack.c.h.bf16 %v938_v61  ;;  %v1379_v53 = vunpack.c.h.bf16 %v939_v12  ;;  %v7538_v35 = vadd.f32 %v1669_v40, %v1365_v28  ;;  %v7540_v24 = vadd.f32 %v1669_v40, %v1366_v36  ;;  %v963_v12 = vld [vmem:[%s5108_s17 + $0x678] sm:$0xff] }
 0x1dd   : > { %11177 = vst [vmem:[#allocation336_spill] sm:$0xff] %v7536_v4  ;;  %v7542_v31 = vadd.f32 %v1669_v40, %v1367_v6  ;;  %v7544_v7 = vadd.f32 %v1669_v40, %v1368_v37  ;;  %v7546_v16 = vadd.f32 %v1669_v40, %v1369_v13  ;;  %v7548_v63 = vadd.f32 %v1669_v40, %v1370_v11 }
 0x1de   : > { %11178 = vst [vmem:[#allocation337_spill] sm:$0xff] %v7538_v35  ;;  %11179 = vst [vmem:[#allocation338_spill] sm:$0xff] %v7540_v24  ;;  %v7550_v20 = vadd.f32 %v1669_v40, %v1371_v34  ;;  %v7552_v9 = vadd.f32 %v1669_v40, %v1372_v59  ;;  %v7554_v61 = vadd.f32 %v1669_v40, %v1373_v19  ;;  %v958_v59 = vld [vmem:[%s5108_s17 + $0x650] sm:$0xff]  ;;  %v959_v19 = vld [vmem:[%s5108_s17 + $0x658] sm:$0xff] }
 0x1df   : > { %11180 = vst [vmem:[#allocation339_spill] sm:$0xff] %v7542_v31  ;;  %11181 = vst [vmem:[#allocation340_spill] sm:$0xff] %v7544_v7  ;;  %v7556_v3 = vadd.f32 %v1669_v40, %v1374_v1  ;;  %v7558_v36 = vadd.f32 %v1669_v40, %v1375_v10  ;;  %v7560_v6 = vadd.f32 %v1669_v40, %v1376_v15  ;;  %v1416_v10 = vunpack.c.l.bf16 %v958_v59 }
 0x1e0   : > { %11182 = vst [vmem:[#allocation341_spill] sm:$0xff] %v7546_v16  ;;  %11183 = vst [vmem:[#allocation342_spill] sm:$0xff] %v7548_v63  ;;  %v7562_v37 = vadd.f32 %v1669_v40, %v1377_v0  ;;  %v7564_v13 = vadd.f32 %v1669_v40, %v1378_v2  ;;  %v7566_v11 = vadd.f32 %v1669_v40, %v1379_v53  ;;  %v956_v53 = vld [vmem:[%s5108_s17 + $0x640] sm:$0xff]  ;;  %v957_v2 = vld [vmem:[%s5108_s17 + $0x648] sm:$0xff]  ;;  %v1418_v7 = vunpack.c.l.bf16 %v959_v19 }
 0x1e1   : > { %11184 = vst [vmem:[#allocation343_spill] sm:$0xff] %v7550_v20  ;;  %11185 = vst [vmem:[#allocation344_spill] sm:$0xff] %v7552_v9  ;;  %v960_v20 = vld [vmem:[%s5108_s17 + $0x660] sm:$0xff]  ;;  %v961_v63 = vld [vmem:[%s5108_s17 + $0x668] sm:$0xff]  ;;  %v1412_v9 = vunpack.c.l.bf16 %v956_v53  ;;  %v1413_v28 = vunpack.c.h.bf16 %v956_v53  ;;  %v1415_v1 = vunpack.c.h.bf16 %v957_v2  ;;  %v1419_v31 = vunpack.c.h.bf16 %v959_v19 }
 0x1e2   : > { %11186 = vst [vmem:[#allocation345_spill] sm:$0xff] %v7554_v61  ;;  %11187 = vst [vmem:[#allocation346_spill] sm:$0xff] %v7556_v3  ;;  %v962_v16 = vld [vmem:[%s5108_s17 + $0x670] sm:$0xff]  ;;  %v1414_v61 = vunpack.c.l.bf16 %v957_v2  ;;  %v1684_v3 = vpop.permute.xlu1 %1683  ;;  %v1420_v0 = vunpack.c.l.bf16 %v960_v20  ;;  %v1422_v15 = vunpack.c.l.bf16 %v961_v63  ;;  %v1426_v40 = vunpack.c.l.bf16 %v963_v12 }
 0x1e3   : > { %11188 = vst [vmem:[#allocation347_spill] sm:$0xff] %v7558_v36  ;;  %11189 = vst [vmem:[#allocation348_spill] sm:$0xff] %v7560_v6  ;;  %v1417_v36 = vunpack.c.h.bf16 %v958_v59  ;;  %v1421_v6 = vunpack.c.h.bf16 %v960_v20  ;;  %v1424_v34 = vunpack.c.l.bf16 %v962_v16  ;;  %v7592_v24 = vadd.f32 %v1684_v3, %v1412_v9 }
 0x1e4   : > { %11190 = vst [vmem:[#allocation349_spill] sm:$0xff] %v7562_v37  ;;  %11191 = vst [vmem:[#allocation350_spill] sm:$0xff] %v7564_v13  ;;  %v1423_v37 = vunpack.c.h.bf16 %v961_v63  ;;  %v1425_v13 = vunpack.c.h.bf16 %v962_v16  ;;  %v7594_v35 = vadd.f32 %v1684_v3, %v1413_v28  ;;  %v7596_v53 = vadd.f32 %v1684_v3, %v1414_v61 }
 0x1e5   : > { %11192 = vst [vmem:[#allocation351_spill] sm:$0xff] %v7566_v11  ;;  %v1427_v11 = vunpack.c.h.bf16 %v963_v12  ;;  %11193 = vst [vmem:[#allocation352_spill] sm:$0xff] %v7592_v24  ;;  %v7598_v2 = vadd.f32 %v1684_v3, %v1415_v1  ;;  %v7600_v4 = vadd.f32 %v1684_v3, %v1416_v10  ;;  %v7602_v59 = vadd.f32 %v1684_v3, %v1417_v36  ;;  %v955_v12 = vld [vmem:[%s5108_s17 + $0x638] sm:$0xff] }
 0x1e6   : > { %11194 = vst [vmem:[#allocation353_spill] sm:$0xff] %v7594_v35  ;;  %11195 = vst [vmem:[#allocation354_spill] sm:$0xff] %v7596_v53  ;;  %v7604_v19 = vadd.f32 %v1684_v3, %v1418_v7  ;;  %v7606_v20 = vadd.f32 %v1684_v3, %v1419_v31  ;;  %v7608_v63 = vadd.f32 %v1684_v3, %v1420_v0  ;;  %v950_v0 = vld [vmem:[%s5108_s17 + $0x610] sm:$0xff] }
 0x1e7   : > { %11196 = vst [vmem:[#allocation355_spill] sm:$0xff] %v7598_v2  ;;  %11197 = vst [vmem:[#allocation356_spill] sm:$0xff] %v7600_v4  ;;  %v7610_v16 = vadd.f32 %v1684_v3, %v1421_v6  ;;  %v7612_v9 = vadd.f32 %v1684_v3, %v1422_v15  ;;  %v7614_v61 = vadd.f32 %v1684_v3, %v1423_v37  ;;  %v951_v6 = vld [vmem:[%s5108_s17 + $0x618] sm:$0xff]  ;;  %v1400_v37 = vunpack.c.l.bf16 %v950_v0 }
 0x1e8   : > { %11198 = vst [vmem:[#allocation357_spill] sm:$0xff] %v7602_v59  ;;  %11199 = vst [vmem:[#allocation358_spill] sm:$0xff] %v7604_v19  ;;  %v7616_v1 = vadd.f32 %v1684_v3, %v1424_v34  ;;  %v7618_v10 = vadd.f32 %v1684_v3, %v1425_v13  ;;  %v7620_v36 = vadd.f32 %v1684_v3, %v1426_v40  ;;  %v949_v40 = vld [vmem:[%s5108_s17 + $0x608] sm:$0xff]  ;;  %v954_v59 = vld [vmem:[%s5108_s17 + $0x630] sm:$0xff]  ;;  %v1402_v4 = vunpack.c.l.bf16 %v951_v6 }
 0x1e9   : > { %11200 = vst [vmem:[#allocation359_spill] sm:$0xff] %v7606_v20  ;;  %11201 = vst [vmem:[#allocation360_spill] sm:$0xff] %v7608_v63  ;;  %v7622_v7 = vadd.f32 %v1684_v3, %v1427_v11  ;;  %v948_v11 = vld [vmem:[%s5108_s17 + $0x600] sm:$0xff]  ;;  %v953_v19 = vld [vmem:[%s5108_s17 + $0x628] sm:$0xff]  ;;  %v1399_v15 = vunpack.c.h.bf16 %v949_v40  ;;  %v1403_v2 = vunpack.c.h.bf16 %v951_v6  ;;  %v1408_v31 = vunpack.c.l.bf16 %v954_v59 }
 0x1ea   : > { %11202 = vst [vmem:[#allocation361_spill] sm:$0xff] %v7610_v16  ;;  %11203 = vst [vmem:[#allocation362_spill] sm:$0xff] %v7612_v9  ;;  %v952_v20 = vld [vmem:[%s5108_s17 + $0x620] sm:$0xff]  ;;  %v1396_v63 = vunpack.c.l.bf16 %v948_v11  ;;  %v1397_v28 = vunpack.c.h.bf16 %v948_v11  ;;  %v1398_v16 = vunpack.c.l.bf16 %v949_v40  ;;  %v1679_v9 = vpop.permute.xlu0 %1678  ;;  %v1406_v34 = vunpack.c.l.bf16 %v953_v19 }
 0x1eb   : > { %11204 = vst [vmem:[#allocation363_spill] sm:$0xff] %v7614_v61  ;;  %11205 = vst [vmem:[#allocation364_spill] sm:$0xff] %v7616_v1  ;;  %v1401_v61 = vunpack.c.h.bf16 %v950_v0  ;;  %v1404_v13 = vunpack.c.l.bf16 %v952_v20  ;;  %v1405_v1 = vunpack.c.h.bf16 %v952_v20  ;;  %v1410_v3 = vunpack.c.l.bf16 %v955_v12 }
 0x1ec   : > { %11206 = vst [vmem:[#allocation365_spill] sm:$0xff] %v7618_v10  ;;  %11207 = vst [vmem:[#allocation366_spill] sm:$0xff] %v7620_v36  ;;  %v1407_v10 = vunpack.c.h.bf16 %v953_v19  ;;  %v1409_v36 = vunpack.c.h.bf16 %v954_v59  ;;  %v7648_v53 = vadd.f32 %v1679_v9, %v1396_v63  ;;  %v7650_v35 = vadd.f32 %v1679_v9, %v1397_v28 }
 0x1ed   : > { %11208 = vst [vmem:[#allocation367_spill] sm:$0xff] %v7622_v7  ;;  %v1411_v7 = vunpack.c.h.bf16 %v955_v12  ;;  %v7652_v11 = vadd.f32 %v1679_v9, %v1398_v16  ;;  %v7654_v40 = vadd.f32 %v1679_v9, %v1399_v15  ;;  %v7656_v24 = vadd.f32 %v1679_v9, %v1400_v37  ;;  %v979_v12 = vld [vmem:[%s5108_s17 + $0x6f8] sm:$0xff] }
 0x1ee   : > { %11209 = vst [vmem:[#allocation368_spill] sm:$0xff] %v7648_v53  ;;  %11210 = vst [vmem:[#allocation369_spill] sm:$0xff] %v7650_v35  ;;  %v7658_v0 = vadd.f32 %v1679_v9, %v1401_v61  ;;  %v7660_v6 = vadd.f32 %v1679_v9, %v1402_v4  ;;  %v7662_v20 = vadd.f32 %v1679_v9, %v1403_v2 }
 0x1ef   : > { %11211 = vst [vmem:[#allocation370_spill] sm:$0xff] %v7652_v11  ;;  %11212 = vst [vmem:[#allocation371_spill] sm:$0xff] %v7654_v40  ;;  %v7664_v19 = vadd.f32 %v1679_v9, %v1404_v13  ;;  %v7666_v59 = vadd.f32 %v1679_v9, %v1405_v1  ;;  %v7668_v63 = vadd.f32 %v1679_v9, %v1406_v34  ;;  %v974_v13 = vld [vmem:[%s5108_s17 + $0x6d0] sm:$0xff]  ;;  %v975_v1 = vld [vmem:[%s5108_s17 + $0x6d8] sm:$0xff] }
 0x1f0   : > { %11213 = vst [vmem:[#allocation372_spill] sm:$0xff] %v7656_v24  ;;  %11214 = vst [vmem:[#allocation373_spill] sm:$0xff] %v7658_v0  ;;  %v7670_v16 = vadd.f32 %v1679_v9, %v1407_v10  ;;  %v7672_v15 = vadd.f32 %v1679_v9, %v1408_v31  ;;  %v7674_v37 = vadd.f32 %v1679_v9, %v1409_v36  ;;  %v978_v0 = vld [vmem:[%s5108_s17 + $0x6f0] sm:$0xff]  ;;  %v1448_v10 = vunpack.c.l.bf16 %v974_v13 }
 0x1f1   : > { %11215 = vst [vmem:[#allocation374_spill] sm:$0xff] %v7660_v6  ;;  %11216 = vst [vmem:[#allocation375_spill] sm:$0xff] %v7662_v20  ;;  %v7676_v61 = vadd.f32 %v1679_v9, %v1410_v3  ;;  %v7678_v4 = vadd.f32 %v1679_v9, %v1411_v7  ;;  %v972_v7 = vld [vmem:[%s5108_s17 + $0x6c0] sm:$0xff]  ;;  %v973_v3 = vld [vmem:[%s5108_s17 + $0x6c8] sm:$0xff]  ;;  %v1450_v24 = vunpack.c.l.bf16 %v975_v1  ;;  %v1451_v40 = vunpack.c.h.bf16 %v975_v1 }
 0x1f2   : > { %11217 = vst [vmem:[#allocation376_spill] sm:$0xff] %v7664_v19  ;;  %11218 = vst [vmem:[#allocation377_spill] sm:$0xff] %v7666_v59  ;;  %v976_v20 = vld [vmem:[%s5108_s17 + $0x6e0] sm:$0xff]  ;;  %v977_v6 = vld [vmem:[%s5108_s17 + $0x6e8] sm:$0xff]  ;;  %v1444_v19 = vunpack.c.l.bf16 %v972_v7  ;;  %v1445_v28 = vunpack.c.h.bf16 %v972_v7  ;;  %v1446_v59 = vunpack.c.l.bf16 %v973_v3  ;;  %v1447_v34 = vunpack.c.h.bf16 %v973_v3 }
 0x1f3   : > { %11219 = vst [vmem:[#allocation378_spill] sm:$0xff] %v7668_v63  ;;  %11220 = vst [vmem:[#allocation379_spill] sm:$0xff] %v7670_v16  ;;  %v1694_v63 = vpop.permute.xlu1 %1693  ;;  %v1449_v16 = vunpack.c.h.bf16 %v974_v13  ;;  %v1452_v36 = vunpack.c.l.bf16 %v976_v20  ;;  %v1454_v31 = vunpack.c.l.bf16 %v977_v6  ;;  %v1456_v2 = vunpack.c.l.bf16 %v978_v0 }
 0x1f4   : > { %11221 = vst [vmem:[#allocation380_spill] sm:$0xff] %v7672_v15  ;;  %11222 = vst [vmem:[#allocation381_spill] sm:$0xff] %v7674_v37  ;;  %v1453_v15 = vunpack.c.h.bf16 %v976_v20  ;;  %v1455_v37 = vunpack.c.h.bf16 %v977_v6  ;;  %v1458_v9 = vunpack.c.l.bf16 %v979_v12  ;;  %v7704_v11 = vadd.f32 %v1694_v63, %v1444_v19 }
 0x1f5   : > { %11223 = vst [vmem:[#allocation382_spill] sm:$0xff] %v7676_v61  ;;  %11224 = vst [vmem:[#allocation383_spill] sm:$0xff] %v7678_v4  ;;  %v1457_v61 = vunpack.c.h.bf16 %v978_v0  ;;  %v1459_v4 = vunpack.c.h.bf16 %v979_v12  ;;  %v7706_v35 = vadd.f32 %v1694_v63, %v1445_v28  ;;  %v7708_v7 = vadd.f32 %v1694_v63, %v1446_v59  ;;  %v971_v12 = vld [vmem:[%s5108_s17 + $0x6b8] sm:$0xff] }
 0x1f6   : > { %11225 = vst [vmem:[#allocation384_spill] sm:$0xff] %v7704_v11  ;;  %v7710_v3 = vadd.f32 %v1694_v63, %v1447_v34  ;;  %v7712_v53 = vadd.f32 %v1694_v63, %v1448_v10  ;;  %v7714_v13 = vadd.f32 %v1694_v63, %v1449_v16  ;;  %v7716_v1 = vadd.f32 %v1694_v63, %v1450_v24 }
 0x1f7   : > { %11226 = vst [vmem:[#allocation385_spill] sm:$0xff] %v7706_v35  ;;  %11227 = vst [vmem:[#allocation386_spill] sm:$0xff] %v7708_v7  ;;  %v7718_v20 = vadd.f32 %v1694_v63, %v1451_v40  ;;  %v7720_v6 = vadd.f32 %v1694_v63, %v1452_v36  ;;  %v7722_v0 = vadd.f32 %v1694_v63, %v1453_v15  ;;  %v966_v36 = vld [vmem:[%s5108_s17 + $0x690] sm:$0xff]  ;;  %v967_v15 = vld [vmem:[%s5108_s17 + $0x698] sm:$0xff] }
 0x1f8   : > { %11228 = vst [vmem:[#allocation387_spill] sm:$0xff] %v7710_v3  ;;  %11229 = vst [vmem:[#allocation388_spill] sm:$0xff] %v7712_v53  ;;  %v7724_v19 = vadd.f32 %v1694_v63, %v1454_v31  ;;  %v7726_v59 = vadd.f32 %v1694_v63, %v1455_v37  ;;  %v7728_v34 = vadd.f32 %v1694_v63, %v1456_v2  ;;  %v1432_v37 = vunpack.c.l.bf16 %v966_v36 }
 0x1f9   : > { %11230 = vst [vmem:[#allocation389_spill] sm:$0xff] %v7714_v13  ;;  %11231 = vst [vmem:[#allocation390_spill] sm:$0xff] %v7716_v1  ;;  %v7730_v10 = vadd.f32 %v1694_v63, %v1457_v61  ;;  %v7732_v16 = vadd.f32 %v1694_v63, %v1458_v9  ;;  %v7734_v24 = vadd.f32 %v1694_v63, %v1459_v4  ;;  %v964_v4 = vld [vmem:[%s5108_s17 + $0x680] sm:$0xff]  ;;  %v965_v9 = vld [vmem:[%s5108_s17 + $0x688] sm:$0xff]  ;;  %v1434_v53 = vunpack.c.l.bf16 %v967_v15 }
 0x1fa   : > { %11232 = vst [vmem:[#allocation391_spill] sm:$0xff] %v7718_v20  ;;  %11233 = vst [vmem:[#allocation392_spill] sm:$0xff] %v7720_v6  ;;  %v968_v20 = vld [vmem:[%s5108_s17 + $0x6a0] sm:$0xff]  ;;  %v969_v1 = vld [vmem:[%s5108_s17 + $0x6a8] sm:$0xff]  ;;  %v1428_v6 = vunpack.c.l.bf16 %v964_v4  ;;  %v1429_v28 = vunpack.c.h.bf16 %v964_v4  ;;  %v1431_v31 = vunpack.c.h.bf16 %v965_v9  ;;  %v1435_v3 = vunpack.c.h.bf16 %v967_v15 }
 0x1fb   : > { %11234 = vst [vmem:[#allocation393_spill] sm:$0xff] %v7722_v0  ;;  %11235 = vst [vmem:[#allocation394_spill] sm:$0xff] %v7724_v19  ;;  %v970_v13 = vld [vmem:[%s5108_s17 + $0x6b0] sm:$0xff]  ;;  %v1430_v0 = vunpack.c.l.bf16 %v965_v9  ;;  %v1689_v19 = vpop.permute.xlu0 %1688  ;;  %v1436_v61 = vunpack.c.l.bf16 %v968_v20  ;;  %v1438_v2 = vunpack.c.l.bf16 %v969_v1  ;;  %v1442_v63 = vunpack.c.l.bf16 %v971_v12 }
 0x1fc   : > { %11236 = vst [vmem:[#allocation395_spill] sm:$0xff] %v7726_v59  ;;  %11237 = vst [vmem:[#allocation396_spill] sm:$0xff] %v7728_v34  ;;  %v1433_v59 = vunpack.c.h.bf16 %v966_v36  ;;  %v1437_v34 = vunpack.c.h.bf16 %v968_v20  ;;  %v1440_v40 = vunpack.c.l.bf16 %v970_v13  ;;  %v7760_v7 = vadd.f32 %v1689_v19, %v1428_v6 }
 0x1fd   : > { %11238 = vst [vmem:[#allocation397_spill] sm:$0xff] %v7730_v10  ;;  %11239 = vst [vmem:[#allocation398_spill] sm:$0xff] %v7732_v16  ;;  %v1439_v10 = vunpack.c.h.bf16 %v969_v1  ;;  %v1441_v16 = vunpack.c.h.bf16 %v970_v13  ;;  %v7762_v35 = vadd.f32 %v1689_v19, %v1429_v28  ;;  %v7764_v4 = vadd.f32 %v1689_v19, %v1430_v0 }
 0x1fe   : > { %11240 = vst [vmem:[#allocation399_spill] sm:$0xff] %v7734_v24  ;;  %v1443_v24 = vunpack.c.h.bf16 %v971_v12  ;;  %11241 = vst [vmem:[#allocation400_spill] sm:$0xff] %v7760_v7  ;;  %v7766_v9 = vadd.f32 %v1689_v19, %v1431_v31  ;;  %v7768_v11 = vadd.f32 %v1689_v19, %v1432_v37  ;;  %v7770_v36 = vadd.f32 %v1689_v19, %v1433_v59 }
 0x1ff   : > { %11242 = vst [vmem:[#allocation401_spill] sm:$0xff] %v7762_v35  ;;  %11243 = vst [vmem:[#allocation402_spill] sm:$0xff] %v7764_v4  ;;  %v7772_v15 = vadd.f32 %v1689_v19, %v1434_v53  ;;  %v7774_v20 = vadd.f32 %v1689_v19, %v1435_v3  ;;  %v7776_v1 = vadd.f32 %v1689_v19, %v1436_v61  ;;  %v11258_v53 = vmax.f32 %v6096_v30, 0.0  ;;  %v2775_v30 = vpop.permute.xlu0 %2774 }
 0x200   : > { %11244 = vst [vmem:[#allocation403_spill] sm:$0xff] %v7766_v9  ;;  %11245 = vst [vmem:[#allocation404_spill] sm:$0xff] %v7768_v11  ;;  %v7778_v13 = vadd.f32 %v1689_v19, %v1437_v34  ;;  %v7780_v6 = vadd.f32 %v1689_v19, %v1438_v2  ;;  %v7782_v12 = vadd.f32 %v1689_v19, %v1439_v10  ;;  %v11260_v28 = vmax.f32 %v6104_v50, 0.0 }
 0x201   : > { %11246 = vst [vmem:[#allocation405_spill] sm:$0xff] %v7770_v36  ;;  %11247 = vst [vmem:[#allocation406_spill] sm:$0xff] %v7772_v15  ;;  %v7784_v0 = vadd.f32 %v1689_v19, %v1440_v40  ;;  %v7786_v31 = vadd.f32 %v1689_v19, %v1441_v16  ;;  %v7788_v37 = vadd.f32 %v1689_v19, %v1442_v63  ;;  %v2780_v63 = vpop.permute.xlu1 %2779  ;;  %v11257_v40 = vmax.f32 %v6092_v29, 0.0 }
 0x202   : > { %11248 = vst [vmem:[#allocation407_spill] sm:$0xff] %v7774_v20  ;;  %11249 = vst [vmem:[#allocation408_spill] sm:$0xff] %v7776_v1  ;;  %v7790_v59 = vadd.f32 %v1689_v19, %v1443_v24  ;;  %v2949_v19 = vmul.f32 %v2780_v63, %v11258_v53  ;;  %v11259_v24 = vmax.f32 %v6100_v27, 0.0  ;;  %v2951_v3 = vmul.f32 %v2780_v63, %v11260_v28  ;;  %v11289_v20 = vld [vmem:[#allocation106_spill] sm:$0xff] }
 0x203   : > { %11250 = vst [vmem:[#allocation409_spill] sm:$0xff] %v7778_v13  ;;  %11251 = vst [vmem:[#allocation410_spill] sm:$0xff] %v7780_v6  ;;  %v2948_v16 = vmul.f32 %v2780_v63, %v11257_v40  ;;  %v11261_v61 = vmax.f32 %v6108_v23, 0.0  ;;  %v11262_v34 = vmax.f32 %v6112_v57, 0.0  ;;  %v11263_v10 = vmax.f32 %v6116_v33, 0.0 }
 0x204   : > { %11252 = vst [vmem:[#allocation411_spill] sm:$0xff] %v7782_v12  ;;  %11253 = vst [vmem:[#allocation412_spill] sm:$0xff] %v7784_v0  ;;  %v2950_v13 = vmul.f32 %v2780_v63, %v11259_v24  ;;  %v11264_v29 = vmax.f32 %v6120_v46, 0.0  ;;  %v11265_v53 = vmax.f32 %v6124_v14, 0.0  ;;  %v11266_v24 = vmax.f32 %v6128_v32, 0.0 }
 0x205   : > { %11254 = vst [vmem:[#allocation413_spill] sm:$0xff] %v7786_v31  ;;  %11255 = vst [vmem:[#allocation414_spill] sm:$0xff] %v7788_v37  ;;  %v2952_v0 = vmul.f32 %v2780_v63, %v11261_v61  ;;  %v2953_v2 = vmul.f32 %v2780_v63, %v11262_v34  ;;  %v11267_v28 = vmax.f32 %v6132_v58, 0.0  ;;  %v11268_v61 = vmax.f32 %v6136_v26, 0.0  ;;  %v2790_v12 = vpop.permute.xlu1 %2789 }
 0x206   : > { %11256 = vst [vmem:[#allocation415_spill] sm:$0xff] %v7790_v59  ;;  %v2954_v59 = vmul.f32 %v2780_v63, %v11263_v10  ;;  %v2955_v40 = vmul.f32 %v2780_v63, %v11264_v29  ;;  %v2956_v27 = vmul.f32 %v2780_v63, %v11265_v53  ;;  %v2957_v50 = vmul.f32 %v2780_v63, %v11266_v24 }
 0x207   : > { %v2958_v23 = vmul.f32 %v2780_v63, %v11267_v28  ;;  %v2959_v57 = vmul.f32 %v2780_v63, %v11268_v61  ;;  %v11269_v34 = vmax.f32 %v6140_v22, 0.0  ;;  %v11270_v10 = vmax.f32 %v6144_v25, 0.0 }
 0x208   : > { %v11271_v29 = vmax.f32 %v6148_v56, 0.0  ;;  %v11272_v14 = vmax.f32 %v6152_v43, 0.0  ;;  %v11273_v32 = vmax.f32 %v5932_v41, 0.0  ;;  %v11274_v58 = vmax.f32 %v5936_v42, 0.0 }
 0x209   : > { %v2960_v33 = vmul.f32 %v2780_v63, %v11269_v34  ;;  %v2961_v46 = vmul.f32 %v2780_v63, %v11270_v10  ;;  %v11275_v26 = vmax.f32 %v5940_v5, 0.0  ;;  %v11276_v22 = vmax.f32 %v5944_v18, 0.0 }
 0x20a   : > { %v2962_v37 = vmul.f32 %v2780_v63, %v11271_v29  ;;  %v2963_v53 = vmul.f32 %v2780_v63, %v11272_v14  ;;  %v2932_v24 = vmul.f32 %v2775_v30, %v11273_v32  ;;  %v2933_v28 = vmul.f32 %v2775_v30, %v11274_v58 }
 0x20b   : > { %v2934_v61 = vmul.f32 %v2775_v30, %v11275_v26  ;;  %v2935_v34 = vmul.f32 %v2775_v30, %v11276_v22  ;;  %v11277_v25 = vmax.f32 %v5948_v39, 0.0  ;;  %v11278_v56 = vmax.f32 %v5952_v47, 0.0 }
 0x20c   : > { %v11279_v43 = vmax.f32 %v5956_v45, 0.0  ;;  %v11280_v41 = vmax.f32 %v5960_v48, 0.0  ;;  %v11281_v42 = vmax.f32 %v5964_v52, 0.0  ;;  %v11282_v5 = vmax.f32 %v5968_v44, 0.0 }
 0x20d   : > { %v2936_v10 = vmul.f32 %v2775_v30, %v11277_v25  ;;  %v2937_v29 = vmul.f32 %v2775_v30, %v11278_v56  ;;  %v11283_v18 = vmax.f32 %v5972_v49, 0.0  ;;  %v11284_v39 = vmax.f32 %v5976_v54, 0.0 }
 0x20e   : > { %v2938_v63 = vmul.f32 %v2775_v30, %v11279_v43  ;;  %v2939_v14 = vmul.f32 %v2775_v30, %v11280_v41  ;;  %v2940_v32 = vmul.f32 %v2775_v30, %v11281_v42  ;;  %v2941_v58 = vmul.f32 %v2775_v30, %v11282_v5 }
 0x20f   : > { %v2942_v26 = vmul.f32 %v2775_v30, %v11283_v18  ;;  %v2943_v22 = vmul.f32 %v2775_v30, %v11284_v39  ;;  %v11285_v47 = vmax.f32 %v5980_v38, 0.0  ;;  %v11286_v45 = vmax.f32 %v5984_v55, 0.0 }
 0x210   : > { %v11287_v48 = vmax.f32 %v5988_v51, 0.0  ;;  %v11288_v52 = vmax.f32 %v5992_v60, 0.0  ;;  %v3444_v44 = vadd.f32 %v2948_v16, %v2932_v24  ;;  %v3481_v42 = vadd.f32 %v2949_v19, %v2933_v28  ;;  %v11291_v16 = vld [vmem:[#allocation107_spill] sm:$0xff]  ;;  %v11295_v19 = vld [vmem:[#allocation109_spill] sm:$0xff] }
 0x211   : > { %v2944_v25 = vmul.f32 %v2775_v30, %v11285_v47  ;;  %v2945_v56 = vmul.f32 %v2775_v30, %v11286_v45  ;;  %v3518_v5 = vadd.f32 %v2950_v13, %v2934_v61  ;;  %v3555_v49 = vadd.f32 %v2951_v3, %v2935_v34  ;;  %v11303_v28 = vld [vmem:[#allocation113_spill] sm:$0xff] }
 0x212   : > { %v2946_v43 = vmul.f32 %v2775_v30, %v11287_v48  ;;  %v2947_v41 = vmul.f32 %v2775_v30, %v11288_v52  ;;  %v3592_v18 = vadd.f32 %v2952_v0, %v2936_v10  ;;  %v3629_v31 = vadd.f32 %v2953_v2, %v2937_v29  ;;  %v11293_v0 = vld [vmem:[#allocation108_spill] sm:$0xff]  ;;  %v2785_v10 = vpop.permute.xlu0 %2784  ;;  %v11305_v29 = vld [vmem:[#allocation114_spill] sm:$0xff] }
 0x213   : > { %v3666_v54 = vadd.f32 %v2954_v59, %v2938_v63  ;;  %v3703_v39 = vadd.f32 %v2955_v40, %v2939_v14  ;;  %v3740_v38 = vadd.f32 %v2956_v27, %v2940_v32  ;;  %v3777_v47 = vadd.f32 %v2957_v50, %v2941_v58  ;;  %v11297_v50 = vld [vmem:[#allocation110_spill] sm:$0xff]  ;;  %v11308_v32 = vld [vmem:[#allocation115_spill] sm:$0xff] }
 0x214   : > { %v3814_v6 = vadd.f32 %v2958_v23, %v2942_v26  ;;  %v3851_v55 = vadd.f32 %v2959_v57, %v2943_v22  ;;  %v3888_v45 = vadd.f32 %v2960_v33, %v2944_v25  ;;  %v3925_v1 = vadd.f32 %v2961_v46, %v2945_v56  ;;  %v11299_v57 = vld [vmem:[#allocation111_spill] sm:$0xff]  ;;  %v11301_v46 = vld [vmem:[#allocation112_spill] sm:$0xff] }
 0x215   : > { %v3962_v51 = vadd.f32 %v2962_v37, %v2946_v43  ;;  %v3999_v48 = vadd.f32 %v2963_v53, %v2947_v41  ;;  %v11290_v60 = vmax.f32 %v11289_v20, 0.0  ;;  %v11292_v13 = vmax.f32 %v11291_v16, 0.0  ;;  %v11311_v22 = vld [vmem:[#allocation116_spill] sm:$0xff]  ;;  %v11314_v43 = vld [vmem:[#allocation117_spill] sm:$0xff] }
 0x216   : > { %v11294_v59 = vmax.f32 %v11293_v0, 0.0  ;;  %v11296_v40 = vmax.f32 %v11295_v19, 0.0  ;;  %v11298_v23 = vmax.f32 %v11297_v50, 0.0  ;;  %v11300_v20 = vmax.f32 %v11299_v57, 0.0  ;;  %v11320_v0 = vld [vmem:[#allocation119_spill] sm:$0xff]  ;;  %v11326_v57 = vld [vmem:[#allocation121_spill] sm:$0xff] }
 0x217   : > { %v7874_v30 = vmul.f32 %v2790_v12, %v11290_v60  ;;  %v7878_v3 = vmul.f32 %v2790_v12, %v11292_v13  ;;  %v11302_v53 = vmax.f32 %v11301_v46, 0.0  ;;  %v11304_v61 = vmax.f32 %v11303_v28, 0.0  ;;  %v11317_v60 = vld [vmem:[#allocation118_spill] sm:$0xff] }
 0x218   : > { %v7882_v2 = vmul.f32 %v2790_v12, %v11294_v59  ;;  %v7886_v27 = vmul.f32 %v2790_v12, %v11296_v40  ;;  %v7890_v37 = vmul.f32 %v2790_v12, %v11298_v23  ;;  %v7894_v33 = vmul.f32 %v2790_v12, %v11300_v20  ;;  %v11323_v40 = vld [vmem:[#allocation120_spill] sm:$0xff] }
 0x219   : > { %v7898_v24 = vmul.f32 %v2790_v12, %v11302_v53  ;;  %v7902_v34 = vmul.f32 %v2790_v12, %v11304_v61  ;;  %v11306_v63 = vmax.f32 %v11305_v29, 0.0  ;;  %v11309_v58 = vmax.f32 %v11308_v32, 0.0  ;;  %v11329_v53 = vld [vmem:[#allocation90_spill] sm:$0xff]  ;;  %v11331_v29 = vld [vmem:[#allocation91_spill] sm:$0xff] }
 0x21a   : > { %v11312_v25 = vmax.f32 %v11311_v22, 0.0  ;;  %v11315_v52 = vmax.f32 %v11314_v43, 0.0  ;;  %v11318_v16 = vmax.f32 %v11317_v60, 0.0  ;;  %v11321_v59 = vmax.f32 %v11320_v0, 0.0  ;;  %v11335_v43 = vld [vmem:[#allocation93_spill] sm:$0xff] }
 0x21b   : > { %v7906_v14 = vmul.f32 %v2790_v12, %v11306_v63  ;;  %v7910_v26 = vmul.f32 %v2790_v12, %v11309_v58  ;;  %v11324_v50 = vmax.f32 %v11323_v40, 0.0  ;;  %v11327_v20 = vmax.f32 %v11326_v57, 0.0  ;;  %v11333_v58 = vld [vmem:[#allocation92_spill] sm:$0xff]  ;;  %v11339_v40 = vld [vmem:[#allocation95_spill] sm:$0xff] }
 0x21c   : > { %v7914_v56 = vmul.f32 %v2790_v12, %v11312_v25  ;;  %v7918_v41 = vmul.f32 %v2790_v12, %v11315_v52  ;;  %v7922_v13 = vmul.f32 %v2790_v12, %v11318_v16  ;;  %v7926_v19 = vmul.f32 %v2790_v12, %v11321_v59  ;;  %v11337_v16 = vld [vmem:[#allocation94_spill] sm:$0xff] }
 0x21d   : > { %11307 = vst [vmem:[#allocation106_spill] sm:$0xff] %v7906_v14  ;;  %11310 = vst [vmem:[#allocation107_spill] sm:$0xff] %v7910_v26  ;;  %v7930_v23 = vmul.f32 %v2790_v12, %v11324_v50  ;;  %v7934_v46 = vmul.f32 %v2790_v12, %v11327_v20  ;;  %v11330_v28 = vmax.f32 %v11329_v53, 0.0  ;;  %v11332_v63 = vmax.f32 %v11331_v29, 0.0  ;;  %v11341_v12 = vld [vmem:[#allocation96_spill] sm:$0xff]  ;;  %v11343_v53 = vld [vmem:[#allocation97_spill] sm:$0xff] }
 0x21e   : > { %11313 = vst [vmem:[#allocation108_spill] sm:$0xff] %v7914_v56  ;;  %11316 = vst [vmem:[#allocation109_spill] sm:$0xff] %v7918_v41  ;;  %v11334_v22 = vmax.f32 %v11333_v58, 0.0  ;;  %v11336_v52 = vmax.f32 %v11335_v43, 0.0  ;;  %v11338_v0 = vmax.f32 %v11337_v16, 0.0  ;;  %v11340_v50 = vmax.f32 %v11339_v40, 0.0  ;;  %v2800_v56 = vpop.permute.xlu1 %2799 }
 0x21f   : > { %11319 = vst [vmem:[#allocation110_spill] sm:$0xff] %v7922_v13  ;;  %11322 = vst [vmem:[#allocation111_spill] sm:$0xff] %v7926_v19  ;;  %v2964_v61 = vmul.f32 %v2785_v10, %v11330_v28  ;;  %v2965_v32 = vmul.f32 %v2785_v10, %v11332_v63  ;;  %v11342_v20 = vmax.f32 %v11341_v12, 0.0  ;;  %v11344_v28 = vmax.f32 %v11343_v53, 0.0  ;;  %v11345_v29 = vld [vmem:[#allocation98_spill] sm:$0xff]  ;;  %v11347_v58 = vld [vmem:[#allocation99_spill] sm:$0xff] }
 0x220   : > { %11325 = vst [vmem:[#allocation112_spill] sm:$0xff] %v7930_v23  ;;  %11328 = vst [vmem:[#allocation113_spill] sm:$0xff] %v7934_v46  ;;  %v2966_v25 = vmul.f32 %v2785_v10, %v11334_v22  ;;  %v2967_v60 = vmul.f32 %v2785_v10, %v11336_v52  ;;  %v2968_v59 = vmul.f32 %v2785_v10, %v11338_v0  ;;  %v11346_v63 = vmax.f32 %v11345_v29, 0.0  ;;  %v11349_v43 = vld [vmem:[#allocation100_spill] sm:$0xff]  ;;  %v11351_v16 = vld [vmem:[#allocation101_spill] sm:$0xff] }
 0x221   : > { %v2969_v57 = vmul.f32 %v2785_v10, %v11340_v50  ;;  %v2970_v15 = vmul.f32 %v2785_v10, %v11342_v20  ;;  %v2971_v36 = vmul.f32 %v2785_v10, %v11344_v28  ;;  %v11348_v22 = vmax.f32 %v11347_v58, 0.0  ;;  %v11353_v40 = vld [vmem:[#allocation102_spill] sm:$0xff]  ;;  %v11355_v12 = vld [vmem:[#allocation103_spill] sm:$0xff]  ;;  %v11357_v53 = vld [vmem:[#allocation104_spill] sm:$0xff] }
 0x222   : > { %v2972_v11 = vmul.f32 %v2785_v10, %v11346_v63  ;;  %v11350_v52 = vmax.f32 %v11349_v43, 0.0  ;;  %v11352_v0 = vmax.f32 %v11351_v16, 0.0  ;;  %v11354_v50 = vmax.f32 %v11353_v40, 0.0  ;;  %v11359_v29 = vld [vmem:[#allocation105_spill] sm:$0xff] }
 0x223   : > { %v2973_v9 = vmul.f32 %v2785_v10, %v11348_v22  ;;  %v11356_v20 = vmax.f32 %v11355_v12, 0.0  ;;  %v11358_v28 = vmax.f32 %v11357_v53, 0.0  ;;  %v11360_v63 = vmax.f32 %v11359_v29, 0.0 }
 0x224   : > { %v2974_v4 = vmul.f32 %v2785_v10, %v11350_v52  ;;  %v2975_v35 = vmul.f32 %v2785_v10, %v11352_v0  ;;  %v2976_v7 = vmul.f32 %v2785_v10, %v11354_v50  ;;  %v3445_v58 = vadd.f32 %v3444_v44, %v2964_v61 }
 0x225   : > { %v2977_v46 = vmul.f32 %v2785_v10, %v11356_v20  ;;  %v2978_v23 = vmul.f32 %v2785_v10, %v11358_v28  ;;  %v2979_v19 = vmul.f32 %v2785_v10, %v11360_v63  ;;  %v3482_v22 = vadd.f32 %v3481_v42, %v2965_v32  ;;  %v11384_v32 = vld [vmem:[#allocation130_spill] sm:$0xff] }
 0x226   : > { %v3519_v13 = vadd.f32 %v3518_v5, %v2966_v25  ;;  %v3556_v43 = vadd.f32 %v3555_v49, %v2967_v60  ;;  %v3593_v52 = vadd.f32 %v3592_v18, %v2968_v59  ;;  %v3630_v41 = vadd.f32 %v3629_v31, %v2969_v57  ;;  %v11369_v31 = vld [vmem:[#allocation124_spill] sm:$0xff]  ;;  %v11371_v49 = vld [vmem:[#allocation125_spill] sm:$0xff]  ;;  %v11387_v59 = vld [vmem:[#allocation131_spill] sm:$0xff] }
 0x227   : > { %v3667_v16 = vadd.f32 %v3666_v54, %v2970_v15  ;;  %v3704_v0 = vadd.f32 %v3703_v39, %v2971_v36  ;;  %v3741_v40 = vadd.f32 %v3740_v38, %v2972_v11  ;;  %v3778_v50 = vadd.f32 %v3777_v47, %v2973_v9  ;;  %v2795_v54 = vpop.permute.xlu0 %2794  ;;  %v11375_v47 = vld [vmem:[#allocation127_spill] sm:$0xff] }
 0x228   : > { %v3815_v26 = vadd.f32 %v3814_v6, %v2974_v4  ;;  %v3852_v12 = vadd.f32 %v3851_v55, %v2975_v35  ;;  %v3889_v20 = vadd.f32 %v3888_v45, %v2976_v7  ;;  %v3926_v14 = vadd.f32 %v3925_v1, %v2977_v46  ;;  %v11365_v35 = vld [vmem:[#allocation122_spill] sm:$0xff]  ;;  %v11367_v1 = vld [vmem:[#allocation123_spill] sm:$0xff] }
 0x229   : > { %v3963_v53 = vadd.f32 %v3962_v51, %v2978_v23  ;;  %v4000_v28 = vadd.f32 %v3999_v48, %v2979_v19  ;;  %v11361_v29 = vmax.f32 %v6172_v62, 0.0  ;;  %v11362_v44 = vmax.f32 %v6176_v21, 0.0  ;;  %v11378_v51 = vld [vmem:[#allocation128_spill] sm:$0xff]  ;;  %v11381_v23 = vld [vmem:[#allocation129_spill] sm:$0xff] }
 0x22a   : > { %v11363_v15 = vmax.f32 %v6180_v8, 0.0  ;;  %v11364_v11 = vmax.f32 %v6184_v17, 0.0  ;;  %v11366_v7 = vmax.f32 %v11365_v35, 0.0  ;;  %v11368_v62 = vmax.f32 %v11367_v1, 0.0  ;;  %v11373_v17 = vld [vmem:[#allocation126_spill] sm:$0xff] }
 0x22b   : > { %v7970_v10 = vmul.f32 %v2800_v56, %v11361_v29  ;;  %v7974_v42 = vmul.f32 %v2800_v56, %v11362_v44  ;;  %v11370_v21 = vmax.f32 %v11369_v31, 0.0  ;;  %v11372_v8 = vmax.f32 %v11371_v49, 0.0  ;;  %v11390_v29 = vld [vmem:[#allocation132_spill] sm:$0xff]  ;;  %v11396_v1 = vld [vmem:[#allocation134_spill] sm:$0xff] }
 0x22c   : > { %v7978_v36 = vmul.f32 %v2800_v56, %v11363_v15  ;;  %v7982_v4 = vmul.f32 %v2800_v56, %v11364_v11  ;;  %v7986_v9 = vmul.f32 %v2800_v56, %v11366_v7  ;;  %v7990_v6 = vmul.f32 %v2800_v56, %v11368_v62  ;;  %v11393_v11 = vld [vmem:[#allocation133_spill] sm:$0xff] }
 0x22d   : > { %v7994_v5 = vmul.f32 %v2800_v56, %v11370_v21  ;;  %v7998_v18 = vmul.f32 %v2800_v56, %v11372_v8  ;;  %v11374_v39 = vmax.f32 %v11373_v17, 0.0  ;;  %v11376_v55 = vmax.f32 %v11375_v47, 0.0  ;;  %v11398_v21 = vld [vmem:[#allocation135_spill] sm:$0xff]  ;;  %v11400_v17 = vld [vmem:[#allocation136_spill] sm:$0xff] }
 0x22e   : > { %v11379_v48 = vmax.f32 %v11378_v51, 0.0  ;;  %v11382_v46 = vmax.f32 %v11381_v23, 0.0  ;;  %v11385_v25 = vmax.f32 %v11384_v32, 0.0  ;;  %v11388_v57 = vmax.f32 %v11387_v59, 0.0  ;;  %v11404_v23 = vld [vmem:[#allocation138_spill] sm:$0xff] }
 0x22f   : > { %v8002_v38 = vmul.f32 %v2800_v56, %v11374_v39  ;;  %v8006_v45 = vmul.f32 %v2800_v56, %v11376_v55  ;;  %v11391_v44 = vmax.f32 %v11390_v29, 0.0  ;;  %v11394_v35 = vmax.f32 %v11393_v11, 0.0  ;;  %v11402_v55 = vld [vmem:[#allocation137_spill] sm:$0xff] }
 0x230   : > { %v8010_v19 = vmul.f32 %v2800_v56, %v11379_v48  ;;  %v8014_v61 = vmul.f32 %v2800_v56, %v11382_v46  ;;  %v8018_v60 = vmul.f32 %v2800_v56, %v11385_v25  ;;  %v8022_v63 = vmul.f32 %v2800_v56, %v11388_v57  ;;  %v11406_v25 = vld [vmem:[#allocation139_spill] sm:$0xff]  ;;  %v11410_v11 = vld [vmem:[#allocation141_spill] sm:$0xff] }
 0x231   : > { %11377 = vst [vmem:[#allocation114_spill] sm:$0xff] %v8006_v45  ;;  %v8026_v15 = vmul.f32 %v2800_v56, %v11391_v44  ;;  %v8030_v7 = vmul.f32 %v2800_v56, %v11394_v35  ;;  %v11397_v62 = vmax.f32 %v11396_v1, 0.0  ;;  %v11399_v49 = vmax.f32 %v11398_v21, 0.0  ;;  %v11408_v56 = vld [vmem:[#allocation140_spill] sm:$0xff] }
 0x232   : > { %11380 = vst [vmem:[#allocation115_spill] sm:$0xff] %v8010_v19  ;;  %11383 = vst [vmem:[#allocation116_spill] sm:$0xff] %v8014_v61  ;;  %v11401_v39 = vmax.f32 %v11400_v17, 0.0  ;;  %v11403_v51 = vmax.f32 %v11402_v55, 0.0  ;;  %v11405_v46 = vmax.f32 %v11404_v23, 0.0  ;;  %v11407_v59 = vmax.f32 %v11406_v25, 0.0 }
 0x233   : > { %11386 = vst [vmem:[#allocation117_spill] sm:$0xff] %v8018_v60  ;;  %11389 = vst [vmem:[#allocation118_spill] sm:$0xff] %v8022_v63  ;;  %v2996_v31 = vmul.f32 %v2795_v54, %v11397_v62  ;;  %v2997_v8 = vmul.f32 %v2795_v54, %v11399_v49  ;;  %v11409_v29 = vmax.f32 %v11408_v56, 0.0  ;;  %v11411_v35 = vmax.f32 %v11410_v11, 0.0  ;;  %v11412_v62 = vld [vmem:[#allocation4_spill] sm:$0xff]  ;;  %v11414_v17 = vld [vmem:[#allocation142_spill] sm:$0xff] }
 0x234   : > { %11392 = vst [vmem:[#allocation119_spill] sm:$0xff] %v8026_v15  ;;  %11395 = vst [vmem:[#allocation120_spill] sm:$0xff] %v8030_v7  ;;  %v2998_v47 = vmul.f32 %v2795_v54, %v11401_v39  ;;  %v2999_v48 = vmul.f32 %v2795_v54, %v11403_v51  ;;  %v3000_v32 = vmul.f32 %v2795_v54, %v11405_v46  ;;  %v11413_v21 = vmax.f32 %v11412_v62, 0.0  ;;  %v11416_v55 = vld [vmem:[#allocation5_spill] sm:$0xff]  ;;  %v11418_v23 = vld [vmem:[#allocation143_spill] sm:$0xff] }
 0x235   : > { %v3001_v57 = vmul.f32 %v2795_v54, %v11407_v59  ;;  %v3002_v44 = vmul.f32 %v2795_v54, %v11409_v29  ;;  %v3003_v1 = vmul.f32 %v2795_v54, %v11411_v35  ;;  %v11415_v39 = vmax.f32 %v11414_v17, 0.0  ;;  %v11420_v25 = vld [vmem:[#allocation6_spill] sm:$0xff]  ;;  %v11422_v56 = vld [vmem:[#allocation144_spill] sm:$0xff]  ;;  %v11424_v11 = vld [vmem:[#allocation7_spill] sm:$0xff] }
 0x236   : > { %v3004_v49 = vmul.f32 %v2795_v54, %v11413_v21  ;;  %v11417_v51 = vmax.f32 %v11416_v55, 0.0  ;;  %v11419_v46 = vmax.f32 %v11418_v23, 0.0  ;;  %v11421_v59 = vmax.f32 %v11420_v25, 0.0  ;;  %v11426_v62 = vld [vmem:[#allocation145_spill] sm:$0xff] }
 0x237   : > { %v3005_v7 = vmul.f32 %v2795_v54, %v11415_v39  ;;  %v11423_v29 = vmax.f32 %v11422_v56, 0.0  ;;  %v11425_v35 = vmax.f32 %v11424_v11, 0.0  ;;  %v11427_v21 = vmax.f32 %v11426_v62, 0.0  ;;  %v11428_v56 = vld [vmem:[#allocation106_spill] sm:$0xff]  ;;  %v11429_v11 = vld [vmem:[#allocation107_spill] sm:$0xff] }
 0x238   : > { %v3006_v15 = vmul.f32 %v2795_v54, %v11417_v51  ;;  %v3007_v63 = vmul.f32 %v2795_v54, %v11419_v46  ;;  %v3008_v60 = vmul.f32 %v2795_v54, %v11421_v59  ;;  %v3446_v17 = vadd.f32 %v3445_v58, %v7874_v30  ;;  %v11431_v58 = vld [vmem:[#allocation109_spill] sm:$0xff] }
 0x239   : > { %v3009_v61 = vmul.f32 %v2795_v54, %v11423_v29  ;;  %v3010_v19 = vmul.f32 %v2795_v54, %v11425_v35  ;;  %v3011_v45 = vmul.f32 %v2795_v54, %v11427_v21  ;;  %v3483_v39 = vadd.f32 %v3482_v22, %v7878_v3  ;;  %v11430_v35 = vld [vmem:[#allocation108_spill] sm:$0xff]  ;;  %v11432_v22 = vld [vmem:[#allocation110_spill] sm:$0xff]  ;;  %v2810_v21 = vpop.permute.xlu1 %2809 }
 0x23a   : > { %v3520_v55 = vadd.f32 %v3519_v13, %v7882_v2  ;;  %v3557_v51 = vadd.f32 %v3556_v43, %v7886_v27  ;;  %v3594_v23 = vadd.f32 %v3593_v52, %v7890_v37  ;;  %v3631_v46 = vadd.f32 %v3630_v41, %v7894_v33  ;;  %v11433_v13 = vld [vmem:[#allocation111_spill] sm:$0xff]  ;;  %v11434_v43 = vld [vmem:[#allocation112_spill] sm:$0xff]  ;;  %v11435_v52 = vld [vmem:[#allocation113_spill] sm:$0xff] }
 0x23b   : > { %v3668_v25 = vadd.f32 %v3667_v16, %v7898_v24  ;;  %v3705_v59 = vadd.f32 %v3704_v0, %v7902_v34  ;;  %v3742_v29 = vadd.f32 %v3741_v40, %v11428_v56  ;;  %v3779_v54 = vadd.f32 %v3778_v50, %v11429_v11 }
 0x23c   : > { %v3816_v30 = vadd.f32 %v3815_v26, %v11430_v35  ;;  %v3853_v3 = vadd.f32 %v3852_v12, %v11431_v58  ;;  %v3890_v2 = vadd.f32 %v3889_v20, %v11432_v22  ;;  %v3927_v27 = vadd.f32 %v3926_v14, %v11433_v13 }
 0x23d   : > { %v3964_v37 = vadd.f32 %v3963_v53, %v11434_v43  ;;  %v4001_v33 = vadd.f32 %v4000_v28, %v11435_v52  ;;  %v3447_v41 = vadd.f32 %v3446_v17, %v2996_v31  ;;  %v3484_v24 = vadd.f32 %v3483_v39, %v2997_v8  ;;  %v11436_v53 = vld [vmem:[#allocation8_spill] sm:$0xff]  ;;  %v11438_v31 = vld [vmem:[#allocation146_spill] sm:$0xff]  ;;  %v11461_v43 = vld [vmem:[#allocation151_spill] sm:$0xff] }
 0x23e   : > { %v3521_v16 = vadd.f32 %v3520_v55, %v2998_v47  ;;  %v3558_v34 = vadd.f32 %v3557_v51, %v2999_v48  ;;  %v3595_v0 = vadd.f32 %v3594_v23, %v3000_v32  ;;  %v3632_v40 = vadd.f32 %v3631_v46, %v3001_v57  ;;  %v11440_v48 = vld [vmem:[#allocation9_spill] sm:$0xff]  ;;  %v2805_v46 = vpop.permute.xlu0 %2804 }
 0x23f   : > { %v3669_v62 = vadd.f32 %v3668_v25, %v3002_v44  ;;  %v3706_v50 = vadd.f32 %v3705_v59, %v3003_v1  ;;  %v3743_v26 = vadd.f32 %v3742_v29, %v3004_v49  ;;  %v3780_v56 = vadd.f32 %v3779_v54, %v3005_v7  ;;  %v11442_v44 = vld [vmem:[#allocation147_spill] sm:$0xff]  ;;  %v11450_v55 = vld [vmem:[#allocation149_spill] sm:$0xff]  ;;  %v11452_v25 = vld [vmem:[#allocation12_spill] sm:$0xff] }
 0x240   : > { %v3817_v12 = vadd.f32 %v3816_v30, %v3006_v15  ;;  %v3854_v11 = vadd.f32 %v3853_v3, %v3007_v63  ;;  %v3891_v20 = vadd.f32 %v3890_v2, %v3008_v60  ;;  %v3928_v35 = vadd.f32 %v3927_v27, %v3009_v61  ;;  %v11444_v60 = vld [vmem:[#allocation10_spill] sm:$0xff]  ;;  %v11448_v49 = vld [vmem:[#allocation11_spill] sm:$0xff]  ;;  %v11458_v2 = vld [vmem:[#allocation13_spill] sm:$0xff] }
 0x241   : > { %v3965_v14 = vadd.f32 %v3964_v37, %v3010_v19  ;;  %v4002_v58 = vadd.f32 %v4001_v33, %v3011_v45  ;;  %v11437_v22 = vmax.f32 %v11436_v53, 0.0  ;;  %v11439_v8 = vmax.f32 %v11438_v31, 0.0  ;;  %v11446_v45 = vld [vmem:[#allocation148_spill] sm:$0xff]  ;;  %v11455_v54 = vld [vmem:[#allocation150_spill] sm:$0xff] }
 0x242   : > { %v11441_v32 = vmax.f32 %v11440_v48, 0.0  ;;  %v11443_v7 = vmax.f32 %v11442_v44, 0.0  ;;  %v11445_v61 = vmax.f32 %v11444_v60, 0.0  ;;  %v11447_v63 = vmax.f32 %v11446_v45, 0.0  ;;  %v11464_v33 = vld [vmem:[#allocation14_spill] sm:$0xff]  ;;  %v11467_v31 = vld [vmem:[#allocation152_spill] sm:$0xff] }
 0x243   : > { %v8082_v28 = vmul.f32 %v2810_v21, %v11437_v22  ;;  %v8086_v47 = vmul.f32 %v2810_v21, %v11439_v8  ;;  %v11449_v17 = vmax.f32 %v11448_v49, 0.0  ;;  %v11451_v51 = vmax.f32 %v11450_v55, 0.0  ;;  %v11473_v60 = vld [vmem:[#allocation153_spill] sm:$0xff]  ;;  %v11478_v55 = vld [vmem:[#allocation154_spill] sm:$0xff] }
 0x244   : > { %v8090_v57 = vmul.f32 %v2810_v21, %v11441_v32  ;;  %v8094_v15 = vmul.f32 %v2810_v21, %v11443_v7  ;;  %v8098_v19 = vmul.f32 %v2810_v21, %v11445_v61  ;;  %v8102_v1 = vmul.f32 %v2810_v21, %v11447_v63  ;;  %v11470_v32 = vld [vmem:[#allocation15_spill] sm:$0xff]  ;;  %v11476_v63 = vld [vmem:[#allocation16_spill] sm:$0xff] }
 0x245   : > { %v8106_v39 = vmul.f32 %v2810_v21, %v11449_v17  ;;  %v8110_v23 = vmul.f32 %v2810_v21, %v11451_v51  ;;  %v11453_v59 = vmax.f32 %v11452_v25, 0.0  ;;  %v11456_v30 = vmax.f32 %v11455_v54, 0.0 }
 0x246   : > { %v11459_v13 = vmax.f32 %v11458_v2, 0.0  ;;  %v11462_v37 = vmax.f32 %v11461_v43, 0.0  ;;  %v11465_v53 = vmax.f32 %v11464_v33, 0.0  ;;  %v11468_v8 = vmax.f32 %v11467_v31, 0.0  ;;  %v11482_v2 = vld [vmem:[#allocation155_spill] sm:$0xff]  ;;  %v11486_v31 = vld [vmem:[#allocation156_spill] sm:$0xff] }
 0x247   : > { %v8114_v29 = vmul.f32 %v2810_v21, %v11453_v59  ;;  %v8118_v3 = vmul.f32 %v2810_v21, %v11456_v30  ;;  %v11471_v44 = vmax.f32 %v11470_v32, 0.0  ;;  %v11474_v61 = vmax.f32 %v11473_v60, 0.0  ;;  %v11480_v59 = vld [vmem:[#allocation17_spill] sm:$0xff] }
 0x248   : > { %v8122_v27 = vmul.f32 %v2810_v21, %v11459_v13  ;;  %v8126_v52 = vmul.f32 %v2810_v21, %v11462_v37  ;;  %v8130_v22 = vmul.f32 %v2810_v21, %v11465_v53  ;;  %v8134_v48 = vmul.f32 %v2810_v21, %v11468_v8  ;;  %v11484_v37 = vld [vmem:[#allocation18_spill] sm:$0xff] }
 0x249   : > { %11454 = vst [vmem:[#allocation121_spill] sm:$0xff] %v8114_v29  ;;  %11457 = vst [vmem:[#allocation90_spill] sm:$0xff] %v8118_v3  ;;  %v8138_v7 = vmul.f32 %v2810_v21, %v11471_v44  ;;  %v8142_v45 = vmul.f32 %v2810_v21, %v11474_v61  ;;  %v11477_v49 = vmax.f32 %v11476_v63, 0.0  ;;  %v11479_v51 = vmax.f32 %v11478_v55, 0.0  ;;  %v11488_v21 = vld [vmem:[#allocation19_spill] sm:$0xff]  ;;  %v11490_v61 = vld [vmem:[#allocation157_spill] sm:$0xff] }
 0x24a   : > { %11460 = vst [vmem:[#allocation91_spill] sm:$0xff] %v8122_v27  ;;  %11463 = vst [vmem:[#allocation92_spill] sm:$0xff] %v8126_v52  ;;  %v11481_v54 = vmax.f32 %v11480_v59, 0.0  ;;  %v11483_v13 = vmax.f32 %v11482_v2, 0.0  ;;  %v11485_v33 = vmax.f32 %v11484_v37, 0.0  ;;  %v11487_v8 = vmax.f32 %v11486_v31, 0.0 }
 0x24b   : > { %11466 = vst [vmem:[#allocation93_spill] sm:$0xff] %v8130_v22  ;;  %11469 = vst [vmem:[#allocation94_spill] sm:$0xff] %v8134_v48  ;;  %v3028_v17 = vmul.f32 %v2805_v46, %v11477_v49  ;;  %v3029_v25 = vmul.f32 %v2805_v46, %v11479_v51  ;;  %v11489_v44 = vmax.f32 %v11488_v21, 0.0  ;;  %v11491_v63 = vmax.f32 %v11490_v61, 0.0  ;;  %v11492_v55 = vld [vmem:[#allocation20_spill] sm:$0xff]  ;;  %v11494_v59 = vld [vmem:[#allocation158_spill] sm:$0xff] }
 0x24c   : > { %11472 = vst [vmem:[#allocation95_spill] sm:$0xff] %v8138_v7  ;;  %11475 = vst [vmem:[#allocation96_spill] sm:$0xff] %v8142_v45  ;;  %v3030_v30 = vmul.f32 %v2805_v46, %v11481_v54  ;;  %v3031_v43 = vmul.f32 %v2805_v46, %v11483_v13  ;;  %v3032_v53 = vmul.f32 %v2805_v46, %v11485_v33  ;;  %v11493_v51 = vmax.f32 %v11492_v55, 0.0  ;;  %v11496_v2 = vld [vmem:[#allocation21_spill] sm:$0xff]  ;;  %v11498_v37 = vld [vmem:[#allocation159_spill] sm:$0xff] }
 0x24d   : > { %v3033_v32 = vmul.f32 %v2805_v46, %v11487_v8  ;;  %v3034_v60 = vmul.f32 %v2805_v46, %v11489_v44  ;;  %v3035_v49 = vmul.f32 %v2805_v46, %v11491_v63  ;;  %v11495_v54 = vmax.f32 %v11494_v59, 0.0  ;;  %v11500_v31 = vld [vmem:[#allocation22_spill] sm:$0xff]  ;;  %v11502_v21 = vld [vmem:[#allocation160_spill] sm:$0xff]  ;;  %v11504_v61 = vld [vmem:[#allocation23_spill] sm:$0xff] }
 0x24e   : > { %v3036_v45 = vmul.f32 %v2805_v46, %v11493_v51  ;;  %v11497_v13 = vmax.f32 %v11496_v2, 0.0  ;;  %v11499_v33 = vmax.f32 %v11498_v37, 0.0  ;;  %v11501_v8 = vmax.f32 %v11500_v31, 0.0  ;;  %v11506_v55 = vld [vmem:[#allocation161_spill] sm:$0xff] }
 0x24f   : > { %v3037_v7 = vmul.f32 %v2805_v46, %v11495_v54  ;;  %v11503_v44 = vmax.f32 %v11502_v21, 0.0  ;;  %v11505_v63 = vmax.f32 %v11504_v61, 0.0  ;;  %v11507_v51 = vmax.f32 %v11506_v55, 0.0  ;;  %v11509_v61 = vld [vmem:[#allocation115_spill] sm:$0xff] }
 0x250   : > { %v3038_v48 = vmul.f32 %v2805_v46, %v11497_v13  ;;  %v3039_v22 = vmul.f32 %v2805_v46, %v11499_v33  ;;  %v3040_v52 = vmul.f32 %v2805_v46, %v11501_v8  ;;  %v3448_v59 = vadd.f32 %v3447_v41, %v7970_v10  ;;  %v11510_v41 = vld [vmem:[#allocation116_spill] sm:$0xff] }
 0x251   : > { %v3041_v27 = vmul.f32 %v2805_v46, %v11503_v44  ;;  %v3042_v3 = vmul.f32 %v2805_v46, %v11505_v63  ;;  %v3043_v29 = vmul.f32 %v2805_v46, %v11507_v51  ;;  %v3485_v54 = vadd.f32 %v3484_v24, %v7974_v42  ;;  %v11508_v44 = vld [vmem:[#allocation114_spill] sm:$0xff]  ;;  %v11511_v24 = vld [vmem:[#allocation117_spill] sm:$0xff]  ;;  %v2820_v63 = vpop.permute.xlu1 %2819 }
 0x252   : > { %v3522_v2 = vadd.f32 %v3521_v16, %v7978_v36  ;;  %v3559_v13 = vadd.f32 %v3558_v34, %v7982_v4  ;;  %v3596_v37 = vadd.f32 %v3595_v0, %v7986_v9  ;;  %v3633_v33 = vadd.f32 %v3632_v40, %v7990_v6  ;;  %v11512_v16 = vld [vmem:[#allocation118_spill] sm:$0xff]  ;;  %v11513_v34 = vld [vmem:[#allocation119_spill] sm:$0xff]  ;;  %v11514_v0 = vld [vmem:[#allocation120_spill] sm:$0xff] }
 0x253   : > { %v3670_v31 = vadd.f32 %v3669_v62, %v7994_v5  ;;  %v3707_v8 = vadd.f32 %v3706_v50, %v7998_v18  ;;  %v3744_v21 = vadd.f32 %v3743_v26, %v8002_v38  ;;  %v3781_v46 = vadd.f32 %v3780_v56, %v11508_v44 }
 0x254   : > { %v3818_v10 = vadd.f32 %v3817_v12, %v11509_v61  ;;  %v3855_v42 = vadd.f32 %v3854_v11, %v11510_v41  ;;  %v3892_v36 = vadd.f32 %v3891_v20, %v11511_v24  ;;  %v3929_v4 = vadd.f32 %v3928_v35, %v11512_v16  ;;  %v11536_v24 = vld [vmem:[#allocation29_spill] sm:$0xff] }
 0x255   : > { %v3966_v9 = vadd.f32 %v3965_v14, %v11513_v34  ;;  %v4003_v6 = vadd.f32 %v4002_v58, %v11514_v0  ;;  %v3449_v40 = vadd.f32 %v3448_v59, %v3028_v17  ;;  %v3486_v5 = vadd.f32 %v3485_v54, %v3029_v25  ;;  %v11515_v14 = vld [vmem:[#allocation24_spill] sm:$0xff]  ;;  %v11517_v17 = vld [vmem:[#allocation162_spill] sm:$0xff] }
 0x256   : > { %v3523_v62 = vadd.f32 %v3522_v2, %v3030_v30  ;;  %v3560_v18 = vadd.f32 %v3559_v13, %v3031_v43  ;;  %v3597_v50 = vadd.f32 %v3596_v37, %v3032_v53  ;;  %v3634_v38 = vadd.f32 %v3633_v33, %v3033_v32  ;;  %v11519_v43 = vld [vmem:[#allocation25_spill] sm:$0xff]  ;;  %v2815_v33 = vpop.permute.xlu0 %2814  ;;  %v11542_v0 = vld [vmem:[#allocation30_spill] sm:$0xff] }
 0x257   : > { %v3671_v26 = vadd.f32 %v3670_v31, %v3034_v60  ;;  %v3708_v56 = vadd.f32 %v3707_v8, %v3035_v49  ;;  %v3745_v12 = vadd.f32 %v3744_v21, %v3036_v45  ;;  %v3782_v55 = vadd.f32 %v3781_v46, %v3037_v7  ;;  %v11521_v45 = vld [vmem:[#allocation163_spill] sm:$0xff]  ;;  %v11529_v2 = vld [vmem:[#allocation165_spill] sm:$0xff]  ;;  %v11531_v31 = vld [vmem:[#allocation28_spill] sm:$0xff] }
 0x258   : > { %v3819_v11 = vadd.f32 %v3818_v10, %v3038_v48  ;;  %v3856_v51 = vadd.f32 %v3855_v42, %v3039_v22  ;;  %v3893_v20 = vadd.f32 %v3892_v36, %v3040_v52  ;;  %v3930_v44 = vadd.f32 %v3929_v4, %v3041_v27  ;;  %v11523_v52 = vld [vmem:[#allocation26_spill] sm:$0xff]  ;;  %v11527_v49 = vld [vmem:[#allocation27_spill] sm:$0xff] }
 0x259   : > { %v3967_v35 = vadd.f32 %v3966_v9, %v3042_v3  ;;  %v4004_v61 = vadd.f32 %v4003_v6, %v3043_v29  ;;  %v11516_v41 = vmax.f32 %v11515_v14, 0.0  ;;  %v11518_v25 = vmax.f32 %v11517_v17, 0.0  ;;  %v11525_v29 = vld [vmem:[#allocation164_spill] sm:$0xff]  ;;  %v11533_v46 = vld [vmem:[#allocation166_spill] sm:$0xff]  ;;  %v11539_v4 = vld [vmem:[#allocation167_spill] sm:$0xff] }
 0x25a   : > { %v11520_v53 = vmax.f32 %v11519_v43, 0.0  ;;  %v11522_v7 = vmax.f32 %v11521_v45, 0.0  ;;  %v11524_v27 = vmax.f32 %v11523_v52, 0.0  ;;  %v11526_v22 = vmax.f32 %v11525_v29, 0.0  ;;  %v11548_v43 = vld [vmem:[#allocation31_spill] sm:$0xff]  ;;  %v11554_v29 = vld [vmem:[#allocation32_spill] sm:$0xff] }
 0x25b   : > { %v8194_v58 = vmul.f32 %v2820_v63, %v11516_v41  ;;  %v8198_v30 = vmul.f32 %v2820_v63, %v11518_v25  ;;  %v11528_v59 = vmax.f32 %v11527_v49, 0.0  ;;  %v11530_v13 = vmax.f32 %v11529_v2, 0.0  ;;  %v11545_v41 = vld [vmem:[#allocation168_spill] sm:$0xff] }
 0x25c   : > { %v8202_v32 = vmul.f32 %v2820_v63, %v11520_v53  ;;  %v8206_v48 = vmul.f32 %v2820_v63, %v11522_v7  ;;  %v8210_v3 = vmul.f32 %v2820_v63, %v11524_v27  ;;  %v8214_v60 = vmul.f32 %v2820_v63, %v11526_v22  ;;  %v11551_v7 = vld [vmem:[#allocation169_spill] sm:$0xff] }
 0x25d   : > { %v8218_v54 = vmul.f32 %v2820_v63, %v11528_v59  ;;  %v8222_v37 = vmul.f32 %v2820_v63, %v11530_v13  ;;  %v11532_v8 = vmax.f32 %v11531_v31, 0.0  ;;  %v11534_v10 = vmax.f32 %v11533_v46, 0.0  ;;  %v11556_v59 = vld [vmem:[#allocation170_spill] sm:$0xff]  ;;  %v11558_v31 = vld [vmem:[#allocation33_spill] sm:$0xff] }
 0x25e   : > { %v11537_v36 = vmax.f32 %v11536_v24, 0.0  ;;  %v11540_v34 = vmax.f32 %v11539_v4, 0.0  ;;  %v11543_v6 = vmax.f32 %v11542_v0, 0.0  ;;  %v11546_v17 = vmax.f32 %v11545_v41, 0.0  ;;  %v11562_v4 = vld [vmem:[#allocation34_spill] sm:$0xff] }
 0x25f   : > { %v8226_v21 = vmul.f32 %v2820_v63, %v11532_v8  ;;  %v8230_v42 = vmul.f32 %v2820_v63, %v11534_v10  ;;  %v11549_v53 = vmax.f32 %v11548_v43, 0.0  ;;  %v11552_v52 = vmax.f32 %v11551_v7, 0.0  ;;  %v11560_v10 = vld [vmem:[#allocation171_spill] sm:$0xff]  ;;  %v11568_v7 = vld [vmem:[#allocation173_spill] sm:$0xff] }
 0x260   : > { %v8234_v16 = vmul.f32 %v2820_v63, %v11537_v36  ;;  %v8238_v9 = vmul.f32 %v2820_v63, %v11540_v34  ;;  %v8242_v14 = vmul.f32 %v2820_v63, %v11543_v6  ;;  %v8246_v25 = vmul.f32 %v2820_v63, %v11546_v17  ;;  %v11564_v6 = vld [vmem:[#allocation172_spill] sm:$0xff] }
 0x261   : > { %11535 = vst [vmem:[#allocation97_spill] sm:$0xff] %v8230_v42  ;;  %v8250_v45 = vmul.f32 %v2820_v63, %v11549_v53  ;;  %v8254_v27 = vmul.f32 %v2820_v63, %v11552_v52  ;;  %v11555_v22 = vmax.f32 %v11554_v29, 0.0  ;;  %v11557_v2 = vmax.f32 %v11556_v59, 0.0  ;;  %v11566_v63 = vld [vmem:[#allocation35_spill] sm:$0xff] }
 0x262   : > { %11538 = vst [vmem:[#allocation98_spill] sm:$0xff] %v8234_v16  ;;  %11541 = vst [vmem:[#allocation99_spill] sm:$0xff] %v8238_v9  ;;  %v11559_v8 = vmax.f32 %v11558_v31, 0.0  ;;  %v11561_v24 = vmax.f32 %v11560_v10, 0.0  ;;  %v11563_v34 = vmax.f32 %v11562_v4, 0.0  ;;  %v11565_v41 = vmax.f32 %v11564_v6, 0.0 }
 0x263   : > { %11544 = vst [vmem:[#allocation100_spill] sm:$0xff] %v8242_v14  ;;  %11547 = vst [vmem:[#allocation101_spill] sm:$0xff] %v8246_v25  ;;  %v3060_v49 = vmul.f32 %v2815_v33, %v11555_v22  ;;  %v3061_v13 = vmul.f32 %v2815_v33, %v11557_v2  ;;  %v11567_v43 = vmax.f32 %v11566_v63, 0.0  ;;  %v11569_v52 = vmax.f32 %v11568_v7, 0.0  ;;  %v11570_v22 = vld [vmem:[#allocation36_spill] sm:$0xff]  ;;  %v11572_v31 = vld [vmem:[#allocation174_spill] sm:$0xff] }
 0x264   : > { %11550 = vst [vmem:[#allocation102_spill] sm:$0xff] %v8250_v45  ;;  %11553 = vst [vmem:[#allocation103_spill] sm:$0xff] %v8254_v27  ;;  %v3062_v46 = vmul.f32 %v2815_v33, %v11559_v8  ;;  %v3063_v36 = vmul.f32 %v2815_v33, %v11561_v24  ;;  %v3064_v0 = vmul.f32 %v2815_v33, %v11563_v34  ;;  %v11571_v59 = vmax.f32 %v11570_v22, 0.0  ;;  %v11574_v10 = vld [vmem:[#allocation37_spill] sm:$0xff]  ;;  %v11576_v4 = vld [vmem:[#allocation175_spill] sm:$0xff] }
 0x265   : > { %v3065_v17 = vmul.f32 %v2815_v33, %v11565_v41  ;;  %v3066_v53 = vmul.f32 %v2815_v33, %v11567_v43  ;;  %v3067_v29 = vmul.f32 %v2815_v33, %v11569_v52  ;;  %v11573_v8 = vmax.f32 %v11572_v31, 0.0  ;;  %v11578_v6 = vld [vmem:[#allocation38_spill] sm:$0xff]  ;;  %v11580_v63 = vld [vmem:[#allocation176_spill] sm:$0xff]  ;;  %v11582_v7 = vld [vmem:[#allocation39_spill] sm:$0xff] }
 0x266   : > { %v3068_v2 = vmul.f32 %v2815_v33, %v11571_v59  ;;  %v11575_v24 = vmax.f32 %v11574_v10, 0.0  ;;  %v11577_v34 = vmax.f32 %v11576_v4, 0.0  ;;  %v11579_v41 = vmax.f32 %v11578_v6, 0.0  ;;  %v11584_v22 = vld [vmem:[#allocation177_spill] sm:$0xff] }
 0x267   : > { %v3069_v27 = vmul.f32 %v2815_v33, %v11573_v8  ;;  %v11581_v43 = vmax.f32 %v11580_v63, 0.0  ;;  %v11583_v52 = vmax.f32 %v11582_v7, 0.0  ;;  %v11585_v59 = vmax.f32 %v11584_v22, 0.0  ;;  %v11586_v63 = vld [vmem:[#allocation121_spill] sm:$0xff]  ;;  %v11587_v7 = vld [vmem:[#allocation90_spill] sm:$0xff] }
 0x268   : > { %v3070_v45 = vmul.f32 %v2815_v33, %v11575_v24  ;;  %v3071_v25 = vmul.f32 %v2815_v33, %v11577_v34  ;;  %v3072_v14 = vmul.f32 %v2815_v33, %v11579_v41  ;;  %v3450_v31 = vadd.f32 %v3449_v40, %v8082_v28  ;;  %v11589_v40 = vld [vmem:[#allocation92_spill] sm:$0xff] }
 0x269   : > { %v3073_v9 = vmul.f32 %v2815_v33, %v11581_v43  ;;  %v3074_v16 = vmul.f32 %v2815_v33, %v11583_v52  ;;  %v3075_v42 = vmul.f32 %v2815_v33, %v11585_v59  ;;  %v3487_v8 = vadd.f32 %v3486_v5, %v8086_v47  ;;  %v11588_v52 = vld [vmem:[#allocation91_spill] sm:$0xff]  ;;  %v11590_v5 = vld [vmem:[#allocation93_spill] sm:$0xff]  ;;  %v2830_v59 = vpop.permute.xlu1 %2829 }
 0x26a   : > { %v3524_v10 = vadd.f32 %v3523_v62, %v8090_v57  ;;  %v3561_v24 = vadd.f32 %v3560_v18, %v8094_v15  ;;  %v3598_v4 = vadd.f32 %v3597_v50, %v8098_v19  ;;  %v3635_v34 = vadd.f32 %v3634_v38, %v8102_v1  ;;  %v11591_v62 = vld [vmem:[#allocation94_spill] sm:$0xff]  ;;  %v11592_v18 = vld [vmem:[#allocation95_spill] sm:$0xff]  ;;  %v11593_v50 = vld [vmem:[#allocation96_spill] sm:$0xff] }
 0x26b   : > { %v3672_v6 = vadd.f32 %v3671_v26, %v8106_v39  ;;  %v3709_v41 = vadd.f32 %v3708_v56, %v8110_v23  ;;  %v3746_v43 = vadd.f32 %v3745_v12, %v11586_v63  ;;  %v3783_v33 = vadd.f32 %v3782_v55, %v11587_v7 }
 0x26c   : > { %v3820_v28 = vadd.f32 %v3819_v11, %v11588_v52  ;;  %v3857_v47 = vadd.f32 %v3856_v51, %v11589_v40  ;;  %v3894_v57 = vadd.f32 %v3893_v20, %v11590_v5  ;;  %v3931_v15 = vadd.f32 %v3930_v44, %v11591_v62 }
 0x26d   : > { %v3968_v19 = vadd.f32 %v3967_v35, %v11592_v18  ;;  %v4005_v1 = vadd.f32 %v4004_v61, %v11593_v50  ;;  %v3451_v38 = vadd.f32 %v3450_v31, %v3060_v49  ;;  %v3488_v39 = vadd.f32 %v3487_v8, %v3061_v13  ;;  %v11594_v35 = vld [vmem:[#allocation40_spill] sm:$0xff]  ;;  %v11596_v49 = vld [vmem:[#allocation178_spill] sm:$0xff]  ;;  %v11619_v18 = vld [vmem:[#allocation183_spill] sm:$0xff] }
 0x26e   : > { %v3525_v26 = vadd.f32 %v3524_v10, %v3062_v46  ;;  %v3562_v23 = vadd.f32 %v3561_v24, %v3063_v36  ;;  %v3599_v56 = vadd.f32 %v3598_v4, %v3064_v0  ;;  %v3636_v12 = vadd.f32 %v3635_v34, %v3065_v17  ;;  %v11598_v36 = vld [vmem:[#allocation41_spill] sm:$0xff]  ;;  %v2825_v34 = vpop.permute.xlu0 %2824 }
 0x26f   : > { %v3673_v22 = vadd.f32 %v3672_v6, %v3066_v53  ;;  %v3710_v55 = vadd.f32 %v3709_v41, %v3067_v29  ;;  %v3747_v11 = vadd.f32 %v3746_v43, %v3068_v2  ;;  %v3784_v63 = vadd.f32 %v3783_v33, %v3069_v27  ;;  %v11600_v53 = vld [vmem:[#allocation179_spill] sm:$0xff]  ;;  %v11608_v10 = vld [vmem:[#allocation181_spill] sm:$0xff]  ;;  %v11610_v6 = vld [vmem:[#allocation44_spill] sm:$0xff] }
 0x270   : > { %v3821_v51 = vadd.f32 %v3820_v28, %v3070_v45  ;;  %v3858_v7 = vadd.f32 %v3857_v47, %v3071_v25  ;;  %v3895_v20 = vadd.f32 %v3894_v57, %v3072_v14  ;;  %v3932_v52 = vadd.f32 %v3931_v15, %v3073_v9  ;;  %v11602_v14 = vld [vmem:[#allocation42_spill] sm:$0xff]  ;;  %v11606_v2 = vld [vmem:[#allocation43_spill] sm:$0xff]  ;;  %v11616_v57 = vld [vmem:[#allocation45_spill] sm:$0xff] }
 0x271   : > { %v3969_v44 = vadd.f32 %v3968_v19, %v3074_v16  ;;  %v4006_v40 = vadd.f32 %v4005_v1, %v3075_v42  ;;  %v11595_v5 = vmax.f32 %v11594_v35, 0.0  ;;  %v11597_v13 = vmax.f32 %v11596_v49, 0.0  ;;  %v11604_v42 = vld [vmem:[#allocation180_spill] sm:$0xff]  ;;  %v11613_v33 = vld [vmem:[#allocation182_spill] sm:$0xff] }
 0x272   : > { %v11599_v0 = vmax.f32 %v11598_v36, 0.0  ;;  %v11601_v27 = vmax.f32 %v11600_v53, 0.0  ;;  %v11603_v9 = vmax.f32 %v11602_v14, 0.0  ;;  %v11605_v25 = vmax.f32 %v11604_v42, 0.0  ;;  %v11622_v1 = vld [vmem:[#allocation46_spill] sm:$0xff]  ;;  %v11625_v49 = vld [vmem:[#allocation184_spill] sm:$0xff] }
 0x273   : > { %v8306_v61 = vmul.f32 %v2830_v59, %v11595_v5  ;;  %v8310_v46 = vmul.f32 %v2830_v59, %v11597_v13  ;;  %v11607_v31 = vmax.f32 %v11606_v2, 0.0  ;;  %v11609_v24 = vmax.f32 %v11608_v10, 0.0  ;;  %v11631_v14 = vld [vmem:[#allocation185_spill] sm:$0xff]  ;;  %v11636_v10 = vld [vmem:[#allocation186_spill] sm:$0xff] }
 0x274   : > { %v8314_v17 = vmul.f32 %v2830_v59, %v11599_v0  ;;  %v8318_v45 = vmul.f32 %v2830_v59, %v11601_v27  ;;  %v8322_v16 = vmul.f32 %v2830_v59, %v11603_v9  ;;  %v8326_v29 = vmul.f32 %v2830_v59, %v11605_v25  ;;  %v11628_v0 = vld [vmem:[#allocation47_spill] sm:$0xff]  ;;  %v11634_v25 = vld [vmem:[#allocation48_spill] sm:$0xff] }
 0x275   : > { %v8330_v8 = vmul.f32 %v2830_v59, %v11607_v31  ;;  %v8334_v4 = vmul.f32 %v2830_v59, %v11609_v24  ;;  %v11611_v41 = vmax.f32 %v11610_v6, 0.0  ;;  %v11614_v28 = vmax.f32 %v11613_v33, 0.0 }
 0x276   : > { %v11617_v62 = vmax.f32 %v11616_v57, 0.0  ;;  %v11620_v19 = vmax.f32 %v11619_v18, 0.0  ;;  %v11623_v35 = vmax.f32 %v11622_v1, 0.0  ;;  %v11626_v13 = vmax.f32 %v11625_v49, 0.0  ;;  %v11640_v57 = vld [vmem:[#allocation187_spill] sm:$0xff]  ;;  %v11644_v49 = vld [vmem:[#allocation188_spill] sm:$0xff] }
 0x277   : > { %v8338_v43 = vmul.f32 %v2830_v59, %v11611_v41  ;;  %v8342_v47 = vmul.f32 %v2830_v59, %v11614_v28  ;;  %v11629_v53 = vmax.f32 %v11628_v0, 0.0  ;;  %v11632_v9 = vmax.f32 %v11631_v14, 0.0  ;;  %v11638_v41 = vld [vmem:[#allocation49_spill] sm:$0xff] }
 0x278   : > { %v8346_v15 = vmul.f32 %v2830_v59, %v11617_v62  ;;  %v8350_v50 = vmul.f32 %v2830_v59, %v11620_v19  ;;  %v8354_v5 = vmul.f32 %v2830_v59, %v11623_v35  ;;  %v8358_v36 = vmul.f32 %v2830_v59, %v11626_v13  ;;  %v11642_v19 = vld [vmem:[#allocation50_spill] sm:$0xff] }
 0x279   : > { %11612 = vst [vmem:[#allocation104_spill] sm:$0xff] %v8338_v43  ;;  %11615 = vst [vmem:[#allocation105_spill] sm:$0xff] %v8342_v47  ;;  %v8362_v27 = vmul.f32 %v2830_v59, %v11629_v53  ;;  %v8366_v42 = vmul.f32 %v2830_v59, %v11632_v9  ;;  %v11635_v2 = vmax.f32 %v11634_v25, 0.0  ;;  %v11637_v24 = vmax.f32 %v11636_v10, 0.0  ;;  %v11646_v59 = vld [vmem:[#allocation51_spill] sm:$0xff]  ;;  %v11648_v9 = vld [vmem:[#allocation189_spill] sm:$0xff] }
 0x27a   : > { %11618 = vst [vmem:[#allocation122_spill] sm:$0xff] %v8346_v15  ;;  %11621 = vst [vmem:[#allocation123_spill] sm:$0xff] %v8350_v50  ;;  %v11639_v33 = vmax.f32 %v11638_v41, 0.0  ;;  %v11641_v62 = vmax.f32 %v11640_v57, 0.0  ;;  %v11643_v1 = vmax.f32 %v11642_v19, 0.0  ;;  %v11645_v13 = vmax.f32 %v11644_v49, 0.0 }
 0x27b   : > { %11624 = vst [vmem:[#allocation124_spill] sm:$0xff] %v8354_v5  ;;  %11627 = vst [vmem:[#allocation125_spill] sm:$0xff] %v8358_v36  ;;  %v3092_v31 = vmul.f32 %v2825_v34, %v11635_v2  ;;  %v3093_v6 = vmul.f32 %v2825_v34, %v11637_v24  ;;  %v11647_v53 = vmax.f32 %v11646_v59, 0.0  ;;  %v11649_v25 = vmax.f32 %v11648_v9, 0.0  ;;  %v11650_v10 = vld [vmem:[#allocation52_spill] sm:$0xff]  ;;  %v11652_v41 = vld [vmem:[#allocation190_spill] sm:$0xff] }
 0x27c   : > { %11630 = vst [vmem:[#allocation126_spill] sm:$0xff] %v8362_v27  ;;  %11633 = vst [vmem:[#allocation127_spill] sm:$0xff] %v8366_v42  ;;  %v3094_v28 = vmul.f32 %v2825_v34, %v11639_v33  ;;  %v3095_v18 = vmul.f32 %v2825_v34, %v11641_v62  ;;  %v3096_v35 = vmul.f32 %v2825_v34, %v11643_v1  ;;  %v11651_v24 = vmax.f32 %v11650_v10, 0.0  ;;  %v11654_v57 = vld [vmem:[#allocation53_spill] sm:$0xff]  ;;  %v11656_v19 = vld [vmem:[#allocation191_spill] sm:$0xff] }
 0x27d   : > { %v3097_v0 = vmul.f32 %v2825_v34, %v11645_v13  ;;  %v3098_v14 = vmul.f32 %v2825_v34, %v11647_v53  ;;  %v3099_v2 = vmul.f32 %v2825_v34, %v11649_v25  ;;  %v11653_v33 = vmax.f32 %v11652_v41, 0.0  ;;  %v11658_v49 = vld [vmem:[#allocation54_spill] sm:$0xff]  ;;  %v11660_v59 = vld [vmem:[#allocation192_spill] sm:$0xff]  ;;  %v11662_v9 = vld [vmem:[#allocation55_spill] sm:$0xff] }
 0x27e   : > { %v3100_v42 = vmul.f32 %v2825_v34, %v11651_v24  ;;  %v11655_v62 = vmax.f32 %v11654_v57, 0.0  ;;  %v11657_v1 = vmax.f32 %v11656_v19, 0.0  ;;  %v11659_v13 = vmax.f32 %v11658_v49, 0.0  ;;  %v11664_v10 = vld [vmem:[#allocation193_spill] sm:$0xff] }
 0x27f   : > { %v3101_v27 = vmul.f32 %v2825_v34, %v11653_v33  ;;  %v11661_v53 = vmax.f32 %v11660_v59, 0.0  ;;  %v11663_v25 = vmax.f32 %v11662_v9, 0.0  ;;  %v11665_v24 = vmax.f32 %v11664_v10, 0.0  ;;  %v11667_v9 = vld [vmem:[#allocation98_spill] sm:$0xff] }
 0x280   : > { %v3102_v36 = vmul.f32 %v2825_v34, %v11655_v62  ;;  %v3103_v5 = vmul.f32 %v2825_v34, %v11657_v1  ;;  %v3104_v50 = vmul.f32 %v2825_v34, %v11659_v13  ;;  %v3452_v41 = vadd.f32 %v3451_v38, %v8194_v58  ;;  %v11668_v38 = vld [vmem:[#allocation99_spill] sm:$0xff] }
 0x281   : > { %v3105_v15 = vmul.f32 %v2825_v34, %v11661_v53  ;;  %v3106_v47 = vmul.f32 %v2825_v34, %v11663_v25  ;;  %v3107_v43 = vmul.f32 %v2825_v34, %v11665_v24  ;;  %v3489_v33 = vadd.f32 %v3488_v39, %v8198_v30  ;;  %v11666_v53 = vld [vmem:[#allocation97_spill] sm:$0xff]  ;;  %v11669_v39 = vld [vmem:[#allocation100_spill] sm:$0xff]  ;;  %v2840_v25 = vpop.permute.xlu1 %2839 }
 0x282   : > { %v3526_v57 = vadd.f32 %v3525_v26, %v8202_v32  ;;  %v3563_v62 = vadd.f32 %v3562_v23, %v8206_v48  ;;  %v3600_v19 = vadd.f32 %v3599_v56, %v8210_v3  ;;  %v3637_v1 = vadd.f32 %v3636_v12, %v8214_v60  ;;  %v11670_v26 = vld [vmem:[#allocation101_spill] sm:$0xff]  ;;  %v11671_v23 = vld [vmem:[#allocation102_spill] sm:$0xff]  ;;  %v11672_v56 = vld [vmem:[#allocation103_spill] sm:$0xff] }
 0x283   : > { %v3674_v49 = vadd.f32 %v3673_v22, %v8218_v54  ;;  %v3711_v13 = vadd.f32 %v3710_v55, %v8222_v37  ;;  %v3748_v59 = vadd.f32 %v3747_v11, %v8226_v21  ;;  %v3785_v34 = vadd.f32 %v3784_v63, %v11666_v53 }
 0x284   : > { %v3822_v58 = vadd.f32 %v3821_v51, %v11667_v9  ;;  %v3859_v30 = vadd.f32 %v3858_v7, %v11668_v38  ;;  %v3896_v32 = vadd.f32 %v3895_v20, %v11669_v39  ;;  %v3933_v48 = vadd.f32 %v3932_v52, %v11670_v26  ;;  %v11694_v39 = vld [vmem:[#allocation61_spill] sm:$0xff] }
 0x285   : > { %v3970_v3 = vadd.f32 %v3969_v44, %v11671_v23  ;;  %v4007_v60 = vadd.f32 %v4006_v40, %v11672_v56  ;;  %v3453_v12 = vadd.f32 %v3452_v41, %v3092_v31  ;;  %v3490_v54 = vadd.f32 %v3489_v33, %v3093_v6  ;;  %v11673_v44 = vld [vmem:[#allocation56_spill] sm:$0xff]  ;;  %v11675_v31 = vld [vmem:[#allocation194_spill] sm:$0xff] }
 0x286   : > { %v3527_v22 = vadd.f32 %v3526_v57, %v3094_v28  ;;  %v3564_v37 = vadd.f32 %v3563_v62, %v3095_v18  ;;  %v3601_v55 = vadd.f32 %v3600_v19, %v3096_v35  ;;  %v3638_v21 = vadd.f32 %v3637_v1, %v3097_v0  ;;  %v11677_v18 = vld [vmem:[#allocation57_spill] sm:$0xff]  ;;  %v2835_v1 = vpop.permute.xlu0 %2834  ;;  %v11700_v56 = vld [vmem:[#allocation62_spill] sm:$0xff] }
 0x287   : > { %v3675_v11 = vadd.f32 %v3674_v49, %v3098_v14  ;;  %v3712_v63 = vadd.f32 %v3711_v13, %v3099_v2  ;;  %v3749_v51 = vadd.f32 %v3748_v59, %v3100_v42  ;;  %v3786_v10 = vadd.f32 %v3785_v34, %v3101_v27  ;;  %v11679_v42 = vld [vmem:[#allocation195_spill] sm:$0xff]  ;;  %v11687_v57 = vld [vmem:[#allocation197_spill] sm:$0xff]  ;;  %v11689_v49 = vld [vmem:[#allocation60_spill] sm:$0xff] }
 0x288   : > { %v3823_v7 = vadd.f32 %v3822_v58, %v3102_v36  ;;  %v3860_v24 = vadd.f32 %v3859_v30, %v3103_v5  ;;  %v3897_v20 = vadd.f32 %v3896_v32, %v3104_v50  ;;  %v3934_v53 = vadd.f32 %v3933_v48, %v3105_v15  ;;  %v11681_v50 = vld [vmem:[#allocation58_spill] sm:$0xff]  ;;  %v11685_v2 = vld [vmem:[#allocation59_spill] sm:$0xff] }
 0x289   : > { %v3971_v52 = vadd.f32 %v3970_v3, %v3106_v47  ;;  %v4008_v9 = vadd.f32 %v4007_v60, %v3107_v43  ;;  %v11674_v38 = vmax.f32 %v11673_v44, 0.0  ;;  %v11676_v6 = vmax.f32 %v11675_v31, 0.0  ;;  %v11683_v43 = vld [vmem:[#allocation196_spill] sm:$0xff]  ;;  %v11691_v34 = vld [vmem:[#allocation198_spill] sm:$0xff]  ;;  %v11697_v48 = vld [vmem:[#allocation199_spill] sm:$0xff] }
 0x28a   : > { %v11678_v35 = vmax.f32 %v11677_v18, 0.0  ;;  %v11680_v27 = vmax.f32 %v11679_v42, 0.0  ;;  %v11682_v15 = vmax.f32 %v11681_v50, 0.0  ;;  %v11684_v5 = vmax.f32 %v11683_v43, 0.0  ;;  %v11706_v18 = vld [vmem:[#allocation63_spill] sm:$0xff]  ;;  %v11712_v43 = vld [vmem:[#allocation64_spill] sm:$0xff] }
 0x28b   : > { %v8418_v40 = vmul.f32 %v2840_v25, %v11674_v38  ;;  %v8422_v28 = vmul.f32 %v2840_v25, %v11676_v6  ;;  %v11686_v41 = vmax.f32 %v11685_v2, 0.0  ;;  %v11688_v62 = vmax.f32 %v11687_v57, 0.0  ;;  %v11703_v38 = vld [vmem:[#allocation200_spill] sm:$0xff] }
 0x28c   : > { %v8426_v0 = vmul.f32 %v2840_v25, %v11678_v35  ;;  %v8430_v36 = vmul.f32 %v2840_v25, %v11680_v27  ;;  %v8434_v47 = vmul.f32 %v2840_v25, %v11682_v15  ;;  %v8438_v14 = vmul.f32 %v2840_v25, %v11684_v5  ;;  %v11709_v27 = vld [vmem:[#allocation201_spill] sm:$0xff] }
 0x28d   : > { %v8442_v33 = vmul.f32 %v2840_v25, %v11686_v41  ;;  %v8446_v19 = vmul.f32 %v2840_v25, %v11688_v62  ;;  %v11690_v13 = vmax.f32 %v11689_v49, 0.0  ;;  %v11692_v58 = vmax.f32 %v11691_v34, 0.0  ;;  %v11714_v41 = vld [vmem:[#allocation202_spill] sm:$0xff]  ;;  %v11716_v49 = vld [vmem:[#allocation65_spill] sm:$0xff] }
 0x28e   : > { %v11695_v32 = vmax.f32 %v11694_v39, 0.0  ;;  %v11698_v23 = vmax.f32 %v11697_v48, 0.0  ;;  %v11701_v60 = vmax.f32 %v11700_v56, 0.0  ;;  %v11704_v31 = vmax.f32 %v11703_v38, 0.0  ;;  %v11720_v48 = vld [vmem:[#allocation66_spill] sm:$0xff] }
 0x28f   : > { %v8450_v59 = vmul.f32 %v2840_v25, %v11690_v13  ;;  %v8454_v30 = vmul.f32 %v2840_v25, %v11692_v58  ;;  %v11707_v35 = vmax.f32 %v11706_v18, 0.0  ;;  %v11710_v50 = vmax.f32 %v11709_v27, 0.0  ;;  %v11718_v58 = vld [vmem:[#allocation203_spill] sm:$0xff]  ;;  %v11726_v27 = vld [vmem:[#allocation205_spill] sm:$0xff] }
 0x290   : > { %v8458_v26 = vmul.f32 %v2840_v25, %v11695_v32  ;;  %v8462_v3 = vmul.f32 %v2840_v25, %v11698_v23  ;;  %v8466_v44 = vmul.f32 %v2840_v25, %v11701_v60  ;;  %v8470_v6 = vmul.f32 %v2840_v25, %v11704_v31  ;;  %v11722_v60 = vld [vmem:[#allocation204_spill] sm:$0xff] }
 0x291   : > { %11693 = vst [vmem:[#allocation128_spill] sm:$0xff] %v8454_v30  ;;  %v8474_v42 = vmul.f32 %v2840_v25, %v11707_v35  ;;  %v8478_v15 = vmul.f32 %v2840_v25, %v11710_v50  ;;  %v11713_v5 = vmax.f32 %v11712_v43, 0.0  ;;  %v11715_v57 = vmax.f32 %v11714_v41, 0.0  ;;  %v11724_v25 = vld [vmem:[#allocation67_spill] sm:$0xff] }
 0x292   : > { %11696 = vst [vmem:[#allocation129_spill] sm:$0xff] %v8458_v26  ;;  %11699 = vst [vmem:[#allocation130_spill] sm:$0xff] %v8462_v3  ;;  %v11717_v13 = vmax.f32 %v11716_v49, 0.0  ;;  %v11719_v39 = vmax.f32 %v11718_v58, 0.0  ;;  %v11721_v23 = vmax.f32 %v11720_v48, 0.0  ;;  %v11723_v38 = vmax.f32 %v11722_v60, 0.0 }
 0x293   : > { %11702 = vst [vmem:[#allocation131_spill] sm:$0xff] %v8466_v44  ;;  %11705 = vst [vmem:[#allocation132_spill] sm:$0xff] %v8470_v6  ;;  %v3124_v2 = vmul.f32 %v2835_v1, %v11713_v5  ;;  %v3125_v62 = vmul.f32 %v2835_v1, %v11715_v57  ;;  %v11725_v18 = vmax.f32 %v11724_v25, 0.0  ;;  %v11727_v50 = vmax.f32 %v11726_v27, 0.0  ;;  %v11728_v5 = vld [vmem:[#allocation68_spill] sm:$0xff]  ;;  %v11730_v49 = vld [vmem:[#allocation206_spill] sm:$0xff] }
 0x294   : > { %11708 = vst [vmem:[#allocation133_spill] sm:$0xff] %v8474_v42  ;;  %11711 = vst [vmem:[#allocation134_spill] sm:$0xff] %v8478_v15  ;;  %v3126_v34 = vmul.f32 %v2835_v1, %v11717_v13  ;;  %v3127_v32 = vmul.f32 %v2835_v1, %v11719_v39  ;;  %v3128_v56 = vmul.f32 %v2835_v1, %v11721_v23  ;;  %v11729_v41 = vmax.f32 %v11728_v5, 0.0  ;;  %v11732_v58 = vld [vmem:[#allocation69_spill] sm:$0xff]  ;;  %v11734_v48 = vld [vmem:[#allocation207_spill] sm:$0xff] }
 0x295   : > { %v3129_v31 = vmul.f32 %v2835_v1, %v11723_v38  ;;  %v3130_v35 = vmul.f32 %v2835_v1, %v11725_v18  ;;  %v3131_v43 = vmul.f32 %v2835_v1, %v11727_v50  ;;  %v11731_v13 = vmax.f32 %v11730_v49, 0.0  ;;  %v11736_v60 = vld [vmem:[#allocation70_spill] sm:$0xff]  ;;  %v11738_v25 = vld [vmem:[#allocation208_spill] sm:$0xff]  ;;  %v11740_v27 = vld [vmem:[#allocation71_spill] sm:$0xff] }
 0x296   : > { %v3132_v57 = vmul.f32 %v2835_v1, %v11729_v41  ;;  %v11733_v39 = vmax.f32 %v11732_v58, 0.0  ;;  %v11735_v23 = vmax.f32 %v11734_v48, 0.0  ;;  %v11737_v38 = vmax.f32 %v11736_v60, 0.0  ;;  %v11742_v5 = vld [vmem:[#allocation209_spill] sm:$0xff] }
 0x297   : > { %v3133_v15 = vmul.f32 %v2835_v1, %v11731_v13  ;;  %v11739_v18 = vmax.f32 %v11738_v25, 0.0  ;;  %v11741_v50 = vmax.f32 %v11740_v27, 0.0  ;;  %v11743_v41 = vmax.f32 %v11742_v5, 0.0  ;;  %v11744_v25 = vld [vmem:[#allocation104_spill] sm:$0xff]  ;;  %v11745_v27 = vld [vmem:[#allocation105_spill] sm:$0xff] }
 0x298   : > { %v3134_v42 = vmul.f32 %v2835_v1, %v11733_v39  ;;  %v3135_v6 = vmul.f32 %v2835_v1, %v11735_v23  ;;  %v3136_v44 = vmul.f32 %v2835_v1, %v11737_v38  ;;  %v3454_v49 = vadd.f32 %v3453_v12, %v8306_v61  ;;  %v11747_v12 = vld [vmem:[#allocation123_spill] sm:$0xff] }
 0x299   : > { %v3137_v3 = vmul.f32 %v2835_v1, %v11739_v18  ;;  %v3138_v26 = vmul.f32 %v2835_v1, %v11741_v50  ;;  %v3139_v30 = vmul.f32 %v2835_v1, %v11743_v41  ;;  %v3491_v13 = vadd.f32 %v3490_v54, %v8310_v46  ;;  %v11746_v50 = vld [vmem:[#allocation122_spill] sm:$0xff]  ;;  %v11748_v54 = vld [vmem:[#allocation124_spill] sm:$0xff]  ;;  %v2850_v41 = vpop.permute.xlu1 %2849 }
 0x29a   : > { %v3528_v58 = vadd.f32 %v3527_v22, %v8314_v17  ;;  %v3565_v39 = vadd.f32 %v3564_v37, %v8318_v45  ;;  %v3602_v48 = vadd.f32 %v3601_v55, %v8322_v16  ;;  %v3639_v23 = vadd.f32 %v3638_v21, %v8326_v29  ;;  %v11749_v22 = vld [vmem:[#allocation125_spill] sm:$0xff]  ;;  %v11750_v37 = vld [vmem:[#allocation126_spill] sm:$0xff]  ;;  %v11751_v55 = vld [vmem:[#allocation127_spill] sm:$0xff] }
 0x29b   : > { %v3676_v60 = vadd.f32 %v3675_v11, %v8330_v8  ;;  %v3713_v38 = vadd.f32 %v3712_v63, %v8334_v4  ;;  %v3750_v18 = vadd.f32 %v3749_v51, %v11744_v25  ;;  %v3787_v1 = vadd.f32 %v3786_v10, %v11745_v27 }
 0x29c   : > { %v3824_v61 = vadd.f32 %v3823_v7, %v11746_v50  ;;  %v3861_v46 = vadd.f32 %v3860_v24, %v11747_v12  ;;  %v3898_v17 = vadd.f32 %v3897_v20, %v11748_v54  ;;  %v3935_v45 = vadd.f32 %v3934_v53, %v11749_v22 }
 0x29d   : > { %v3972_v16 = vadd.f32 %v3971_v52, %v11750_v37  ;;  %v4009_v29 = vadd.f32 %v4008_v9, %v11751_v55  ;;  %v3455_v21 = vadd.f32 %v3454_v49, %v3124_v2  ;;  %v3492_v8 = vadd.f32 %v3491_v13, %v3125_v62  ;;  %v11752_v52 = vld [vmem:[#allocation72_spill] sm:$0xff]  ;;  %v11754_v2 = vld [vmem:[#allocation210_spill] sm:$0xff]  ;;  %v11777_v37 = vld [vmem:[#allocation215_spill] sm:$0xff] }
 0x29e   : > { %v3529_v11 = vadd.f32 %v3528_v58, %v3126_v34  ;;  %v3566_v4 = vadd.f32 %v3565_v39, %v3127_v32  ;;  %v3603_v63 = vadd.f32 %v3602_v48, %v3128_v56  ;;  %v3640_v51 = vadd.f32 %v3639_v23, %v3129_v31  ;;  %v11756_v32 = vld [vmem:[#allocation73_spill] sm:$0xff]  ;;  %v2845_v23 = vpop.permute.xlu0 %2844 }
 0x29f   : > { %v3677_v5 = vadd.f32 %v3676_v60, %v3130_v35  ;;  %v3714_v10 = vadd.f32 %v3713_v38, %v3131_v43  ;;  %v3751_v7 = vadd.f32 %v3750_v18, %v3132_v57  ;;  %v3788_v25 = vadd.f32 %v3787_v1, %v3133_v15  ;;  %v11758_v35 = vld [vmem:[#allocation211_spill] sm:$0xff]  ;;  %v11766_v58 = vld [vmem:[#allocation213_spill] sm:$0xff]  ;;  %v11768_v60 = vld [vmem:[#allocation76_spill] sm:$0xff] }
 0x2a0   : > { %v3825_v24 = vadd.f32 %v3824_v61, %v3134_v42  ;;  %v3862_v27 = vadd.f32 %v3861_v46, %v3135_v6  ;;  %v3899_v20 = vadd.f32 %v3898_v17, %v3136_v44  ;;  %v3936_v50 = vadd.f32 %v3935_v45, %v3137_v3  ;;  %v11760_v44 = vld [vmem:[#allocation74_spill] sm:$0xff]  ;;  %v11764_v57 = vld [vmem:[#allocation75_spill] sm:$0xff]  ;;  %v11774_v17 = vld [vmem:[#allocation77_spill] sm:$0xff] }
 0x2a1   : > { %v3973_v53 = vadd.f32 %v3972_v16, %v3138_v26  ;;  %v4010_v12 = vadd.f32 %v4009_v29, %v3139_v30  ;;  %v11753_v54 = vmax.f32 %v11752_v52, 0.0  ;;  %v11755_v62 = vmax.f32 %v11754_v2, 0.0  ;;  %v11762_v30 = vld [vmem:[#allocation212_spill] sm:$0xff]  ;;  %v11771_v1 = vld [vmem:[#allocation214_spill] sm:$0xff] }
 0x2a2   : > { %v11757_v56 = vmax.f32 %v11756_v32, 0.0  ;;  %v11759_v15 = vmax.f32 %v11758_v35, 0.0  ;;  %v11761_v3 = vmax.f32 %v11760_v44, 0.0  ;;  %v11763_v6 = vmax.f32 %v11762_v30, 0.0  ;;  %v11780_v29 = vld [vmem:[#allocation78_spill] sm:$0xff]  ;;  %v11783_v2 = vld [vmem:[#allocation216_spill] sm:$0xff] }
 0x2a3   : > { %v8530_v9 = vmul.f32 %v2850_v41, %v11753_v54  ;;  %v8534_v34 = vmul.f32 %v2850_v41, %v11755_v62  ;;  %v11765_v49 = vmax.f32 %v11764_v57, 0.0  ;;  %v11767_v39 = vmax.f32 %v11766_v58, 0.0  ;;  %v11789_v44 = vld [vmem:[#allocation217_spill] sm:$0xff]  ;;  %v11794_v58 = vld [vmem:[#allocation218_spill] sm:$0xff] }
 0x2a4   : > { %v8538_v31 = vmul.f32 %v2850_v41, %v11757_v56  ;;  %v8542_v42 = vmul.f32 %v2850_v41, %v11759_v15  ;;  %v8546_v26 = vmul.f32 %v2850_v41, %v11761_v3  ;;  %v8550_v43 = vmul.f32 %v2850_v41, %v11763_v6  ;;  %v11786_v56 = vld [vmem:[#allocation79_spill] sm:$0xff]  ;;  %v11792_v6 = vld [vmem:[#allocation80_spill] sm:$0xff] }
 0x2a5   : > { %v8554_v13 = vmul.f32 %v2850_v41, %v11765_v49  ;;  %v8558_v48 = vmul.f32 %v2850_v41, %v11767_v39  ;;  %v11769_v38 = vmax.f32 %v11768_v60, 0.0  ;;  %v11772_v61 = vmax.f32 %v11771_v1, 0.0 }
 0x2a6   : > { %v11775_v22 = vmax.f32 %v11774_v17, 0.0  ;;  %v11778_v16 = vmax.f32 %v11777_v37, 0.0  ;;  %v11781_v52 = vmax.f32 %v11780_v29, 0.0  ;;  %v11784_v62 = vmax.f32 %v11783_v2, 0.0  ;;  %v11798_v17 = vld [vmem:[#allocation219_spill] sm:$0xff]  ;;  %v11802_v2 = vld [vmem:[#allocation220_spill] sm:$0xff] }
 0x2a7   : > { %v8562_v18 = vmul.f32 %v2850_v41, %v11769_v38  ;;  %v8566_v46 = vmul.f32 %v2850_v41, %v11772_v61  ;;  %v11787_v35 = vmax.f32 %v11786_v56, 0.0  ;;  %v11790_v3 = vmax.f32 %v11789_v44, 0.0  ;;  %v11796_v38 = vld [vmem:[#allocation81_spill] sm:$0xff] }
 0x2a8   : > { %v8570_v45 = vmul.f32 %v2850_v41, %v11775_v22  ;;  %v8574_v55 = vmul.f32 %v2850_v41, %v11778_v16  ;;  %v8578_v54 = vmul.f32 %v2850_v41, %v11781_v52  ;;  %v8582_v32 = vmul.f32 %v2850_v41, %v11784_v62  ;;  %v11800_v16 = vld [vmem:[#allocation82_spill] sm:$0xff] }
 0x2a9   : > { %11770 = vst [vmem:[#allocation135_spill] sm:$0xff] %v8562_v18  ;;  %11773 = vst [vmem:[#allocation136_spill] sm:$0xff] %v8566_v46  ;;  %v8586_v15 = vmul.f32 %v2850_v41, %v11787_v35  ;;  %v8590_v30 = vmul.f32 %v2850_v41, %v11790_v3  ;;  %v11793_v57 = vmax.f32 %v11792_v6, 0.0  ;;  %v11795_v39 = vmax.f32 %v11794_v58, 0.0  ;;  %v11804_v41 = vld [vmem:[#allocation83_spill] sm:$0xff]  ;;  %v11806_v3 = vld [vmem:[#allocation221_spill] sm:$0xff] }
 0x2aa   : > { %11776 = vst [vmem:[#allocation137_spill] sm:$0xff] %v8570_v45  ;;  %11779 = vst [vmem:[#allocation138_spill] sm:$0xff] %v8574_v55  ;;  %v11797_v1 = vmax.f32 %v11796_v38, 0.0  ;;  %v11799_v22 = vmax.f32 %v11798_v17, 0.0  ;;  %v11801_v29 = vmax.f32 %v11800_v16, 0.0  ;;  %v11803_v62 = vmax.f32 %v11802_v2, 0.0 }
 0x2ab   : > { %11782 = vst [vmem:[#allocation139_spill] sm:$0xff] %v8578_v54  ;;  %11785 = vst [vmem:[#allocation140_spill] sm:$0xff] %v8582_v32  ;;  %v3156_v49 = vmul.f32 %v2845_v23, %v11793_v57  ;;  %v3157_v60 = vmul.f32 %v2845_v23, %v11795_v39  ;;  %v11805_v35 = vmax.f32 %v11804_v41, 0.0  ;;  %v11807_v6 = vmax.f32 %v11806_v3, 0.0  ;;  %v11808_v58 = vld [vmem:[#allocation84_spill] sm:$0xff]  ;;  %v11810_v38 = vld [vmem:[#allocation222_spill] sm:$0xff] }
 0x2ac   : > { %11788 = vst [vmem:[#allocation141_spill] sm:$0xff] %v8586_v15  ;;  %11791 = vst [vmem:[#allocation4_spill] sm:$0xff] %v8590_v30  ;;  %v3158_v61 = vmul.f32 %v2845_v23, %v11797_v1  ;;  %v3159_v37 = vmul.f32 %v2845_v23, %v11799_v22  ;;  %v3160_v52 = vmul.f32 %v2845_v23, %v11801_v29  ;;  %v11809_v39 = vmax.f32 %v11808_v58, 0.0  ;;  %v11812_v17 = vld [vmem:[#allocation85_spill] sm:$0xff]  ;;  %v11814_v16 = vld [vmem:[#allocation223_spill] sm:$0xff] }
 0x2ad   : > { %v3161_v56 = vmul.f32 %v2845_v23, %v11803_v62  ;;  %v3162_v44 = vmul.f32 %v2845_v23, %v11805_v35  ;;  %v3163_v57 = vmul.f32 %v2845_v23, %v11807_v6  ;;  %v11811_v1 = vmax.f32 %v11810_v38, 0.0  ;;  %v11816_v2 = vld [vmem:[#allocation86_spill] sm:$0xff]  ;;  %v11818_v41 = vld [vmem:[#allocation224_spill] sm:$0xff]  ;;  %v11820_v3 = vld [vmem:[#allocation87_spill] sm:$0xff] }
 0x2ae   : > { %v3164_v30 = vmul.f32 %v2845_v23, %v11809_v39  ;;  %v11813_v22 = vmax.f32 %v11812_v17, 0.0  ;;  %v11815_v29 = vmax.f32 %v11814_v16, 0.0  ;;  %v11817_v62 = vmax.f32 %v11816_v2, 0.0  ;;  %v11822_v58 = vld [vmem:[#allocation225_spill] sm:$0xff] }
 0x2af   : > { %v3165_v15 = vmul.f32 %v2845_v23, %v11811_v1  ;;  %v11819_v35 = vmax.f32 %v11818_v41, 0.0  ;;  %v11821_v6 = vmax.f32 %v11820_v3, 0.0  ;;  %v11823_v39 = vmax.f32 %v11822_v58, 0.0  ;;  %v11825_v3 = vld [vmem:[#allocation129_spill] sm:$0xff] }
 0x2b0   : > { %v3166_v32 = vmul.f32 %v2845_v23, %v11813_v22  ;;  %v3167_v54 = vmul.f32 %v2845_v23, %v11815_v29  ;;  %v3168_v55 = vmul.f32 %v2845_v23, %v11817_v62  ;;  %v3456_v38 = vadd.f32 %v3455_v21, %v8418_v40  ;;  %v11826_v21 = vld [vmem:[#allocation130_spill] sm:$0xff] }
 0x2b1   : > { %v3169_v45 = vmul.f32 %v2845_v23, %v11819_v35  ;;  %v3170_v46 = vmul.f32 %v2845_v23, %v11821_v6  ;;  %v3171_v18 = vmul.f32 %v2845_v23, %v11823_v39  ;;  %v3493_v1 = vadd.f32 %v3492_v8, %v8422_v28  ;;  %v11824_v35 = vld [vmem:[#allocation128_spill] sm:$0xff]  ;;  %v11827_v8 = vld [vmem:[#allocation131_spill] sm:$0xff]  ;;  %v2860_v6 = vpop.permute.xlu1 %2859 }
 0x2b2   : > { %v3530_v17 = vadd.f32 %v3529_v11, %v8426_v0  ;;  %v3567_v22 = vadd.f32 %v3566_v4, %v8430_v36  ;;  %v3604_v16 = vadd.f32 %v3603_v63, %v8434_v47  ;;  %v3641_v29 = vadd.f32 %v3640_v51, %v8438_v14  ;;  %v11828_v11 = vld [vmem:[#allocation132_spill] sm:$0xff]  ;;  %v11829_v4 = vld [vmem:[#allocation133_spill] sm:$0xff]  ;;  %v11830_v63 = vld [vmem:[#allocation134_spill] sm:$0xff] }
 0x2b3   : > { %v3678_v2 = vadd.f32 %v3677_v5, %v8442_v33  ;;  %v3715_v62 = vadd.f32 %v3714_v10, %v8446_v19  ;;  %v3752_v41 = vadd.f32 %v3751_v7, %v8450_v59  ;;  %v3789_v23 = vadd.f32 %v3788_v25, %v11824_v35 }
 0x2b4   : > { %v3826_v40 = vadd.f32 %v3825_v24, %v11825_v3  ;;  %v3863_v28 = vadd.f32 %v3862_v27, %v11826_v21  ;;  %v3900_v0 = vadd.f32 %v3899_v20, %v11827_v8  ;;  %v3937_v36 = vadd.f32 %v3936_v50, %v11828_v11  ;;  %v11852_v8 = vld [vmem:[#allocation234_spill] sm:$0xff] }
 0x2b5   : > { %v3974_v47 = vadd.f32 %v3973_v53, %v11829_v4  ;;  %v4011_v14 = vadd.f32 %v4010_v12, %v11830_v63  ;;  %v3457_v51 = vadd.f32 %v3456_v38, %v3156_v49  ;;  %v3494_v33 = vadd.f32 %v3493_v1, %v3157_v60  ;;  %v11831_v53 = vld [vmem:[#allocation88_spill] sm:$0xff]  ;;  %v11833_v49 = vld [vmem:[#allocation226_spill] sm:$0xff] }
 0x2b6   : > { %v3531_v5 = vadd.f32 %v3530_v17, %v3158_v61  ;;  %v3568_v19 = vadd.f32 %v3567_v22, %v3159_v37  ;;  %v3605_v10 = vadd.f32 %v3604_v16, %v3160_v52  ;;  %v3642_v59 = vadd.f32 %v3641_v29, %v3161_v56  ;;  %v11835_v37 = vld [vmem:[#allocation89_spill] sm:$0xff]  ;;  %v11845_v17 = vld [vmem:[#allocation231_spill] sm:$0xff]  ;;  %v2855_v29 = vpop.permute.xlu0 %2854  ;;  %v11858_v63 = vld [vmem:[#allocation236_spill] sm:$0xff] }
 0x2b7   : > { %v3679_v7 = vadd.f32 %v3678_v2, %v3162_v44  ;;  %v3716_v25 = vadd.f32 %v3715_v62, %v3163_v57  ;;  %v3753_v24 = vadd.f32 %v3752_v41, %v3164_v30  ;;  %v3790_v58 = vadd.f32 %v3789_v23, %v3165_v15  ;;  %v11837_v30 = vld [vmem:[#allocation227_spill] sm:$0xff]  ;;  %v11843_v57 = vld [vmem:[#allocation230_spill] sm:$0xff]  ;;  %v11847_v2 = vld [vmem:[#allocation232_spill] sm:$0xff] }
 0x2b8   : > { %v3827_v27 = vadd.f32 %v3826_v40, %v3166_v32  ;;  %v3864_v39 = vadd.f32 %v3863_v28, %v3167_v54  ;;  %v3901_v20 = vadd.f32 %v3900_v0, %v3168_v55  ;;  %v3938_v35 = vadd.f32 %v3937_v36, %v3169_v45  ;;  %v11839_v55 = vld [vmem:[#allocation228_spill] sm:$0xff]  ;;  %v11849_v23 = vld [vmem:[#allocation233_spill] sm:$0xff]  ;;  %v11855_v36 = vld [vmem:[#allocation235_spill] sm:$0xff] }
 0x2b9   : > { %v3975_v50 = vadd.f32 %v3974_v47, %v3170_v46  ;;  %v4012_v3 = vadd.f32 %v4011_v14, %v3171_v18  ;;  %v11832_v21 = vmax.f32 %v11831_v53, 0.0  ;;  %v11834_v60 = vmax.f32 %v11833_v49, 0.0  ;;  %v11841_v18 = vld [vmem:[#allocation229_spill] sm:$0xff] }
 0x2ba   : > { %v11836_v52 = vmax.f32 %v11835_v37, 0.0  ;;  %v11838_v15 = vmax.f32 %v11837_v30, 0.0  ;;  %v11840_v45 = vmax.f32 %v11839_v55, 0.0  ;;  %v11842_v54 = vmax.f32 %v11841_v18, 0.0  ;;  %v11864_v37 = vld [vmem:[#allocation238_spill] sm:$0xff]  ;;  %v11870_v18 = vld [vmem:[#allocation240_spill] sm:$0xff] }
 0x2bb   : > { %v8642_v12 = vmul.f32 %v2860_v6, %v11832_v21  ;;  %v8646_v61 = vmul.f32 %v2860_v6, %v11834_v60  ;;  %v11844_v38 = vmax.f32 %v11843_v57, 0.0  ;;  %v11846_v22 = vmax.f32 %v11845_v17, 0.0  ;;  %v11861_v21 = vld [vmem:[#allocation237_spill] sm:$0xff] }
 0x2bc   : > { %v8650_v56 = vmul.f32 %v2860_v6, %v11836_v52  ;;  %v8654_v32 = vmul.f32 %v2860_v6, %v11838_v15  ;;  %v8658_v46 = vmul.f32 %v2860_v6, %v11840_v45  ;;  %v8662_v44 = vmul.f32 %v2860_v6, %v11842_v54  ;;  %v11867_v15 = vld [vmem:[#allocation239_spill] sm:$0xff] }
 0x2bd   : > { %v8666_v1 = vmul.f32 %v2860_v6, %v11844_v38  ;;  %v8670_v16 = vmul.f32 %v2860_v6, %v11846_v22  ;;  %v11848_v62 = vmax.f32 %v11847_v2, 0.0  ;;  %v11850_v40 = vmax.f32 %v11849_v23, 0.0  ;;  %v11872_v38 = vld [vmem:[#allocation241_spill] sm:$0xff]  ;;  %v11874_v2 = vld [vmem:[#allocation242_spill] sm:$0xff] }
 0x2be   : > { %v11853_v0 = vmax.f32 %v11852_v8, 0.0  ;;  %v11856_v4 = vmax.f32 %v11855_v36, 0.0  ;;  %v11859_v14 = vmax.f32 %v11858_v63, 0.0  ;;  %v11862_v49 = vmax.f32 %v11861_v21, 0.0  ;;  %v11878_v36 = vld [vmem:[#allocation244_spill] sm:$0xff] }
 0x2bf   : > { %v8674_v41 = vmul.f32 %v2860_v6, %v11848_v62  ;;  %v8678_v28 = vmul.f32 %v2860_v6, %v11850_v40  ;;  %v11865_v52 = vmax.f32 %v11864_v37, 0.0  ;;  %v11868_v55 = vmax.f32 %v11867_v15, 0.0  ;;  %v11876_v40 = vld [vmem:[#allocation243_spill] sm:$0xff] }
 0x2c0   : > { %v8682_v11 = vmul.f32 %v2860_v6, %v11853_v0  ;;  %v8686_v47 = vmul.f32 %v2860_v6, %v11856_v4  ;;  %v8690_v53 = vmul.f32 %v2860_v6, %v11859_v14  ;;  %v8694_v60 = vmul.f32 %v2860_v6, %v11862_v49  ;;  %v11880_v14 = vld [vmem:[#allocation245_spill] sm:$0xff]  ;;  %v11884_v15 = vld [vmem:[#allocation247_spill] sm:$0xff] }
 0x2c1   : > { %11851 = vst [vmem:[#allocation142_spill] sm:$0xff] %v8678_v28  ;;  %v8698_v30 = vmul.f32 %v2860_v6, %v11865_v52  ;;  %v8702_v45 = vmul.f32 %v2860_v6, %v11868_v55  ;;  %v11871_v54 = vmax.f32 %v11870_v18, 0.0  ;;  %v11873_v17 = vmax.f32 %v11872_v38, 0.0  ;;  %v11882_v6 = vld [vmem:[#allocation246_spill] sm:$0xff] }
 0x2c2   : > { %11854 = vst [vmem:[#allocation5_spill] sm:$0xff] %v8682_v11  ;;  %11857 = vst [vmem:[#allocation143_spill] sm:$0xff] %v8686_v47  ;;  %v11875_v62 = vmax.f32 %v11874_v2, 0.0  ;;  %v11877_v8 = vmax.f32 %v11876_v40, 0.0  ;;  %v11879_v4 = vmax.f32 %v11878_v36, 0.0  ;;  %v11881_v21 = vmax.f32 %v11880_v14, 0.0 }
 0x2c3   : > { %11860 = vst [vmem:[#allocation6_spill] sm:$0xff] %v8690_v53  ;;  %11863 = vst [vmem:[#allocation144_spill] sm:$0xff] %v8694_v60  ;;  %v3188_v57 = vmul.f32 %v2855_v29, %v11871_v54  ;;  %v3189_v22 = vmul.f32 %v2855_v29, %v11873_v17  ;;  %v11883_v37 = vmax.f32 %v11882_v6, 0.0  ;;  %v11885_v55 = vmax.f32 %v11884_v15, 0.0  ;;  %v11886_v54 = vld [vmem:[#allocation248_spill] sm:$0xff]  ;;  %v11888_v2 = vld [vmem:[#allocation249_spill] sm:$0xff] }
 0x2c4   : > { %11866 = vst [vmem:[#allocation7_spill] sm:$0xff] %v8698_v30  ;;  %11869 = vst [vmem:[#allocation145_spill] sm:$0xff] %v8702_v45  ;;  %v3190_v23 = vmul.f32 %v2855_v29, %v11875_v62  ;;  %v3191_v0 = vmul.f32 %v2855_v29, %v11877_v8  ;;  %v3192_v63 = vmul.f32 %v2855_v29, %v11879_v4  ;;  %v11887_v38 = vmax.f32 %v11886_v54, 0.0  ;;  %v11890_v40 = vld [vmem:[#allocation250_spill] sm:$0xff]  ;;  %v11892_v36 = vld [vmem:[#allocation251_spill] sm:$0xff] }
 0x2c5   : > { %v3193_v49 = vmul.f32 %v2855_v29, %v11881_v21  ;;  %v3194_v52 = vmul.f32 %v2855_v29, %v11883_v37  ;;  %v3195_v18 = vmul.f32 %v2855_v29, %v11885_v55  ;;  %v11889_v62 = vmax.f32 %v11888_v2, 0.0  ;;  %v11894_v14 = vld [vmem:[#allocation252_spill] sm:$0xff]  ;;  %v11896_v6 = vld [vmem:[#allocation253_spill] sm:$0xff]  ;;  %v11898_v15 = vld [vmem:[#allocation254_spill] sm:$0xff] }
 0x2c6   : > { %v3196_v17 = vmul.f32 %v2855_v29, %v11887_v38  ;;  %v11891_v8 = vmax.f32 %v11890_v40, 0.0  ;;  %v11893_v4 = vmax.f32 %v11892_v36, 0.0  ;;  %v11895_v21 = vmax.f32 %v11894_v14, 0.0  ;;  %v11900_v54 = vld [vmem:[#allocation255_spill] sm:$0xff] }
 0x2c7   : > { %v3197_v45 = vmul.f32 %v2855_v29, %v11889_v62  ;;  %v11897_v37 = vmax.f32 %v11896_v6, 0.0  ;;  %v11899_v55 = vmax.f32 %v11898_v15, 0.0  ;;  %v11901_v38 = vmax.f32 %v11900_v54, 0.0  ;;  %v11902_v6 = vld [vmem:[#allocation135_spill] sm:$0xff]  ;;  %v11903_v15 = vld [vmem:[#allocation136_spill] sm:$0xff] }
 0x2c8   : > { %v3198_v30 = vmul.f32 %v2855_v29, %v11891_v8  ;;  %v3199_v60 = vmul.f32 %v2855_v29, %v11893_v4  ;;  %v3200_v53 = vmul.f32 %v2855_v29, %v11895_v21  ;;  %v3458_v2 = vadd.f32 %v3457_v51, %v8530_v9  ;;  %v11905_v51 = vld [vmem:[#allocation138_spill] sm:$0xff] }
 0x2c9   : > { %v3201_v47 = vmul.f32 %v2855_v29, %v11897_v37  ;;  %v3202_v11 = vmul.f32 %v2855_v29, %v11899_v55  ;;  %v3203_v28 = vmul.f32 %v2855_v29, %v11901_v38  ;;  %v3495_v62 = vadd.f32 %v3494_v33, %v8534_v34  ;;  %v11904_v55 = vld [vmem:[#allocation137_spill] sm:$0xff]  ;;  %v11906_v33 = vld [vmem:[#allocation139_spill] sm:$0xff]  ;;  %v2870_v38 = vpop.permute.xlu1 %2869 }
 0x2ca   : > { %v3532_v40 = vadd.f32 %v3531_v5, %v8538_v31  ;;  %v3569_v8 = vadd.f32 %v3568_v19, %v8542_v42  ;;  %v3606_v36 = vadd.f32 %v3605_v10, %v8546_v26  ;;  %v3643_v4 = vadd.f32 %v3642_v59, %v8550_v43  ;;  %v11907_v5 = vld [vmem:[#allocation140_spill] sm:$0xff]  ;;  %v11908_v19 = vld [vmem:[#allocation141_spill] sm:$0xff] }
 0x2cb   : > { %v3680_v14 = vadd.f32 %v3679_v7, %v8554_v13  ;;  %v3717_v21 = vadd.f32 %v3716_v25, %v8558_v48  ;;  %v3754_v37 = vadd.f32 %v3753_v24, %v11902_v6  ;;  %v3791_v29 = vadd.f32 %v3790_v58, %v11903_v15  ;;  %v11909_v10 = vld [vmem:[#allocation4_spill] sm:$0xff] }
 0x2cc   : > { %v3828_v9 = vadd.f32 %v3827_v27, %v11904_v55  ;;  %v3865_v34 = vadd.f32 %v3864_v39, %v11905_v51  ;;  %v3902_v31 = vadd.f32 %v3901_v20, %v11906_v33  ;;  %v3939_v42 = vadd.f32 %v3938_v35, %v11907_v5 }
 0x2cd   : > { %v3976_v26 = vadd.f32 %v3975_v50, %v11908_v19  ;;  %v4013_v43 = vadd.f32 %v4012_v3, %v11909_v10  ;;  %v3459_v59 = vadd.f32 %v3458_v2, %v3188_v57  ;;  %v3496_v13 = vadd.f32 %v3495_v62, %v3189_v22  ;;  %v11910_v50 = vld [vmem:[#allocation256_spill] sm:$0xff]  ;;  %v11912_v57 = vld [vmem:[#allocation257_spill] sm:$0xff]  ;;  %v11935_v19 = vld [vmem:[#allocation267_spill] sm:$0xff] }
 0x2ce   : > { %v3533_v7 = vadd.f32 %v3532_v40, %v3190_v23  ;;  %v3570_v48 = vadd.f32 %v3569_v8, %v3191_v0  ;;  %v3607_v25 = vadd.f32 %v3606_v36, %v3192_v63  ;;  %v3644_v24 = vadd.f32 %v3643_v4, %v3193_v49  ;;  %v11914_v0 = vld [vmem:[#allocation258_spill] sm:$0xff]  ;;  %v11924_v40 = vld [vmem:[#allocation263_spill] sm:$0xff]  ;;  %v2865_v4 = vpop.permute.xlu0 %2864 }
 0x2cf   : > { %v3681_v54 = vadd.f32 %v3680_v14, %v3194_v52  ;;  %v3718_v58 = vadd.f32 %v3717_v21, %v3195_v18  ;;  %v3755_v27 = vadd.f32 %v3754_v37, %v3196_v17  ;;  %v3792_v6 = vadd.f32 %v3791_v29, %v3197_v45  ;;  %v11916_v52 = vld [vmem:[#allocation259_spill] sm:$0xff]  ;;  %v11922_v17 = vld [vmem:[#allocation262_spill] sm:$0xff]  ;;  %v11926_v14 = vld [vmem:[#allocation264_spill] sm:$0xff] }
 0x2d0   : > { %v3829_v39 = vadd.f32 %v3828_v9, %v3198_v30  ;;  %v3866_v15 = vadd.f32 %v3865_v34, %v3199_v60  ;;  %v3903_v20 = vadd.f32 %v3902_v31, %v3200_v53  ;;  %v3940_v55 = vadd.f32 %v3939_v42, %v3201_v47  ;;  %v11918_v53 = vld [vmem:[#allocation260_spill] sm:$0xff]  ;;  %v11929_v29 = vld [vmem:[#allocation265_spill] sm:$0xff]  ;;  %v11932_v31 = vld [vmem:[#allocation266_spill] sm:$0xff] }
 0x2d1   : > { %v3977_v35 = vadd.f32 %v3976_v26, %v3202_v11  ;;  %v4014_v51 = vadd.f32 %v4013_v43, %v3203_v28  ;;  %v11911_v33 = vmax.f32 %v11910_v50, 0.0  ;;  %v11913_v22 = vmax.f32 %v11912_v57, 0.0  ;;  %v11920_v28 = vld [vmem:[#allocation261_spill] sm:$0xff]  ;;  %v11938_v43 = vld [vmem:[#allocation268_spill] sm:$0xff] }
 0x2d2   : > { %v11915_v63 = vmax.f32 %v11914_v0, 0.0  ;;  %v11917_v45 = vmax.f32 %v11916_v52, 0.0  ;;  %v11919_v47 = vmax.f32 %v11918_v53, 0.0  ;;  %v11921_v60 = vmax.f32 %v11920_v28, 0.0  ;;  %v11941_v57 = vld [vmem:[#allocation269_spill] sm:$0xff]  ;;  %v11947_v53 = vld [vmem:[#allocation271_spill] sm:$0xff] }
 0x2d3   : > { %v8754_v3 = vmul.f32 %v2870_v38, %v11911_v33  ;;  %v8758_v23 = vmul.f32 %v2870_v38, %v11913_v22  ;;  %v11923_v2 = vmax.f32 %v11922_v17, 0.0  ;;  %v11925_v8 = vmax.f32 %v11924_v40, 0.0  ;;  %v11952_v40 = vld [vmem:[#allocation273_spill] sm:$0xff] }
 0x2d4   : > { %v8762_v49 = vmul.f32 %v2870_v38, %v11915_v63  ;;  %v8766_v30 = vmul.f32 %v2870_v38, %v11917_v45  ;;  %v8770_v11 = vmul.f32 %v2870_v38, %v11919_v47  ;;  %v8774_v18 = vmul.f32 %v2870_v38, %v11921_v60  ;;  %v11944_v63 = vld [vmem:[#allocation270_spill] sm:$0xff]  ;;  %v11950_v60 = vld [vmem:[#allocation272_spill] sm:$0xff] }
 0x2d5   : > { %v8778_v62 = vmul.f32 %v2870_v38, %v11923_v2  ;;  %v8782_v36 = vmul.f32 %v2870_v38, %v11925_v8  ;;  %v11927_v21 = vmax.f32 %v11926_v14, 0.0  ;;  %v11930_v9 = vmax.f32 %v11929_v29, 0.0 }
 0x2d6   : > { %v11933_v5 = vmax.f32 %v11932_v31, 0.0  ;;  %v11936_v26 = vmax.f32 %v11935_v19, 0.0  ;;  %v11939_v50 = vmax.f32 %v11938_v43, 0.0  ;;  %v11942_v22 = vmax.f32 %v11941_v57, 0.0  ;;  %v11956_v31 = vld [vmem:[#allocation275_spill] sm:$0xff]  ;;  %v11960_v57 = vld [vmem:[#allocation277_spill] sm:$0xff] }
 0x2d7   : > { %v8786_v37 = vmul.f32 %v2870_v38, %v11927_v21  ;;  %v8790_v34 = vmul.f32 %v2870_v38, %v11930_v9  ;;  %v11945_v52 = vmax.f32 %v11944_v63, 0.0  ;;  %v11948_v47 = vmax.f32 %v11947_v53, 0.0  ;;  %v11954_v21 = vld [vmem:[#allocation274_spill] sm:$0xff] }
 0x2d8   : > { %v8794_v42 = vmul.f32 %v2870_v38, %v11933_v5  ;;  %v8798_v10 = vmul.f32 %v2870_v38, %v11936_v26  ;;  %v8802_v33 = vmul.f32 %v2870_v38, %v11939_v50  ;;  %v8806_v0 = vmul.f32 %v2870_v38, %v11942_v22  ;;  %v11958_v26 = vld [vmem:[#allocation276_spill] sm:$0xff] }
 0x2d9   : > { %11928 = vst [vmem:[#allocation106_spill] sm:$0xff] %v8786_v37  ;;  %11931 = vst [vmem:[#allocation107_spill] sm:$0xff] %v8790_v34  ;;  %v8810_v45 = vmul.f32 %v2870_v38, %v11945_v52  ;;  %v8814_v28 = vmul.f32 %v2870_v38, %v11948_v47  ;;  %v11951_v17 = vmax.f32 %v11950_v60, 0.0  ;;  %v11953_v8 = vmax.f32 %v11952_v40, 0.0  ;;  %v11962_v38 = vld [vmem:[#allocation278_spill] sm:$0xff]  ;;  %v11964_v47 = vld [vmem:[#allocation279_spill] sm:$0xff] }
 0x2da   : > { %11934 = vst [vmem:[#allocation108_spill] sm:$0xff] %v8794_v42  ;;  %11937 = vst [vmem:[#allocation109_spill] sm:$0xff] %v8798_v10  ;;  %v11955_v29 = vmax.f32 %v11954_v21, 0.0  ;;  %v11957_v5 = vmax.f32 %v11956_v31, 0.0  ;;  %v11959_v43 = vmax.f32 %v11958_v26, 0.0  ;;  %v11961_v22 = vmax.f32 %v11960_v57, 0.0 }
 0x2db   : > { %11940 = vst [vmem:[#allocation110_spill] sm:$0xff] %v8802_v33  ;;  %11943 = vst [vmem:[#allocation111_spill] sm:$0xff] %v8806_v0  ;;  %v3220_v2 = vmul.f32 %v2865_v4, %v11951_v17  ;;  %v3221_v14 = vmul.f32 %v2865_v4, %v11953_v8  ;;  %v11963_v52 = vmax.f32 %v11962_v38, 0.0  ;;  %v11965_v60 = vmax.f32 %v11964_v47, 0.0  ;;  %v11966_v40 = vld [vmem:[#allocation280_spill] sm:$0xff]  ;;  %v11968_v21 = vld [vmem:[#allocation281_spill] sm:$0xff] }
 0x2dc   : > { %11946 = vst [vmem:[#allocation112_spill] sm:$0xff] %v8810_v45  ;;  %11949 = vst [vmem:[#allocation113_spill] sm:$0xff] %v8814_v28  ;;  %v3222_v9 = vmul.f32 %v2865_v4, %v11955_v29  ;;  %v3223_v19 = vmul.f32 %v2865_v4, %v11957_v5  ;;  %v3224_v50 = vmul.f32 %v2865_v4, %v11959_v43  ;;  %v11967_v8 = vmax.f32 %v11966_v40, 0.0  ;;  %v11970_v31 = vld [vmem:[#allocation282_spill] sm:$0xff]  ;;  %v11972_v26 = vld [vmem:[#allocation283_spill] sm:$0xff] }
 0x2dd   : > { %v3225_v63 = vmul.f32 %v2865_v4, %v11961_v22  ;;  %v3226_v53 = vmul.f32 %v2865_v4, %v11963_v52  ;;  %v3227_v17 = vmul.f32 %v2865_v4, %v11965_v60  ;;  %v11969_v29 = vmax.f32 %v11968_v21, 0.0  ;;  %v11974_v57 = vld [vmem:[#allocation284_spill] sm:$0xff]  ;;  %v11976_v38 = vld [vmem:[#allocation285_spill] sm:$0xff]  ;;  %v11978_v47 = vld [vmem:[#allocation286_spill] sm:$0xff] }
 0x2de   : > { %v3228_v28 = vmul.f32 %v2865_v4, %v11967_v8  ;;  %v11971_v5 = vmax.f32 %v11970_v31, 0.0  ;;  %v11973_v43 = vmax.f32 %v11972_v26, 0.0  ;;  %v11975_v22 = vmax.f32 %v11974_v57, 0.0  ;;  %v11980_v40 = vld [vmem:[#allocation287_spill] sm:$0xff] }
 0x2df   : > { %v3229_v45 = vmul.f32 %v2865_v4, %v11969_v29  ;;  %v11977_v52 = vmax.f32 %v11976_v38, 0.0  ;;  %v11979_v60 = vmax.f32 %v11978_v47, 0.0  ;;  %v11981_v8 = vmax.f32 %v11980_v40, 0.0  ;;  %v11983_v47 = vld [vmem:[#allocation5_spill] sm:$0xff] }
 0x2e0   : > { %v3230_v0 = vmul.f32 %v2865_v4, %v11971_v5  ;;  %v3231_v33 = vmul.f32 %v2865_v4, %v11973_v43  ;;  %v3232_v10 = vmul.f32 %v2865_v4, %v11975_v22  ;;  %v3460_v21 = vadd.f32 %v3459_v59, %v8642_v12  ;;  %v11984_v59 = vld [vmem:[#allocation143_spill] sm:$0xff] }
 0x2e1   : > { %v3233_v42 = vmul.f32 %v2865_v4, %v11977_v52  ;;  %v3234_v34 = vmul.f32 %v2865_v4, %v11979_v60  ;;  %v3235_v37 = vmul.f32 %v2865_v4, %v11981_v8  ;;  %v3497_v29 = vadd.f32 %v3496_v13, %v8646_v61  ;;  %v11982_v52 = vld [vmem:[#allocation142_spill] sm:$0xff]  ;;  %v2880_v60 = vpop.permute.xlu1 %2879 }
 0x2e2   : > { %v3534_v31 = vadd.f32 %v3533_v7, %v8650_v56  ;;  %v3571_v5 = vadd.f32 %v3570_v48, %v8654_v32  ;;  %v3608_v26 = vadd.f32 %v3607_v25, %v8658_v46  ;;  %v3645_v43 = vadd.f32 %v3644_v24, %v8662_v44  ;;  %v11985_v13 = vld [vmem:[#allocation6_spill] sm:$0xff]  ;;  %v11986_v7 = vld [vmem:[#allocation144_spill] sm:$0xff]  ;;  %v11987_v48 = vld [vmem:[#allocation7_spill] sm:$0xff] }
 0x2e3   : > { %v3682_v57 = vadd.f32 %v3681_v54, %v8666_v1  ;;  %v3719_v22 = vadd.f32 %v3718_v58, %v8670_v16  ;;  %v3756_v38 = vadd.f32 %v3755_v27, %v8674_v41  ;;  %v3793_v4 = vadd.f32 %v3792_v6, %v11982_v52  ;;  %v11988_v25 = vld [vmem:[#allocation145_spill] sm:$0xff] }
 0x2e4   : > { %v3830_v12 = vadd.f32 %v3829_v39, %v11983_v47  ;;  %v3867_v61 = vadd.f32 %v3866_v15, %v11984_v59  ;;  %v3904_v56 = vadd.f32 %v3903_v20, %v11985_v13  ;;  %v3941_v32 = vadd.f32 %v3940_v55, %v11986_v7  ;;  %v12010_v13 = vld [vmem:[#allocation298_spill] sm:$0xff] }
 0x2e5   : > { %v3978_v46 = vadd.f32 %v3977_v35, %v11987_v48  ;;  %v4015_v44 = vadd.f32 %v4014_v51, %v11988_v25  ;;  %v3461_v24 = vadd.f32 %v3460_v21, %v3220_v2  ;;  %v3498_v1 = vadd.f32 %v3497_v29, %v3221_v14  ;;  %v11989_v35 = vld [vmem:[#allocation288_spill] sm:$0xff]  ;;  %v11991_v2 = vld [vmem:[#allocation289_spill] sm:$0xff] }
 0x2e6   : > { %v3535_v54 = vadd.f32 %v3534_v31, %v3222_v9  ;;  %v3572_v16 = vadd.f32 %v3571_v5, %v3223_v19  ;;  %v3609_v58 = vadd.f32 %v3608_v26, %v3224_v50  ;;  %v3646_v41 = vadd.f32 %v3645_v43, %v3225_v63  ;;  %v11993_v19 = vld [vmem:[#allocation290_spill] sm:$0xff]  ;;  %v12003_v31 = vld [vmem:[#allocation295_spill] sm:$0xff]  ;;  %v2875_v43 = vpop.permute.xlu0 %2874  ;;  %v12016_v25 = vld [vmem:[#allocation300_spill] sm:$0xff] }
 0x2e7   : > { %v3683_v27 = vadd.f32 %v3682_v57, %v3226_v53  ;;  %v3720_v6 = vadd.f32 %v3719_v22, %v3227_v17  ;;  %v3757_v39 = vadd.f32 %v3756_v38, %v3228_v28  ;;  %v3794_v40 = vadd.f32 %v3793_v4, %v3229_v45  ;;  %v11995_v28 = vld [vmem:[#allocation291_spill] sm:$0xff]  ;;  %v12001_v17 = vld [vmem:[#allocation294_spill] sm:$0xff]  ;;  %v12005_v57 = vld [vmem:[#allocation296_spill] sm:$0xff] }
 0x2e8   : > { %v3831_v15 = vadd.f32 %v3830_v12, %v3230_v0  ;;  %v3868_v8 = vadd.f32 %v3867_v61, %v3231_v33  ;;  %v3905_v20 = vadd.f32 %v3904_v56, %v3232_v10  ;;  %v3942_v52 = vadd.f32 %v3941_v32, %v3233_v42  ;;  %v11997_v10 = vld [vmem:[#allocation292_spill] sm:$0xff]  ;;  %v12007_v4 = vld [vmem:[#allocation297_spill] sm:$0xff]  ;;  %v12013_v32 = vld [vmem:[#allocation299_spill] sm:$0xff] }
 0x2e9   : > { %v3979_v55 = vadd.f32 %v3978_v46, %v3234_v34  ;;  %v4016_v47 = vadd.f32 %v4015_v44, %v3235_v37  ;;  %v11990_v59 = vmax.f32 %v11989_v35, 0.0  ;;  %v11992_v14 = vmax.f32 %v11991_v2, 0.0  ;;  %v11999_v37 = vld [vmem:[#allocation293_spill] sm:$0xff] }
 0x2ea   : > { %v11994_v50 = vmax.f32 %v11993_v19, 0.0  ;;  %v11996_v45 = vmax.f32 %v11995_v28, 0.0  ;;  %v11998_v42 = vmax.f32 %v11997_v10, 0.0  ;;  %v12000_v33 = vmax.f32 %v11999_v37, 0.0  ;;  %v12022_v19 = vld [vmem:[#allocation302_spill] sm:$0xff]  ;;  %v12028_v37 = vld [vmem:[#allocation304_spill] sm:$0xff] }
 0x2eb   : > { %v8866_v51 = vmul.f32 %v2880_v60, %v11990_v59  ;;  %v8870_v9 = vmul.f32 %v2880_v60, %v11992_v14  ;;  %v12002_v21 = vmax.f32 %v12001_v17, 0.0  ;;  %v12004_v5 = vmax.f32 %v12003_v31, 0.0  ;;  %v12019_v59 = vld [vmem:[#allocation301_spill] sm:$0xff] }
 0x2ec   : > { %v8874_v63 = vmul.f32 %v2880_v60, %v11994_v50  ;;  %v8878_v0 = vmul.f32 %v2880_v60, %v11996_v45  ;;  %v8882_v34 = vmul.f32 %v2880_v60, %v11998_v42  ;;  %v8886_v53 = vmul.f32 %v2880_v60, %v12000_v33  ;;  %v12025_v45 = vld [vmem:[#allocation303_spill] sm:$0xff] }
 0x2ed   : > { %v8890_v29 = vmul.f32 %v2880_v60, %v12002_v21  ;;  %v8894_v26 = vmul.f32 %v2880_v60, %v12004_v5  ;;  %v12006_v22 = vmax.f32 %v12005_v57, 0.0  ;;  %v12008_v12 = vmax.f32 %v12007_v4, 0.0  ;;  %v12030_v21 = vld [vmem:[#allocation305_spill] sm:$0xff]  ;;  %v12032_v57 = vld [vmem:[#allocation306_spill] sm:$0xff] }
 0x2ee   : > { %v12011_v56 = vmax.f32 %v12010_v13, 0.0  ;;  %v12014_v48 = vmax.f32 %v12013_v32, 0.0  ;;  %v12017_v44 = vmax.f32 %v12016_v25, 0.0  ;;  %v12020_v2 = vmax.f32 %v12019_v59, 0.0  ;;  %v12036_v32 = vld [vmem:[#allocation308_spill] sm:$0xff] }
 0x2ef   : > { %v8898_v38 = vmul.f32 %v2880_v60, %v12006_v22  ;;  %v8902_v61 = vmul.f32 %v2880_v60, %v12008_v12  ;;  %v12023_v50 = vmax.f32 %v12022_v19, 0.0  ;;  %v12026_v10 = vmax.f32 %v12025_v45, 0.0  ;;  %v12034_v12 = vld [vmem:[#allocation307_spill] sm:$0xff] }
 0x2f0   : > { %v8906_v7 = vmul.f32 %v2880_v60, %v12011_v56  ;;  %v8910_v46 = vmul.f32 %v2880_v60, %v12014_v48  ;;  %v8914_v35 = vmul.f32 %v2880_v60, %v12017_v44  ;;  %v8918_v14 = vmul.f32 %v2880_v60, %v12020_v2  ;;  %v12038_v44 = vld [vmem:[#allocation309_spill] sm:$0xff]  ;;  %v12042_v45 = vld [vmem:[#allocation311_spill] sm:$0xff] }
 0x2f1   : > { %12009 = vst [vmem:[#allocation8_spill] sm:$0xff] %v8902_v61  ;;  %v8922_v28 = vmul.f32 %v2880_v60, %v12023_v50  ;;  %v8926_v42 = vmul.f32 %v2880_v60, %v12026_v10  ;;  %v12029_v33 = vmax.f32 %v12028_v37, 0.0  ;;  %v12031_v31 = vmax.f32 %v12030_v21, 0.0  ;;  %v12040_v60 = vld [vmem:[#allocation310_spill] sm:$0xff] }
 0x2f2   : > { %12012 = vst [vmem:[#allocation146_spill] sm:$0xff] %v8906_v7  ;;  %12015 = vst [vmem:[#allocation9_spill] sm:$0xff] %v8910_v46  ;;  %v12033_v22 = vmax.f32 %v12032_v57, 0.0  ;;  %v12035_v13 = vmax.f32 %v12034_v12, 0.0  ;;  %v12037_v48 = vmax.f32 %v12036_v32, 0.0  ;;  %v12039_v59 = vmax.f32 %v12038_v44, 0.0 }
 0x2f3   : > { %12018 = vst [vmem:[#allocation147_spill] sm:$0xff] %v8914_v35  ;;  %12021 = vst [vmem:[#allocation10_spill] sm:$0xff] %v8918_v14  ;;  %v3252_v17 = vmul.f32 %v2875_v43, %v12029_v33  ;;  %v3253_v5 = vmul.f32 %v2875_v43, %v12031_v31  ;;  %v12041_v19 = vmax.f32 %v12040_v60, 0.0  ;;  %v12043_v10 = vmax.f32 %v12042_v45, 0.0  ;;  %v12044_v33 = vld [vmem:[#allocation312_spill] sm:$0xff]  ;;  %v12046_v57 = vld [vmem:[#allocation313_spill] sm:$0xff] }
 0x2f4   : > { %12024 = vst [vmem:[#allocation148_spill] sm:$0xff] %v8922_v28  ;;  %12027 = vst [vmem:[#allocation11_spill] sm:$0xff] %v8926_v42  ;;  %v3254_v4 = vmul.f32 %v2875_v43, %v12033_v22  ;;  %v3255_v56 = vmul.f32 %v2875_v43, %v12035_v13  ;;  %v3256_v25 = vmul.f32 %v2875_v43, %v12037_v48  ;;  %v12045_v21 = vmax.f32 %v12044_v33, 0.0  ;;  %v12048_v12 = vld [vmem:[#allocation314_spill] sm:$0xff]  ;;  %v12050_v32 = vld [vmem:[#allocation315_spill] sm:$0xff] }
 0x2f5   : > { %v3257_v2 = vmul.f32 %v2875_v43, %v12039_v59  ;;  %v3258_v50 = vmul.f32 %v2875_v43, %v12041_v19  ;;  %v3259_v37 = vmul.f32 %v2875_v43, %v12043_v10  ;;  %v12047_v22 = vmax.f32 %v12046_v57, 0.0  ;;  %v12052_v44 = vld [vmem:[#allocation316_spill] sm:$0xff]  ;;  %v12054_v60 = vld [vmem:[#allocation317_spill] sm:$0xff]  ;;  %v12056_v45 = vld [vmem:[#allocation318_spill] sm:$0xff] }
 0x2f6   : > { %v3260_v31 = vmul.f32 %v2875_v43, %v12045_v21  ;;  %v12049_v13 = vmax.f32 %v12048_v12, 0.0  ;;  %v12051_v48 = vmax.f32 %v12050_v32, 0.0  ;;  %v12053_v59 = vmax.f32 %v12052_v44, 0.0  ;;  %v12058_v33 = vld [vmem:[#allocation319_spill] sm:$0xff] }
 0x2f7   : > { %v3261_v42 = vmul.f32 %v2875_v43, %v12047_v22  ;;  %v12055_v19 = vmax.f32 %v12054_v60, 0.0  ;;  %v12057_v10 = vmax.f32 %v12056_v45, 0.0  ;;  %v12059_v21 = vmax.f32 %v12058_v33, 0.0  ;;  %v12060_v60 = vld [vmem:[#allocation106_spill] sm:$0xff]  ;;  %v12061_v45 = vld [vmem:[#allocation107_spill] sm:$0xff] }
 0x2f8   : > { %v3262_v28 = vmul.f32 %v2875_v43, %v12049_v13  ;;  %v3263_v14 = vmul.f32 %v2875_v43, %v12051_v48  ;;  %v3264_v35 = vmul.f32 %v2875_v43, %v12053_v59  ;;  %v3462_v57 = vadd.f32 %v3461_v24, %v8754_v3  ;;  %v12063_v24 = vld [vmem:[#allocation109_spill] sm:$0xff] }
 0x2f9   : > { %v3265_v46 = vmul.f32 %v2875_v43, %v12055_v19  ;;  %v3266_v7 = vmul.f32 %v2875_v43, %v12057_v10  ;;  %v3267_v61 = vmul.f32 %v2875_v43, %v12059_v21  ;;  %v3499_v22 = vadd.f32 %v3498_v1, %v8758_v23  ;;  %v12062_v10 = vld [vmem:[#allocation108_spill] sm:$0xff]  ;;  %v12064_v1 = vld [vmem:[#allocation110_spill] sm:$0xff]  ;;  %v2890_v21 = vpop.permute.xlu1 %2889 }
 0x2fa   : > { %v3536_v12 = vadd.f32 %v3535_v54, %v8762_v49  ;;  %v3573_v13 = vadd.f32 %v3572_v16, %v8766_v30  ;;  %v3610_v32 = vadd.f32 %v3609_v58, %v8770_v11  ;;  %v3647_v48 = vadd.f32 %v3646_v41, %v8774_v18  ;;  %v12065_v54 = vld [vmem:[#allocation111_spill] sm:$0xff]  ;;  %v12066_v16 = vld [vmem:[#allocation112_spill] sm:$0xff]  ;;  %v12067_v58 = vld [vmem:[#allocation113_spill] sm:$0xff] }
 0x2fb   : > { %v3684_v44 = vadd.f32 %v3683_v27, %v8778_v62  ;;  %v3721_v59 = vadd.f32 %v3720_v6, %v8782_v36  ;;  %v3758_v19 = vadd.f32 %v3757_v39, %v12060_v60  ;;  %v3795_v43 = vadd.f32 %v3794_v40, %v12061_v45 }
 0x2fc   : > { %v3832_v3 = vadd.f32 %v3831_v15, %v12062_v10  ;;  %v3869_v23 = vadd.f32 %v3868_v8, %v12063_v24  ;;  %v3906_v49 = vadd.f32 %v3905_v20, %v12064_v1  ;;  %v3943_v30 = vadd.f32 %v3942_v52, %v12065_v54 }
 0x2fd   : > { %v3980_v11 = vadd.f32 %v3979_v55, %v12066_v16  ;;  %v4017_v18 = vadd.f32 %v4016_v47, %v12067_v58  ;;  %v3463_v41 = vadd.f32 %v3462_v57, %v3252_v17  ;;  %v3500_v62 = vadd.f32 %v3499_v22, %v3253_v5  ;;  %v12068_v55 = vld [vmem:[#allocation320_spill] sm:$0xff]  ;;  %v12070_v17 = vld [vmem:[#allocation321_spill] sm:$0xff]  ;;  %v12093_v16 = vld [vmem:[#allocation331_spill] sm:$0xff] }
 0x2fe   : > { %v3537_v27 = vadd.f32 %v3536_v12, %v3254_v4  ;;  %v3574_v36 = vadd.f32 %v3573_v13, %v3255_v56  ;;  %v3611_v6 = vadd.f32 %v3610_v32, %v3256_v25  ;;  %v3648_v39 = vadd.f32 %v3647_v48, %v3257_v2  ;;  %v12072_v56 = vld [vmem:[#allocation322_spill] sm:$0xff]  ;;  %v12082_v12 = vld [vmem:[#allocation327_spill] sm:$0xff]  ;;  %v2885_v48 = vpop.permute.xlu0 %2884 }
 0x2ff   : > { %v3685_v33 = vadd.f32 %v3684_v44, %v3258_v50  ;;  %v3722_v40 = vadd.f32 %v3721_v59, %v3259_v37  ;;  %v3759_v15 = vadd.f32 %v3758_v19, %v3260_v31  ;;  %v3796_v60 = vadd.f32 %v3795_v43, %v3261_v42  ;;  %v12074_v50 = vld [vmem:[#allocation323_spill] sm:$0xff]  ;;  %v12080_v31 = vld [vmem:[#allocation326_spill] sm:$0xff]  ;;  %v12084_v44 = vld [vmem:[#allocation328_spill] sm:$0xff] }
 0x300   : > { %v3833_v8 = vadd.f32 %v3832_v3, %v3262_v28  ;;  %v3870_v45 = vadd.f32 %v3869_v23, %v3263_v14  ;;  %v3907_v20 = vadd.f32 %v3906_v49, %v3264_v35  ;;  %v3944_v10 = vadd.f32 %v3943_v30, %v3265_v46  ;;  %v12076_v35 = vld [vmem:[#allocation324_spill] sm:$0xff]  ;;  %v12087_v43 = vld [vmem:[#allocation329_spill] sm:$0xff]  ;;  %v12090_v49 = vld [vmem:[#allocation330_spill] sm:$0xff] }
 0x301   : > { %v3981_v52 = vadd.f32 %v3980_v11, %v3266_v7  ;;  %v4018_v24 = vadd.f32 %v4017_v18, %v3267_v61  ;;  %v12069_v1 = vmax.f32 %v12068_v55, 0.0  ;;  %v12071_v5 = vmax.f32 %v12070_v17, 0.0  ;;  %v12078_v61 = vld [vmem:[#allocation325_spill] sm:$0xff]  ;;  %v12096_v18 = vld [vmem:[#allocation332_spill] sm:$0xff] }
 0x302   : > { %v12073_v25 = vmax.f32 %v12072_v56, 0.0  ;;  %v12075_v42 = vmax.f32 %v12074_v50, 0.0  ;;  %v12077_v46 = vmax.f32 %v12076_v35, 0.0  ;;  %v12079_v14 = vmax.f32 %v12078_v61, 0.0  ;;  %v12099_v17 = vld [vmem:[#allocation333_spill] sm:$0xff]  ;;  %v12105_v35 = vld [vmem:[#allocation335_spill] sm:$0xff] }
 0x303   : > { %v8978_v47 = vmul.f32 %v2890_v21, %v12069_v1  ;;  %v8982_v4 = vmul.f32 %v2890_v21, %v12071_v5  ;;  %v12081_v57 = vmax.f32 %v12080_v31, 0.0  ;;  %v12083_v13 = vmax.f32 %v12082_v12, 0.0  ;;  %v12110_v12 = vld [vmem:[#allocation337_spill] sm:$0xff] }
 0x304   : > { %v8986_v2 = vmul.f32 %v2890_v21, %v12073_v25  ;;  %v8990_v28 = vmul.f32 %v2890_v21, %v12075_v42  ;;  %v8994_v7 = vmul.f32 %v2890_v21, %v12077_v46  ;;  %v8998_v37 = vmul.f32 %v2890_v21, %v12079_v14  ;;  %v12102_v25 = vld [vmem:[#allocation334_spill] sm:$0xff]  ;;  %v12108_v14 = vld [vmem:[#allocation336_spill] sm:$0xff] }
 0x305   : > { %v9002_v22 = vmul.f32 %v2890_v21, %v12081_v57  ;;  %v9006_v32 = vmul.f32 %v2890_v21, %v12083_v13  ;;  %v12085_v59 = vmax.f32 %v12084_v44, 0.0  ;;  %v12088_v3 = vmax.f32 %v12087_v43, 0.0 }
 0x306   : > { %v12091_v54 = vmax.f32 %v12090_v49, 0.0  ;;  %v12094_v11 = vmax.f32 %v12093_v16, 0.0  ;;  %v12097_v55 = vmax.f32 %v12096_v18, 0.0  ;;  %v12100_v5 = vmax.f32 %v12099_v17, 0.0  ;;  %v12114_v49 = vld [vmem:[#allocation339_spill] sm:$0xff]  ;;  %v12118_v17 = vld [vmem:[#allocation341_spill] sm:$0xff] }
 0x307   : > { %v9010_v19 = vmul.f32 %v2890_v21, %v12085_v59  ;;  %v9014_v23 = vmul.f32 %v2890_v21, %v12088_v3  ;;  %v12103_v50 = vmax.f32 %v12102_v25, 0.0  ;;  %v12106_v46 = vmax.f32 %v12105_v35, 0.0  ;;  %v12112_v59 = vld [vmem:[#allocation338_spill] sm:$0xff] }
 0x308   : > { %v9018_v30 = vmul.f32 %v2890_v21, %v12091_v54  ;;  %v9022_v58 = vmul.f32 %v2890_v21, %v12094_v11  ;;  %v9026_v1 = vmul.f32 %v2890_v21, %v12097_v55  ;;  %v9030_v56 = vmul.f32 %v2890_v21, %v12100_v5  ;;  %v12116_v11 = vld [vmem:[#allocation340_spill] sm:$0xff] }
 0x309   : > { %12086 = vst [vmem:[#allocation149_spill] sm:$0xff] %v9010_v19  ;;  %12089 = vst [vmem:[#allocation12_spill] sm:$0xff] %v9014_v23  ;;  %v9034_v42 = vmul.f32 %v2890_v21, %v12103_v50  ;;  %v9038_v61 = vmul.f32 %v2890_v21, %v12106_v46  ;;  %v12109_v31 = vmax.f32 %v12108_v14, 0.0  ;;  %v12111_v13 = vmax.f32 %v12110_v12, 0.0  ;;  %v12120_v21 = vld [vmem:[#allocation342_spill] sm:$0xff]  ;;  %v12122_v46 = vld [vmem:[#allocation343_spill] sm:$0xff] }
 0x30a   : > { %12092 = vst [vmem:[#allocation150_spill] sm:$0xff] %v9018_v30  ;;  %12095 = vst [vmem:[#allocation13_spill] sm:$0xff] %v9022_v58  ;;  %v12113_v43 = vmax.f32 %v12112_v59, 0.0  ;;  %v12115_v54 = vmax.f32 %v12114_v49, 0.0  ;;  %v12117_v18 = vmax.f32 %v12116_v11, 0.0  ;;  %v12119_v5 = vmax.f32 %v12118_v17, 0.0 }
 0x30b   : > { %12098 = vst [vmem:[#allocation151_spill] sm:$0xff] %v9026_v1  ;;  %12101 = vst [vmem:[#allocation14_spill] sm:$0xff] %v9030_v56  ;;  %v3284_v57 = vmul.f32 %v2885_v48, %v12109_v31  ;;  %v3285_v44 = vmul.f32 %v2885_v48, %v12111_v13  ;;  %v12121_v50 = vmax.f32 %v12120_v21, 0.0  ;;  %v12123_v14 = vmax.f32 %v12122_v46, 0.0  ;;  %v12124_v12 = vld [vmem:[#allocation344_spill] sm:$0xff]  ;;  %v12126_v59 = vld [vmem:[#allocation345_spill] sm:$0xff] }
 0x30c   : > { %12104 = vst [vmem:[#allocation152_spill] sm:$0xff] %v9034_v42  ;;  %12107 = vst [vmem:[#allocation15_spill] sm:$0xff] %v9038_v61  ;;  %v3286_v3 = vmul.f32 %v2885_v48, %v12113_v43  ;;  %v3287_v16 = vmul.f32 %v2885_v48, %v12115_v54  ;;  %v3288_v55 = vmul.f32 %v2885_v48, %v12117_v18  ;;  %v12125_v13 = vmax.f32 %v12124_v12, 0.0  ;;  %v12128_v49 = vld [vmem:[#allocation346_spill] sm:$0xff]  ;;  %v12130_v11 = vld [vmem:[#allocation347_spill] sm:$0xff] }
 0x30d   : > { %v3289_v25 = vmul.f32 %v2885_v48, %v12119_v5  ;;  %v3290_v35 = vmul.f32 %v2885_v48, %v12121_v50  ;;  %v3291_v31 = vmul.f32 %v2885_v48, %v12123_v14  ;;  %v12127_v43 = vmax.f32 %v12126_v59, 0.0  ;;  %v12132_v17 = vld [vmem:[#allocation348_spill] sm:$0xff]  ;;  %v12134_v21 = vld [vmem:[#allocation349_spill] sm:$0xff]  ;;  %v12136_v46 = vld [vmem:[#allocation350_spill] sm:$0xff] }
 0x30e   : > { %v3292_v61 = vmul.f32 %v2885_v48, %v12125_v13  ;;  %v12129_v54 = vmax.f32 %v12128_v49, 0.0  ;;  %v12131_v18 = vmax.f32 %v12130_v11, 0.0  ;;  %v12133_v5 = vmax.f32 %v12132_v17, 0.0  ;;  %v12138_v12 = vld [vmem:[#allocation351_spill] sm:$0xff] }
 0x30f   : > { %v3293_v42 = vmul.f32 %v2885_v48, %v12127_v43  ;;  %v12135_v50 = vmax.f32 %v12134_v21, 0.0  ;;  %v12137_v14 = vmax.f32 %v12136_v46, 0.0  ;;  %v12139_v13 = vmax.f32 %v12138_v12, 0.0  ;;  %v12141_v46 = vld [vmem:[#allocation146_spill] sm:$0xff] }
 0x310   : > { %v3294_v56 = vmul.f32 %v2885_v48, %v12129_v54  ;;  %v3295_v1 = vmul.f32 %v2885_v48, %v12131_v18  ;;  %v3296_v58 = vmul.f32 %v2885_v48, %v12133_v5  ;;  %v3464_v59 = vadd.f32 %v3463_v41, %v8866_v51  ;;  %v12142_v41 = vld [vmem:[#allocation9_spill] sm:$0xff] }
 0x311   : > { %v3297_v30 = vmul.f32 %v2885_v48, %v12135_v50  ;;  %v3298_v23 = vmul.f32 %v2885_v48, %v12137_v14  ;;  %v3299_v19 = vmul.f32 %v2885_v48, %v12139_v13  ;;  %v3501_v43 = vadd.f32 %v3500_v62, %v8870_v9  ;;  %v12140_v50 = vld [vmem:[#allocation8_spill] sm:$0xff]  ;;  %v12143_v62 = vld [vmem:[#allocation147_spill] sm:$0xff]  ;;  %v2900_v14 = vpop.permute.xlu1 %2899 }
 0x312   : > { %v3538_v49 = vadd.f32 %v3537_v27, %v8874_v63  ;;  %v3575_v54 = vadd.f32 %v3574_v36, %v8878_v0  ;;  %v3612_v11 = vadd.f32 %v3611_v6, %v8882_v34  ;;  %v3649_v18 = vadd.f32 %v3648_v39, %v8886_v53  ;;  %v12144_v27 = vld [vmem:[#allocation10_spill] sm:$0xff]  ;;  %v12145_v36 = vld [vmem:[#allocation148_spill] sm:$0xff]  ;;  %v12146_v6 = vld [vmem:[#allocation11_spill] sm:$0xff] }
 0x313   : > { %v3686_v17 = vadd.f32 %v3685_v33, %v8890_v29  ;;  %v3723_v5 = vadd.f32 %v3722_v40, %v8894_v26  ;;  %v3760_v21 = vadd.f32 %v3759_v15, %v8898_v38  ;;  %v3797_v48 = vadd.f32 %v3796_v60, %v12140_v50 }
 0x314   : > { %v3834_v51 = vadd.f32 %v3833_v8, %v12141_v46  ;;  %v3871_v9 = vadd.f32 %v3870_v45, %v12142_v41  ;;  %v3908_v63 = vadd.f32 %v3907_v20, %v12143_v62  ;;  %v3945_v0 = vadd.f32 %v3944_v10, %v12144_v27  ;;  %v12168_v62 = vld [vmem:[#allocation362_spill] sm:$0xff] }
 0x315   : > { %v3982_v34 = vadd.f32 %v3981_v52, %v12145_v36  ;;  %v4019_v53 = vadd.f32 %v4018_v24, %v12146_v6  ;;  %v3465_v39 = vadd.f32 %v3464_v59, %v3284_v57  ;;  %v3502_v29 = vadd.f32 %v3501_v43, %v3285_v44  ;;  %v12147_v52 = vld [vmem:[#allocation352_spill] sm:$0xff]  ;;  %v12149_v57 = vld [vmem:[#allocation353_spill] sm:$0xff] }
 0x316   : > { %v3539_v33 = vadd.f32 %v3538_v49, %v3286_v3  ;;  %v3576_v26 = vadd.f32 %v3575_v54, %v3287_v16  ;;  %v3613_v40 = vadd.f32 %v3612_v11, %v3288_v55  ;;  %v3650_v38 = vadd.f32 %v3649_v18, %v3289_v25  ;;  %v12151_v16 = vld [vmem:[#allocation354_spill] sm:$0xff]  ;;  %v12161_v49 = vld [vmem:[#allocation359_spill] sm:$0xff]  ;;  %v2895_v18 = vpop.permute.xlu0 %2894  ;;  %v12174_v6 = vld [vmem:[#allocation364_spill] sm:$0xff] }
 0x317   : > { %v3687_v15 = vadd.f32 %v3686_v17, %v3290_v35  ;;  %v3724_v60 = vadd.f32 %v3723_v5, %v3291_v31  ;;  %v3761_v8 = vadd.f32 %v3760_v21, %v3292_v61  ;;  %v3798_v12 = vadd.f32 %v3797_v48, %v3293_v42  ;;  %v12153_v61 = vld [vmem:[#allocation355_spill] sm:$0xff]  ;;  %v12159_v31 = vld [vmem:[#allocation358_spill] sm:$0xff]  ;;  %v12163_v17 = vld [vmem:[#allocation360_spill] sm:$0xff] }
 0x318   : > { %v3835_v45 = vadd.f32 %v3834_v51, %v3294_v56  ;;  %v3872_v13 = vadd.f32 %v3871_v9, %v3295_v1  ;;  %v3909_v20 = vadd.f32 %v3908_v63, %v3296_v58  ;;  %v3946_v50 = vadd.f32 %v3945_v0, %v3297_v30  ;;  %v12155_v58 = vld [vmem:[#allocation356_spill] sm:$0xff]  ;;  %v12165_v48 = vld [vmem:[#allocation361_spill] sm:$0xff]  ;;  %v12171_v0 = vld [vmem:[#allocation363_spill] sm:$0xff] }
 0x319   : > { %v3983_v10 = vadd.f32 %v3982_v34, %v3298_v23  ;;  %v4020_v46 = vadd.f32 %v4019_v53, %v3299_v19  ;;  %v12148_v41 = vmax.f32 %v12147_v52, 0.0  ;;  %v12150_v44 = vmax.f32 %v12149_v57, 0.0  ;;  %v12157_v19 = vld [vmem:[#allocation357_spill] sm:$0xff] }
 0x31a   : > { %v12152_v55 = vmax.f32 %v12151_v16, 0.0  ;;  %v12154_v42 = vmax.f32 %v12153_v61, 0.0  ;;  %v12156_v30 = vmax.f32 %v12155_v58, 0.0  ;;  %v12158_v1 = vmax.f32 %v12157_v19, 0.0  ;;  %v12180_v16 = vld [vmem:[#allocation366_spill] sm:$0xff]  ;;  %v12186_v19 = vld [vmem:[#allocation368_spill] sm:$0xff] }
 0x31b   : > { %v9090_v24 = vmul.f32 %v2900_v14, %v12148_v41  ;;  %v9094_v3 = vmul.f32 %v2900_v14, %v12150_v44  ;;  %v12160_v59 = vmax.f32 %v12159_v31, 0.0  ;;  %v12162_v54 = vmax.f32 %v12161_v49, 0.0  ;;  %v12177_v41 = vld [vmem:[#allocation365_spill] sm:$0xff] }
 0x31c   : > { %v9098_v25 = vmul.f32 %v2900_v14, %v12152_v55  ;;  %v9102_v56 = vmul.f32 %v2900_v14, %v12154_v42  ;;  %v9106_v23 = vmul.f32 %v2900_v14, %v12156_v30  ;;  %v9110_v35 = vmul.f32 %v2900_v14, %v12158_v1  ;;  %v12183_v42 = vld [vmem:[#allocation367_spill] sm:$0xff] }
 0x31d   : > { %v9114_v43 = vmul.f32 %v2900_v14, %v12160_v59  ;;  %v9118_v11 = vmul.f32 %v2900_v14, %v12162_v54  ;;  %v12164_v5 = vmax.f32 %v12163_v17, 0.0  ;;  %v12166_v51 = vmax.f32 %v12165_v48, 0.0  ;;  %v12188_v59 = vld [vmem:[#allocation369_spill] sm:$0xff]  ;;  %v12190_v17 = vld [vmem:[#allocation370_spill] sm:$0xff] }
 0x31e   : > { %v12169_v63 = vmax.f32 %v12168_v62, 0.0  ;;  %v12172_v36 = vmax.f32 %v12171_v0, 0.0  ;;  %v12175_v53 = vmax.f32 %v12174_v6, 0.0  ;;  %v12178_v57 = vmax.f32 %v12177_v41, 0.0  ;;  %v12194_v0 = vld [vmem:[#allocation372_spill] sm:$0xff] }
 0x31f   : > { %v9122_v21 = vmul.f32 %v2900_v14, %v12164_v5  ;;  %v9126_v9 = vmul.f32 %v2900_v14, %v12166_v51  ;;  %v12181_v55 = vmax.f32 %v12180_v16, 0.0  ;;  %v12184_v58 = vmax.f32 %v12183_v42, 0.0  ;;  %v12192_v51 = vld [vmem:[#allocation371_spill] sm:$0xff] }
 0x320   : > { %v9130_v27 = vmul.f32 %v2900_v14, %v12169_v63  ;;  %v9134_v34 = vmul.f32 %v2900_v14, %v12172_v36  ;;  %v9138_v52 = vmul.f32 %v2900_v14, %v12175_v53  ;;  %v9142_v44 = vmul.f32 %v2900_v14, %v12178_v57  ;;  %v12196_v53 = vld [vmem:[#allocation373_spill] sm:$0xff]  ;;  %v12200_v42 = vld [vmem:[#allocation375_spill] sm:$0xff] }
 0x321   : > { %12167 = vst [vmem:[#allocation153_spill] sm:$0xff] %v9126_v9  ;;  %v9146_v61 = vmul.f32 %v2900_v14, %v12181_v55  ;;  %v9150_v30 = vmul.f32 %v2900_v14, %v12184_v58  ;;  %v12187_v1 = vmax.f32 %v12186_v19, 0.0  ;;  %v12189_v49 = vmax.f32 %v12188_v59, 0.0  ;;  %v12198_v14 = vld [vmem:[#allocation374_spill] sm:$0xff] }
 0x322   : > { %12170 = vst [vmem:[#allocation16_spill] sm:$0xff] %v9130_v27  ;;  %12173 = vst [vmem:[#allocation154_spill] sm:$0xff] %v9134_v34  ;;  %v12191_v5 = vmax.f32 %v12190_v17, 0.0  ;;  %v12193_v62 = vmax.f32 %v12192_v51, 0.0  ;;  %v12195_v36 = vmax.f32 %v12194_v0, 0.0  ;;  %v12197_v41 = vmax.f32 %v12196_v53, 0.0 }
 0x323   : > { %12176 = vst [vmem:[#allocation17_spill] sm:$0xff] %v9138_v52  ;;  %12179 = vst [vmem:[#allocation155_spill] sm:$0xff] %v9142_v44  ;;  %v3316_v31 = vmul.f32 %v2895_v18, %v12187_v1  ;;  %v3317_v54 = vmul.f32 %v2895_v18, %v12189_v49  ;;  %v12199_v16 = vmax.f32 %v12198_v14, 0.0  ;;  %v12201_v58 = vmax.f32 %v12200_v42, 0.0  ;;  %v12202_v1 = vld [vmem:[#allocation376_spill] sm:$0xff]  ;;  %v12204_v17 = vld [vmem:[#allocation377_spill] sm:$0xff] }
 0x324   : > { %12182 = vst [vmem:[#allocation18_spill] sm:$0xff] %v9146_v61  ;;  %12185 = vst [vmem:[#allocation156_spill] sm:$0xff] %v9150_v30  ;;  %v3318_v48 = vmul.f32 %v2895_v18, %v12191_v5  ;;  %v3319_v63 = vmul.f32 %v2895_v18, %v12193_v62  ;;  %v3320_v6 = vmul.f32 %v2895_v18, %v12195_v36  ;;  %v12203_v59 = vmax.f32 %v12202_v1, 0.0  ;;  %v12206_v51 = vld [vmem:[#allocation378_spill] sm:$0xff]  ;;  %v12208_v0 = vld [vmem:[#allocation379_spill] sm:$0xff] }
 0x325   : > { %v3321_v57 = vmul.f32 %v2895_v18, %v12197_v41  ;;  %v3322_v55 = vmul.f32 %v2895_v18, %v12199_v16  ;;  %v3323_v19 = vmul.f32 %v2895_v18, %v12201_v58  ;;  %v12205_v5 = vmax.f32 %v12204_v17, 0.0  ;;  %v12210_v53 = vld [vmem:[#allocation380_spill] sm:$0xff]  ;;  %v12212_v14 = vld [vmem:[#allocation381_spill] sm:$0xff]  ;;  %v12214_v42 = vld [vmem:[#allocation382_spill] sm:$0xff] }
 0x326   : > { %v3324_v49 = vmul.f32 %v2895_v18, %v12203_v59  ;;  %v12207_v62 = vmax.f32 %v12206_v51, 0.0  ;;  %v12209_v36 = vmax.f32 %v12208_v0, 0.0  ;;  %v12211_v41 = vmax.f32 %v12210_v53, 0.0  ;;  %v12216_v1 = vld [vmem:[#allocation383_spill] sm:$0xff] }
 0x327   : > { %v3325_v30 = vmul.f32 %v2895_v18, %v12205_v5  ;;  %v12213_v16 = vmax.f32 %v12212_v14, 0.0  ;;  %v12215_v58 = vmax.f32 %v12214_v42, 0.0  ;;  %v12217_v59 = vmax.f32 %v12216_v1, 0.0  ;;  %v12218_v14 = vld [vmem:[#allocation149_spill] sm:$0xff]  ;;  %v12219_v42 = vld [vmem:[#allocation12_spill] sm:$0xff] }
 0x328   : > { %v3326_v61 = vmul.f32 %v2895_v18, %v12207_v62  ;;  %v3327_v44 = vmul.f32 %v2895_v18, %v12209_v36  ;;  %v3328_v52 = vmul.f32 %v2895_v18, %v12211_v41  ;;  %v3466_v17 = vadd.f32 %v3465_v39, %v8978_v47  ;;  %v12221_v39 = vld [vmem:[#allocation13_spill] sm:$0xff] }
 0x329   : > { %v3329_v34 = vmul.f32 %v2895_v18, %v12213_v16  ;;  %v3330_v27 = vmul.f32 %v2895_v18, %v12215_v58  ;;  %v3331_v9 = vmul.f32 %v2895_v18, %v12217_v59  ;;  %v3503_v5 = vadd.f32 %v3502_v29, %v8982_v4  ;;  %v12220_v58 = vld [vmem:[#allocation150_spill] sm:$0xff]  ;;  %v12222_v29 = vld [vmem:[#allocation151_spill] sm:$0xff]  ;;  %v2905_v59 = vpop.permute.xlu1 %2904 }
 0x32a   : > { %v3540_v51 = vadd.f32 %v3539_v33, %v8986_v2  ;;  %v3577_v62 = vadd.f32 %v3576_v26, %v8990_v28  ;;  %v3614_v0 = vadd.f32 %v3613_v40, %v8994_v7  ;;  %v3651_v36 = vadd.f32 %v3650_v38, %v8998_v37  ;;  %v12223_v33 = vld [vmem:[#allocation14_spill] sm:$0xff]  ;;  %v12224_v26 = vld [vmem:[#allocation152_spill] sm:$0xff]  ;;  %v12225_v40 = vld [vmem:[#allocation15_spill] sm:$0xff] }
 0x32b   : > { %v3688_v53 = vadd.f32 %v3687_v15, %v9002_v22  ;;  %v3725_v41 = vadd.f32 %v3724_v60, %v9006_v32  ;;  %v3762_v16 = vadd.f32 %v3761_v8, %v12218_v14  ;;  %v3799_v18 = vadd.f32 %v3798_v12, %v12219_v42 }
 0x32c   : > { %v3836_v47 = vadd.f32 %v3835_v45, %v12220_v58  ;;  %v3873_v4 = vadd.f32 %v3872_v13, %v12221_v39  ;;  %v3910_v2 = vadd.f32 %v3909_v20, %v12222_v29  ;;  %v3947_v28 = vadd.f32 %v3946_v50, %v12223_v33 }
 0x32d   : > { %v3984_v7 = vadd.f32 %v3983_v10, %v12224_v26  ;;  %v4021_v37 = vadd.f32 %v4020_v46, %v12225_v40  ;;  %v3467_v38 = vadd.f32 %v3466_v17, %v3316_v31  ;;  %v3504_v22 = vadd.f32 %v3503_v5, %v3317_v54  ;;  %v12226_v10 = vld [vmem:[#allocation400_spill] sm:$0xff]  ;;  %v12228_v31 = vld [vmem:[#allocation401_spill] sm:$0xff] }
 0x32e   : > { %v3541_v15 = vadd.f32 %v3540_v51, %v3318_v48  ;;  %v3578_v32 = vadd.f32 %v3577_v62, %v3319_v63  ;;  %v3615_v60 = vadd.f32 %v3614_v0, %v3320_v6  ;;  %v3652_v8 = vadd.f32 %v3651_v36, %v3321_v57  ;;  %v12230_v63 = vld [vmem:[#allocation402_spill] sm:$0xff]  ;;  %v12240_v51 = vld [vmem:[#allocation407_spill] sm:$0xff]  ;;  %v12242_v36 = vld [vmem:[#allocation408_spill] sm:$0xff] }
 0x32f   : > { %v3689_v1 = vadd.f32 %v3688_v53, %v3322_v55  ;;  %v3726_v12 = vadd.f32 %v3725_v41, %v3323_v19  ;;  %v3763_v45 = vadd.f32 %v3762_v16, %v3324_v49  ;;  %v3800_v14 = vadd.f32 %v3799_v18, %v3325_v30  ;;  %v12232_v55 = vld [vmem:[#allocation403_spill] sm:$0xff]  ;;  %v12234_v49 = vld [vmem:[#allocation404_spill] sm:$0xff]  ;;  %v12244_v16 = vld [vmem:[#allocation409_spill] sm:$0xff] }
 0x330   : > { %v3837_v13 = vadd.f32 %v3836_v47, %v3326_v61  ;;  %v3874_v42 = vadd.f32 %v3873_v4, %v3327_v44  ;;  %v3911_v20 = vadd.f32 %v3910_v2, %v3328_v52  ;;  %v3948_v58 = vadd.f32 %v3947_v28, %v3329_v34  ;;  %v12236_v44 = vld [vmem:[#allocation405_spill] sm:$0xff]  ;;  %v12246_v4 = vld [vmem:[#allocation410_spill] sm:$0xff]  ;;  %v12248_v28 = vld [vmem:[#allocation411_spill] sm:$0xff] }
 0x331   : > { %v3985_v50 = vadd.f32 %v3984_v7, %v3330_v27  ;;  %v4022_v39 = vadd.f32 %v4021_v37, %v3331_v9  ;;  %v12227_v29 = vmax.f32 %v12226_v10, 0.0  ;;  %v12229_v54 = vmax.f32 %v12228_v31, 0.0  ;;  %v12238_v27 = vld [vmem:[#allocation406_spill] sm:$0xff]  ;;  %v12250_v40 = vld [vmem:[#allocation412_spill] sm:$0xff] }
 0x332   : > { %v12231_v6 = vmax.f32 %v12230_v63, 0.0  ;;  %v12233_v19 = vmax.f32 %v12232_v55, 0.0  ;;  %v12235_v30 = vmax.f32 %v12234_v49, 0.0  ;;  %v12237_v52 = vmax.f32 %v12236_v44, 0.0  ;;  %v12254_v63 = vld [vmem:[#allocation414_spill] sm:$0xff] }
 0x333   : > { %v3348_v46 = vmul.f32 %v2905_v59, %v12227_v29  ;;  %v3349_v48 = vmul.f32 %v2905_v59, %v12229_v54  ;;  %v12239_v9 = vmax.f32 %v12238_v27, 0.0  ;;  %v12241_v62 = vmax.f32 %v12240_v51, 0.0  ;;  %v12252_v29 = vld [vmem:[#allocation413_spill] sm:$0xff] }
 0x334   : > { %v3350_v57 = vmul.f32 %v2905_v59, %v12231_v6  ;;  %v3351_v17 = vmul.f32 %v2905_v59, %v12233_v19  ;;  %v3352_v61 = vmul.f32 %v2905_v59, %v12235_v30  ;;  %v3353_v34 = vmul.f32 %v2905_v59, %v12237_v52  ;;  %v12256_v19 = vld [vmem:[#allocation415_spill] sm:$0xff] }
 0x335   : > { %v3354_v5 = vmul.f32 %v2905_v59, %v12239_v9  ;;  %v3355_v0 = vmul.f32 %v2905_v59, %v12241_v62  ;;  %v12243_v53 = vmax.f32 %v12242_v36, 0.0  ;;  %v12245_v18 = vmax.f32 %v12244_v16, 0.0 }
 0x336   : > { %v12247_v2 = vmax.f32 %v12246_v4, 0.0  ;;  %v12249_v26 = vmax.f32 %v12248_v28, 0.0  ;;  %v12251_v37 = vmax.f32 %v12250_v40, 0.0  ;;  %v12253_v31 = vmax.f32 %v12252_v29, 0.0  ;;  %v985_v4 = vld [vmem:[%s5108_s17 + $0x728] sm:$0xff] }
 0x337   : > { %v3356_v41 = vmul.f32 %v2905_v59, %v12243_v53  ;;  %v3357_v47 = vmul.f32 %v2905_v59, %v12245_v18  ;;  %v12255_v6 = vmax.f32 %v12254_v63, 0.0  ;;  %v12257_v49 = vmax.f32 %v12256_v19, 0.0  ;;  %v12258_v18 = vld [vmem:[#allocation153_spill] sm:$0xff] }
 0x338   : > { %v3358_v33 = vmul.f32 %v2905_v59, %v12247_v2  ;;  %v3359_v7 = vmul.f32 %v2905_v59, %v12249_v26  ;;  %v3360_v10 = vmul.f32 %v2905_v59, %v12251_v37  ;;  %v3361_v54 = vmul.f32 %v2905_v59, %v12253_v31  ;;  %v987_v2 = vld [vmem:[%s5108_s17 + $0x738] sm:$0xff] }
 0x339   : > { %v3362_v55 = vmul.f32 %v2905_v59, %v12255_v6  ;;  %v3363_v30 = vmul.f32 %v2905_v59, %v12257_v49  ;;  %v3468_v44 = vadd.f32 %v3467_v38, %v9090_v24  ;;  %v3505_v52 = vadd.f32 %v3504_v22, %v9094_v3  ;;  %v12259_v24 = vld [vmem:[#allocation16_spill] sm:$0xff]  ;;  %v12260_v38 = vld [vmem:[#allocation154_spill] sm:$0xff]  ;;  %v12261_v22 = vld [vmem:[#allocation17_spill] sm:$0xff] }
 0x33a   : > { %v3542_v27 = vadd.f32 %v3541_v15, %v9098_v25  ;;  %v3579_v9 = vadd.f32 %v3578_v32, %v9102_v56  ;;  %v3616_v51 = vadd.f32 %v3615_v60, %v9106_v23  ;;  %v3653_v62 = vadd.f32 %v3652_v8, %v9110_v35  ;;  %v12262_v15 = vld [vmem:[#allocation155_spill] sm:$0xff]  ;;  %v12263_v32 = vld [vmem:[#allocation18_spill] sm:$0xff]  ;;  %v12264_v60 = vld [vmem:[#allocation156_spill] sm:$0xff] }
 0x33b   : > { %v3690_v36 = vadd.f32 %v3689_v1, %v9114_v43  ;;  %v3727_v53 = vadd.f32 %v3726_v12, %v9118_v11  ;;  %v3764_v16 = vadd.f32 %v3763_v45, %v9122_v21  ;;  %v3801_v59 = vadd.f32 %v3800_v14, %v12258_v18 }
 0x33c   : > { %v3838_v3 = vadd.f32 %v3837_v13, %v12259_v24  ;;  %v3875_v25 = vadd.f32 %v3874_v42, %v12260_v38  ;;  %v3912_v56 = vadd.f32 %v3911_v20, %v12261_v22  ;;  %v3949_v23 = vadd.f32 %v3948_v58, %v12262_v15  ;;  %v980_v42 = vld [vmem:[%s5108_s17 + $0x700] sm:$0xff]  ;;  %v981_v20 = vld [vmem:[%s5108_s17 + $0x708] sm:$0xff] }
 0x33d   : > { %v3986_v35 = vadd.f32 %v3985_v50, %v12263_v32  ;;  %v4023_v43 = vadd.f32 %v4022_v39, %v12264_v60  ;;  %v9248_v11 = vadd.f32 %v3468_v44, %v3348_v46  ;;  %v9250_v21 = vadd.f32 %v3505_v52, %v3349_v48  ;;  %v982_v48 = vld [vmem:[%s5108_s17 + $0x710] sm:$0xff]  ;;  %v12291_v60 = vld [vmem:[#allocation397_spill] sm:$0xff]  ;;  %v12295_v32 = vld [vmem:[#allocation399_spill] sm:$0xff] }
 0x33e   : > { %v9252_v8 = vadd.f32 %v3542_v27, %v3350_v57  ;;  %v9254_v1 = vadd.f32 %v3579_v9, %v3351_v17  ;;  %v9256_v12 = vadd.f32 %v3616_v51, %v3352_v61  ;;  %v9258_v45 = vadd.f32 %v3653_v62, %v3353_v34  ;;  %v983_v57 = vld [vmem:[%s5108_s17 + $0x718] sm:$0xff] }
 0x33f   : > { %v9260_v14 = vadd.f32 %v3690_v36, %v3354_v5  ;;  %v9262_v13 = vadd.f32 %v3727_v53, %v3355_v0  ;;  %v9266_v58 = vadd.f32 %v3764_v16, %v3356_v41  ;;  %v9268_v50 = vadd.f32 %v3801_v59, %v3357_v47  ;;  %v984_v0 = vld [vmem:[%s5108_s17 + $0x720] sm:$0xff]  ;;  %v986_v41 = vld [vmem:[%s5108_s17 + $0x730] sm:$0xff] }
 0x340   : > { %v9270_v39 = vadd.f32 %v3838_v3, %v3358_v33  ;;  %v9272_v46 = vadd.f32 %v3875_v25, %v3359_v7  ;;  %v9276_v17 = vadd.f32 %v3912_v56, %v3360_v10  ;;  %v9278_v61 = vadd.f32 %v3949_v23, %v3361_v54  ;;  %v1699_v7 = vpop.permute.xlu0 %1698 }
 0x341   : > { %v9280_v34 = vadd.f32 %v3986_v35, %v3362_v55  ;;  %v9282_v5 = vadd.f32 %v4023_v43, %v3363_v30  ;;  %v1460_v47 = vunpack.c.l.bf16 %v980_v42  ;;  %v1461_v28 = vunpack.c.h.bf16 %v980_v42  ;;  %v12289_v43 = vld [vmem:[#allocation396_spill] sm:$0xff]  ;;  %v12293_v35 = vld [vmem:[#allocation398_spill] sm:$0xff] }
 0x342   : > { %v1462_v33 = vunpack.c.l.bf16 %v981_v20  ;;  %v1463_v26 = vunpack.c.h.bf16 %v981_v20  ;;  %v1464_v40 = vunpack.c.l.bf16 %v982_v48  ;;  %v1465_v37 = vunpack.c.h.bf16 %v982_v48  ;;  %v2910_v20 = vpop.permute.xlu1 %2909 }
 0x343   : > { %v1466_v29 = vunpack.c.l.bf16 %v983_v57  ;;  %v1467_v10 = vunpack.c.h.bf16 %v983_v57  ;;  %v1468_v31 = vunpack.c.l.bf16 %v984_v0  ;;  %v1469_v54 = vunpack.c.h.bf16 %v984_v0 }
 0x344   : > { %v1470_v63 = vunpack.c.l.bf16 %v985_v4  ;;  %v1471_v6 = vunpack.c.h.bf16 %v985_v4  ;;  %v1472_v55 = vunpack.c.l.bf16 %v986_v41  ;;  %v1473_v19 = vunpack.c.h.bf16 %v986_v41  ;;  %v12277_v4 = vld [vmem:[#allocation390_spill] sm:$0xff] }
 0x345   : > { %v1474_v49 = vunpack.c.l.bf16 %v987_v2  ;;  %v1475_v30 = vunpack.c.h.bf16 %v987_v2  ;;  %v9288_v44 = vadd.f32 %v1699_v7, %v1460_v47  ;;  %v9290_v52 = vadd.f32 %v1699_v7, %v1461_v28  ;;  %v12275_v2 = vld [vmem:[#allocation389_spill] sm:$0xff] }
 0x346   : > { %v9292_v27 = vadd.f32 %v1699_v7, %v1462_v33  ;;  %v9294_v9 = vadd.f32 %v1699_v7, %v1463_v26  ;;  %v9296_v51 = vadd.f32 %v1699_v7, %v1464_v40  ;;  %v9298_v62 = vadd.f32 %v1699_v7, %v1465_v37  ;;  %v12265_v33 = vld [vmem:[#allocation384_spill] sm:$0xff]  ;;  %v12267_v40 = vld [vmem:[#allocation385_spill] sm:$0xff] }
 0x347   : > { %v9300_v36 = vadd.f32 %v1699_v7, %v1466_v29  ;;  %v9302_v53 = vadd.f32 %v1699_v7, %v1467_v10  ;;  %v9304_v16 = vadd.f32 %v1699_v7, %v1468_v31  ;;  %v9306_v18 = vadd.f32 %v1699_v7, %v1469_v54  ;;  %v12269_v10 = vld [vmem:[#allocation386_spill] sm:$0xff] }
 0x348   : > { %v9308_v59 = vadd.f32 %v1699_v7, %v1470_v63  ;;  %v9310_v24 = vadd.f32 %v1699_v7, %v1471_v6  ;;  %v9312_v3 = vadd.f32 %v1699_v7, %v1472_v55  ;;  %v9314_v38 = vadd.f32 %v1699_v7, %v1473_v19  ;;  %v12271_v63 = vld [vmem:[#allocation387_spill] sm:$0xff]  ;;  %v12273_v19 = vld [vmem:[#allocation388_spill] sm:$0xff] }
 0x349   : > { %v9316_v25 = vadd.f32 %v1699_v7, %v1474_v49  ;;  %v9318_v22 = vadd.f32 %v1699_v7, %v1475_v30  ;;  %v2676_v56 = vmax.f32 %v9288_v44, 0.0  ;;  %v2677_v15 = vmax.f32 %v9290_v52, 0.0 }
 0x34a   : > { %v2678_v23 = vmax.f32 %v9292_v27, 0.0  ;;  %v12266_v26 = vmax.f32 %v12265_v33, 0.0  ;;  %v12268_v37 = vmax.f32 %v12267_v40, 0.0  ;;  %v12270_v31 = vmax.f32 %v12269_v10, 0.0  ;;  %v12279_v33 = vld [vmem:[#allocation391_spill] sm:$0xff]  ;;  %v12281_v40 = vld [vmem:[#allocation392_spill] sm:$0xff] }
 0x34b   : > { %v12272_v6 = vmax.f32 %v12271_v63, 0.0  ;;  %v12274_v49 = vmax.f32 %v12273_v19, 0.0  ;;  %v12276_v41 = vmax.f32 %v12275_v2, 0.0  ;;  %v12278_v28 = vmax.f32 %v12277_v4, 0.0  ;;  %v12283_v10 = vld [vmem:[#allocation393_spill] sm:$0xff] }
 0x34c   : > { %v3364_v7 = vmul.f32 %v2910_v20, %v12266_v26  ;;  %v3365_v29 = vmul.f32 %v2910_v20, %v12268_v37  ;;  %v3366_v54 = vmul.f32 %v2910_v20, %v12270_v31  ;;  %v12280_v26 = vmax.f32 %v12279_v33, 0.0 }
 0x34d   : > { %v3367_v55 = vmul.f32 %v2910_v20, %v12272_v6  ;;  %v3368_v30 = vmul.f32 %v2910_v20, %v12274_v49  ;;  %v3369_v47 = vmul.f32 %v2910_v20, %v12276_v41  ;;  %v3370_v0 = vmul.f32 %v2910_v20, %v12278_v28  ;;  %v12285_v6 = vld [vmem:[#allocation394_spill] sm:$0xff]  ;;  %v12287_v49 = vld [vmem:[#allocation395_spill] sm:$0xff] }
 0x34e   : > { %v3371_v57 = vmul.f32 %v2910_v20, %v12280_v26  ;;  %v12282_v37 = vmax.f32 %v12281_v40, 0.0  ;;  %v12284_v31 = vmax.f32 %v12283_v10, 0.0  ;;  %v12286_v42 = vmax.f32 %v12285_v6, 0.0 }
 0x34f   : > { %v12288_v2 = vmax.f32 %v12287_v49, 0.0  ;;  %v12290_v4 = vmax.f32 %v12289_v43, 0.0  ;;  %v12292_v33 = vmax.f32 %v12291_v60, 0.0  ;;  %v12294_v40 = vmax.f32 %v12293_v35, 0.0 }
 0x350   : > { %v3372_v48 = vmul.f32 %v2910_v20, %v12282_v37  ;;  %v3373_v63 = vmul.f32 %v2910_v20, %v12284_v31  ;;  %v3374_v19 = vmul.f32 %v2910_v20, %v12286_v42  ;;  %v12296_v10 = vmax.f32 %v12295_v32, 0.0 }
 0x351   : > { %v3375_v41 = vmul.f32 %v2910_v20, %v12288_v2  ;;  %v3376_v28 = vmul.f32 %v2910_v20, %v12290_v4  ;;  %v3377_v26 = vmul.f32 %v2910_v20, %v12292_v33  ;;  %v3378_v37 = vmul.f32 %v2910_v20, %v12294_v40 }
 0x352   : > { %v3379_v31 = vmul.f32 %v2910_v20, %v12296_v10  ;;  %v9369_v6 = vadd.f32 %v9248_v11, %v3364_v7  ;;  %v9372_v42 = vadd.f32 %v9250_v21, %v3365_v29  ;;  %v9375_v43 = vadd.f32 %v9252_v8, %v3366_v54  ;;  %v988_v8 = vld [vmem:[%s5108_s17 + $0x740] sm:$0xff]  ;;  %v989_v20 = vld [vmem:[%s5108_s17 + $0x748] sm:$0xff]  ;;  %v994_v7 = vld [vmem:[%s5108_s17 + $0x770] sm:$0xff] }
 0x353   : > { %v9378_v60 = vadd.f32 %v9254_v1, %v3367_v55  ;;  %v9381_v35 = vadd.f32 %v9256_v12, %v3368_v30  ;;  %v9384_v32 = vadd.f32 %v9258_v45, %v3369_v47  ;;  %v9387_v11 = vadd.f32 %v9260_v14, %v3370_v0  ;;  %v990_v14 = vld [vmem:[%s5108_s17 + $0x750] sm:$0xff]  ;;  %v991_v0 = vld [vmem:[%s5108_s17 + $0x758] sm:$0xff] }
 0x354   : > { %v9390_v21 = vadd.f32 %v9262_v13, %v3371_v57  ;;  %v9395_v1 = vadd.f32 %v9266_v58, %v3372_v48  ;;  %v9398_v12 = vadd.f32 %v9268_v50, %v3373_v63  ;;  %v9401_v45 = vadd.f32 %v9270_v39, %v3374_v19  ;;  %v992_v48 = vld [vmem:[%s5108_s17 + $0x760] sm:$0xff]  ;;  %v993_v39 = vld [vmem:[%s5108_s17 + $0x768] sm:$0xff]  ;;  %v995_v29 = vld [vmem:[%s5108_s17 + $0x778] sm:$0xff]  ;;  %v1704_v63 = vpop.permute.xlu0 %1703 }
 0x355   : > { %v9404_v47 = vadd.f32 %v9272_v46, %v3375_v41  ;;  %v9409_v13 = vadd.f32 %v9276_v17, %v3376_v28  ;;  %v9412_v57 = vadd.f32 %v9278_v61, %v3377_v26  ;;  %v9415_v58 = vadd.f32 %v9280_v34, %v3378_v37 }
 0x356   : > { %v9418_v50 = vadd.f32 %v9282_v5, %v3379_v31  ;;  %v1476_v46 = vunpack.c.l.bf16 %v988_v8  ;;  %v1477_v54 = vunpack.c.h.bf16 %v988_v8  ;;  %v1478_v55 = vunpack.c.l.bf16 %v989_v20 }
 0x357   : > { %v1479_v30 = vunpack.c.h.bf16 %v989_v20  ;;  %v1480_v17 = vunpack.c.l.bf16 %v990_v14  ;;  %v1481_v19 = vunpack.c.h.bf16 %v990_v14  ;;  %v1482_v49 = vunpack.c.l.bf16 %v991_v0 }
 0x358   : > { %v1483_v61 = vunpack.c.h.bf16 %v991_v0  ;;  %v1484_v2 = vunpack.c.l.bf16 %v992_v48  ;;  %v1485_v41 = vunpack.c.h.bf16 %v992_v48  ;;  %v1486_v34 = vunpack.c.l.bf16 %v993_v39 }
 0x359   : > { %v1487_v4 = vunpack.c.h.bf16 %v993_v39  ;;  %v1488_v28 = vunpack.c.l.bf16 %v994_v7  ;;  %v1489_v5 = vunpack.c.h.bf16 %v994_v7  ;;  %v1490_v33 = vunpack.c.l.bf16 %v995_v29 }
 0x35a   : > { %v1491_v26 = vunpack.c.h.bf16 %v995_v29  ;;  %v9424_v40 = vadd.f32 %v1704_v63, %v1476_v46  ;;  %v9426_v37 = vadd.f32 %v1704_v63, %v1477_v54  ;;  %v9428_v10 = vadd.f32 %v1704_v63, %v1478_v55 }
 0x35b   : > { %v9430_v31 = vadd.f32 %v1704_v63, %v1479_v30  ;;  %v9432_v8 = vadd.f32 %v1704_v63, %v1480_v17  ;;  %v9434_v20 = vadd.f32 %v1704_v63, %v1481_v19  ;;  %v9436_v14 = vadd.f32 %v1704_v63, %v1482_v49 }
 0x35c   : > { %v9438_v0 = vadd.f32 %v1704_v63, %v1483_v61  ;;  %v9440_v48 = vadd.f32 %v1704_v63, %v1484_v2  ;;  %v9442_v39 = vadd.f32 %v1704_v63, %v1485_v41  ;;  %v9444_v7 = vadd.f32 %v1704_v63, %v1486_v34 }
 0x35d   : > { %v9446_v29 = vadd.f32 %v1704_v63, %v1487_v4  ;;  %v9448_v46 = vadd.f32 %v1704_v63, %v1488_v28  ;;  %v9450_v54 = vadd.f32 %v1704_v63, %v1489_v5  ;;  %v9452_v55 = vadd.f32 %v1704_v63, %v1490_v33  ;;  %v2915_v28 = vpop.permute.xlu1 %2914 }
 0x35e   : > { %v9454_v30 = vadd.f32 %v1704_v63, %v1491_v26  ;;  %v2692_v17 = vmax.f32 %v9424_v40, 0.0  ;;  %v3380_v4 = vmul.f32 %v2915_v28, %v2676_v56  ;;  %v3381_v63 = vmul.f32 %v2915_v28, %v2677_v15 }
 0x35f   : > { %v3382_v5 = vmul.f32 %v2915_v28, %v2678_v23  ;;  %v12297_v33 = vmax.f32 %v9294_v9, 0.0  ;;  %v12298_v49 = vmax.f32 %v9296_v51, 0.0  ;;  %v12299_v61 = vmax.f32 %v9298_v62, 0.0 }
 0x360   : > { %v12300_v41 = vmax.f32 %v9300_v36, 0.0  ;;  %v12301_v44 = vmax.f32 %v9302_v53, 0.0  ;;  %v12302_v52 = vmax.f32 %v9304_v16, 0.0  ;;  %v12303_v27 = vmax.f32 %v9306_v18, 0.0 }
 0x361   : > { %v3383_v26 = vmul.f32 %v2915_v28, %v12297_v33  ;;  %v3384_v34 = vmul.f32 %v2915_v28, %v12298_v49  ;;  %v3385_v2 = vmul.f32 %v2915_v28, %v12299_v61  ;;  %v12304_v23 = vmax.f32 %v9308_v59, 0.0 }
 0x362   : > { %v3386_v19 = vmul.f32 %v2915_v28, %v12300_v41  ;;  %v3387_v56 = vmul.f32 %v2915_v28, %v12301_v44  ;;  %v3388_v15 = vmul.f32 %v2915_v28, %v12302_v52  ;;  %v3389_v9 = vmul.f32 %v2915_v28, %v12303_v27 }
 0x363   : > { %v3390_v51 = vmul.f32 %v2915_v28, %v12304_v23  ;;  %v12305_v62 = vmax.f32 %v9310_v24, 0.0  ;;  %v12306_v36 = vmax.f32 %v9312_v3, 0.0  ;;  %v12307_v53 = vmax.f32 %v9314_v38, 0.0 }
 0x364   : > { %v12308_v16 = vmax.f32 %v9316_v25, 0.0  ;;  %v12309_v18 = vmax.f32 %v9318_v22, 0.0  ;;  %v9505_v59 = vadd.f32 %v9369_v6, %v3380_v4  ;;  %v9508_v24 = vadd.f32 %v9372_v42, %v3381_v63  ;;  %v997_v4 = vld [vmem:[%s5108_s17 + $0x788] sm:$0xff]  ;;  %v1002_v63 = vld [vmem:[%s5108_s17 + $0x7b0] sm:$0xff] }
 0x365   : > { %v3391_v49 = vmul.f32 %v2915_v28, %v12305_v62  ;;  %v3392_v61 = vmul.f32 %v2915_v28, %v12306_v36  ;;  %v3393_v41 = vmul.f32 %v2915_v28, %v12307_v53  ;;  %v9511_v3 = vadd.f32 %v9375_v43, %v3382_v5  ;;  %v996_v43 = vld [vmem:[%s5108_s17 + $0x780] sm:$0xff]  ;;  %v1003_v5 = vld [vmem:[%s5108_s17 + $0x7b8] sm:$0xff] }
 0x366   : > { %v3394_v33 = vmul.f32 %v2915_v28, %v12308_v16  ;;  %v3395_v44 = vmul.f32 %v2915_v28, %v12309_v18  ;;  %v9514_v38 = vadd.f32 %v9378_v60, %v3383_v26  ;;  %v9517_v25 = vadd.f32 %v9381_v35, %v3384_v34  ;;  %v1000_v28 = vld [vmem:[%s5108_s17 + $0x7a0] sm:$0xff] }
 0x367   : > { %v9520_v22 = vadd.f32 %v9384_v32, %v3385_v2  ;;  %v9523_v6 = vadd.f32 %v9387_v11, %v3386_v19  ;;  %v9526_v42 = vadd.f32 %v9390_v21, %v3387_v56  ;;  %v9531_v60 = vadd.f32 %v9395_v1, %v3388_v15  ;;  %v998_v11 = vld [vmem:[%s5108_s17 + $0x790] sm:$0xff]  ;;  %v999_v19 = vld [vmem:[%s5108_s17 + $0x798] sm:$0xff]  ;;  %v1709_v15 = vpop.permute.xlu0 %1708 }
 0x368   : > { %v9534_v35 = vadd.f32 %v9398_v12, %v3389_v9  ;;  %v9537_v32 = vadd.f32 %v9401_v45, %v3390_v51  ;;  %v9540_v2 = vadd.f32 %v9404_v47, %v3391_v49  ;;  %v9545_v21 = vadd.f32 %v9409_v13, %v3392_v61  ;;  %v1001_v45 = vld [vmem:[%s5108_s17 + $0x7a8] sm:$0xff] }
 0x369   : > { %v9548_v34 = vadd.f32 %v9412_v57, %v3393_v41  ;;  %v9551_v1 = vadd.f32 %v9415_v58, %v3394_v33  ;;  %v9554_v12 = vadd.f32 %v9418_v50, %v3395_v44  ;;  %v1492_v47 = vunpack.c.l.bf16 %v996_v43 }
 0x36a   : > { %v1493_v26 = vunpack.c.h.bf16 %v996_v43  ;;  %v1494_v56 = vunpack.c.l.bf16 %v997_v4  ;;  %v1495_v52 = vunpack.c.h.bf16 %v997_v4  ;;  %v1496_v13 = vunpack.c.l.bf16 %v998_v11 }
 0x36b   : > { %v1497_v27 = vunpack.c.h.bf16 %v998_v11  ;;  %v1498_v9 = vunpack.c.l.bf16 %v999_v19  ;;  %v1499_v57 = vunpack.c.h.bf16 %v999_v19  ;;  %v1500_v23 = vunpack.c.l.bf16 %v1000_v28 }
 0x36c   : > { %v1501_v51 = vunpack.c.h.bf16 %v1000_v28  ;;  %v1502_v58 = vunpack.c.l.bf16 %v1001_v45  ;;  %v1503_v62 = vunpack.c.h.bf16 %v1001_v45  ;;  %v1504_v49 = vunpack.c.l.bf16 %v1002_v63 }
 0x36d   : > { %v1505_v50 = vunpack.c.h.bf16 %v1002_v63  ;;  %v1506_v36 = vunpack.c.l.bf16 %v1003_v5  ;;  %v1507_v61 = vunpack.c.h.bf16 %v1003_v5  ;;  %v9560_v53 = vadd.f32 %v1709_v15, %v1492_v47 }
 0x36e   : > { %v9562_v41 = vadd.f32 %v1709_v15, %v1493_v26  ;;  %v9564_v16 = vadd.f32 %v1709_v15, %v1494_v56  ;;  %v9566_v33 = vadd.f32 %v1709_v15, %v1495_v52  ;;  %v9568_v18 = vadd.f32 %v1709_v15, %v1496_v13 }
 0x36f   : > { %v9570_v44 = vadd.f32 %v1709_v15, %v1497_v27  ;;  %v9572_v43 = vadd.f32 %v1709_v15, %v1498_v9  ;;  %v9574_v4 = vadd.f32 %v1709_v15, %v1499_v57  ;;  %v9576_v11 = vadd.f32 %v1709_v15, %v1500_v23 }
 0x370   : > { %v9578_v19 = vadd.f32 %v1709_v15, %v1501_v51  ;;  %v9580_v28 = vadd.f32 %v1709_v15, %v1502_v58  ;;  %v9582_v45 = vadd.f32 %v1709_v15, %v1503_v62  ;;  %v9584_v63 = vadd.f32 %v1709_v15, %v1504_v49  ;;  %v2920_v58 = vpop.permute.xlu1 %2919 }
 0x371   : > { %v9586_v5 = vadd.f32 %v1709_v15, %v1505_v50  ;;  %v9588_v47 = vadd.f32 %v1709_v15, %v1506_v36  ;;  %v9590_v26 = vadd.f32 %v1709_v15, %v1507_v61  ;;  %v3396_v51 = vmul.f32 %v2920_v58, %v2692_v17 }
 0x372   : > { %v12310_v23 = vmax.f32 %v9426_v37, 0.0  ;;  %v12311_v62 = vmax.f32 %v9428_v10, 0.0  ;;  %v12312_v49 = vmax.f32 %v9430_v31, 0.0  ;;  %v12313_v36 = vmax.f32 %v9432_v8, 0.0 }
 0x373   : > { %v12314_v61 = vmax.f32 %v9434_v20, 0.0  ;;  %v12315_v57 = vmax.f32 %v9436_v14, 0.0  ;;  %v12316_v40 = vmax.f32 %v9438_v0, 0.0  ;;  %v12317_v37 = vmax.f32 %v9440_v48, 0.0 }
 0x374   : > { %v3397_v15 = vmul.f32 %v2920_v58, %v12310_v23  ;;  %v3398_v27 = vmul.f32 %v2920_v58, %v12311_v62  ;;  %v3399_v50 = vmul.f32 %v2920_v58, %v12312_v49  ;;  %v3400_v13 = vmul.f32 %v2920_v58, %v12313_v36 }
 0x375   : > { %v3401_v9 = vmul.f32 %v2920_v58, %v12314_v61  ;;  %v3402_v52 = vmul.f32 %v2920_v58, %v12315_v57  ;;  %v3403_v17 = vmul.f32 %v2920_v58, %v12316_v40  ;;  %v3404_v23 = vmul.f32 %v2920_v58, %v12317_v37 }
 0x376   : > { %v12318_v10 = vmax.f32 %v9442_v39, 0.0  ;;  %v12319_v62 = vmax.f32 %v9444_v7, 0.0  ;;  %v12320_v20 = vmax.f32 %v9446_v29, 0.0  ;;  %v12321_v14 = vmax.f32 %v9448_v46, 0.0 }
 0x377   : > { %v12322_v0 = vmax.f32 %v9450_v54, 0.0  ;;  %v12323_v48 = vmax.f32 %v9452_v55, 0.0  ;;  %v12324_v39 = vmax.f32 %v9454_v30, 0.0  ;;  %v9641_v7 = vadd.f32 %v9505_v59, %v3396_v51  ;;  %v1008_v51 = vld [vmem:[%s5108_s17 + $0x7e0] sm:$0xff] }
 0x378   : > { %v3405_v31 = vmul.f32 %v2920_v58, %v12318_v10  ;;  %v3406_v8 = vmul.f32 %v2920_v58, %v12319_v62  ;;  %v3407_v49 = vmul.f32 %v2920_v58, %v12320_v20  ;;  %v3408_v57 = vmul.f32 %v2920_v58, %v12321_v14 }
 0x379   : > { %v3409_v36 = vmul.f32 %v2920_v58, %v12322_v0  ;;  %v3410_v61 = vmul.f32 %v2920_v58, %v12323_v48  ;;  %v3411_v40 = vmul.f32 %v2920_v58, %v12324_v39  ;;  %v9644_v29 = vadd.f32 %v9508_v24, %v3397_v15  ;;  %v1010_v58 = vld [vmem:[%s5108_s17 + $0x7f0] sm:$0xff]  ;;  %v1011_v15 = vld [vmem:[%s5108_s17 + $0x7f8] sm:$0xff] }
 0x37a   : > { %v9647_v46 = vadd.f32 %v9511_v3, %v3398_v27  ;;  %v9650_v54 = vadd.f32 %v9514_v38, %v3399_v50  ;;  %v9653_v55 = vadd.f32 %v9517_v25, %v3400_v13  ;;  %v9656_v30 = vadd.f32 %v9520_v22, %v3401_v9  ;;  %v1004_v3 = vld [vmem:[%s5108_s17 + $0x7c0] sm:$0xff]  ;;  %v1005_v27 = vld [vmem:[%s5108_s17 + $0x7c8] sm:$0xff] }
 0x37b   : > { %v9659_v59 = vadd.f32 %v9523_v6, %v3402_v52  ;;  %v9662_v24 = vadd.f32 %v9526_v42, %v3403_v17  ;;  %v9667_v38 = vadd.f32 %v9531_v60, %v3404_v23  ;;  %v9670_v25 = vadd.f32 %v9534_v35, %v3405_v31  ;;  %v1006_v6 = vld [vmem:[%s5108_s17 + $0x7d0] sm:$0xff]  ;;  %v1007_v52 = vld [vmem:[%s5108_s17 + $0x7d8] sm:$0xff]  ;;  %v1714_v23 = vpop.permute.xlu0 %1713 }
 0x37c   : > { %v9673_v22 = vadd.f32 %v9537_v32, %v3406_v8  ;;  %v9676_v13 = vadd.f32 %v9540_v2, %v3407_v49  ;;  %v9681_v42 = vadd.f32 %v9545_v21, %v3408_v57  ;;  %v9684_v9 = vadd.f32 %v9548_v34, %v3409_v36  ;;  %v1009_v32 = vld [vmem:[%s5108_s17 + $0x7e8] sm:$0xff]  ;;  %s4277_s17 = sshll.u32 %s4379_s19, 4  ;;  %s4278_s19 = sshll.u32 %s12355_s20, 5 }
 0x37d   : > { %v9687_v60 = vadd.f32 %v9551_v1, %v3410_v61  ;;  %v9690_v35 = vadd.f32 %v9554_v12, %v3411_v40  ;;  %v1508_v2 = vunpack.c.l.bf16 %v1004_v3  ;;  %v1509_v50 = vunpack.c.h.bf16 %v1004_v3  ;;  %p9788_p11 = scmp.lt.s32.totalorder %s4277_s17, 31 }
 0x37e   : > { %v1510_v17 = vunpack.c.l.bf16 %v1005_v27  ;;  %v1511_v37 = vunpack.c.h.bf16 %v1005_v27  ;;  %v1512_v21 = vunpack.c.l.bf16 %v1006_v6  ;;  %v1513_v10 = vunpack.c.h.bf16 %v1006_v6 }
 0x37f   : > { %v1514_v31 = vunpack.c.l.bf16 %v1007_v52  ;;  %v1515_v34 = vunpack.c.h.bf16 %v1007_v52  ;;  %v1516_v62 = vunpack.c.l.bf16 %v1008_v51  ;;  %v1517_v8 = vunpack.c.h.bf16 %v1008_v51  ;;  %s12357_s17 = smov (!%p9788_p11, %s4277_s17), 31 }
 0x380   : > { %v1518_v1 = vunpack.c.l.bf16 %v1009_v32  ;;  %v1519_v20 = vunpack.c.h.bf16 %v1009_v32  ;;  %v1520_v49 = vunpack.c.l.bf16 %v1010_v58  ;;  %v1521_v12 = vunpack.c.h.bf16 %v1010_v58  ;;  %s753_s9 = sadd.s32 %s4278_s19, %s12357_s17 }
 0x381   : > { %v1522_v14 = vunpack.c.l.bf16 %v1011_v15  ;;  %v1523_v57 = vunpack.c.h.bf16 %v1011_v15  ;;  %v2212_v0 = vadd.f32 %v1714_v23, %v1508_v2  ;;  %v2213_v36 = vadd.f32 %v1714_v23, %v1509_v50  ;;  %v9712_v50 = vpop.permute.xlu0 %2924  ;;  %s754_s11 = scalar_lea.vmem %s9828_s4, %s753_s9 }
 0x382   : > { %v2214_v48 = vadd.f32 %v1714_v23, %v1510_v17  ;;  %v2215_v61 = vadd.f32 %v1714_v23, %v1511_v37  ;;  %v2216_v39 = vadd.f32 %v1714_v23, %v1512_v21  ;;  %v2217_v40 = vadd.f32 %v1714_v23, %v1513_v10 }
 0x383   : > { %v2218_v3 = vadd.f32 %v1714_v23, %v1514_v31  ;;  %v2219_v27 = vadd.f32 %v1714_v23, %v1515_v34  ;;  %v9696_v56 = vadd.f32 %v1714_v23, %v1516_v62  ;;  %v9698_v6 = vadd.f32 %v1714_v23, %v1517_v8  ;;  %v2930_v31 = vpop.permute.xlu1 %2929 }
 0x384   : > { %v9700_v52 = vadd.f32 %v1714_v23, %v1518_v1  ;;  %v9702_v51 = vadd.f32 %v1714_v23, %v1519_v20  ;;  %v9704_v32 = vadd.f32 %v1714_v23, %v1520_v49  ;;  %v9706_v58 = vadd.f32 %v1714_v23, %v1521_v12 }
 0x385   : > { %v9708_v15 = vadd.f32 %v1714_v23, %v1522_v14  ;;  %v9710_v2 = vadd.f32 %v1714_v23, %v1523_v57  ;;  %v2724_v17 = vmax.f32 %v2212_v0, 0.0  ;;  %v2725_v37 = vmax.f32 %v2213_v36, 0.0 }
 0x386   : > { %v2726_v21 = vmax.f32 %v2214_v48, 0.0  ;;  %v2727_v10 = vmax.f32 %v2215_v61, 0.0  ;;  %v2728_v34 = vmax.f32 %v2216_v39, 0.0  ;;  %v2729_v62 = vmax.f32 %v2217_v40, 0.0 }
 0x387   : > { %v2730_v8 = vmax.f32 %v2218_v3, 0.0  ;;  %v2731_v1 = vmax.f32 %v2219_v27, 0.0  ;;  %v12325_v20 = vmax.f32 %v9560_v53, 0.0  ;;  %v12326_v12 = vmax.f32 %v9562_v41, 0.0 }
 0x388   : > { %v12327_v14 = vmax.f32 %v9564_v16, 0.0  ;;  %v12328_v0 = vmax.f32 %v9566_v33, 0.0  ;;  %v12329_v48 = vmax.f32 %v9568_v18, 0.0  ;;  %v12330_v53 = vmax.f32 %v9570_v44, 0.0 }
 0x389   : > { %v3412_v49 = vmul.f32 %v9712_v50, %v12325_v20  ;;  %v3413_v23 = vmul.f32 %v9712_v50, %v12326_v12  ;;  %v12331_v41 = vmax.f32 %v9572_v43, 0.0  ;;  %v12332_v16 = vmax.f32 %v9574_v4, 0.0 }
 0x38a   : > { %v3414_v57 = vmul.f32 %v9712_v50, %v12327_v14  ;;  %v3415_v36 = vmul.f32 %v9712_v50, %v12328_v0  ;;  %v3416_v61 = vmul.f32 %v9712_v50, %v12329_v48  ;;  %v3417_v39 = vmul.f32 %v9712_v50, %v12330_v53 }
 0x38b   : > { %v3418_v40 = vmul.f32 %v9712_v50, %v12331_v41  ;;  %v3419_v3 = vmul.f32 %v9712_v50, %v12332_v16  ;;  %v3428_v27 = vmul.f32 %v2930_v31, %v2724_v17  ;;  %v3429_v33 = vmul.f32 %v2930_v31, %v2725_v37 }
 0x38c   : > { %v3430_v20 = vmul.f32 %v2930_v31, %v2726_v21  ;;  %v3431_v12 = vmul.f32 %v2930_v31, %v2727_v10  ;;  %v3432_v14 = vmul.f32 %v2930_v31, %v2728_v34  ;;  %v3433_v18 = vmul.f32 %v2930_v31, %v2729_v62 }
 0x38d   : > { %v3434_v0 = vmul.f32 %v2930_v31, %v2730_v8  ;;  %v3435_v48 = vmul.f32 %v2930_v31, %v2731_v1  ;;  %v3473_v44 = vadd.f32 %v9641_v7, %v3412_v49  ;;  %v3510_v53 = vadd.f32 %v9644_v29, %v3413_v23 }
 0x38e   : > { %v3547_v43 = vadd.f32 %v9647_v46, %v3414_v57  ;;  %v3584_v41 = vadd.f32 %v9650_v54, %v3415_v36  ;;  %v3621_v4 = vadd.f32 %v9653_v55, %v3416_v61  ;;  %v3658_v16 = vadd.f32 %v9656_v30, %v3417_v39 }
 0x38f   : > { %v3695_v17 = vadd.f32 %v9659_v59, %v3418_v40  ;;  %v3732_v37 = vadd.f32 %v9662_v24, %v3419_v3  ;;  %v3474_v21 = vadd.f32 %v3473_v44, %v3428_v27  ;;  %v3511_v10 = vadd.f32 %v3510_v53, %v3429_v33 }
 0x390   : > { %v3548_v34 = vadd.f32 %v3547_v43, %v3430_v20  ;;  %v3585_v62 = vadd.f32 %v3584_v41, %v3431_v12  ;;  %v3622_v8 = vadd.f32 %v3621_v4, %v3432_v14  ;;  %v3659_v7 = vadd.f32 %v3658_v16, %v3433_v18 }
 0x391   : > { %v3696_v1 = vadd.f32 %v3695_v17, %v3434_v0  ;;  %v3733_v29 = vadd.f32 %v3732_v37, %v3435_v48  ;;  %v2732_v46 = vmax.f32 %v9696_v56, 0.0  ;;  %v2733_v54 = vmax.f32 %v9698_v6, 0.0 }
 0x392   : > { %v2734_v55 = vmax.f32 %v9700_v52, 0.0  ;;  %v2735_v30 = vmax.f32 %v9702_v51, 0.0  ;;  %v2736_v59 = vmax.f32 %v9704_v32, 0.0  ;;  %v2737_v24 = vmax.f32 %v9706_v58, 0.0 }
 0x393   : > { %v2738_v49 = vmax.f32 %v9708_v15, 0.0  ;;  %v2739_v23 = vmax.f32 %v9710_v2, 0.0  ;;  %v3475_v57 = vrot.slane %v3474_v21, 4  ;;  %v3512_v36 = vrot.slane %v3511_v10, 4 }
 0x394   : > { %v3549_v61 = vrot.slane %v3548_v34, 4  ;;  %v3586_v39 = vrot.slane %v3585_v62, 4  ;;  %v3623_v40 = vrot.slane %v3622_v8, 4  ;;  %v3660_v56 = vrot.slane %v3659_v7, 4 }
 0x395   : > { %v3697_v3 = vrot.slane %v3696_v1, 4  ;;  %v3734_v6 = vrot.slane %v3733_v29, 4  ;;  %v3436_v27 = vmul.f32 %v2930_v31, %v2732_v46  ;;  %v3437_v52 = vmul.f32 %v2930_v31, %v2733_v54 }
 0x396   : > { %v3438_v33 = vmul.f32 %v2930_v31, %v2734_v55  ;;  %v3439_v51 = vmul.f32 %v2930_v31, %v2735_v30  ;;  %v3440_v20 = vmul.f32 %v2930_v31, %v2736_v59  ;;  %v3441_v32 = vmul.f32 %v2930_v31, %v2737_v24 }
 0x397   : > { %v3442_v12 = vmul.f32 %v2930_v31, %v2738_v49  ;;  %v3443_v58 = vmul.f32 %v2930_v31, %v2739_v23  ;;  %v3476_v14 = vadd.f32 %v3475_v57, %v3474_v21  ;;  %v3513_v15 = vadd.f32 %v3512_v36, %v3511_v10 }
 0x398   : > { %v3550_v18 = vadd.f32 %v3549_v61, %v3548_v34  ;;  %v3587_v2 = vadd.f32 %v3586_v39, %v3585_v62  ;;  %v3624_v0 = vadd.f32 %v3623_v40, %v3622_v8  ;;  %v3661_v48 = vadd.f32 %v3660_v56, %v3659_v7 }
 0x399   : > { %v3698_v44 = vadd.f32 %v3697_v3, %v3696_v1  ;;  %v3735_v53 = vadd.f32 %v3734_v6, %v3733_v29  ;;  %v12333_v43 = vmax.f32 %v9576_v11, 0.0  ;;  %v12334_v4 = vmax.f32 %v9578_v19, 0.0 }
 0x39a   : > { %v12335_v17 = vmax.f32 %v9580_v28, 0.0  ;;  %v12336_v37 = vmax.f32 %v9582_v45, 0.0  ;;  %v12337_v10 = vmax.f32 %v9584_v63, 0.0  ;;  %v12338_v11 = vmax.f32 %v9586_v5, 0.0 }
 0x39b   : > { %v3420_v41 = vmul.f32 %v9712_v50, %v12333_v43  ;;  %v3421_v16 = vmul.f32 %v9712_v50, %v12334_v4  ;;  %v12339_v19 = vmax.f32 %v9588_v47, 0.0  ;;  %v12340_v28 = vmax.f32 %v9590_v26, 0.0 }
 0x39c   : > { %v3422_v31 = vmul.f32 %v9712_v50, %v12335_v17  ;;  %v3423_v21 = vmul.f32 %v9712_v50, %v12336_v37  ;;  %v3424_v34 = vmul.f32 %v9712_v50, %v12337_v10  ;;  %v3425_v62 = vmul.f32 %v9712_v50, %v12338_v11 }
 0x39d   : > { %v3426_v8 = vmul.f32 %v9712_v50, %v12339_v19  ;;  %v3427_v7 = vmul.f32 %v9712_v50, %v12340_v28  ;;  %v3477_v1 = vrot.slane %v3476_v14, 2  ;;  %v3514_v45 = vrot.slane %v3513_v15, 2 }
 0x39e   : > { %v3551_v29 = vrot.slane %v3550_v18, 2  ;;  %v3588_v46 = vrot.slane %v3587_v2, 2  ;;  %v3625_v54 = vrot.slane %v3624_v0, 2  ;;  %v3662_v63 = vrot.slane %v3661_v48, 2 }
 0x39f   : > { %v3699_v55 = vrot.slane %v3698_v44, 2  ;;  %v3736_v30 = vrot.slane %v3735_v53, 2  ;;  %v3769_v5 = vadd.f32 %v9667_v38, %v3420_v41  ;;  %v3806_v59 = vadd.f32 %v9670_v25, %v3421_v16 }
 0x3a0   : > { %v3843_v47 = vadd.f32 %v9673_v22, %v3422_v31  ;;  %v3880_v24 = vadd.f32 %v9676_v13, %v3423_v21  ;;  %v3917_v26 = vadd.f32 %v9681_v42, %v3424_v34  ;;  %v3954_v50 = vadd.f32 %v9684_v9, %v3425_v62 }
 0x3a1   : > { %v3991_v49 = vadd.f32 %v9687_v60, %v3426_v8  ;;  %v4028_v23 = vadd.f32 %v9690_v35, %v3427_v7  ;;  %v3770_v57 = vadd.f32 %v3769_v5, %v3436_v27  ;;  %v3807_v36 = vadd.f32 %v3806_v59, %v3437_v52 }
 0x3a2   : > { %v3844_v61 = vadd.f32 %v3843_v47, %v3438_v33  ;;  %v3881_v39 = vadd.f32 %v3880_v24, %v3439_v51  ;;  %v3918_v40 = vadd.f32 %v3917_v26, %v3440_v20  ;;  %v3955_v38 = vadd.f32 %v3954_v50, %v3441_v32 }
 0x3a3   : > { %v3992_v56 = vadd.f32 %v3991_v49, %v3442_v12  ;;  %v4029_v25 = vadd.f32 %v4028_v23, %v3443_v58  ;;  %v3771_v3 = vrot.slane %v3770_v57, 4  ;;  %v3808_v22 = vrot.slane %v3807_v36, 4 }
 0x3a4   : > { %v3845_v6 = vrot.slane %v3844_v61, 4  ;;  %v3882_v13 = vrot.slane %v3881_v39, 4  ;;  %v3919_v43 = vrot.slane %v3918_v40, 4  ;;  %v3956_v42 = vrot.slane %v3955_v38, 4 }
 0x3a5   : > { %v3993_v41 = vrot.slane %v3992_v56, 4  ;;  %v4030_v9 = vrot.slane %v4029_v25, 4  ;;  %v3772_v4 = vadd.f32 %v3771_v3, %v3770_v57  ;;  %v3809_v60 = vadd.f32 %v3808_v22, %v3807_v36  ;;  %v4040_v3 = vpop.permute.xlu0 %4039 }
 0x3a6   : > { %v3846_v16 = vadd.f32 %v3845_v6, %v3844_v61  ;;  %v3883_v35 = vadd.f32 %v3882_v13, %v3881_v39  ;;  %v3920_v27 = vadd.f32 %v3919_v43, %v3918_v40  ;;  %v3957_v52 = vadd.f32 %v3956_v42, %v3955_v38 }
 0x3a7   : > { %v3994_v33 = vadd.f32 %v3993_v41, %v3992_v56  ;;  %v4031_v51 = vadd.f32 %v4030_v9, %v4029_v25  ;;  %v3478_v20 = vadd.f32 %v3477_v1, %v3476_v14  ;;  %v3515_v32 = vadd.f32 %v3514_v45, %v3513_v15 }
 0x3a8   : > { %v3552_v12 = vadd.f32 %v3551_v29, %v3550_v18  ;;  %v3589_v58 = vadd.f32 %v3588_v46, %v3587_v2  ;;  %v3626_v17 = vadd.f32 %v3625_v54, %v3624_v0  ;;  %v3663_v31 = vadd.f32 %v3662_v63, %v3661_v48 }
 0x3a9   : > { %v3773_v37 = vrot.slane %v3772_v4, 2  ;;  %v3810_v21 = vrot.slane %v3809_v60, 2  ;;  %v3700_v10 = vadd.f32 %v3699_v55, %v3698_v44  ;;  %v3847_v34 = vrot.slane %v3846_v16, 2 }
 0x3aa   : > { %v3884_v11 = vrot.slane %v3883_v35, 2  ;;  %v3921_v62 = vrot.slane %v3920_v27, 2  ;;  %v3737_v19 = vadd.f32 %v3736_v30, %v3735_v53  ;;  %v3958_v8 = vrot.slane %v3957_v52, 2 }
 0x3ab   : > { %v3995_v28 = vrot.slane %v3994_v33, 2  ;;  %v4032_v7 = vrot.slane %v4031_v51, 2  ;;  %v3479_v5 = vrot.slane %v3478_v20, 1  ;;  %v3516_v59 = vrot.slane %v3515_v32, 1 }
 0x3ac   : > { %v3553_v47 = vrot.slane %v3552_v12, 1  ;;  %v3590_v24 = vrot.slane %v3589_v58, 1  ;;  %v3627_v14 = vrot.slane %v3626_v17, 1  ;;  %v3664_v15 = vrot.slane %v3663_v31, 1 }
 0x3ad   : > { %v3774_v18 = vadd.f32 %v3773_v37, %v3772_v4  ;;  %v3811_v2 = vadd.f32 %v3810_v21, %v3809_v60  ;;  %v3701_v0 = vrot.slane %v3700_v10, 1  ;;  %v3848_v48 = vadd.f32 %v3847_v34, %v3846_v16 }
 0x3ae   : > { %v3885_v1 = vadd.f32 %v3884_v11, %v3883_v35  ;;  %v3922_v45 = vadd.f32 %v3921_v62, %v3920_v27  ;;  %v3738_v44 = vrot.slane %v3737_v19, 1  ;;  %v3959_v29 = vadd.f32 %v3958_v8, %v3957_v52 }
 0x3af   : > { %v3996_v46 = vadd.f32 %v3995_v28, %v3994_v33  ;;  %v4033_v54 = vadd.f32 %v4032_v7, %v4031_v51  ;;  %v3480_v53 = vadd.f32 %v3479_v5, %v3478_v20  ;;  %v3517_v63 = vadd.f32 %v3516_v59, %v3515_v32 }
 0x3b0   : > { %v4042_v55 = vlaneseq  ;;  %v3554_v30 = vadd.f32 %v3553_v47, %v3552_v12  ;;  %v3775_v26 = vrot.slane %v3774_v18, 1  ;;  %v3812_v50 = vrot.slane %v3811_v2, 1 }
 0x3b1   : > { %v4398_v49 = vmov 1966171168   ;;  %v3849_v57 = vrot.slane %v3848_v48, 1  ;;  %v3886_v36 = vrot.slane %v3885_v1, 1  ;;  %v3923_v61 = vrot.slane %v3922_v45, 1 }
 0x3b2   : > { %v4083_v23 = vunpack.c.l.s4 %v4398_v49  ;;  %v4043_v39 = vshrl.u32 %v4042_v55, 7  ;;  %v3960_v40 = vrot.slane %v3959_v29, 1  ;;  %v3997_v38 = vrot.slane %v3996_v46, 1 }
 0x3b3   : > { %v4034_v56 = vrot.slane %v4033_v54, 1  ;;  %v3591_v22 = vadd.f32 %v3590_v24, %v3589_v58  ;;  %v3628_v6 = vadd.f32 %v3627_v14, %v3626_v17  ;;  %v3665_v13 = vadd.f32 %v3664_v15, %v3663_v31 }
 0x3b4   : > { %v4084_v25 = vunpack.c.0.s8 %v4083_v23  ;;  %v4044_v43 = vsub.s32 0, %v4043_v39  ;;  %v3702_v42 = vadd.f32 %v3701_v0, %v3700_v10  ;;  %v3739_v41 = vadd.f32 %v3738_v44, %v3737_v19 }
 0x3b5   : > { %v3776_v9 = vadd.f32 %v3775_v26, %v3774_v18  ;;  %v3813_v4 = vadd.f32 %v3812_v50, %v3811_v2  ;;  %v3850_v60 = vadd.f32 %v3849_v57, %v3848_v48  ;;  %v3887_v16 = vadd.f32 %v3886_v36, %v3885_v1 }
 0x3b6   : > { %v3924_v35 = vadd.f32 %v3923_v61, %v3922_v45  ;;  %v4045_v27 = vrot.slane %v4040_v3, %v4044_v43  ;;  %v3961_v52 = vadd.f32 %v3960_v40, %v3959_v29  ;;  %v3998_v33 = vadd.f32 %v3997_v38, %v3996_v46 }
 0x3b7   : > { %v4035_v51 = vadd.f32 %v4034_v56, %v4033_v54  ;;  %v4087_v20 = vsub.s32 %v4084_v25, %v4043_v39 }
 0x3b8   : > { %v4046_v32 = vadd.f32 %v4045_v27, %v3480_v53  ;;  %v4047_v12 = vadd.f32 %v4045_v27, %v3517_v63  ;;  %v4048_v58 = vadd.f32 %v4045_v27, %v3554_v30  ;;  %v4049_v17 = vadd.f32 %v4045_v27, %v3591_v22 }
 0x3b9   : > { %v4050_v31 = vadd.f32 %v4045_v27, %v3628_v6  ;;  %v4051_v37 = vadd.f32 %v4045_v27, %v3665_v13  ;;  %v4052_v21 = vadd.f32 %v4045_v27, %v3702_v42  ;;  %v4053_v10 = vadd.f32 %v4045_v27, %v3739_v41 }
 0x3ba   : > { %v4054_v34 = vadd.f32 %v4045_v27, %v3776_v9  ;;  %v4055_v11 = vadd.f32 %v4045_v27, %v3813_v4  ;;  %v4056_v62 = vadd.f32 %v4045_v27, %v3850_v60  ;;  %v4057_v19 = vadd.f32 %v4045_v27, %v3887_v16 }
 0x3bb   : > { %v4058_v8 = vadd.f32 %v4045_v27, %v3924_v35  ;;  %v4059_v28 = vadd.f32 %v4045_v27, %v3961_v52  ;;  %v4060_v7 = vadd.f32 %v4045_v27, %v3998_v33  ;;  %v4061_v5 = vadd.f32 %v4045_v27, %v4035_v51 }
 0x3bc   : > { %v4078_v59 = vcombine.low %v4046_v32, %v4047_v12  ;;  %v4079_v47 = vcombine.low %v4048_v58, %v4049_v17  ;;  %v4080_v24 = vcombine.low %v4050_v31, %v4051_v37  ;;  %v4081_v14 = vcombine.low %v4052_v21, %v4053_v10 }
 0x3bd   : > { %v4127_v15 = vcombine.low %v4054_v34, %v4055_v11  ;;  %v4128_v18 = vcombine.low %v4056_v62, %v4057_v19  ;;  %v4129_v2 = vcombine.low %v4058_v8, %v4059_v28  ;;  %v4130_v0 = vcombine.low %v4060_v7, %v4061_v5 }
 0x3be   : > { %v4088_v48 = vrot.slane %v4078_v59, %v4087_v20  ;;  %v4095_v1 = vrot.slane %v4079_v47, %v4087_v20  ;;  %v4102_v45 = vrot.slane %v4080_v24, %v4087_v20  ;;  %v4109_v44 = vrot.slane %v4081_v14, %v4087_v20 }
 0x3bf   : > { %v4137_v29 = vrot.slane %v4127_v15, %v4087_v20  ;;  %v4144_v46 = vrot.slane %v4128_v18, %v4087_v20  ;;  %v4151_v54 = vrot.slane %v4129_v2, %v4087_v20  ;;  %v4158_v53 = vrot.slane %v4130_v0, %v4087_v20 }
 0x3c0   : > { %v4110_v63 = vcombine.low %v4088_v48, %v4095_v1  ;;  %v4111_v55 = vcombine.low %v4102_v45, %v4109_v44 }
 0x3c1   : > { %v4159_v30 = vcombine.low %v4137_v29, %v4144_v46  ;;  %v4160_v26 = vcombine.low %v4151_v54, %v4158_v53 }
 0x3c2   : > { %v4118_v50 = vrot.slane %v4110_v63, %v4087_v20  ;;  %v4125_v49 = vrot.slane %v4111_v55, %v4087_v20 }
 0x3c3   : > { %v4167_v23 = vrot.slane %v4159_v30, %v4087_v20  ;;  %v4174_v57 = vrot.slane %v4160_v26, %v4087_v20 }
 0x3c4   : > { %v4126_v36 = vcombine.low %v4118_v50, %v4125_v49 }
 0x3c5   : > { %v4175_v61 = vcombine.low %v4167_v23, %v4174_v57 }
 0x3c6   : > { %4178 = vst [vmem:[%s754_s11] sm:$0xff] %v4126_v36 }
 0x3c7   : > { %4179 = vst [vmem:[%s754_s11 + $0x8] sm:$0xff] %v4175_v61 }
 0x3c8 PF: > { %s16_s23 = sadd.s32 1, %s4395_s23   ;;  %s12342_s17 = smov %s4375_s18 }
 0x3c9   : > { %p13_p12 = scmp.ge.s32.totalorder %s16_s23, 6   ;;  %s12343_s18 = smov %s4478_s29 }
 0x3ca   : > { %s12344_s19 = smov %s4387_s21  ;;  %s12345_s20 = smov %s4391_s22 }
 0x3cb   : > { %s12346_s21 = smov %s12349_s3  ;;  %s12347_s22 = smov %s12353_s24 }
 0x3cc   :  { %15 = sbr.rel (!%p13_p12) target bundleno = 7 (0x7), region = 94 }

</bundles_post_ra>
